<compile_context>
chip_gen: v7x
topology: tpu7x:2x2x1
jax: 0.10.0
libtpu: 0.0.40
codegen_flags: <defaults>
</compile_context>

<pallas_src>
import functools

import jax
import jax.numpy as jnp
from jax.experimental import pallas as pl
from jax.experimental.pallas import tpu as pltpu

HIDDEN = 512
KERNEL_SIZES = (3, 3, 3, 3, 2, 2)
CONV0_IN = 2
CONV0_K = 10
CONV0_STRIDE = 5
GN_EPS = 1e-5

TILE_L = 512                      # time-tile (frames); multiple of 8 and 128
HALO = 8                          # halo rows (>= max(k)-1, multiple of 8)
VMEM_LIMIT = 32 * 1024 * 1024     # safe on v5e / v6e / v7x


def _round_up(n, m):
    return ((n + m - 1) // m) * m


# ----------------------------- in-kernel math ------------------------------
_GELU_C = 0.7978845608028654  # sqrt(2/pi)


def _gelu(x):
    # tanh-approximate GELU: one EUP tanh + a few VPU ops (max |delta| vs the
    # exact erf GELU ~1e-3, well inside the test tolerance).
    # TODO(synk): exact-erf GELU would need an erf lowering (or the A&S poly).
    return 0.5 * x * (1.0 + jnp.tanh(_GELU_C * (x + 0.044715 * (x * x * x))))


# ------------------------------- kernels -----------------------------------
def _conv0_kernel(patches_ref, w_ref, h_ref, sum_ref, sumsq_ref):
    # patches_ref: (1, TL0, 20) f32   im2col windows of the raw waveform
    # w_ref:       (20, 512)    f32   conv0 weight, (ci*K + k, co)
    # h_ref:       (1, TL0, 512) bf16 raw conv0 output (pre-norm)
    # sum/sumsq:   (1, 1, 512)  f32   per-channel stats, accumulated over t
    h = jnp.dot(patches_ref[0], w_ref[...],
                preferred_element_type=jnp.float32)          # (TL0, 512) f32
    h_ref[0] = h.astype(h_ref.dtype)

    @pl.when(pl.program_id(1) == 0)
    def _():
        sum_ref[...] = jnp.zeros_like(sum_ref)
        sumsq_ref[...] = jnp.zeros_like(sumsq_ref)

    sum_ref[...] += jnp.sum(h, axis=0, keepdims=True)[None, :, :]
    sumsq_ref[...] += jnp.sum(h * h, axis=0, keepdims=True)[None, :, :]


def _conv_gelu_kernel(*refs, k, tl, fuse_norm):
    # main x:  (1, TL, 512)   bf16
    # halo x:  (1, 8, 512)    bf16   (first rows of the next tile, clamped)
    # w:       (k*512, 512)   bf16
    # [scale, shift: (1,1,512) f32 — only for the first layer: fused GroupNorm]
    # out:     (1, TL, 512)
    if fuse_norm:
        x_ref, halo_ref, w_ref, scale_ref, shift_ref, out_ref = refs
    else:
        x_ref, halo_ref, w_ref, out_ref = refs

    x = jnp.concatenate([x_ref[0], halo_ref[0]], axis=0)     # (TL+8, 512)
    if fuse_norm:
        xf = x.astype(jnp.float32) * scale_ref[0] + shift_ref[0]
        x = _gelu(xf).astype(jnp.bfloat16)

    # In-VMEM im2col -> a single (TL, k*512) @ (k*512, 512) MXU contraction.
    xk = jnp.concatenate([x[j:j + tl, :] for j in range(k)], axis=-1)
    acc = jnp.dot(xk, w_ref[...], preferred_element_type=jnp.float32)
    out_ref[0] = _gelu(acc).astype(out_ref.dtype)


# ------------------------------- wrappers -----------------------------------
def _conv0_stats(x, w0, tl0=TILE_L):
    """conv0 (k=10, stride=5, 2->512) + per-channel sum/sumsq, time-tiled."""
    B, c_in, T = x.shape
    L0 = (T - CONV0_K) // CONV0_STRIDE + 1
    TL0 = min(tl0, _round_up(L0, 8))
    nt = pl.cdiv(L0, TL0)
    L0p = nt * TL0

    # im2col of the raw waveform (cheap: 20 values per output frame). Each
    # length-10 stride-5 window is two consecutive length-5 chunks.
    n_chunks = L0 + 1
    xr = x[:, :, :n_chunks * CONV0_STRIDE].reshape(B, c_in, n_chunks, CONV0_STRIDE)
    win = jnp.concatenate([xr[:, :, :L0, :], xr[:, :, 1:L0 + 1, :]], axis=-1)
    patches = win.transpose(0, 2, 1, 3).reshape(B, L0, c_in * CONV0_K)
    patches = jnp.pad(patches, ((0, 0), (0, L0p - L0), (0, 0)))   # zero rows
    w0c = w0.reshape(HIDDEN, c_in * CONV0_K).T                    # (20, 512)

    h, ssum, ssq = pl.pallas_call(
        _conv0_kernel,
        out_shape=(jax.ShapeDtypeStruct((B, L0p, HIDDEN), jnp.bfloat16),
                   jax.ShapeDtypeStruct((B, 1, HIDDEN), jnp.float32),
                   jax.ShapeDtypeStruct((B, 1, HIDDEN), jnp.float32)),
        grid_spec=pltpu.PrefetchScalarGridSpec(
            num_scalar_prefetch=0,
            grid=(B, nt),
            in_specs=[
                pl.BlockSpec((1, TL0, c_in * CONV0_K), lambda b, t: (b, t, 0)),
                pl.BlockSpec((c_in * CONV0_K, HIDDEN), lambda b, t: (0, 0)),
            ],
            out_specs=[
                pl.BlockSpec((1, TL0, HIDDEN), lambda b, t: (b, t, 0)),
                pl.BlockSpec((1, 1, HIDDEN), lambda b, t: (b, 0, 0)),
                pl.BlockSpec((1, 1, HIDDEN), lambda b, t: (b, 0, 0)),
            ]),
        compiler_params=pltpu.CompilerParams(
            dimension_semantics=("parallel", "arbitrary"),
            vmem_limit_bytes=VMEM_LIMIT),
    )(patches, w0c)
    return h, ssum, ssq, L0


def _conv_gelu(x, l_in, w2, k, scale=None, shift=None,
               out_dtype=jnp.bfloat16, tl=TILE_L):
    """x: (B, P_in, 512), first l_in rows valid; w2: (k*512, 512) bf16.

    Returns (y, l_out) with y: (B, nt*TL, 512); rows >= l_out hold finite
    don't-care values that are never read by any downstream *valid* row.
    """
    B, p_in, _ = x.shape
    l_out = l_in - k + 1
    TL = min(tl, _round_up(l_out, HALO))
    nt = pl.cdiv(l_out, TL)
    assert p_in % HALO == 0 and p_in >= nt * TL
    max_hb = p_in // HALO - 1     # last in-range 8-row halo block index

    fuse_norm = scale is not None
    kernel = functools.partial(_conv_gelu_kernel, k=k, tl=TL, fuse_norm=fuse_norm)

    in_specs = [
        pl.BlockSpec((1, TL, HIDDEN), lambda b, t: (b, t, 0)),
        # Halo = first 8 rows of the next tile; clamped for the last tile,
        # where it is provably unused by valid output rows.
        pl.BlockSpec((1, HALO, HIDDEN),
                     lambda b, t: (b, jnp.minimum((t + 1) * (TL // HALO), max_hb), 0)),
        pl.BlockSpec((k * HIDDEN, HIDDEN), lambda b, t: (0, 0)),
    ]
    args = [x, x, w2]
    if fuse_norm:
        in_specs += [pl.BlockSpec((1, 1, HIDDEN), lambda b, t: (b, 0, 0)),
                     pl.BlockSpec((1, 1, HIDDEN), lambda b, t: (b, 0, 0))]
        args += [scale, shift]

    y = pl.pallas_call(
        kernel,
        out_shape=jax.ShapeDtypeStruct((B, nt * TL, HIDDEN), out_dtype),
        grid_spec=pltpu.PrefetchScalarGridSpec(
            num_scalar_prefetch=0,
            grid=(B, nt),
            in_specs=in_specs,
            out_specs=pl.BlockSpec((1, TL, HIDDEN), lambda b, t: (b, t, 0))),
        compiler_params=pltpu.CompilerParams(
            dimension_semantics=("parallel", "parallel"),
            vmem_limit_bytes=VMEM_LIMIT),
    )(*args)
    return y, l_out


@jax.jit
def feature_extractor(x, params):
    """x: (B, 2, T) f32 -> (B, 512, L_final) f32 (PyTorch NCL layout)."""
    h, ssum, ssq, L = _conv0_stats(x, params["w0"])

    # GroupNorm(512, 512) statistics over the full (true) time axis, f32.
    mean = ssum / L
    var = jnp.maximum(ssq / L - mean * mean, 0.0)   # population variance
    rstd = jax.lax.rsqrt(var + GN_EPS)
    scale = params["gamma0"].reshape(1, 1, HIDDEN) * rstd            # (B,1,512)
    shift = params["beta0"].reshape(1, 1, HIDDEN) - mean * scale     # (B,1,512)

    n_layers = len(KERNEL_SIZES)
    for i, (k, w) in enumerate(zip(KERNEL_SIZES, params["ws"])):
        # torch (C_out, C_in, k) -> im2col weight (k*C_in, C_out), bf16.
        w2 = jnp.transpose(w, (2, 1, 0)).reshape(k * HIDDEN, HIDDEN)
        w2 = w2.astype(jnp.bfloat16)
        h, L = _conv_gelu(
            h, L, w2, k,
            scale=scale if i == 0 else None,     # fused GroupNorm affine+GELU
            shift=shift if i == 0 else None,
            out_dtype=jnp.float32 if i == n_layers - 1 else jnp.bfloat16)

    # TODO(synk): the final NLC->NCL transpose is left to XLA; folding it into
    # the last kernel's out_spec would save one HBM round trip.
    return jnp.transpose(h[:, :L, :], (0, 2, 1))


# --------------------------- params & reference -----------------------------
def init_params(key):
    keys = jax.random.split(key, 1 + len(KERNEL_SIZES))
    w0 = jax.random.normal(keys[0], (HIDDEN, CONV0_IN, CONV0_K), jnp.float32)
    w0 = w0 * (1.0 / (CONV0_IN * CONV0_K) ** 0.5)
    gamma0 = jnp.ones((HIDDEN,), jnp.float32)   # PyTorch GroupNorm default
    beta0 = jnp.zeros((HIDDEN,), jnp.float32)
    ws = []
    for i, k in enumerate(KERNEL_SIZES):
        w = jax.random.normal(keys[1 + i], (HIDDEN, HIDDEN, k), jnp.float32)
        ws.append(w * (1.0 / (HIDDEN * k) ** 0.5))   # (C_out, C_in, k)
    return {"w0": w0, "gamma0": gamma0, "beta0": beta0, "ws": ws}


def reference(x, params):
    """Pure-JAX f32 reference matching the PyTorch forward pass."""
    h = jax.lax.conv_general_dilated(
        x, params["w0"], (CONV0_STRIDE,), "VALID",
        dimension_numbers=("NCH", "OIH", "NCH"))
    mean = jnp.mean(h, axis=2, keepdims=True)
    var = jnp.var(h, axis=2, keepdims=True)
    h = (h - mean) * jax.lax.rsqrt(var + GN_EPS)
    h = h * params["gamma0"][None, :, None] + params["beta0"][None, :, None]
    h = jax.nn.gelu(h, approximate=False)
    for w in params["ws"]:
        h = jax.lax.conv_general_dilated(
            h, w, (1,), "VALID", dimension_numbers=("NCH", "OIH", "NCH"))
        h = jax.nn.gelu(h, approximate=False)
    return h


# --------------------------------- main --------------------------------------
if __name__ == "__main__":
    key = jax.random.PRNGKey(0)
    pkey, xkey = jax.random.split(key)
    params = init_params(pkey)

    B, T = 2, 125                   # small: conv0 -> L0=24, final L=14
    x = jax.random.normal(xkey, (B, CONV0_IN, T), jnp.float32)

    out = jax.block_until_ready(feature_extractor(x, params))
    ref = jax.block_until_ready(reference(x, params))

    assert out.shape == ref.shape, (out.shape, ref.shape)
    err = float(jnp.max(jnp.abs(out - ref)))
    assert err < 5e-2, f"max abs error {err}"
    print("KERNEL_OK")
</pallas_src>

<mosaic_0001>
module attributes {stable_mosaic.version = 11 : i64} {
  func.func @_conv0_kernel(%arg0: i32, %arg1: i32, %arg2: memref<1x24x20xf32, #tpu.memory_space<vmem>>, %arg3: memref<20x512xf32, #tpu.memory_space<vmem>>, %arg4: memref<1x24x512xbf16, #tpu.memory_space<vmem>>, %arg5: memref<1x1x512xf32, #tpu.memory_space<vmem>>, %arg6: memref<1x1x512xf32, #tpu.memory_space<vmem>>) attributes {dimension_semantics = [#tpu.dimension_semantics<parallel>, #tpu.dimension_semantics<arbitrary>], iteration_bounds = array<i64: 2, 1>, scalar_prefetch = 0 : i64, scratch_operands = 0 : i64, tpu.core_type = #tpu.core_type<tc>, window_params = [{transform_indices = @transform_0, window_bounds = array<i64: 1, 24, 20>}, {pipeline_mode = #tpu.pipeline_mode<synchronous>, transform_indices = @transform_1, window_bounds = array<i64: 20, 512>}, {transform_indices = @transform_2, window_bounds = array<i64: 1, 24, 512>}, {transform_indices = @transform_3, window_bounds = array<i64: 1, 1, 512>}, {transform_indices = @transform_4, window_bounds = array<i64: 1, 1, 512>}]} {
    %c0 = arith.constant 0 : index
    %c0_0 = arith.constant 0 : index
    %c0_1 = arith.constant 0 : index
    %0 = vector.load %arg2[%c0, %c0_0, %c0_1] : memref<1x24x20xf32, #tpu.memory_space<vmem>>, vector<1x24x20xf32>
    %1 = vector.shape_cast %0 : vector<1x24x20xf32> to vector<24x20xf32>
    %c0_2 = arith.constant 0 : index
    %c0_3 = arith.constant 0 : index
    %2 = vector.load %arg3[%c0_2, %c0_3] : memref<20x512xf32, #tpu.memory_space<vmem>>, vector<20x512xf32>
    %cst = arith.constant dense<0.000000e+00> : vector<24x512xf32>
    %3 = tpu.matmul %1, %2, %cst {dimension_numbers = #tpu.dot_dimension_numbers<[1], [0], [0], [1], [0, 0, 1, 1], [], []>} : vector<24x20xf32>, vector<20x512xf32>, vector<24x512xf32> -> vector<24x512xf32>
    %4 = arith.truncf %3 : vector<24x512xf32> to vector<24x512xbf16>
    %c0_4 = arith.constant 0 : index
    %c0_5 = arith.constant 0 : index
    %c0_6 = arith.constant 0 : index
    %5 = vector.load %arg4[%c0_4, %c0_5, %c0_6] : memref<1x24x512xbf16, #tpu.memory_space<vmem>>, vector<1x24x512xbf16>
    %6 = vector.shape_cast %5 : vector<1x24x512xbf16> to vector<24x512xbf16>
    %7 = vector.shape_cast %4 : vector<24x512xbf16> to vector<1x24x512xbf16>
    tpu.vector_store %arg4[%c0_4, %c0_5, %c0_6], %7 {strides = array<i32>} : memref<1x24x512xbf16, #tpu.memory_space<vmem>>, vector<1x24x512xbf16>,
    %c0_i32 = arith.constant 0 : i32
    %8 = arith.cmpi eq, %arg1, %c0_i32 : i32
    %9 = arith.extui %8 : i1 to i32
    %c0_i32_7 = arith.constant 0 : i32
    %10 = arith.cmpi ne, %9, %c0_i32_7 : i32
    scf.if %10 {
      %cst_22 = arith.constant 0.000000e+00 : f32
      %24 = vector.broadcast %cst_22 : f32 to vector<1x1x512xf32>
      %c0_23 = arith.constant 0 : index
      %c0_24 = arith.constant 0 : index
      %c0_25 = arith.constant 0 : index
      %25 = vector.load %arg5[%c0_23, %c0_24, %c0_25] : memref<1x1x512xf32, #tpu.memory_space<vmem>>, vector<1x1x512xf32>
      tpu.vector_store %arg5[%c0_23, %c0_24, %c0_25], %24 {strides = array<i32>} : memref<1x1x512xf32, #tpu.memory_space<vmem>>, vector<1x1x512xf32>,
      %cst_26 = arith.constant 0.000000e+00 : f32
      %26 = vector.broadcast %cst_26 : f32 to vector<1x1x512xf32>
      %c0_27 = arith.constant 0 : index
      %c0_28 = arith.constant 0 : index
      %c0_29 = arith.constant 0 : index
      %27 = vector.load %arg6[%c0_27, %c0_28, %c0_29] : memref<1x1x512xf32, #tpu.memory_space<vmem>>, vector<1x1x512xf32>
      tpu.vector_store %arg6[%c0_27, %c0_28, %c0_29], %26 {strides = array<i32>} : memref<1x1x512xf32, #tpu.memory_space<vmem>>, vector<1x1x512xf32>,
    } else {
    }
    %c0_8 = arith.constant 0 : index
    %c0_9 = arith.constant 0 : index
    %c0_10 = arith.constant 0 : index
    %11 = vector.load %arg5[%c0_8, %c0_9, %c0_10] : memref<1x1x512xf32, #tpu.memory_space<vmem>>, vector<1x1x512xf32>
    %cst_11 = arith.constant dense<0.000000e+00> : vector<512xf32>
    %12 = vector.multi_reduction <add>, %3, %cst_11 [0] : vector<24x512xf32> to vector<512xf32>
    %13 = vector.shape_cast %12 : vector<512xf32> to vector<1x512xf32>
    %14 = vector.shape_cast %13 : vector<1x512xf32> to vector<1x1x512xf32>
    %15 = arith.addf %11, %14 : vector<1x1x512xf32>
    %c0_12 = arith.constant 0 : index
    %c0_13 = arith.constant 0 : index
    %c0_14 = arith.constant 0 : index
    %16 = vector.load %arg5[%c0_12, %c0_13, %c0_14] : memref<1x1x512xf32, #tpu.memory_space<vmem>>, vector<1x1x512xf32>
    tpu.vector_store %arg5[%c0_12, %c0_13, %c0_14], %15 {strides = array<i32>} : memref<1x1x512xf32, #tpu.memory_space<vmem>>, vector<1x1x512xf32>,
    %c0_15 = arith.constant 0 : index
    %c0_16 = arith.constant 0 : index
    %c0_17 = arith.constant 0 : index
    %17 = vector.load %arg6[%c0_15, %c0_16, %c0_17] : memref<1x1x512xf32, #tpu.memory_space<vmem>>, vector<1x1x512xf32>
    %18 = arith.mulf %3, %3 : vector<24x512xf32>
    %cst_18 = arith.constant dense<0.000000e+00> : vector<512xf32>
    %19 = vector.multi_reduction <add>, %18, %cst_18 [0] : vector<24x512xf32> to vector<512xf32>
    %20 = vector.shape_cast %19 : vector<512xf32> to vector<1x512xf32>
    %21 = vector.shape_cast %20 : vector<1x512xf32> to vector<1x1x512xf32>
    %22 = arith.addf %17, %21 : vector<1x1x512xf32>
    %c0_19 = arith.constant 0 : index
    %c0_20 = arith.constant 0 : index
    %c0_21 = arith.constant 0 : index
    %23 = vector.load %arg6[%c0_19, %c0_20, %c0_21] : memref<1x1x512xf32, #tpu.memory_space<vmem>>, vector<1x1x512xf32>
    tpu.vector_store %arg6[%c0_19, %c0_20, %c0_21], %22 {strides = array<i32>} : memref<1x1x512xf32, #tpu.memory_space<vmem>>, vector<1x1x512xf32>,
    return
  }
  func.func @transform_0(%arg0: i32, %arg1: i32) -> (i32, i32, i32) {
    %c0_i32 = arith.constant 0 : i32
    %c0_i32_0 = arith.constant 0 : i32
    return %arg0, %arg1, %c0_i32 : i32, i32, i32
  }
  func.func @transform_1(%arg0: i32, %arg1: i32) -> (i32, i32) {
    %c0_i32 = arith.constant 0 : i32
    %c0_i32_0 = arith.constant 0 : i32
    %c0_i32_1 = arith.constant 0 : i32
    return %c0_i32, %c0_i32_0 : i32, i32
  }
  func.func @transform_2(%arg0: i32, %arg1: i32) -> (i32, i32, i32) {
    %c0_i32 = arith.constant 0 : i32
    %c0_i32_0 = arith.constant 0 : i32
    return %arg0, %arg1, %c0_i32 : i32, i32, i32
  }
  func.func @transform_3(%arg0: i32, %arg1: i32) -> (i32, i32, i32) {
    %c0_i32 = arith.constant 0 : i32
    %c0_i32_0 = arith.constant 0 : i32
    %c0_i32_1 = arith.constant 0 : i32
    return %arg0, %c0_i32, %c0_i32_0 : i32, i32, i32
  }
  func.func @transform_4(%arg0: i32, %arg1: i32) -> (i32, i32, i32) {
    %c0_i32 = arith.constant 0 : i32
    %c0_i32_0 = arith.constant 0 : i32
    %c0_i32_1 = arith.constant 0 : i32
    return %arg0, %c0_i32, %c0_i32_0 : i32, i32, i32
  }
}

module attributes {stable_mosaic.version = 11 : i64} {
  func.func @_conv_gelu_kernel(%arg0: i32, %arg1: i32, %arg2: memref<1x24x512xbf16, #tpu.memory_space<vmem>>, %arg3: memref<1x8x512xbf16, #tpu.memory_space<vmem>>, %arg4: memref<1536x512xbf16, #tpu.memory_space<vmem>>, %arg5: memref<1x1x512xf32, #tpu.memory_space<vmem>>, %arg6: memref<1x1x512xf32, #tpu.memory_space<vmem>>, %arg7: memref<1x24x512xbf16, #tpu.memory_space<vmem>>) attributes {dimension_semantics = [#tpu.dimension_semantics<parallel>, #tpu.dimension_semantics<parallel>], iteration_bounds = array<i64: 2, 1>, scalar_prefetch = 0 : i64, scratch_operands = 0 : i64, tpu.core_type = #tpu.core_type<tc>, window_params = [{transform_indices = @transform_0, window_bounds = array<i64: 1, 24, 512>}, {transform_indices = @transform_1, window_bounds = array<i64: 1, 8, 512>}, {pipeline_mode = #tpu.pipeline_mode<synchronous>, transform_indices = @transform_2, window_bounds = array<i64: 1536, 512>}, {transform_indices = @transform_3, window_bounds = array<i64: 1, 1, 512>}, {transform_indices = @transform_4, window_bounds = array<i64: 1, 1, 512>}, {transform_indices = @transform_5, window_bounds = array<i64: 1, 24, 512>}]} {
    %c0 = arith.constant 0 : index
    %c0_0 = arith.constant 0 : index
    %c0_1 = arith.constant 0 : index
    %0 = vector.load %arg2[%c0, %c0_0, %c0_1] : memref<1x24x512xbf16, #tpu.memory_space<vmem>>, vector<1x24x512xbf16>
    %1 = vector.shape_cast %0 : vector<1x24x512xbf16> to vector<24x512xbf16>
    %c0_2 = arith.constant 0 : index
    %c0_3 = arith.constant 0 : index
    %c0_4 = arith.constant 0 : index
    %2 = vector.load %arg3[%c0_2, %c0_3, %c0_4] : memref<1x8x512xbf16, #tpu.memory_space<vmem>>, vector<1x8x512xbf16>
    %3 = vector.shape_cast %2 : vector<1x8x512xbf16> to vector<8x512xbf16>
    %4 = tpu.concatenate %1, %3 in 0 : vector<24x512xbf16>, vector<8x512xbf16> -> vector<32x512xbf16>
    %5 = arith.extf %4 : vector<32x512xbf16> to vector<32x512xf32>
    %c0_5 = arith.constant 0 : index
    %c0_6 = arith.constant 0 : index
    %c0_7 = arith.constant 0 : index
    %6 = vector.load %arg5[%c0_5, %c0_6, %c0_7] : memref<1x1x512xf32, #tpu.memory_space<vmem>>, vector<1x1x512xf32>
    %7 = vector.shape_cast %6 : vector<1x1x512xf32> to vector<1x512xf32>
    %8 = vector.broadcast %7 : vector<1x512xf32> to vector<32x512xf32>
    %9 = arith.mulf %5, %8 : vector<32x512xf32>
    %c0_8 = arith.constant 0 : index
    %c0_9 = arith.constant 0 : index
    %c0_10 = arith.constant 0 : index
    %10 = vector.load %arg6[%c0_8, %c0_9, %c0_10] : memref<1x1x512xf32, #tpu.memory_space<vmem>>, vector<1x1x512xf32>
    %11 = vector.shape_cast %10 : vector<1x1x512xf32> to vector<1x512xf32>
    %12 = vector.broadcast %11 : vector<1x512xf32> to vector<32x512xf32>
    %13 = arith.addf %9, %12 : vector<32x512xf32>
    %cst = arith.constant 5.000000e-01 : f32
    %14 = vector.broadcast %cst : f32 to vector<32x512xf32>
    %15 = arith.mulf %14, %13 : vector<32x512xf32>
    %16 = arith.mulf %13, %13 : vector<32x512xf32>
    %17 = arith.mulf %16, %13 : vector<32x512xf32>
    %cst_11 = arith.constant 4.471500e-02 : f32
    %18 = vector.broadcast %cst_11 : f32 to vector<32x512xf32>
    %19 = arith.mulf %18, %17 : vector<32x512xf32>
    %20 = arith.addf %13, %19 : vector<32x512xf32>
    %cst_12 = arith.constant 0.797884583 : f32
    %21 = vector.broadcast %cst_12 : f32 to vector<32x512xf32>
    %22 = arith.mulf %21, %20 : vector<32x512xf32>
    %23 = math.tanh %22 : vector<32x512xf32>
    %cst_13 = arith.constant 1.000000e+00 : f32
    %24 = vector.broadcast %cst_13 : f32 to vector<32x512xf32>
    %25 = arith.addf %24, %23 : vector<32x512xf32>
    %26 = arith.mulf %15, %25 : vector<32x512xf32>
    %27 = arith.truncf %26 : vector<32x512xf32> to vector<32x512xbf16>
    %28 = vector.extract_strided_slice %27 {offsets = [0, 0], sizes = [24, 512], strides = [1, 1]} : vector<32x512xbf16> to vector<24x512xbf16>
    %29 = vector.extract_strided_slice %27 {offsets = [1, 0], sizes = [24, 512], strides = [1, 1]} : vector<32x512xbf16> to vector<24x512xbf16>
    %30 = vector.extract_strided_slice %27 {offsets = [2, 0], sizes = [24, 512], strides = [1, 1]} : vector<32x512xbf16> to vector<24x512xbf16>
    %31 = tpu.concatenate %28, %29, %30 in 1 : vector<24x512xbf16>, vector<24x512xbf16>, vector<24x512xbf16> -> vector<24x1536xbf16>
    %c0_14 = arith.constant 0 : index
    %c0_15 = arith.constant 0 : index
    %32 = vector.load %arg4[%c0_14, %c0_15] : memref<1536x512xbf16, #tpu.memory_space<vmem>>, vector<1536x512xbf16>
    %cst_16 = arith.constant dense<0.000000e+00> : vector<24x512xf32>
    %33 = tpu.matmul %31, %32, %cst_16 {dimension_numbers = #tpu.dot_dimension_numbers<[1], [0], [0], [1], [0, 0, 1, 1], [], []>} : vector<24x1536xbf16>, vector<1536x512xbf16>, vector<24x512xf32> -> vector<24x512xf32>
    %cst_17 = arith.constant 5.000000e-01 : f32
    %34 = vector.broadcast %cst_17 : f32 to vector<24x512xf32>
    %35 = arith.mulf %34, %33 : vector<24x512xf32>
    %36 = arith.mulf %33, %33 : vector<24x512xf32>
    %37 = arith.mulf %36, %33 : vector<24x512xf32>
    %cst_18 = arith.constant 4.471500e-02 : f32
    %38 = vector.broadcast %cst_18 : f32 to vector<24x512xf32>
    %39 = arith.mulf %38, %37 : vector<24x512xf32>
    %40 = arith.addf %33, %39 : vector<24x512xf32>
    %cst_19 = arith.constant 0.797884583 : f32
    %41 = vector.broadcast %cst_19 : f32 to vector<24x512xf32>
    %42 = arith.mulf %41, %40 : vector<24x512xf32>
    %43 = math.tanh %42 : vector<24x512xf32>
    %cst_20 = arith.constant 1.000000e+00 : f32
    %44 = vector.broadcast %cst_20 : f32 to vector<24x512xf32>
    %45 = arith.addf %44, %43 : vector<24x512xf32>
    %46 = arith.mulf %35, %45 : vector<24x512xf32>
    %47 = arith.truncf %46 : vector<24x512xf32> to vector<24x512xbf16>
    %c0_21 = arith.constant 0 : index
    %c0_22 = arith.constant 0 : index
    %c0_23 = arith.constant 0 : index
    %48 = vector.load %arg7[%c0_21, %c0_22, %c0_23] : memref<1x24x512xbf16, #tpu.memory_space<vmem>>, vector<1x24x512xbf16>
    %49 = vector.shape_cast %48 : vector<1x24x512xbf16> to vector<24x512xbf16>
    %50 = vector.shape_cast %47 : vector<24x512xbf16> to vector<1x24x512xbf16>
    tpu.vector_store %arg7[%c0_21, %c0_22, %c0_23], %50 {strides = array<i32>} : memref<1x24x512xbf16, #tpu.memory_space<vmem>>, vector<1x24x512xbf16>,
    return
  }
  func.func @transform_0(%arg0: i32, %arg1: i32) -> (i32, i32, i32) {
    %c0_i32 = arith.constant 0 : i32
    %c0_i32_0 = arith.constant 0 : i32
    return %arg0, %arg1, %c0_i32 : i32, i32, i32
  }
  func.func @transform_1(%arg0: i32, %arg1: i32) -> (i32, i32, i32) {
    %c1_i32 = arith.constant 1 : i32
    %0 = arith.addi %arg1, %c1_i32 : i32
    %c3_i32 = arith.constant 3 : i32
    %1 = arith.muli %0, %c3_i32 : i32
    %c2_i32 = arith.constant 2 : i32
    %2 = arith.minsi %1, %c2_i32 : i32
    %c0_i32 = arith.constant 0 : i32
    %c0_i32_0 = arith.constant 0 : i32
    return %arg0, %2, %c0_i32 : i32, i32, i32
  }
  func.func @transform_2(%arg0: i32, %arg1: i32) -> (i32, i32) {
    %c0_i32 = arith.constant 0 : i32
    %c0_i32_0 = arith.constant 0 : i32
    %c0_i32_1 = arith.constant 0 : i32
    return %c0_i32, %c0_i32_0 : i32, i32
  }
  func.func @transform_3(%arg0: i32, %arg1: i32) -> (i32, i32, i32) {
    %c0_i32 = arith.constant 0 : i32
    %c0_i32_0 = arith.constant 0 : i32
    %c0_i32_1 = arith.constant 0 : i32
    return %arg0, %c0_i32, %c0_i32_0 : i32, i32, i32
  }
  func.func @transform_4(%arg0: i32, %arg1: i32) -> (i32, i32, i32) {
    %c0_i32 = arith.constant 0 : i32
    %c0_i32_0 = arith.constant 0 : i32
    %c0_i32_1 = arith.constant 0 : i32
    return %arg0, %c0_i32, %c0_i32_0 : i32, i32, i32
  }
  func.func @transform_5(%arg0: i32, %arg1: i32) -> (i32, i32, i32) {
    %c0_i32 = arith.constant 0 : i32
    %c0_i32_0 = arith.constant 0 : i32
    return %arg0, %arg1, %c0_i32 : i32, i32, i32
  }
}

module attributes {stable_mosaic.version = 11 : i64} {
  func.func @_conv_gelu_kernel(%arg0: i32, %arg1: i32, %arg2: memref<1x24x512xbf16, #tpu.memory_space<vmem>>, %arg3: memref<1x8x512xbf16, #tpu.memory_space<vmem>>, %arg4: memref<1536x512xbf16, #tpu.memory_space<vmem>>, %arg5: memref<1x24x512xbf16, #tpu.memory_space<vmem>>) attributes {dimension_semantics = [#tpu.dimension_semantics<parallel>, #tpu.dimension_semantics<parallel>], iteration_bounds = array<i64: 2, 1>, scalar_prefetch = 0 : i64, scratch_operands = 0 : i64, tpu.core_type = #tpu.core_type<tc>, window_params = [{transform_indices = @transform_0, window_bounds = array<i64: 1, 24, 512>}, {transform_indices = @transform_1, window_bounds = array<i64: 1, 8, 512>}, {pipeline_mode = #tpu.pipeline_mode<synchronous>, transform_indices = @transform_2, window_bounds = array<i64: 1536, 512>}, {transform_indices = @transform_3, window_bounds = array<i64: 1, 24, 512>}]} {
    %c0 = arith.constant 0 : index
    %c0_0 = arith.constant 0 : index
    %c0_1 = arith.constant 0 : index
    %0 = vector.load %arg2[%c0, %c0_0, %c0_1] : memref<1x24x512xbf16, #tpu.memory_space<vmem>>, vector<1x24x512xbf16>
    %1 = vector.shape_cast %0 : vector<1x24x512xbf16> to vector<24x512xbf16>
    %c0_2 = arith.constant 0 : index
    %c0_3 = arith.constant 0 : index
    %c0_4 = arith.constant 0 : index
    %2 = vector.load %arg3[%c0_2, %c0_3, %c0_4] : memref<1x8x512xbf16, #tpu.memory_space<vmem>>, vector<1x8x512xbf16>
    %3 = vector.shape_cast %2 : vector<1x8x512xbf16> to vector<8x512xbf16>
    %4 = tpu.concatenate %1, %3 in 0 : vector<24x512xbf16>, vector<8x512xbf16> -> vector<32x512xbf16>
    %5 = vector.extract_strided_slice %4 {offsets = [0, 0], sizes = [24, 512], strides = [1, 1]} : vector<32x512xbf16> to vector<24x512xbf16>
    %6 = vector.extract_strided_slice %4 {offsets = [1, 0], sizes = [24, 512], strides = [1, 1]} : vector<32x512xbf16> to vector<24x512xbf16>
    %7 = vector.extract_strided_slice %4 {offsets = [2, 0], sizes = [24, 512], strides = [1, 1]} : vector<32x512xbf16> to vector<24x512xbf16>
    %8 = tpu.concatenate %5, %6, %7 in 1 : vector<24x512xbf16>, vector<24x512xbf16>, vector<24x512xbf16> -> vector<24x1536xbf16>
    %c0_5 = arith.constant 0 : index
    %c0_6 = arith.constant 0 : index
    %9 = vector.load %arg4[%c0_5, %c0_6] : memref<1536x512xbf16, #tpu.memory_space<vmem>>, vector<1536x512xbf16>
    %cst = arith.constant dense<0.000000e+00> : vector<24x512xf32>
    %10 = tpu.matmul %8, %9, %cst {dimension_numbers = #tpu.dot_dimension_numbers<[1], [0], [0], [1], [0, 0, 1, 1], [], []>} : vector<24x1536xbf16>, vector<1536x512xbf16>, vector<24x512xf32> -> vector<24x512xf32>
    %cst_7 = arith.constant 5.000000e-01 : f32
    %11 = vector.broadcast %cst_7 : f32 to vector<24x512xf32>
    %12 = arith.mulf %11, %10 : vector<24x512xf32>
    %13 = arith.mulf %10, %10 : vector<24x512xf32>
    %14 = arith.mulf %13, %10 : vector<24x512xf32>
    %cst_8 = arith.constant 4.471500e-02 : f32
    %15 = vector.broadcast %cst_8 : f32 to vector<24x512xf32>
    %16 = arith.mulf %15, %14 : vector<24x512xf32>
    %17 = arith.addf %10, %16 : vector<24x512xf32>
    %cst_9 = arith.constant 0.797884583 : f32
    %18 = vector.broadcast %cst_9 : f32 to vector<24x512xf32>
    %19 = arith.mulf %18, %17 : vector<24x512xf32>
    %20 = math.tanh %19 : vector<24x512xf32>
    %cst_10 = arith.constant 1.000000e+00 : f32
    %21 = vector.broadcast %cst_10 : f32 to vector<24x512xf32>
    %22 = arith.addf %21, %20 : vector<24x512xf32>
    %23 = arith.mulf %12, %22 : vector<24x512xf32>
    %24 = arith.truncf %23 : vector<24x512xf32> to vector<24x512xbf16>
    %c0_11 = arith.constant 0 : index
    %c0_12 = arith.constant 0 : index
    %c0_13 = arith.constant 0 : index
    %25 = vector.load %arg5[%c0_11, %c0_12, %c0_13] : memref<1x24x512xbf16, #tpu.memory_space<vmem>>, vector<1x24x512xbf16>
    %26 = vector.shape_cast %25 : vector<1x24x512xbf16> to vector<24x512xbf16>
    %27 = vector.shape_cast %24 : vector<24x512xbf16> to vector<1x24x512xbf16>
    tpu.vector_store %arg5[%c0_11, %c0_12, %c0_13], %27 {strides = array<i32>} : memref<1x24x512xbf16, #tpu.memory_space<vmem>>, vector<1x24x512xbf16>,
    return
  }
  func.func @transform_0(%arg0: i32, %arg1: i32) -> (i32, i32, i32) {
    %c0_i32 = arith.constant 0 : i32
    %c0_i32_0 = arith.constant 0 : i32
    return %arg0, %arg1, %c0_i32 : i32, i32, i32
  }
  func.func @transform_1(%arg0: i32, %arg1: i32) -> (i32, i32, i32) {
    %c1_i32 = arith.constant 1 : i32
    %0 = arith.addi %arg1, %c1_i32 : i32
    %c3_i32 = arith.constant 3 : i32
    %1 = arith.muli %0, %c3_i32 : i32
    %c2_i32 = arith.constant 2 : i32
    %2 = arith.minsi %1, %c2_i32 : i32
    %c0_i32 = arith.constant 0 : i32
    %c0_i32_0 = arith.constant 0 : i32
    return %arg0, %2, %c0_i32 : i32, i32, i32
  }
  func.func @transform_2(%arg0: i32, %arg1: i32) -> (i32, i32) {
    %c0_i32 = arith.constant 0 : i32
    %c0_i32_0 = arith.constant 0 : i32
    %c0_i32_1 = arith.constant 0 : i32
    return %c0_i32, %c0_i32_0 : i32, i32
  }
  func.func @transform_3(%arg0: i32, %arg1: i32) -> (i32, i32, i32) {
    %c0_i32 = arith.constant 0 : i32
    %c0_i32_0 = arith.constant 0 : i32
    return %arg0, %arg1, %c0_i32 : i32, i32, i32
  }
}

module attributes {stable_mosaic.version = 11 : i64} {
  func.func @_conv_gelu_kernel(%arg0: i32, %arg1: i32, %arg2: memref<1x16x512xbf16, #tpu.memory_space<vmem>>, %arg3: memref<1x8x512xbf16, #tpu.memory_space<vmem>>, %arg4: memref<1536x512xbf16, #tpu.memory_space<vmem>>, %arg5: memref<1x16x512xbf16, #tpu.memory_space<vmem>>) attributes {dimension_semantics = [#tpu.dimension_semantics<parallel>, #tpu.dimension_semantics<parallel>], iteration_bounds = array<i64: 2, 1>, scalar_prefetch = 0 : i64, scratch_operands = 0 : i64, tpu.core_type = #tpu.core_type<tc>, window_params = [{transform_indices = @transform_0, window_bounds = array<i64: 1, 16, 512>}, {transform_indices = @transform_1, window_bounds = array<i64: 1, 8, 512>}, {pipeline_mode = #tpu.pipeline_mode<synchronous>, transform_indices = @transform_2, window_bounds = array<i64: 1536, 512>}, {transform_indices = @transform_3, window_bounds = array<i64: 1, 16, 512>}]} {
    %c0 = arith.constant 0 : index
    %c0_0 = arith.constant 0 : index
    %c0_1 = arith.constant 0 : index
    %0 = vector.load %arg2[%c0, %c0_0, %c0_1] : memref<1x16x512xbf16, #tpu.memory_space<vmem>>, vector<1x16x512xbf16>
    %1 = vector.shape_cast %0 : vector<1x16x512xbf16> to vector<16x512xbf16>
    %c0_2 = arith.constant 0 : index
    %c0_3 = arith.constant 0 : index
    %c0_4 = arith.constant 0 : index
    %2 = vector.load %arg3[%c0_2, %c0_3, %c0_4] : memref<1x8x512xbf16, #tpu.memory_space<vmem>>, vector<1x8x512xbf16>
    %3 = vector.shape_cast %2 : vector<1x8x512xbf16> to vector<8x512xbf16>
    %4 = tpu.concatenate %1, %3 in 0 : vector<16x512xbf16>, vector<8x512xbf16> -> vector<24x512xbf16>
    %5 = vector.extract_strided_slice %4 {offsets = [0, 0], sizes = [16, 512], strides = [1, 1]} : vector<24x512xbf16> to vector<16x512xbf16>
    %6 = vector.extract_strided_slice %4 {offsets = [1, 0], sizes = [16, 512], strides = [1, 1]} : vector<24x512xbf16> to vector<16x512xbf16>
    %7 = vector.extract_strided_slice %4 {offsets = [2, 0], sizes = [16, 512], strides = [1, 1]} : vector<24x512xbf16> to vector<16x512xbf16>
    %8 = tpu.concatenate %5, %6, %7 in 1 : vector<16x512xbf16>, vector<16x512xbf16>, vector<16x512xbf16> -> vector<16x1536xbf16>
    %c0_5 = arith.constant 0 : index
    %c0_6 = arith.constant 0 : index
    %9 = vector.load %arg4[%c0_5, %c0_6] : memref<1536x512xbf16, #tpu.memory_space<vmem>>, vector<1536x512xbf16>
    %cst = arith.constant dense<0.000000e+00> : vector<16x512xf32>
    %10 = tpu.matmul %8, %9, %cst {dimension_numbers = #tpu.dot_dimension_numbers<[1], [0], [0], [1], [0, 0, 1, 1], [], []>} : vector<16x1536xbf16>, vector<1536x512xbf16>, vector<16x512xf32> -> vector<16x512xf32>
    %cst_7 = arith.constant 5.000000e-01 : f32
    %11 = vector.broadcast %cst_7 : f32 to vector<16x512xf32>
    %12 = arith.mulf %11, %10 : vector<16x512xf32>
    %13 = arith.mulf %10, %10 : vector<16x512xf32>
    %14 = arith.mulf %13, %10 : vector<16x512xf32>
    %cst_8 = arith.constant 4.471500e-02 : f32
    %15 = vector.broadcast %cst_8 : f32 to vector<16x512xf32>
    %16 = arith.mulf %15, %14 : vector<16x512xf32>
    %17 = arith.addf %10, %16 : vector<16x512xf32>
    %cst_9 = arith.constant 0.797884583 : f32
    %18 = vector.broadcast %cst_9 : f32 to vector<16x512xf32>
    %19 = arith.mulf %18, %17 : vector<16x512xf32>
    %20 = math.tanh %19 : vector<16x512xf32>
    %cst_10 = arith.constant 1.000000e+00 : f32
    %21 = vector.broadcast %cst_10 : f32 to vector<16x512xf32>
    %22 = arith.addf %21, %20 : vector<16x512xf32>
    %23 = arith.mulf %12, %22 : vector<16x512xf32>
    %24 = arith.truncf %23 : vector<16x512xf32> to vector<16x512xbf16>
    %c0_11 = arith.constant 0 : index
    %c0_12 = arith.constant 0 : index
    %c0_13 = arith.constant 0 : index
    %25 = vector.load %arg5[%c0_11, %c0_12, %c0_13] : memref<1x16x512xbf16, #tpu.memory_space<vmem>>, vector<1x16x512xbf16>
    %26 = vector.shape_cast %25 : vector<1x16x512xbf16> to vector<16x512xbf16>
    %27 = vector.shape_cast %24 : vector<16x512xbf16> to vector<1x16x512xbf16>
    tpu.vector_store %arg5[%c0_11, %c0_12, %c0_13], %27 {strides = array<i32>} : memref<1x16x512xbf16, #tpu.memory_space<vmem>>, vector<1x16x512xbf16>,
    return
  }
  func.func @transform_0(%arg0: i32, %arg1: i32) -> (i32, i32, i32) {
    %c0_i32 = arith.constant 0 : i32
    %c0_i32_0 = arith.constant 0 : i32
    return %arg0, %arg1, %c0_i32 : i32, i32, i32
  }
  func.func @transform_1(%arg0: i32, %arg1: i32) -> (i32, i32, i32) {
    %c1_i32 = arith.constant 1 : i32
    %0 = arith.addi %arg1, %c1_i32 : i32
    %c2_i32 = arith.constant 2 : i32
    %1 = arith.muli %0, %c2_i32 : i32
    %c2_i32_0 = arith.constant 2 : i32
    %2 = arith.minsi %1, %c2_i32_0 : i32
    %c0_i32 = arith.constant 0 : i32
    %c0_i32_1 = arith.constant 0 : i32
    return %arg0, %2, %c0_i32 : i32, i32, i32
  }
  func.func @transform_2(%arg0: i32, %arg1: i32) -> (i32, i32) {
    %c0_i32 = arith.constant 0 : i32
    %c0_i32_0 = arith.constant 0 : i32
    %c0_i32_1 = arith.constant 0 : i32
    return %c0_i32, %c0_i32_0 : i32, i32
  }
  func.func @transform_3(%arg0: i32, %arg1: i32) -> (i32, i32, i32) {
    %c0_i32 = arith.constant 0 : i32
    %c0_i32_0 = arith.constant 0 : i32
    return %arg0, %arg1, %c0_i32 : i32, i32, i32
  }
}

module attributes {stable_mosaic.version = 11 : i64} {
  func.func @_conv_gelu_kernel(%arg0: i32, %arg1: i32, %arg2: memref<1x16x512xbf16, #tpu.memory_space<vmem>>, %arg3: memref<1x8x512xbf16, #tpu.memory_space<vmem>>, %arg4: memref<1024x512xbf16, #tpu.memory_space<vmem>>, %arg5: memref<1x16x512xbf16, #tpu.memory_space<vmem>>) attributes {dimension_semantics = [#tpu.dimension_semantics<parallel>, #tpu.dimension_semantics<parallel>], iteration_bounds = array<i64: 2, 1>, scalar_prefetch = 0 : i64, scratch_operands = 0 : i64, tpu.core_type = #tpu.core_type<tc>, window_params = [{transform_indices = @transform_0, window_bounds = array<i64: 1, 16, 512>}, {transform_indices = @transform_1, window_bounds = array<i64: 1, 8, 512>}, {pipeline_mode = #tpu.pipeline_mode<synchronous>, transform_indices = @transform_2, window_bounds = array<i64: 1024, 512>}, {transform_indices = @transform_3, window_bounds = array<i64: 1, 16, 512>}]} {
    %c0 = arith.constant 0 : index
    %c0_0 = arith.constant 0 : index
    %c0_1 = arith.constant 0 : index
    %0 = vector.load %arg2[%c0, %c0_0, %c0_1] : memref<1x16x512xbf16, #tpu.memory_space<vmem>>, vector<1x16x512xbf16>
    %1 = vector.shape_cast %0 : vector<1x16x512xbf16> to vector<16x512xbf16>
    %c0_2 = arith.constant 0 : index
    %c0_3 = arith.constant 0 : index
    %c0_4 = arith.constant 0 : index
    %2 = vector.load %arg3[%c0_2, %c0_3, %c0_4] : memref<1x8x512xbf16, #tpu.memory_space<vmem>>, vector<1x8x512xbf16>
    %3 = vector.shape_cast %2 : vector<1x8x512xbf16> to vector<8x512xbf16>
    %4 = tpu.concatenate %1, %3 in 0 : vector<16x512xbf16>, vector<8x512xbf16> -> vector<24x512xbf16>
    %5 = vector.extract_strided_slice %4 {offsets = [0, 0], sizes = [16, 512], strides = [1, 1]} : vector<24x512xbf16> to vector<16x512xbf16>
    %6 = vector.extract_strided_slice %4 {offsets = [1, 0], sizes = [16, 512], strides = [1, 1]} : vector<24x512xbf16> to vector<16x512xbf16>
    %7 = tpu.concatenate %5, %6 in 1 : vector<16x512xbf16>, vector<16x512xbf16> -> vector<16x1024xbf16>
    %c0_5 = arith.constant 0 : index
    %c0_6 = arith.constant 0 : index
    %8 = vector.load %arg4[%c0_5, %c0_6] : memref<1024x512xbf16, #tpu.memory_space<vmem>>, vector<1024x512xbf16>
    %cst = arith.constant dense<0.000000e+00> : vector<16x512xf32>
    %9 = tpu.matmul %7, %8, %cst {dimension_numbers = #tpu.dot_dimension_numbers<[1], [0], [0], [1], [0, 0, 1, 1], [], []>} : vector<16x1024xbf16>, vector<1024x512xbf16>, vector<16x512xf32> -> vector<16x512xf32>
    %cst_7 = arith.constant 5.000000e-01 : f32
    %10 = vector.broadcast %cst_7 : f32 to vector<16x512xf32>
    %11 = arith.mulf %10, %9 : vector<16x512xf32>
    %12 = arith.mulf %9, %9 : vector<16x512xf32>
    %13 = arith.mulf %12, %9 : vector<16x512xf32>
    %cst_8 = arith.constant 4.471500e-02 : f32
    %14 = vector.broadcast %cst_8 : f32 to vector<16x512xf32>
    %15 = arith.mulf %14, %13 : vector<16x512xf32>
    %16 = arith.addf %9, %15 : vector<16x512xf32>
    %cst_9 = arith.constant 0.797884583 : f32
    %17 = vector.broadcast %cst_9 : f32 to vector<16x512xf32>
    %18 = arith.mulf %17, %16 : vector<16x512xf32>
    %19 = math.tanh %18 : vector<16x512xf32>
    %cst_10 = arith.constant 1.000000e+00 : f32
    %20 = vector.broadcast %cst_10 : f32 to vector<16x512xf32>
    %21 = arith.addf %20, %19 : vector<16x512xf32>
    %22 = arith.mulf %11, %21 : vector<16x512xf32>
    %23 = arith.truncf %22 : vector<16x512xf32> to vector<16x512xbf16>
    %c0_11 = arith.constant 0 : index
    %c0_12 = arith.constant 0 : index
    %c0_13 = arith.constant 0 : index
    %24 = vector.load %arg5[%c0_11, %c0_12, %c0_13] : memref<1x16x512xbf16, #tpu.memory_space<vmem>>, vector<1x16x512xbf16>
    %25 = vector.shape_cast %24 : vector<1x16x512xbf16> to vector<16x512xbf16>
    %26 = vector.shape_cast %23 : vector<16x512xbf16> to vector<1x16x512xbf16>
    tpu.vector_store %arg5[%c0_11, %c0_12, %c0_13], %26 {strides = array<i32>} : memref<1x16x512xbf16, #tpu.memory_space<vmem>>, vector<1x16x512xbf16>,
    return
  }
  func.func @transform_0(%arg0: i32, %arg1: i32) -> (i32, i32, i32) {
    %c0_i32 = arith.constant 0 : i32
    %c0_i32_0 = arith.constant 0 : i32
    return %arg0, %arg1, %c0_i32 : i32, i32, i32
  }
  func.func @transform_1(%arg0: i32, %arg1: i32) -> (i32, i32, i32) {
    %c1_i32 = arith.constant 1 : i32
    %0 = arith.addi %arg1, %c1_i32 : i32
    %c2_i32 = arith.constant 2 : i32
    %1 = arith.muli %0, %c2_i32 : i32
    %c1_i32_0 = arith.constant 1 : i32
    %2 = arith.minsi %1, %c1_i32_0 : i32
    %c0_i32 = arith.constant 0 : i32
    %c0_i32_1 = arith.constant 0 : i32
    return %arg0, %2, %c0_i32 : i32, i32, i32
  }
  func.func @transform_2(%arg0: i32, %arg1: i32) -> (i32, i32) {
    %c0_i32 = arith.constant 0 : i32
    %c0_i32_0 = arith.constant 0 : i32
    %c0_i32_1 = arith.constant 0 : i32
    return %c0_i32, %c0_i32_0 : i32, i32
  }
  func.func @transform_3(%arg0: i32, %arg1: i32) -> (i32, i32, i32) {
    %c0_i32 = arith.constant 0 : i32
    %c0_i32_0 = arith.constant 0 : i32
    return %arg0, %arg1, %c0_i32 : i32, i32, i32
  }
}

module attributes {stable_mosaic.version = 11 : i64} {
  func.func @_conv_gelu_kernel(%arg0: i32, %arg1: i32, %arg2: memref<1x16x512xbf16, #tpu.memory_space<vmem>>, %arg3: memref<1x8x512xbf16, #tpu.memory_space<vmem>>, %arg4: memref<1024x512xbf16, #tpu.memory_space<vmem>>, %arg5: memref<1x16x512xf32, #tpu.memory_space<vmem>>) attributes {dimension_semantics = [#tpu.dimension_semantics<parallel>, #tpu.dimension_semantics<parallel>], iteration_bounds = array<i64: 2, 1>, scalar_prefetch = 0 : i64, scratch_operands = 0 : i64, tpu.core_type = #tpu.core_type<tc>, window_params = [{transform_indices = @transform_0, window_bounds = array<i64: 1, 16, 512>}, {transform_indices = @transform_1, window_bounds = array<i64: 1, 8, 512>}, {pipeline_mode = #tpu.pipeline_mode<synchronous>, transform_indices = @transform_2, window_bounds = array<i64: 1024, 512>}, {transform_indices = @transform_3, window_bounds = array<i64: 1, 16, 512>}]} {
    %c0 = arith.constant 0 : index
    %c0_0 = arith.constant 0 : index
    %c0_1 = arith.constant 0 : index
    %0 = vector.load %arg2[%c0, %c0_0, %c0_1] : memref<1x16x512xbf16, #tpu.memory_space<vmem>>, vector<1x16x512xbf16>
    %1 = vector.shape_cast %0 : vector<1x16x512xbf16> to vector<16x512xbf16>
    %c0_2 = arith.constant 0 : index
    %c0_3 = arith.constant 0 : index
    %c0_4 = arith.constant 0 : index
    %2 = vector.load %arg3[%c0_2, %c0_3, %c0_4] : memref<1x8x512xbf16, #tpu.memory_space<vmem>>, vector<1x8x512xbf16>
    %3 = vector.shape_cast %2 : vector<1x8x512xbf16> to vector<8x512xbf16>
    %4 = tpu.concatenate %1, %3 in 0 : vector<16x512xbf16>, vector<8x512xbf16> -> vector<24x512xbf16>
    %5 = vector.extract_strided_slice %4 {offsets = [0, 0], sizes = [16, 512], strides = [1, 1]} : vector<24x512xbf16> to vector<16x512xbf16>
    %6 = vector.extract_strided_slice %4 {offsets = [1, 0], sizes = [16, 512], strides = [1, 1]} : vector<24x512xbf16> to vector<16x512xbf16>
    %7 = tpu.concatenate %5, %6 in 1 : vector<16x512xbf16>, vector<16x512xbf16> -> vector<16x1024xbf16>
    %c0_5 = arith.constant 0 : index
    %c0_6 = arith.constant 0 : index
    %8 = vector.load %arg4[%c0_5, %c0_6] : memref<1024x512xbf16, #tpu.memory_space<vmem>>, vector<1024x512xbf16>
    %cst = arith.constant dense<0.000000e+00> : vector<16x512xf32>
    %9 = tpu.matmul %7, %8, %cst {dimension_numbers = #tpu.dot_dimension_numbers<[1], [0], [0], [1], [0, 0, 1, 1], [], []>} : vector<16x1024xbf16>, vector<1024x512xbf16>, vector<16x512xf32> -> vector<16x512xf32>
    %cst_7 = arith.constant 5.000000e-01 : f32
    %10 = vector.broadcast %cst_7 : f32 to vector<16x512xf32>
    %11 = arith.mulf %10, %9 : vector<16x512xf32>
    %12 = arith.mulf %9, %9 : vector<16x512xf32>
    %13 = arith.mulf %12, %9 : vector<16x512xf32>
    %cst_8 = arith.constant 4.471500e-02 : f32
    %14 = vector.broadcast %cst_8 : f32 to vector<16x512xf32>
    %15 = arith.mulf %14, %13 : vector<16x512xf32>
    %16 = arith.addf %9, %15 : vector<16x512xf32>
    %cst_9 = arith.constant 0.797884583 : f32
    %17 = vector.broadcast %cst_9 : f32 to vector<16x512xf32>
    %18 = arith.mulf %17, %16 : vector<16x512xf32>
    %19 = math.tanh %18 : vector<16x512xf32>
    %cst_10 = arith.constant 1.000000e+00 : f32
    %20 = vector.broadcast %cst_10 : f32 to vector<16x512xf32>
    %21 = arith.addf %20, %19 : vector<16x512xf32>
    %22 = arith.mulf %11, %21 : vector<16x512xf32>
    %c0_11 = arith.constant 0 : index
    %c0_12 = arith.constant 0 : index
    %c0_13 = arith.constant 0 : index
    %23 = vector.load %arg5[%c0_11, %c0_12, %c0_13] : memref<1x16x512xf32, #tpu.memory_space<vmem>>, vector<1x16x512xf32>
    %24 = vector.shape_cast %23 : vector<1x16x512xf32> to vector<16x512xf32>
    %25 = vector.shape_cast %22 : vector<16x512xf32> to vector<1x16x512xf32>
    tpu.vector_store %arg5[%c0_11, %c0_12, %c0_13], %25 {strides = array<i32>} : memref<1x16x512xf32, #tpu.memory_space<vmem>>, vector<1x16x512xf32>,
    return
  }
  func.func @transform_0(%arg0: i32, %arg1: i32) -> (i32, i32, i32) {
    %c0_i32 = arith.constant 0 : i32
    %c0_i32_0 = arith.constant 0 : i32
    return %arg0, %arg1, %c0_i32 : i32, i32, i32
  }
  func.func @transform_1(%arg0: i32, %arg1: i32) -> (i32, i32, i32) {
    %c1_i32 = arith.constant 1 : i32
    %0 = arith.addi %arg1, %c1_i32 : i32
    %c2_i32 = arith.constant 2 : i32
    %1 = arith.muli %0, %c2_i32 : i32
    %c1_i32_0 = arith.constant 1 : i32
    %2 = arith.minsi %1, %c1_i32_0 : i32
    %c0_i32 = arith.constant 0 : i32
    %c0_i32_1 = arith.constant 0 : i32
    return %arg0, %2, %c0_i32 : i32, i32, i32
  }
  func.func @transform_2(%arg0: i32, %arg1: i32) -> (i32, i32) {
    %c0_i32 = arith.constant 0 : i32
    %c0_i32_0 = arith.constant 0 : i32
    %c0_i32_1 = arith.constant 0 : i32
    return %c0_i32, %c0_i32_0 : i32, i32
  }
  func.func @transform_3(%arg0: i32, %arg1: i32) -> (i32, i32, i32) {
    %c0_i32 = arith.constant 0 : i32
    %c0_i32_0 = arith.constant 0 : i32
    return %arg0, %arg1, %c0_i32 : i32, i32, i32
  }
}

</mosaic_0001>

<bundles_post_ra>
// kernel: feature_extractor.7
= control target key start
LH: loop header
LB: loop body
LE: loop exit
PB: predicated region body
PF: predicated region fallthrough
CT: control target
= control target key end

     0   :  { %s939_s15 = smov 0   ;;  %s941_s16 = smov 0   ;;  %s1067_s0 = inlined_call_operand.vmem [shape: f32[2,24,20], index: 0, kind: input, shape index: {}]   ;;  %s1068_s1 = inlined_call_operand.vmem [shape: f32[20,512], index: 1, kind: input, shape index: {}]   ;;  %s1069_s2 = inlined_call_operand.vmem [shape: bf16[2,24,512], index: 2, kind: output, shape index: {0}]   ;;  %s1070_s3 = inlined_call_operand.vmem [shape: f32[2,1,512], index: 3, kind: output, shape index: {1}]   ;;  %s1071_s4 = inlined_call_operand.vmem [shape: f32[2,1,512], index: 4, kind: output, shape index: {2}]  }
   0x1   :  { %s943_s17 = smov 0  }
   0x2 LB: > { %s27_s18 = sadd.s32 1, %s906_s16  ;;  %p823_p0 = scmp.ge.s32.totalorder %s910_s17, 1  ;;  %s910_s17 = sphi %s943_s17, %s15_s17   ;;  %s906_s16 = sphi %s941_s16, %s1075_s16   ;;  %s902_s15 = sphi %s939_s15, %s1074_s15  }
   0x3   : > { %p29_p1 = scmp.ge.s32.totalorder %s27_s18, 2  ;;  %p188_p2 = scmp.lt.s32.totalorder %s910_s17, 3 }
   0x5   : > { %s1077_s18 = smov (%p29_p1, %s27_s18), 0  ;;  %p189_p3 = pnand %p823_p0, %p188_p2 }
   0x6   : > { %v264_v0 = vld [vmem:[%s1068_s1 + $0x8] sm:$0xff] (!%p189_p3)  ;;  %v266_v2 = vld [vmem:[%s1068_s1 + $0x18] sm:$0xff] (!%p189_p3)  ;;  %p232_p4 = scmp.lt.s32.totalorder (!%p189_p3), %s902_s15, 1  ;;  %v514_v3 = vlaneseq (!%p189_p3)  ;;  %v263_v6 = vld [vmem:[%s1068_s1] sm:$0xff] (!%p189_p3)  ;;  %v912_v8 = vmov (!%p189_p3), 0.0   ;;  %vm285_vm0 = vcmask (!%p189_p3), 1043456  }
   0x7   : > { %192 = sbr.rel (%p189_p3) target bundleno = 270 (0x10e), region = 28  ;;  %v268_v1 = vld [vmem:[%s1068_s1 + $0x28] sm:$0xff] (!%p189_p3)  ;;  %v270_v5 = vld [vmem:[%s1068_s1 + $0x38] sm:$0xff] (!%p189_p3)  ;;  %v267_v7 = vld [vmem:[%s1068_s1 + $0x20] sm:$0xff] (!%p189_p3)  ;;  %362 = vmatprep.mubr.f32.mxu0 (!%p189_p3), %v912_v8  ;;  %445 = vmatprep.mubr.f32.mxu1 (!%p189_p3), %v912_v8  ;;  %vm275_vm2 = vcmask (!%p189_p3), 162816  }
   0x8   : > { %v852_v4 = vpack.c.bf16 (!%p189_p3), %v268_v1, %v264_v0  ;;  %v856_v9 = vpack.c.bf16 (!%p189_p3), %v270_v5, %v266_v2  ;;  %v854_v10 = vpack.c.bf16 (!%p189_p3), %v267_v7, %v263_v6  ;;  %v265_v11 = vld [vmem:[%s1068_s1 + $0x10] sm:$0xff] (!%p189_p3)  ;;  %v272_v13 = vld [vmem:[%s1068_s1 + $0x48] sm:$0xf] (!%p189_p3)  ;;  %v274_v15 = vld [vmem:[%s1068_s1 + $0x58] sm:$0xf] (!%p189_p3)  ;;  %vm991_vm1 = vcmp.lt.s32.totalorder (!%p189_p3), %v514_v3, 512 }
   0x9   : > { %v269_v12 = vld [vmem:[%s1068_s1 + $0x30] sm:$0xff] (!%p189_p3)  ;;  %v271_v17 = vld [vmem:[%s1068_s1 + $0x40] sm:$0xf] (!%p189_p3)  ;;  %v913_v28 = vmov (!%p189_p3), 1966171168   ;;  %v563_v52 = vshrl.u32 (!%p189_p3), %v514_v3, 7 }
   0xa   : > { %853 = vmatprep.subr.bf16.mxu0 (!%p189_p3), %v852_v4  ;;  %v858_v14 = vpack.c.bf16 (!%p189_p3), %v269_v12, %v265_v11  ;;  %857 = vmatprep.subr.bf16.mxu1 (!%p189_p3), %v856_v9  ;;  %v273_v18 = vld [vmem:[%s1068_s1 + $0x50] sm:$0xf] (!%p189_p3)  ;;  %v1038_v29 = vunpack.c.l.s4 (!%p189_p3), %v913_v28 }
   0xb   : > { %855 = vmatpush1.bf16.msra.mxu0 (!%p189_p3), %v854_v10 }
   0xc   : > { %859 = vmatpush1.bf16.msra.mxu1 (!%p189_p3), %v858_v14  ;;  %828 = vmatprep.subr.msk.mxu0 (!%p189_p3), %vm285_vm0, %v272_v13  ;;  %v561_v47 = vunpack.c.0.s8 (!%p189_p3), %v1038_v29 }
   0xd   : > { %833 = vmatprep.subr.msk.mxu1 (!%p189_p3), %vm285_vm0, %v274_v15 }
   0xe   : > { %s1079_s15 = smov (!%p232_p4, %s902_s15), 1 }
   0xf   : > { %s860_s13 = smul.u32 24, %s1079_s15  ;;  %s826_s14 = sshll.u32 %s1079_s15, 2  ;;  %829 = vmatpush1.msk.msra.mxu0 %vm285_vm0, %v271_v17 }
  0x10   : > { %s1004_s23 = scalar_lea.vmem %s1070_s3, %s826_s14  ;;  %s1009_s26 = scalar_lea.vmem %s1071_s4, %s826_s14  ;;  %834 = vmatpush1.msk.msra.mxu1 %vm285_vm0, %v273_v18 }
  0x11   : > { %s239_s5 = scalar_lea.vmem %s1067_s0, %s860_s13  ;;  %518 = vst.msk [vmem:[%s1004_s23] sm:$0xf] %vm991_vm1, %v912_v8  ;;  %519 = vst.msk [vmem:[%s1009_s26] sm:$0xf] %vm991_vm1, %v912_v8  ;;  %s861_s6 = smul.u32 48, %s1079_s15 }
  0x12   : > { %v260_v19 = vld [vmem:[%s239_s5] sm:$0xff]  ;;  %v261_v20 = vld [vmem:[%s239_s5 + $0x8] sm:$0xff]  ;;  %v262_v21 = vld [vmem:[%s239_s5 + $0x10] sm:$0xff] }
  0x13   : > { %830 = vmatmul.mubr.msk.f32.vlgmr.msra.gmra.mrb[0].mxu0 %vm275_vm2, %v260_v19  ;;  %835 = vmatmul.mubr.msk.f32.vlgmr.msra.gmra.mrb[0].mxu1 %vm275_vm2, %v260_v19  ;;  %s1036_s9 = scalar_lea.vmem %s1069_s2, %s861_s6 }
  0x14   : > { %368 = vmatprep.mubr.f32.mxu0 %v912_v8  ;;  %451 = vmatprep.mubr.f32.mxu1 %v912_v8 }
  0x17   : > { %831 = vmatmul.mubr.msk.f32.gmra.mrb[2].mxu0 %vm275_vm2, %v261_v20  ;;  %836 = vmatmul.mubr.msk.f32.gmra.mrb[2].mxu1 %vm275_vm2, %v261_v20 }
  0x18   : > { %374 = vmatprep.mubr.f32.mxu0 %v912_v8  ;;  %457 = vmatprep.mubr.f32.mxu1 %v912_v8 }
  0x1b   : > { %832 = vmatmul.mubr.msk.f32.gmra.mrb[4].mxu0 %vm275_vm2, %v262_v21  ;;  %837 = vmatmul.mubr.msk.f32.gmra.mrb[4].mxu1 %vm275_vm2, %v262_v21 }
  0xe6   : > { %v364_v22 = vpop.f32.mrb[0].mxu0  ;;  %v447_v23 = vpop.f32.mrb[0].mxu1 }
  0xe7   : > { %v366_v24 = vpop.f32.mrb[1].mxu0  ;;  %v449_v26 = vpop.f32.mrb[1].mxu1  ;;  %v589_v30 = vmul.f32 %v364_v22, %v364_v22  ;;  %v591_v32 = vmul.f32 %v447_v23, %v447_v23 }
  0xe8   : > { %v846_v25 = vpack.c.bf16 %v366_v24, %v364_v22  ;;  %v847_v27 = vpack.c.bf16 %v449_v26, %v447_v23  ;;  %v590_v33 = vmul.f32 %v366_v24, %v366_v24  ;;  %v592_v48 = vmul.f32 %v449_v26, %v449_v26 }
  0xea   : > { %504 = vst [vmem:[%s1036_s9] sm:$0xff] %v846_v25  ;;  %v370_v31 = vpop.f32.mrb[2].mxu0  ;;  %505 = vst [vmem:[%s1036_s9 + $0x8] sm:$0xff] %v847_v27  ;;  %v453_v36 = vpop.f32.mrb[2].mxu1 }
  0xeb   : > { %v521_v34 = vadd.f32 %v370_v31, %v364_v22  ;;  %v593_v35 = vmul.f32 %v370_v31, %v370_v31  ;;  %v372_v37 = vpop.f32.mrb[3].mxu0  ;;  %v537_v38 = vadd.f32 %v453_v36, %v447_v23  ;;  %v595_v39 = vmul.f32 %v453_v36, %v453_v36  ;;  %v455_v42 = vpop.f32.mrb[3].mxu1 }
  0xec   : > { %v848_v40 = vpack.c.bf16 %v372_v37, %v370_v31  ;;  %v529_v41 = vadd.f32 %v372_v37, %v366_v24  ;;  %v594_v44 = vmul.f32 %v372_v37, %v372_v37  ;;  %v849_v45 = vpack.c.bf16 %v455_v42, %v453_v36 }
  0xed   : > { %v601_v43 = vadd.f32 %v593_v35, %v589_v30  ;;  %v545_v46 = vadd.f32 %v455_v42, %v449_v26  ;;  %v617_v49 = vadd.f32 %v595_v39, %v591_v32  ;;  %v596_v50 = vmul.f32 %v455_v42, %v455_v42 }
  0xee   : > { %506 = vst [vmem:[%s1036_s9 + $0x10] sm:$0xff] %v848_v40  ;;  %v376_v51 = vpop.f32.mrb[4].mxu0  ;;  %v609_v53 = vadd.f32 %v594_v44, %v590_v33  ;;  %507 = vst [vmem:[%s1036_s9 + $0x18] sm:$0xff] %v849_v45  ;;  %v459_v56 = vpop.f32.mrb[4].mxu1 }
  0xef   : > { %v522_v54 = vadd.f32 %v521_v34, %v376_v51  ;;  %v597_v55 = vmul.f32 %v376_v51, %v376_v51  ;;  %v378_v57 = vpop.f32.mrb[5].mxu0  ;;  %v625_v58 = vadd.f32 %v596_v50, %v592_v48  ;;  %v538_v59 = vadd.f32 %v537_v38, %v459_v56  ;;  %v461_v62 = vpop.f32.mrb[5].mxu1 }
  0xf0   : > { %v599_v60 = vmul.f32 %v459_v56, %v459_v56  ;;  %v850_v61 = vpack.c.bf16 %v378_v57, %v376_v51  ;;  %v530_v1 = vadd.f32 %v529_v41, %v378_v57  ;;  %v598_v2 = vmul.f32 %v378_v57, %v378_v57 }
  0xf1   : > { %v523_v63 = vrot.slane %v522_v54, 4  ;;  %v602_v0 = vadd.f32 %v601_v43, %v597_v55  ;;  %v539_v4 = vrot.slane %v538_v59, 4  ;;  %v851_v3 = vpack.c.bf16 %v461_v62, %v459_v56 }
  0xf2   : > { %v618_v5 = vadd.f32 %v617_v49, %v599_v60  ;;  %508 = vst [vmem:[%s1036_s9 + $0x20] sm:$0xff] %v850_v61  ;;  %v546_v6 = vadd.f32 %v545_v46, %v461_v62  ;;  %v531_v9 = vrot.slane %v530_v1, 4  ;;  %v610_v10 = vadd.f32 %v609_v53, %v598_v2  ;;  %v520_v2 = vld [vmem:[%s1004_s23] sm:$0xf] }
  0xf3   : > { %v524_v7 = vadd.f32 %v523_v63, %v522_v54  ;;  %v603_v8 = vrot.slane %v602_v0, 4  ;;  %v540_v11 = vadd.f32 %v539_v4, %v538_v59  ;;  %509 = vst [vmem:[%s1036_s9 + $0x28] sm:$0xff] %v851_v3  ;;  %v600_v14 = vmul.f32 %v461_v62, %v461_v62 }
  0xf4   : > { %v619_v12 = vrot.slane %v618_v5, 4  ;;  %v547_v13 = vrot.slane %v546_v6, 4  ;;  %v532_v18 = vadd.f32 %v531_v9, %v530_v1  ;;  %v611_v19 = vrot.slane %v610_v10, 4 }
  0xf5   : > { %v525_v15 = vrot.slane %v524_v7, 2  ;;  %v604_v17 = vadd.f32 %v603_v8, %v602_v0  ;;  %v541_v20 = vrot.slane %v540_v11, 2  ;;  %v626_v23 = vadd.f32 %v625_v58, %v600_v14 }
  0xf6   : > { %v620_v21 = vadd.f32 %v619_v12, %v618_v5  ;;  %v548_v22 = vadd.f32 %v547_v13, %v546_v6  ;;  %v533_v26 = vrot.slane %v532_v18, 2  ;;  %v612_v27 = vadd.f32 %v611_v19, %v610_v10 }
  0xf7   : > { %v526_v24 = vadd.f32 %v525_v15, %v524_v7  ;;  %v605_v25 = vrot.slane %v604_v17, 2  ;;  %v542_v28 = vadd.f32 %v541_v20, %v540_v11  ;;  %v627_v32 = vrot.slane %v626_v23, 4  ;;  %v588_v7 = vld [vmem:[%s1009_s26] sm:$0xf] }
  0xf8   : > { %v621_v30 = vrot.slane %v620_v21, 2  ;;  %v549_v31 = vrot.slane %v548_v22, 2  ;;  %v534_v35 = vadd.f32 %v533_v26, %v532_v18  ;;  %v613_v36 = vrot.slane %v612_v27, 2 }
  0xf9   : > { %v527_v33 = vrot.slane %v526_v24, 1  ;;  %v606_v34 = vadd.f32 %v605_v25, %v604_v17  ;;  %v543_v37 = vrot.slane %v542_v28, 1  ;;  %v628_v40 = vadd.f32 %v627_v32, %v626_v23 }
  0xfa   : > { %v622_v38 = vadd.f32 %v621_v30, %v620_v21  ;;  %v550_v39 = vadd.f32 %v549_v31, %v548_v22  ;;  %v535_v43 = vrot.slane %v534_v35, 1  ;;  %v614_v44 = vadd.f32 %v613_v36, %v612_v27 }
  0xfb   : > { %v528_v41 = vadd.f32 %v527_v33, %v526_v24  ;;  %v607_v42 = vrot.slane %v606_v34, 1  ;;  %v544_v45 = vadd.f32 %v543_v37, %v542_v28  ;;  %v629_v49 = vrot.slane %v628_v40, 2 }
  0xfc   : > { %v623_v46 = vrot.slane %v622_v38, 1  ;;  %v551_v48 = vrot.slane %v550_v39, 1  ;;  %v564_v50 = vsub.s32 %v561_v47, %v563_v52  ;;  %v536_v53 = vadd.f32 %v535_v43, %v534_v35 }
  0xfd   : > { %v608_v51 = vadd.f32 %v607_v42, %v606_v34  ;;  %v615_v54 = vrot.slane %v614_v44, 1  ;;  %v630_v56 = vadd.f32 %v629_v49, %v628_v40 }
  0xfe   : > { %v552_v55 = vadd.f32 %v551_v48, %v550_v39  ;;  %v557_v57 = vcombine.low %v528_v41, %v536_v53  ;;  %v624_v59 = vadd.f32 %v623_v46, %v622_v38 }
  0xff   : > { %v616_v58 = vadd.f32 %v615_v54, %v614_v44  ;;  %v631_v61 = vrot.slane %v630_v56, 1 }
 0x100   : > { %v558_v60 = vcombine.low %v544_v45, %v552_v55  ;;  %v565_v62 = vrot.slane %v557_v57, %v564_v50 }
 0x101   : > { %v637_v63 = vcombine.low %v608_v51, %v616_v58  ;;  %v632_v1 = vadd.f32 %v631_v61, %v630_v56 }
 0x102   : > { %v572_v0 = vrot.slane %v558_v60, %v564_v50 }
 0x103   : > { %v645_v29 = vrot.slane %v637_v63, %v564_v50  ;;  %v638_v52 = vcombine.low %v624_v59, %v632_v1 }
 0x104   : > { %v573_v47 = vcombine.low %v565_v62, %v572_v0 }
 0x105   : > { %v652_v5 = vrot.slane %v638_v52, %v564_v50 }
 0x106   : > { %v580_v4 = vrot.slane %v573_v47, %v564_v50 }
 0x107   : > { %v653_v6 = vcombine.low %v645_v29, %v652_v5 }
 0x108   : > { %v582_v3 = vadd.f32 %v580_v4, %v520_v2 }
 0x109   : > { %v660_v8 = vrot.slane %v653_v6, %v564_v50 }
 0x10a   : > { %587 = vst.msk [vmem:[%s1004_s23] sm:$0xf] %vm991_vm1, %v582_v3 }
 0x10b   : > { %v662_v9 = vadd.f32 %v660_v8, %v588_v7 }
 0x10d   : > { %663 = vst.msk [vmem:[%s1009_s26] sm:$0xf] %vm991_vm1, %v662_v9 }
 0x10e PF: > { %s15_s17 = sadd.s32 1, %s910_s17   ;;  %s1074_s15 = smov %s906_s16 }
 0x10f   : > { %p12_p5 = scmp.ge.s32.totalorder %s15_s17, 4   ;;  %s1075_s16 = smov %s1077_s18 }
 0x111   :  { %14 = sbr.rel (!%p12_p5) target bundleno = 2 (0x2), region = 86 }

// kernel: feature_extractor.8
= control target key start
LH: loop header
LB: loop body
LE: loop exit
PB: predicated region body
PF: predicated region fallthrough
CT: control target
= control target key end

     0   :  { %s5212_s18 = smov 0   ;;  %s5214_s19 = smov 0   ;;  %s6755_s0 = inlined_call_operand.vmem [shape: bf16[2,24,512], index: 0, kind: input, shape index: {}, may-alias: {0,1}]   ;;  %s6756_s1 = inlined_call_operand.vmem [shape: bf16[2,24,512], index: 1, kind: input, shape index: {}, may-alias: {0,1}]   ;;  %s6757_s2 = inlined_call_operand.vmem [shape: bf16[1536,512], index: 2, kind: input, shape index: {}]   ;;  %s6758_s3 = inlined_call_operand.vmem [shape: f32[2,1,512], index: 3, kind: input, shape index: {}]   ;;  %s6759_s4 = inlined_call_operand.vmem [shape: f32[2,1,512], index: 4, kind: input, shape index: {}]   ;;  %s6760_s5 = inlined_call_operand.vmem [shape: bf16[2,24,512], index: 5, kind: output, shape index: {}]  }
   0x1   :  { %s5216_s20 = smov 0  }
   0x2 LB: > { %s27_s21 = sadd.s32 1, %s5176_s19  ;;  %p3987_p0 = scmp.ge.s32.totalorder %s5180_s20, 1  ;;  %s5180_s20 = sphi %s5216_s20, %s15_s20   ;;  %s5176_s19 = sphi %s5214_s19, %s6762_s19   ;;  %s5172_s18 = sphi %s5212_s18, %s6761_s18  }
   0x3   : > { %p29_p1 = scmp.ge.s32.totalorder %s27_s21, 2  ;;  %p259_p2 = scmp.lt.s32.totalorder %s5180_s20, 3 }
   0x5   : > { %s6764_s21 = smov (%p29_p1, %s27_s21), 0  ;;  %p260_p3 = pnand %p3987_p0, %p259_p2 }
   0x6   : > { %v4512_v0 = vld [vmem:[%s6757_s2 + $0x4] ss:$16 sps:$4 sm:$0xff] (!%p260_p3)   ;;  %p319_p4 = scmp.lt.s32.totalorder (!%p260_p3), %s5172_s18, 1  ;;  %v4514_v1 = vld [vmem:[%s6757_s2 + $0xc] ss:$16 sps:$4 sm:$0xff] (!%p260_p3)   ;;  %v448_v36 = vlaneseq (!%p260_p3)  ;;  %vm413_vm0 = vcmask (!%p260_p3), 1043456  }
   0x7   : > { %263 = sbr.rel (%p260_p3) target bundleno = 644 (0x284), region = 40  ;;  %3076 = vmatprep.subr.bf16.mxu0 (!%p260_p3), %v4512_v0  ;;  %v4516_v2 = vld [vmem:[%s6757_s2] ss:$16 sps:$4 sm:$0xff] (!%p260_p3)   ;;  %v4517_v3 = vld [vmem:[%s6757_s2 + $0x8] ss:$16 sps:$4 sm:$0xff] (!%p260_p3)   ;;  %3382 = vmatprep.subr.bf16.mxu1 (!%p260_p3), %v4514_v1  ;;  %vm751_vm2 = vcmask (!%p260_p3), 1046528  }
   0x8   : > { %v4518_v4 = vld [vmem:[%s6757_s2 + $0x24] ss:$16 sps:$4 sm:$0xff] (!%p260_p3)   ;;  %3077 = vmatpush1.bf16.msra.mxu0 (!%p260_p3), %v4516_v2  ;;  %3383 = vmatpush1.bf16.msra.mxu1 (!%p260_p3), %v4517_v3  ;;  %v4520_v5 = vld [vmem:[%s6757_s2 + $0x2c] ss:$16 sps:$4 sm:$0xff] (!%p260_p3)   ;;  %v4522_v6 = vld [vmem:[%s6757_s2 + $0x20] ss:$16 sps:$4 sm:$0xff] (!%p260_p3)  }
   0x9   : > { %3078 = vmatprep.subr.bf16.mxu0 (!%p260_p3), %v4518_v4  ;;  %v4523_v7 = vld [vmem:[%s6757_s2 + $0x28] ss:$16 sps:$4 sm:$0xff] (!%p260_p3)   ;;  %3384 = vmatprep.subr.bf16.mxu1 (!%p260_p3), %v4520_v5  ;;  %v4524_v8 = vld [vmem:[%s6757_s2 + $0x44] ss:$16 sps:$4 sm:$0xff] (!%p260_p3)   ;;  %v4526_v9 = vld [vmem:[%s6757_s2 + $0x4c] ss:$16 sps:$4 sm:$0xff] (!%p260_p3)  }
   0xa   : > { %v4528_v10 = vld [vmem:[%s6757_s2 + $0x40] ss:$16 sps:$4 sm:$0xff] (!%p260_p3)   ;;  %v4529_v11 = vld [vmem:[%s6757_s2 + $0x48] ss:$16 sps:$4 sm:$0xff] (!%p260_p3)   ;;  %v4530_v12 = vld [vmem:[%s6757_s2 + $0x64] ss:$16 sps:$4 sm:$0xff] (!%p260_p3)  }
   0xb   : > { %v4532_v13 = vld [vmem:[%s6757_s2 + $0x6c] ss:$16 sps:$4 sm:$0xff] (!%p260_p3)   ;;  %v4534_v14 = vld [vmem:[%s6757_s2 + $0x60] ss:$16 sps:$4 sm:$0xff] (!%p260_p3)   ;;  %v4535_v15 = vld [vmem:[%s6757_s2 + $0x68] ss:$16 sps:$4 sm:$0xff] (!%p260_p3)  }
   0xc   : > { %3079 = vmatpush1.bf16.msra.mxu0 (!%p260_p3), %v4522_v6  ;;  %3385 = vmatpush1.bf16.msra.mxu1 (!%p260_p3), %v4523_v7  ;;  %v4536_v16 = vld [vmem:[%s6757_s2 + $0x84] ss:$16 sps:$4 sm:$0xff] (!%p260_p3)   ;;  %v4538_v17 = vld [vmem:[%s6757_s2 + $0x8c] ss:$16 sps:$4 sm:$0xff] (!%p260_p3)   ;;  %v4540_v18 = vld [vmem:[%s6757_s2 + $0x80] ss:$16 sps:$4 sm:$0xff] (!%p260_p3)  }
   0xd   : > { %3080 = vmatprep.subr.bf16.mxu0 (!%p260_p3), %v4524_v8  ;;  %3386 = vmatprep.subr.bf16.mxu1 (!%p260_p3), %v4526_v9  ;;  %v4541_v19 = vld [vmem:[%s6757_s2 + $0x88] ss:$16 sps:$4 sm:$0xff] (!%p260_p3)   ;;  %v4542_v20 = vld [vmem:[%s6757_s2 + $0xa4] ss:$16 sps:$4 sm:$0xff] (!%p260_p3)   ;;  %v4544_v21 = vld [vmem:[%s6757_s2 + $0xac] ss:$16 sps:$4 sm:$0xff] (!%p260_p3)  }
   0xe   : > { %s6766_s18 = smov (!%p319_p4, %s5172_s18), 1  ;;  %v4546_v22 = vld [vmem:[%s6757_s2 + $0xa0] ss:$16 sps:$4 sm:$0xff]   ;;  %v4547_v23 = vld [vmem:[%s6757_s2 + $0xa8] ss:$16 sps:$4 sm:$0xff]   ;;  %v5349_v40 = vshrl.u32 %v448_v36, 7 }
   0xf   : > { %v4548_v24 = vld [vmem:[%s6757_s2 + $0xc4] ss:$16 sps:$4 sm:$0xff]   ;;  %v4550_v25 = vld [vmem:[%s6757_s2 + $0xcc] ss:$16 sps:$4 sm:$0xff]   ;;  %v4552_v26 = vld [vmem:[%s6757_s2 + $0xc0] ss:$16 sps:$4 sm:$0xff]  }
  0x10   : > { %3081 = vmatpush1.bf16.msra.mxu0 %v4528_v10  ;;  %3387 = vmatpush1.bf16.msra.mxu1 %v4529_v11  ;;  %v4553_v27 = vld [vmem:[%s6757_s2 + $0xc8] ss:$16 sps:$4 sm:$0xff]   ;;  %v4554_v28 = vld [vmem:[%s6757_s2 + $0xe4] ss:$16 sps:$4 sm:$0xff]   ;;  %v4556_v29 = vld [vmem:[%s6757_s2 + $0xec] ss:$16 sps:$4 sm:$0xff]  }
  0x11   : > { %3082 = vmatprep.subr.bf16.mxu0 %v4530_v12  ;;  %3388 = vmatprep.subr.bf16.mxu1 %v4532_v13  ;;  %v4558_v30 = vld [vmem:[%s6757_s2 + $0xe0] ss:$16 sps:$4 sm:$0xff]   ;;  %v4559_v31 = vld [vmem:[%s6757_s2 + $0xe8] ss:$16 sps:$4 sm:$0xff]   ;;  %v4560_v32 = vld [vmem:[%s6757_s2 + $0x104] ss:$16 sps:$4 sm:$0xff]  }
  0x12   : > { %v4562_v33 = vld [vmem:[%s6757_s2 + $0x10c] ss:$16 sps:$4 sm:$0xff]   ;;  %v4564_v34 = vld [vmem:[%s6757_s2 + $0x100] ss:$16 sps:$4 sm:$0xff]   ;;  %v4565_v35 = vld [vmem:[%s6757_s2 + $0x108] ss:$16 sps:$4 sm:$0xff]  }
  0x13   : > { %v4566_v37 = vld [vmem:[%s6757_s2 + $0x124] ss:$16 sps:$4 sm:$0xff]   ;;  %v4568_v38 = vld [vmem:[%s6757_s2 + $0x12c] ss:$16 sps:$4 sm:$0xff]   ;;  %v4570_v39 = vld [vmem:[%s6757_s2 + $0x120] ss:$16 sps:$4 sm:$0xff]  }
  0x14   : > { %3083 = vmatpush1.bf16.msra.mxu0 %v4534_v14  ;;  %3389 = vmatpush1.bf16.msra.mxu1 %v4535_v15  ;;  %v4571_v41 = vld [vmem:[%s6757_s2 + $0x128] ss:$16 sps:$4 sm:$0xff]   ;;  %v4572_v42 = vld [vmem:[%s6757_s2 + $0x144] ss:$16 sps:$4 sm:$0xff]   ;;  %s5358_s16 = smul.u32 48, %s6766_s18  ;;  %s3990_s23 = sshll.u32 %s6766_s18, 2 }
  0x15   : > { %3084 = vmatprep.subr.bf16.mxu0 %v4536_v16  ;;  %3390 = vmatprep.subr.bf16.mxu1 %v4538_v17  ;;  %v4574_v43 = vld [vmem:[%s6757_s2 + $0x14c] ss:$16 sps:$4 sm:$0xff]   ;;  %v4576_v44 = vld [vmem:[%s6757_s2 + $0x140] ss:$16 sps:$4 sm:$0xff]   ;;  %v4577_v45 = vld [vmem:[%s6757_s2 + $0x148] ss:$16 sps:$4 sm:$0xff]   ;;  %s349_s9 = scalar_lea.vmem %s6758_s3, %s3990_s23  ;;  %s353_s14 = scalar_lea.vmem %s6759_s4, %s3990_s23 }
  0x16   : > { %v4578_v46 = vld [vmem:[%s6757_s2 + $0x164] ss:$16 sps:$4 sm:$0xff]   ;;  %s5377_s7 = scalar_lea.vmem %s6755_s0, %s5358_s16  ;;  %v454_v47 = vsub.s32 1, %v5349_v40  ;;  %v4580_v48 = vld [vmem:[%s6757_s2 + $0x16c] ss:$16 sps:$4 sm:$0xff]   ;;  %v458_v51 = vsub.s32 2, %v5349_v40 }
  0x17   : > { %v4582_v49 = vld [vmem:[%s6757_s2 + $0x160] ss:$16 sps:$4 sm:$0xff]   ;;  %v4583_v50 = vld [vmem:[%s6757_s2 + $0x168] ss:$16 sps:$4 sm:$0xff]   ;;  %v4608_v52 = vld [vmem:[%s5377_s7 + $0x4] ss:$16 sps:$4 sm:$0xff]  }
  0x18   : > { %3085 = vmatpush1.bf16.msra.mxu0 %v4540_v18  ;;  %3391 = vmatpush1.bf16.msra.mxu1 %v4541_v19  ;;  %v5397_v53 = vld [vmem:[%s349_s9] sm:$0xf]  ;;  %v450_v56 = vsub.s32 0, %v5349_v40  ;;  %v4584_v57 = vld [vmem:[%s6757_s2 + $0x184] ss:$16 sps:$4 sm:$0xff]   ;;  %v431_v59 = vunpack.c.l.bf16 %v4608_v52  ;;  %v435_v60 = vunpack.c.h.bf16 %v4608_v52  ;;  %s4398_s15 = sadd.s32 32, %s5358_s16 }
  0x19   : > { %3086 = vmatprep.subr.bf16.mxu0 %v4542_v20  ;;  %3392 = vmatprep.subr.bf16.mxu1 %v4544_v21  ;;  %v5400_v54 = vrot.slane %v5397_v53, %v454_v47  ;;  %v5402_v55 = vld [vmem:[%s353_s14] sm:$0xf]  ;;  %v4586_v58 = vld [vmem:[%s6757_s2 + $0x18c] ss:$16 sps:$4 sm:$0xff]   ;;  %v5415_v62 = vrot.slane %v5397_v53, %v458_v51  ;;  %v4589_v4 = vld [vmem:[%s6757_s2 + $0x188] ss:$16 sps:$4 sm:$0xff]   ;;  %s5497_s27 = scalar_lea.vmem %s6756_s1, %s4398_s15  ;;  %s6731_s15 = scalar_lea.vmem %s6760_s5, %s5358_s16 }
  0x1a   : > { %v5412_v61 = vrot.slane %v5402_v55, %v454_v47  ;;  %v5418_v63 = vrot.slane %v5402_v55, %v458_v51  ;;  %v4616_v2 = vld [vmem:[%s5377_s7] ss:$16 sps:$4 sm:$0xff]   ;;  %v5430_v5 = vrot.slane %v5397_v53, %v450_v56  ;;  %v4590_v6 = vld [vmem:[%s6757_s2 + $0x1a4] ss:$16 sps:$4 sm:$0xff]   ;;  %v4592_v7 = vld [vmem:[%s6757_s2 + $0x1ac] ss:$16 sps:$4 sm:$0xff]   ;;  %v5441_v12 = vrot.slane %v5402_v55, %v450_v56 }
  0x1b   : > { %v469_v0 = vmul.f32 %v5400_v54, %v431_v59  ;;  %v473_v1 = vmul.f32 %v5400_v54, %v435_v60  ;;  %v4588_v3 = vld [vmem:[%s6757_s2 + $0x180] ss:$16 sps:$4 sm:$0xff]   ;;  %v430_v10 = vunpack.c.l.bf16 %v4616_v2  ;;  %v434_v11 = vunpack.c.h.bf16 %v4616_v2  ;;  %v4595_v16 = vld [vmem:[%s6757_s2 + $0x1a8] ss:$16 sps:$4 sm:$0xff]   ;;  %v4596_v19 = vld [vmem:[%s6757_s2 + $0x1c4] ss:$16 sps:$4 sm:$0xff]  }
  0x1c   : > { %3087 = vmatpush1.bf16.msra.mxu0 %v4546_v22  ;;  %3393 = vmatpush1.bf16.msra.mxu1 %v4547_v23  ;;  %v4594_v15 = vld [vmem:[%s6757_s2 + $0x1a0] ss:$16 sps:$4 sm:$0xff]   ;;  %v4598_v20 = vld [vmem:[%s6757_s2 + $0x1cc] ss:$16 sps:$4 sm:$0xff]   ;;  %vm674_vm1 = vsmask.f32 7424 }
  0x1d   : > { %3088 = vmatprep.subr.bf16.mxu0 %v4548_v24  ;;  %3394 = vmatprep.subr.bf16.mxu1 %v4550_v25  ;;  %v507_v8 = vadd.f32 %v5412_v61, %v469_v0  ;;  %v511_v9 = vadd.f32 %v5412_v61, %v473_v1  ;;  %v468_v17 = vmul.f32 %v5430_v5, %v430_v10  ;;  %v4600_v23 = vld [vmem:[%s6757_s2 + $0x1c0] ss:$16 sps:$4 sm:$0xff]  }
  0x1e   : > { %v472_v18 = vmul.f32 %v5430_v5, %v434_v11  ;;  %v4613_v11 = vld [vmem:[%s6757_s2 + $0x208] ss:$16 sps:$4 sm:$0xff]  }
  0x1f   : > { %v539_v13 = vmul.f32 %v507_v8, %v507_v8  ;;  %v543_v14 = vmul.f32 %v511_v9, %v511_v9  ;;  %v506_v24 = vadd.f32 %v5441_v12, %v468_v17  ;;  %v527_v52 = vmul.f32 0.5, %v511_v9  ;;  %v369_v17 = vld [vmem:[%s5377_s7 + $0x20] sm:$0xff] }
  0x20   : > { %3089 = vmatpush1.bf16.msra.mxu0 %v4552_v26  ;;  %3395 = vmatpush1.bf16.msra.mxu1 %v4553_v27  ;;  %v510_v25 = vadd.f32 %v5441_v12, %v472_v18  ;;  %v4601_v26 = vld [vmem:[%s6757_s2 + $0x1c8] ss:$16 sps:$4 sm:$0xff]   ;;  %v371_v18 = vld [vmem:[%s5497_s27] sm:$0xff] }
  0x21   : > { %3090 = vmatprep.subr.bf16.mxu0 %v4554_v28  ;;  %3396 = vmatprep.subr.bf16.mxu1 %v4556_v29  ;;  %v555_v21 = vmul.f32 %v539_v13, %v507_v8  ;;  %v559_v22 = vmul.f32 %v543_v14, %v511_v9  ;;  %v4602_v29 = vld [vmem:[%s6757_s2 + $0x1e4] ss:$16 sps:$4 sm:$0xff]   ;;  %v522_v0 = vmul.f32 0.5, %v506_v24 }
  0x22   : > { %v526_v2 = vmul.f32 0.5, %v510_v25  ;;  %v4619_v14 = vld [vmem:[%s6757_s2 + $0x224] ss:$16 sps:$4 sm:$0xff]  }
  0x23   : > { %v571_v27 = vmul.f32 0.044715, %v555_v21  ;;  %v575_v28 = vmul.f32 0.044715, %v559_v22  ;;  %v3998_v21 = vcombine.high %v369_v17, %v369_v17  ;;  %v4002_v22 = vcombine.high %v371_v18, %v371_v18 }
  0x24   : > { %3091 = vmatpush1.bf16.msra.mxu0 %v4558_v30  ;;  %3397 = vmatpush1.bf16.msra.mxu1 %v4559_v31  ;;  %v538_v30 = vmul.f32 %v506_v24, %v506_v24  ;;  %v542_v31 = vmul.f32 %v510_v25, %v510_v25 }
  0x25   : > { %3092 = vmatprep.subr.bf16.mxu0 %v4560_v32  ;;  %3398 = vmatprep.subr.bf16.mxu1 %v4562_v33  ;;  %v4604_v32 = vld [vmem:[%s6757_s2 + $0x1ec] ss:$16 sps:$4 sm:$0xff]   ;;  %v587_v33 = vadd.f32 %v571_v27, %v507_v8  ;;  %v462_v27 = vsub.s32 3, %v5349_v40 }
  0x26   : > { %v554_v36 = vmul.f32 %v538_v30, %v506_v24  ;;  %v4634_v40 = vld [vmem:[%s6757_s2 + $0x26c] ss:$16 sps:$4 sm:$0xff]  }
  0x28   : > { %3093 = vmatpush1.bf16.msra.mxu0 %v4564_v34  ;;  %3399 = vmatpush1.bf16.msra.mxu1 %v4565_v35  ;;  %v591_v34 = vadd.f32 %v575_v28, %v511_v9  ;;  %v4606_v35 = vld [vmem:[%s6757_s2 + $0x1e0] ss:$16 sps:$4 sm:$0xff]  }
  0x29   : > { %3094 = vmatprep.subr.bf16.mxu0 %v4566_v37  ;;  %3400 = vmatprep.subr.bf16.mxu1 %v4568_v38  ;;  %v558_v37 = vmul.f32 %v542_v31, %v510_v25  ;;  %v603_v38 = vmul.f32 0.7978846, %v587_v33  ;;  %v4610_v9 = vld [vmem:[%s6757_s2 + $0x200] ss:$16 sps:$4 sm:$0xff]   ;;  %v4631_v33 = vld [vmem:[%s6757_s2 + $0x264] ss:$16 sps:$4 sm:$0xff]  }
  0x2a   : > { %v4623_v28 = vld [vmem:[%s6757_s2 + $0x240] ss:$16 sps:$4 sm:$0xff]  }
  0x2b   : > { %5102 = vtanh.f32 %v603_v38  ;;  %v4711_v38 = vld [vmem:[%s5377_s7 + $0xc] ss:$16 sps:$4 sm:$0xff]  }
  0x2c   : > { %3095 = vmatpush1.bf16.msra.mxu0 %v4570_v39  ;;  %3401 = vmatpush1.bf16.msra.mxu1 %v4571_v41  ;;  %v607_v39 = vmul.f32 0.7978846, %v591_v34  ;;  %v4607_v41 = vld [vmem:[%s6757_s2 + $0x1e8] ss:$16 sps:$4 sm:$0xff]  }
  0x2d   : > { %3096 = vmatprep.subr.bf16.mxu0 %v4572_v42  ;;  %3402 = vmatprep.subr.bf16.mxu1 %v4574_v43  ;;  %v570_v42 = vmul.f32 0.044715, %v554_v36  ;;  %v574_v43 = vmul.f32 0.044715, %v558_v37 }
  0x2e   : > { %5104 = vtanh.f32 %v607_v39 }
  0x2f   : > { %v590_v47 = vadd.f32 %v574_v43, %v510_v25  ;;  %v4001_v25 = vcombine.low %v371_v18, %v371_v18  ;;  %v4629_v43 = vld [vmem:[%s6757_s2 + $0x260] ss:$16 sps:$4 sm:$0xff]  }
  0x30   : > { %3097 = vmatpush1.bf16.msra.mxu0 %v4576_v44  ;;  %3403 = vmatpush1.bf16.msra.mxu1 %v4577_v45  ;;  %v4612_v44 = vld [vmem:[%s6757_s2 + $0x204] ss:$16 sps:$4 sm:$0xff]   ;;  %v4615_v45 = vld [vmem:[%s6757_s2 + $0x20c] ss:$16 sps:$4 sm:$0xff]  }
  0x31   : > { %3098 = vmatprep.subr.bf16.mxu0 %v4578_v46  ;;  %3404 = vmatprep.subr.bf16.mxu1 %v4580_v48  ;;  %v586_v46 = vadd.f32 %v570_v42, %v506_v24  ;;  %v4628_v24 = vld [vmem:[%s6757_s2 + $0x24c] ss:$16 sps:$4 sm:$0xff]   ;;  %v5544_v42 = vrot.slane %v5397_v53, %v462_v27  ;;  %v4637_v53 = vld [vmem:[%s6757_s2 + $0x284] ss:$16 sps:$4 sm:$0xff]  }
  0x33   : > { %v602_v48 = vmul.f32 0.7978846, %v586_v46  ;;  %v437_v46 = vunpack.c.h.bf16 %v4711_v38 }
  0x34   : > { %3099 = vmatpush1.bf16.msra.mxu0 %v4582_v49  ;;  %3405 = vmatpush1.bf16.msra.mxu1 %v4583_v50  ;;  %v606_v49 = vmul.f32 0.7978846, %v590_v47  ;;  %v523_v50 = vmul.f32 0.5, %v507_v8 }
  0x35   : > { %3100 = vmatprep.subr.bf16.mxu0 %v4584_v57  ;;  %3406 = vmatprep.subr.bf16.mxu1 %v4586_v58  ;;  %5106 = vtanh.f32 %v602_v48  ;;  %v5103_v51 = vpop.eup %5102 }
  0x36   : > { %5108 = vtanh.f32 %v606_v49  ;;  %v635_v57 = vadd.f32 1.0, %v5103_v51  ;;  %v4640_v49 = vld [vmem:[%s6757_s2 + $0x28c] ss:$16 sps:$4 sm:$0xff]  }
  0x38   : > { %3101 = vmatpush1.bf16.msra.mxu0 %v4588_v3  ;;  %3407 = vmatpush1.bf16.msra.mxu1 %v4589_v4  ;;  %v5105_v56 = vpop.eup %5104  ;;  %v651_v59 = vmul.f32 %v635_v57, %v523_v50  ;;  %v4635_v57 = vld [vmem:[%s6757_s2 + $0x280] ss:$16 sps:$4 sm:$0xff]  }
  0x39   : > { %3102 = vmatprep.subr.bf16.mxu0 %v4590_v6  ;;  %3408 = vmatprep.subr.bf16.mxu1 %v4592_v7  ;;  %v639_v58 = vadd.f32 1.0, %v5105_v56 }
  0x3b   : > { %v655_v60 = vmul.f32 %v639_v58, %v527_v52  ;;  %v5576_v52 = vrot.slane %v5402_v55, %v462_v27  ;;  %v4638_v58 = vld [vmem:[%s6757_s2 + $0x288] ss:$16 sps:$4 sm:$0xff]  }
  0x3c   : > { %3103 = vmatpush1.bf16.msra.mxu0 %v4594_v15  ;;  %3409 = vmatpush1.bf16.msra.mxu1 %v4595_v16  ;;  %v4622_v15 = vld [vmem:[%s6757_s2 + $0x22c] ss:$16 sps:$4 sm:$0xff]   ;;  %v4617_v16 = vld [vmem:[%s6757_s2 + $0x220] ss:$16 sps:$4 sm:$0xff]  }
  0x3d   : > { %3104 = vmatprep.subr.bf16.mxu0 %v4596_v19  ;;  %3410 = vmatprep.subr.bf16.mxu1 %v4598_v20  ;;  %v5483_v4 = vpack.c.bf16 %v655_v60, %v651_v59  ;;  %v4620_v19 = vld [vmem:[%s6757_s2 + $0x228] ss:$16 sps:$4 sm:$0xff]   ;;  %v4625_v20 = vld [vmem:[%s6757_s2 + $0x244] ss:$16 sps:$4 sm:$0xff]  }
  0x3f   : > { %v5107_v1 = vpop.eup %5106  ;;  %3108 = vmatprep.mubr.bf16.mxu0 %v5483_v4  ;;  %3414 = vmatprep.mubr.bf16.mxu1 %v5483_v4 }
  0x40   : > { %3105 = vmatpush1.bf16.msra.mxu0 %v4600_v23  ;;  %3411 = vmatpush1.bf16.msra.mxu1 %v4601_v26  ;;  %v5109_v3 = vpop.eup %5108  ;;  %v634_v6 = vadd.f32 1.0, %v5107_v1  ;;  %v3997_v23 = vcombine.low %v369_v17, %v369_v17  ;;  %v420_v26 = vsel %vm413_vm0, %v3998_v21, %v4002_v22  ;;  %v4643_v1 = vld [vmem:[%s6757_s2 + $0x2a4] ss:$16 sps:$4 sm:$0xff]  }
  0x41   : > { %3106 = vmatprep.subr.bf16.mxu0 %v4602_v29  ;;  %3412 = vmatprep.subr.bf16.mxu1 %v4604_v32  ;;  %v638_v7 = vadd.f32 1.0, %v5109_v3  ;;  %v4626_v29 = vld [vmem:[%s6757_s2 + $0x248] ss:$16 sps:$4 sm:$0xff]   ;;  %v439_v30 = vunpack.c.l.bf16 %v420_v26  ;;  %v443_v31 = vunpack.c.h.bf16 %v420_v26 }
  0x42   : > { %v650_v8 = vmul.f32 %v634_v6, %v522_v0  ;;  %v416_v32 = vsel %vm413_vm0, %v3997_v23, %v4001_v25  ;;  %v475_v0 = vmul.f32 %v5544_v42, %v437_v46  ;;  %v4649_v23 = vld [vmem:[%s6757_s2 + $0x2c4] ss:$16 sps:$4 sm:$0xff]  }
  0x43   : > { %v654_v10 = vmul.f32 %v638_v7, %v526_v2  ;;  %v438_v34 = vunpack.c.l.bf16 %v416_v32  ;;  %v477_v36 = vmul.f32 %v5400_v54, %v439_v30  ;;  %v481_v37 = vmul.f32 %v5400_v54, %v443_v31  ;;  %v4646_v2 = vld [vmem:[%s6757_s2 + $0x2ac] ss:$16 sps:$4 sm:$0xff]  }
  0x44   : > { %3107 = vmatpush1.bf16.msra.mxu0 %v4606_v35  ;;  %3413 = vmatpush1.bf16.msra.mxu1 %v4607_v41  ;;  %v442_v35 = vunpack.c.h.bf16 %v416_v32  ;;  %v433_v54 = vunpack.c.l.bf16 %v4711_v38 }
  0x45   : > { %3127 = vmatprep.subr.bf16.mxu0 %v4612_v44  ;;  %3433 = vmatprep.subr.bf16.mxu1 %v4615_v45  ;;  %v5499_v13 = vpack.c.bf16 %v654_v10, %v650_v8  ;;  %v476_v39 = vmul.f32 %v5430_v5, %v438_v34  ;;  %v5550_v44 = vadd.f32 %v5412_v61, %v477_v36  ;;  %v4650_v36 = vld [vmem:[%s6757_s2 + $0x2c8] ss:$16 sps:$4 sm:$0xff]  }
  0x46   : > { %v480_v41 = vmul.f32 %v5430_v5, %v442_v35  ;;  %v5553_v45 = vadd.f32 %v5412_v61, %v481_v37  ;;  %v4632_v5 = vld [vmem:[%s6757_s2 + $0x268] ss:$16 sps:$4 sm:$0xff]   ;;  %v471_v55 = vmul.f32 %v5544_v42, %v433_v54  ;;  %v4647_v35 = vld [vmem:[%s6757_s2 + $0x2c0] ss:$16 sps:$4 sm:$0xff]   ;;  %v4658_v54 = vld [vmem:[%s6757_s2 + $0x2ec] ss:$16 sps:$4 sm:$0xff]  }
  0x47   : > { %3109 = vmatmul.mubr.bf16.vlgmr.msra.gmra.mrb[0].mxu0 %v5499_v13  ;;  %3415 = vmatmul.mubr.bf16.vlgmr.msra.gmra.mrb[0].mxu1 %v5499_v13  ;;  %v5562_v47 = vadd.f32 %v5441_v12, %v476_v39  ;;  %v4719_v61 = vld [vmem:[%s5377_s7 + $0x8] ss:$16 sps:$4 sm:$0xff]   ;;  %v547_v50 = vmul.f32 %v5550_v44, %v5550_v44  ;;  %v4655_v39 = vld [vmem:[%s6757_s2 + $0x2e4] ss:$16 sps:$4 sm:$0xff]  }
  0x48   : > { %3128 = vmatpush1.bf16.msra.mxu0 %v4610_v9  ;;  %3434 = vmatpush1.bf16.msra.mxu1 %v4613_v11  ;;  %v5565_v48 = vadd.f32 %v5441_v12, %v480_v41  ;;  %v551_v51 = vmul.f32 %v5553_v45, %v5553_v45  ;;  %v432_v7 = vunpack.c.l.bf16 %v4719_v61  ;;  %v436_v8 = vunpack.c.h.bf16 %v4719_v61 }
  0x49   : > { %3129 = vmatprep.subr.bf16.mxu0 %v4619_v14  ;;  %3435 = vmatprep.subr.bf16.mxu1 %v4622_v15  ;;  %v546_v12 = vmul.f32 %v5562_v47, %v5562_v47  ;;  %v563_v59 = vmul.f32 %v547_v50, %v5550_v44  ;;  %v5601_v11 = vadd.f32 %v5576_v52, %v471_v55  ;;  %v4641_v15 = vld [vmem:[%s6757_s2 + $0x2a0] ss:$16 sps:$4 sm:$0xff]   ;;  %v4656_v50 = vld [vmem:[%s6757_s2 + $0x2e8] ss:$16 sps:$4 sm:$0xff]  }
  0x4a   : > { %v550_v56 = vmul.f32 %v5565_v48, %v5565_v48  ;;  %v567_v60 = vmul.f32 %v551_v51, %v5553_v45  ;;  %v5604_v14 = vadd.f32 %v5576_v52, %v475_v0  ;;  %v470_v18 = vmul.f32 %v5415_v62, %v432_v7  ;;  %v4659_v0 = vld [vmem:[%s6757_s2 + $0x300] ss:$16 sps:$4 sm:$0xff]  }
  0x4b   : > { %v562_v3 = vmul.f32 %v546_v12, %v5562_v47  ;;  %v579_v9 = vmul.f32 0.044715, %v563_v59  ;;  %v541_v27 = vmul.f32 %v5601_v11, %v5601_v11  ;;  %v4664_v59 = vld [vmem:[%s6757_s2 + $0x30c] ss:$16 sps:$4 sm:$0xff]  }
  0x4c   : > { %3130 = vmatpush1.bf16.msra.mxu0 %v4617_v16  ;;  %3436 = vmatpush1.bf16.msra.mxu1 %v4620_v19  ;;  %v566_v6 = vmul.f32 %v550_v56, %v5565_v48  ;;  %v583_v10 = vmul.f32 0.044715, %v567_v60  ;;  %v474_v19 = vmul.f32 %v5415_v62, %v436_v8  ;;  %v545_v30 = vmul.f32 %v5604_v14, %v5604_v14  ;;  %v4661_v56 = vld [vmem:[%s6757_s2 + $0x304] ss:$16 sps:$4 sm:$0xff]  }
  0x4d   : > { %3131 = vmatprep.subr.bf16.mxu0 %v4625_v20  ;;  %3437 = vmatprep.subr.bf16.mxu1 %v4628_v24  ;;  %v578_v16 = vmul.f32 0.044715, %v562_v3  ;;  %v4644_v20 = vld [vmem:[%s6757_s2 + $0x2a8] ss:$16 sps:$4 sm:$0xff]   ;;  %v595_v21 = vadd.f32 %v579_v9, %v5550_v44  ;;  %v4652_v24 = vld [vmem:[%s6757_s2 + $0x2cc] ss:$16 sps:$4 sm:$0xff]   ;;  %v5629_v31 = vadd.f32 %v5418_v63, %v470_v18 }
  0x4e   : > { %v582_v17 = vmul.f32 0.044715, %v566_v6  ;;  %v599_v22 = vadd.f32 %v583_v10, %v5553_v45  ;;  %v5633_v34 = vadd.f32 %v5418_v63, %v474_v19  ;;  %v561_v37 = vmul.f32 %v545_v30, %v5604_v14  ;;  %v4667_v9 = vld [vmem:[%s6757_s2 + $0x324] ss:$16 sps:$4 sm:$0xff]   ;;  %v4670_v10 = vld [vmem:[%s6757_s2 + $0x32c] ss:$16 sps:$4 sm:$0xff]  }
  0x4f   : > { %v594_v25 = vadd.f32 %v578_v16, %v5562_v47  ;;  %v540_v38 = vmul.f32 %v5629_v31, %v5629_v31  ;;  %v531_v6 = vmul.f32 0.5, %v5550_v44  ;;  %v4665_v44 = vld [vmem:[%s6757_s2 + $0x320] ss:$16 sps:$4 sm:$0xff]   ;;  %v530_v18 = vmul.f32 0.5, %v5562_v47  ;;  %v4676_v47 = vld [vmem:[%s6757_s2 + $0x34c] ss:$16 sps:$4 sm:$0xff]  }
  0x50   : > { %3132 = vmatpush1.bf16.msra.mxu0 %v4623_v28  ;;  %3438 = vmatpush1.bf16.msra.mxu1 %v4626_v29  ;;  %v598_v26 = vadd.f32 %v582_v17, %v5565_v48  ;;  %v611_v28 = vmul.f32 0.7978846, %v595_v21  ;;  %v615_v29 = vmul.f32 0.7978846, %v599_v22  ;;  %v577_v46 = vmul.f32 0.044715, %v561_v37 }
  0x51   : > { %3133 = vmatprep.subr.bf16.mxu0 %v4631_v33  ;;  %3439 = vmatprep.subr.bf16.mxu1 %v4634_v40  ;;  %v610_v32 = vmul.f32 0.7978846, %v594_v25  ;;  %v557_v40 = vmul.f32 %v541_v27, %v5601_v11  ;;  %v534_v22 = vmul.f32 0.5, %v5565_v48  ;;  %v4671_v48 = vld [vmem:[%s6757_s2 + $0x340] ss:$16 sps:$4 sm:$0xff]  }
  0x52   : > { %v614_v33 = vmul.f32 0.7978846, %v598_v26  ;;  %5110 = vtanh.f32 %v611_v28  ;;  %v593_v51 = vadd.f32 %v577_v46, %v5604_v14  ;;  %v4680_v46 = vld [vmem:[%s6757_s2 + $0x368] ss:$16 sps:$4 sm:$0xff]  }
  0x53   : > { %5112 = vtanh.f32 %v615_v29  ;;  %v573_v41 = vmul.f32 0.044715, %v557_v40  ;;  %v4674_v29 = vld [vmem:[%s6757_s2 + $0x348] ss:$16 sps:$4 sm:$0xff]  }
  0x54   : > { %3134 = vmatpush1.bf16.msra.mxu0 %v4629_v43  ;;  %3440 = vmatpush1.bf16.msra.mxu1 %v4632_v5  ;;  %v544_v43 = vmul.f32 %v5633_v34, %v5633_v34  ;;  %5114 = vtanh.f32 %v610_v32  ;;  %v556_v5 = vmul.f32 %v540_v38, %v5629_v31  ;;  %v609_v60 = vmul.f32 0.7978846, %v593_v51  ;;  %v4682_v38 = vld [vmem:[%s6757_s2 + $0x36c] ss:$16 sps:$4 sm:$0xff]  }
  0x55   : > { %3135 = vmatprep.subr.bf16.mxu0 %v4637_v53  ;;  %3441 = vmatprep.subr.bf16.mxu1 %v4640_v49  ;;  %v4653_v53 = vld [vmem:[%s6757_s2 + $0x2e0] ss:$16 sps:$4 sm:$0xff]   ;;  %5116 = vtanh.f32 %v614_v33  ;;  %v589_v61 = vadd.f32 %v573_v41, %v5601_v11  ;;  %v525_v33 = vmul.f32 0.5, %v5601_v11  ;;  %v4688_v51 = vld [vmem:[%s6757_s2 + $0x38c] ss:$16 sps:$4 sm:$0xff]  }
  0x56   : > { %v560_v49 = vmul.f32 %v544_v43, %v5633_v34  ;;  %v572_v12 = vmul.f32 0.044715, %v556_v5  ;;  %v524_v43 = vmul.f32 0.5, %v5629_v31 }
  0x58   : > { %3136 = vmatpush1.bf16.msra.mxu0 %v4635_v57  ;;  %3442 = vmatpush1.bf16.msra.mxu1 %v4638_v58  ;;  %v605_v57 = vmul.f32 0.7978846, %v589_v61  ;;  %v576_v58 = vmul.f32 0.044715, %v560_v49  ;;  %v588_v55 = vadd.f32 %v572_v12, %v5629_v31  ;;  %v4685_v31 = vld [vmem:[%s6757_s2 + $0x384] ss:$16 sps:$4 sm:$0xff]  }
  0x59   : > { %3137 = vmatprep.subr.bf16.mxu0 %v4643_v1  ;;  %3443 = vmatprep.subr.bf16.mxu1 %v4646_v2  ;;  %v4662_v2 = vld [vmem:[%s6757_s2 + $0x308] ss:$16 sps:$4 sm:$0xff]  }
  0x5a   : > { %5118 = vtanh.f32 %v605_v57  ;;  %v592_v1 = vadd.f32 %v576_v58, %v5633_v34  ;;  %v604_v3 = vmul.f32 0.7978846, %v588_v55  ;;  %v4683_v57 = vld [vmem:[%s6757_s2 + $0x380] ss:$16 sps:$4 sm:$0xff]   ;;  %v4686_v58 = vld [vmem:[%s6757_s2 + $0x388] ss:$16 sps:$4 sm:$0xff]  }
  0x5b   : > { %5120 = vtanh.f32 %v609_v60  ;;  %v4691_v60 = vld [vmem:[%s6757_s2 + $0x3a4] ss:$16 sps:$4 sm:$0xff]   ;;  %v4694_v55 = vld [vmem:[%s6757_s2 + $0x3ac] ss:$16 sps:$4 sm:$0xff]  }
  0x5c   : > { %3138 = vmatpush1.bf16.msra.mxu0 %v4641_v15  ;;  %3444 = vmatpush1.bf16.msra.mxu1 %v4644_v20  ;;  %v608_v7 = vmul.f32 0.7978846, %v592_v1  ;;  %v5111_v8 = vpop.eup %5110  ;;  %v535_v15 = vmul.f32 0.5, %v5553_v45  ;;  %5122 = vtanh.f32 %v604_v3  ;;  %v4668_v20 = vld [vmem:[%s6757_s2 + $0x328] ss:$16 sps:$4 sm:$0xff]  }
  0x5d   : > { %3139 = vmatprep.subr.bf16.mxu0 %v4649_v23  ;;  %3445 = vmatprep.subr.bf16.mxu1 %v4652_v24  ;;  %v5113_v16 = vpop.eup %5112  ;;  %v643_v17 = vadd.f32 1.0, %v5111_v8  ;;  %v4673_v45 = vld [vmem:[%s6757_s2 + $0x344] ss:$16 sps:$4 sm:$0xff]   ;;  %v370_v1 = vld [vmem:[%s5377_s7 + $0x28] sm:$0xff] }
  0x5e   : > { %5124 = vtanh.f32 %v608_v7  ;;  %v5115_v19 = vpop.eup %5114  ;;  %v647_v21 = vadd.f32 1.0, %v5113_v16  ;;  %v4000_v3 = vcombine.high %v370_v1, %v370_v1  ;;  %v4689_v7 = vld [vmem:[%s6757_s2 + $0x3a0] ss:$16 sps:$4 sm:$0xff]   ;;  %v4692_v8 = vld [vmem:[%s6757_s2 + $0x3a8] ss:$16 sps:$4 sm:$0xff]  }
  0x5f   : > { %v5117_v23 = vpop.eup %5116  ;;  %v659_v24 = vmul.f32 %v643_v17, %v531_v6  ;;  %v642_v25 = vadd.f32 1.0, %v5115_v19  ;;  %v3999_v6 = vcombine.low %v370_v1, %v370_v1  ;;  %v4702_v16 = vld [vmem:[%s6757_s2 + $0x3cc] ss:$16 sps:$4 sm:$0xff]  }
  0x60   : > { %3140 = vmatpush1.bf16.msra.mxu0 %v4647_v35  ;;  %3446 = vmatpush1.bf16.msra.mxu1 %v4650_v36  ;;  %v663_v26 = vmul.f32 %v647_v21, %v535_v15  ;;  %v646_v27 = vadd.f32 1.0, %v5117_v23  ;;  %v4679_v35 = vld [vmem:[%s6757_s2 + $0x364] ss:$16 sps:$4 sm:$0xff]   ;;  %v529_v36 = vmul.f32 0.5, %v5604_v14  ;;  %v4677_v14 = vld [vmem:[%s6757_s2 + $0x360] ss:$16 sps:$4 sm:$0xff]  }
  0x61   : > { %3141 = vmatprep.subr.bf16.mxu0 %v4655_v39  ;;  %3447 = vmatprep.subr.bf16.mxu1 %v4658_v54  ;;  %v658_v28 = vmul.f32 %v642_v25, %v530_v18  ;;  %v4699_v15 = vld [vmem:[%s6757_s2 + $0x3c4] ss:$16 sps:$4 sm:$0xff]   ;;  %v4700_v23 = vld [vmem:[%s6757_s2 + $0x3c8] ss:$16 sps:$4 sm:$0xff]  }
  0x62   : > { %v5704_v30 = vpack.c.bf16 %v663_v26, %v659_v24  ;;  %v662_v32 = vmul.f32 %v646_v27, %v534_v22  ;;  %v4697_v22 = vld [vmem:[%s6757_s2 + $0x3c0] ss:$16 sps:$4 sm:$0xff]   ;;  %v4710_v24 = vld [vmem:[%s6757_s2 + $0x3ec] ss:$16 sps:$4 sm:$0xff]  }
  0x64   : > { %3142 = vmatpush1.bf16.msra.mxu0 %v4653_v53  ;;  %3448 = vmatpush1.bf16.msra.mxu1 %v4656_v50  ;;  %v5119_v40 = vpop.eup %5118  ;;  %v5714_v39 = vpack.c.bf16 %v662_v32, %v658_v28  ;;  %v528_v53 = vmul.f32 0.5, %v5633_v34  ;;  %v4705_v28 = vld [vmem:[%s6757_s2 + $0x3e0] ss:$16 sps:$4 sm:$0xff]  }
  0x65   : > { %3143 = vmatprep.subr.bf16.mxu0 %v4661_v56  ;;  %3449 = vmatprep.subr.bf16.mxu1 %v4664_v59  ;;  %v5121_v37 = vpop.eup %5120  ;;  %v637_v41 = vadd.f32 1.0, %v5119_v40 }
  0x66   : > { %3118 = vmatprep.mubr.bf16.mxu0 %v5704_v30  ;;  %3424 = vmatprep.mubr.bf16.mxu1 %v5704_v30  ;;  %v641_v11 = vadd.f32 1.0, %v5121_v37  ;;  %v5123_v54 = vpop.eup %5122 }
  0x67   : > { %3119 = vmatmul.mubr.bf16.gmra.mrb[4].mxu0 %v5714_v39  ;;  %3425 = vmatmul.mubr.bf16.gmra.mrb[4].mxu1 %v5714_v39  ;;  %v653_v5 = vmul.f32 %v637_v41, %v525_v33  ;;  %v636_v50 = vadd.f32 1.0, %v5123_v54  ;;  %v4725_v54 = vld [vmem:[%s6757_s2 + $0x42c] ss:$16 sps:$4 sm:$0xff]  }
  0x68   : > { %3144 = vmatpush1.bf16.msra.mxu0 %v4659_v0  ;;  %3450 = vmatpush1.bf16.msra.mxu1 %v4662_v2  ;;  %v5125_v61 = vpop.eup %5124  ;;  %v657_v49 = vmul.f32 %v641_v11, %v529_v36  ;;  %v372_v2 = vld [vmem:[%s5497_s27 + $0x8] sm:$0xff] }
  0x69   : > { %3145 = vmatprep.subr.bf16.mxu0 %v4667_v9  ;;  %3451 = vmatprep.subr.bf16.mxu1 %v4670_v10  ;;  %v640_v12 = vadd.f32 1.0, %v5125_v61  ;;  %v652_v34 = vmul.f32 %v636_v50, %v524_v43  ;;  %v4004_v9 = vcombine.high %v372_v2, %v372_v2  ;;  %v4003_v10 = vcombine.low %v372_v2, %v372_v2  ;;  %v4722_v43 = vld [vmem:[%s6757_s2 + $0x424] ss:$16 sps:$4 sm:$0xff]   ;;  %v4723_v50 = vld [vmem:[%s6757_s2 + $0x428] ss:$16 sps:$4 sm:$0xff]  }
  0x6a   : > { %v5734_v56 = vpack.c.bf16 %v657_v49, %v653_v5  ;;  %v4720_v49 = vld [vmem:[%s6757_s2 + $0x420] ss:$16 sps:$4 sm:$0xff]  }
  0x6b   : > { %v656_v59 = vmul.f32 %v640_v12, %v528_v53  ;;  %v424_v17 = vsel %vm413_vm0, %v3999_v6, %v4003_v10  ;;  %v4729_v6 = vld [vmem:[%s6757_s2 + $0x448] ss:$16 sps:$4 sm:$0xff]  }
  0x6c   : > { %3146 = vmatpush1.bf16.msra.mxu0 %v4665_v44  ;;  %3452 = vmatpush1.bf16.msra.mxu1 %v4668_v20  ;;  %v428_v44 = vsel %vm413_vm0, %v4000_v3, %v4004_v9  ;;  %v440_v20 = vunpack.c.l.bf16 %v424_v17  ;;  %v444_v21 = vunpack.c.h.bf16 %v424_v17  ;;  %v4726_v3 = vld [vmem:[%s6757_s2 + $0x440] ss:$16 sps:$4 sm:$0xff]   ;;  %v4735_v10 = vld [vmem:[%s6757_s2 + $0x468] ss:$16 sps:$4 sm:$0xff]   ;;  %v690_v17 = vshll.u32 %v5483_v4, 16 }
  0x6d   : > { %3147 = vmatprep.subr.bf16.mxu0 %v4673_v45  ;;  %3453 = vmatprep.subr.bf16.mxu1 %v4676_v47  ;;  %v5748_v0 = vpack.c.bf16 %v656_v59, %v652_v34  ;;  %v441_v18 = vunpack.c.l.bf16 %v428_v44  ;;  %v445_v19 = vunpack.c.h.bf16 %v428_v44  ;;  %v4707_v45 = vld [vmem:[%s6757_s2 + $0x3e4] ss:$16 sps:$4 sm:$0xff]   ;;  %v4731_v59 = vld [vmem:[%s6757_s2 + $0x44c] ss:$16 sps:$4 sm:$0xff]   ;;  %v4732_v9 = vld [vmem:[%s6757_s2 + $0x460] ss:$16 sps:$4 sm:$0xff]  }
  0x6e   : > { %3159 = vmatprep.mubr.bf16.mxu0 %v5734_v56  ;;  %3465 = vmatprep.mubr.bf16.mxu1 %v5734_v56  ;;  %v478_v26 = vmul.f32 %v5415_v62, %v440_v20  ;;  %v482_v27 = vmul.f32 %v5415_v62, %v444_v21  ;;  %v4715_v62 = vld [vmem:[%s6757_s2 + $0x404] ss:$16 sps:$4 sm:$0xff]   ;;  %v4738_v44 = vld [vmem:[%s6757_s2 + $0x480] ss:$16 sps:$4 sm:$0xff]  }
  0x6f   : > { %v479_v25 = vmul.f32 %v5544_v42, %v441_v18  ;;  %v483_v47 = vmul.f32 %v5544_v42, %v445_v19  ;;  %v4708_v42 = vld [vmem:[%s6757_s2 + $0x3e8] ss:$16 sps:$4 sm:$0xff]   ;;  %v4728_v34 = vld [vmem:[%s6757_s2 + $0x444] ss:$16 sps:$4 sm:$0xff]  }
  0x70   : > { %3148 = vmatpush1.bf16.msra.mxu0 %v4671_v48  ;;  %3454 = vmatpush1.bf16.msra.mxu1 %v4674_v29  ;;  %v5794_v32 = vadd.f32 %v5418_v63, %v478_v26  ;;  %v5803_v33 = vadd.f32 %v5418_v63, %v482_v27  ;;  %v4713_v63 = vld [vmem:[%s6757_s2 + $0x400] ss:$16 sps:$4 sm:$0xff]   ;;  %v4741_v18 = vld [vmem:[%s6757_s2 + $0x488] ss:$16 sps:$4 sm:$0xff]   ;;  %v4746_v21 = vld [vmem:[%s6757_s2 + $0x4a4] ss:$16 sps:$4 sm:$0xff]  }
  0x71   : > { %3149 = vmatprep.subr.bf16.mxu0 %v4679_v35  ;;  %3455 = vmatprep.subr.bf16.mxu1 %v4682_v38  ;;  %v5788_v48 = vadd.f32 %v5576_v52, %v479_v25  ;;  %v5791_v29 = vadd.f32 %v5576_v52, %v483_v47  ;;  %v4718_v52 = vld [vmem:[%s6757_s2 + $0x40c] ss:$16 sps:$4 sm:$0xff]   ;;  %v4716_v38 = vld [vmem:[%s6757_s2 + $0x408] ss:$16 sps:$4 sm:$0xff]   ;;  %v688_v26 = vshrl.u32 %v5483_v4, 16 }
  0x72   : > { %v548_v36 = vmul.f32 %v5794_v32, %v5794_v32  ;;  %v552_v37 = vmul.f32 %v5803_v33, %v5803_v33  ;;  %v532_v47 = vmul.f32 0.5, %v5794_v32 }
  0x73   : > { %v549_v40 = vmul.f32 %v5788_v48, %v5788_v48  ;;  %v553_v35 = vmul.f32 %v5791_v29, %v5791_v29  ;;  %v533_v19 = vmul.f32 0.5, %v5788_v48 }
  0x74   : > { %3150 = vmatpush1.bf16.msra.mxu0 %v4677_v14  ;;  %3456 = vmatpush1.bf16.msra.mxu1 %v4680_v46  ;;  %v564_v14 = vmul.f32 %v548_v36, %v5794_v32  ;;  %v568_v46 = vmul.f32 %v552_v37, %v5803_v33 }
  0x75   : > { %3151 = vmatprep.subr.bf16.mxu0 %v4685_v31  ;;  %3457 = vmatprep.subr.bf16.mxu1 %v4688_v51  ;;  %v565_v41 = vmul.f32 %v549_v40, %v5788_v48  ;;  %v569_v11 = vmul.f32 %v553_v35, %v5791_v29 }
  0x76   : > { %v580_v61 = vmul.f32 0.044715, %v564_v14  ;;  %v584_v31 = vmul.f32 0.044715, %v568_v46  ;;  %v4753_v14 = vld [vmem:[%s6757_s2 + $0x4c8] ss:$16 sps:$4 sm:$0xff]  }
  0x77   : > { %v581_v5 = vmul.f32 0.044715, %v565_v41  ;;  %v585_v53 = vmul.f32 0.044715, %v569_v11  ;;  %v4758_v46 = vld [vmem:[%s6757_s2 + $0x4e4] ss:$16 sps:$4 sm:$0xff]  }
  0x78   : > { %3152 = vmatpush1.bf16.msra.mxu0 %v4683_v57  ;;  %3458 = vmatpush1.bf16.msra.mxu1 %v4686_v58  ;;  %v596_v57 = vadd.f32 %v580_v61, %v5794_v32  ;;  %v600_v58 = vadd.f32 %v584_v31, %v5803_v33  ;;  %v4752_v32 = vld [vmem:[%s6757_s2 + $0x4c4] ss:$16 sps:$4 sm:$0xff]   ;;  %v4756_v61 = vld [vmem:[%s6757_s2 + $0x4e0] ss:$16 sps:$4 sm:$0xff]  }
  0x79   : > { %3153 = vmatprep.subr.bf16.mxu0 %v4691_v60  ;;  %3459 = vmatprep.subr.bf16.mxu1 %v4694_v55  ;;  %v597_v51 = vadd.f32 %v581_v5, %v5788_v48  ;;  %v601_v12 = vadd.f32 %v585_v53, %v5791_v29  ;;  %v536_v48 = vmul.f32 0.5, %v5803_v33  ;;  %v4755_v33 = vld [vmem:[%s6757_s2 + $0x4cc] ss:$16 sps:$4 sm:$0xff]  }
  0x7a   : > { %v612_v1 = vmul.f32 0.7978846, %v596_v57  ;;  %v616_v2 = vmul.f32 0.7978846, %v600_v58  ;;  %v4761_v5 = vld [vmem:[%s6757_s2 + $0x4ec] ss:$16 sps:$4 sm:$0xff]  }
  0x7b   : > { %v613_v60 = vmul.f32 0.7978846, %v597_v51  ;;  %v617_v55 = vmul.f32 0.7978846, %v601_v12  ;;  %v4767_v51 = vld [vmem:[%s6757_s2 + $0x50c] ss:$16 sps:$4 sm:$0xff]  }
  0x7c   : > { %3154 = vmatpush1.bf16.msra.mxu0 %v4689_v7  ;;  %3460 = vmatpush1.bf16.msra.mxu1 %v4692_v8  ;;  %v4734_v7 = vld [vmem:[%s6757_s2 + $0x464] ss:$16 sps:$4 sm:$0xff]   ;;  %v4737_v8 = vld [vmem:[%s6757_s2 + $0x46c] ss:$16 sps:$4 sm:$0xff]   ;;  %v4762_v12 = vld [vmem:[%s6757_s2 + $0x500] ss:$16 sps:$4 sm:$0xff]  }
  0x7d   : > { %3155 = vmatprep.subr.bf16.mxu0 %v4699_v15  ;;  %3461 = vmatprep.subr.bf16.mxu1 %v4702_v16  ;;  %5126 = vtanh.f32 %v613_v60  ;;  %v4740_v15 = vld [vmem:[%s6757_s2 + $0x484] ss:$16 sps:$4 sm:$0xff]   ;;  %v4743_v16 = vld [vmem:[%s6757_s2 + $0x48c] ss:$16 sps:$4 sm:$0xff]   ;;  %v4771_v60 = vld [vmem:[%s6757_s2 + $0x528] ss:$16 sps:$4 sm:$0xff]  }
  0x7e   : > { %5128 = vtanh.f32 %v617_v55  ;;  %v4770_v57 = vld [vmem:[%s6757_s2 + $0x524] ss:$16 sps:$4 sm:$0xff]   ;;  %v4773_v58 = vld [vmem:[%s6757_s2 + $0x52c] ss:$16 sps:$4 sm:$0xff]  }
  0x7f   : > { %5130 = vtanh.f32 %v612_v1  ;;  %v4776_v55 = vld [vmem:[%s6757_s2 + $0x544] ss:$16 sps:$4 sm:$0xff]   ;;  %v4779_v1 = vld [vmem:[%s6757_s2 + $0x54c] ss:$16 sps:$4 sm:$0xff]  }
  0x80   : > { %3156 = vmatpush1.bf16.msra.mxu0 %v4697_v22  ;;  %3462 = vmatpush1.bf16.msra.mxu1 %v4700_v23  ;;  %5132 = vtanh.f32 %v616_v2  ;;  %v4749_v22 = vld [vmem:[%s6757_s2 + $0x4ac] ss:$16 sps:$4 sm:$0xff]   ;;  %v537_v23 = vmul.f32 0.5, %v5791_v29  ;;  %v4747_v29 = vld [vmem:[%s6757_s2 + $0x4a8] ss:$16 sps:$4 sm:$0xff]  }
  0x81   : > { %3157 = vmatprep.subr.bf16.mxu0 %v4707_v45  ;;  %3463 = vmatprep.subr.bf16.mxu1 %v4710_v24  ;;  %v4744_v24 = vld [vmem:[%s6757_s2 + $0x4a0] ss:$16 sps:$4 sm:$0xff]  }
  0x82   : > { %v4774_v2 = vld [vmem:[%s6757_s2 + $0x540] ss:$16 sps:$4 sm:$0xff]  }
  0x84   : > { %3158 = vmatpush1.bf16.msra.mxu0 %v4705_v28  ;;  %3464 = vmatpush1.bf16.msra.mxu1 %v4708_v42  ;;  %v692_v42 = vrot.slane %v690_v17, 1  ;;  %v4794_v17 = vld [vmem:[%s6757_s2 + $0x5a4] ss:$16 sps:$4 sm:$0xff]  }
  0x85   : > { %3178 = vmatprep.subr.bf16.mxu0 %v4715_v62  ;;  %3484 = vmatprep.subr.bf16.mxu1 %v4718_v52  ;;  %v695_v62 = vshll.u32 %v5704_v30, 16 }
  0x87   : > { %3160 = vmatmul.mubr.bf16.vlgmr.msra.gmra.mrb[0].mxu0 %v5748_v0  ;;  %3466 = vmatmul.mubr.bf16.vlgmr.msra.gmra.mrb[0].mxu1 %v5748_v0  ;;  %v5127_v20 = vpop.eup %5126 }
  0x88   : > { %3179 = vmatpush1.bf16.msra.mxu0 %v4713_v63  ;;  %3485 = vmatpush1.bf16.msra.mxu1 %v4716_v38  ;;  %v5129_v45 = vpop.eup %5128  ;;  %v645_v25 = vadd.f32 1.0, %v5127_v20  ;;  %v4750_v38 = vld [vmem:[%s6757_s2 + $0x4c0] ss:$16 sps:$4 sm:$0xff]   ;;  %v4795_v20 = vld [vmem:[%s6757_s2 + $0x5a8] ss:$16 sps:$4 sm:$0xff]  }
  0x89   : > { %3180 = vmatprep.subr.bf16.mxu0 %v4722_v43  ;;  %3486 = vmatprep.subr.bf16.mxu1 %v4725_v54  ;;  %v5131_v27 = vpop.eup %5130  ;;  %v649_v28 = vadd.f32 1.0, %v5129_v45  ;;  %v693_v43 = vor.u32 %v692_v42, %v688_v26  ;;  %v5910_v54 = vrot.slane %v695_v62, 1  ;;  %v4800_v45 = vld [vmem:[%s6757_s2 + $0x5c0] ss:$16 sps:$4 sm:$0xff]   ;;  %v683_v26 = vshll.u32 %v5714_v39, 16 }
  0x8a   : > { %v5133_v52 = vpop.eup %5132  ;;  %v661_v40 = vmul.f32 %v645_v25, %v533_v19  ;;  %v644_v35 = vadd.f32 1.0, %v5131_v27  ;;  %v4792_v19 = vld [vmem:[%s6757_s2 + $0x5a0] ss:$16 sps:$4 sm:$0xff]   ;;  %v4803_v25 = vld [vmem:[%s6757_s2 + $0x5c8] ss:$16 sps:$4 sm:$0xff]  }
  0x8b   : > { %v665_v36 = vmul.f32 %v649_v28, %v537_v23  ;;  %v648_v37 = vadd.f32 1.0, %v5133_v52  ;;  %v698_v31 = vsel %vm674_vm1, %v693_v43, %v5910_v54  ;;  %v4805_v23 = vld [vmem:[%s6757_s2 + $0x5cc] ss:$16 sps:$4 sm:$0xff]   ;;  %v4810_v27 = vld [vmem:[%s6757_s2 + $0x5e4] ss:$16 sps:$4 sm:$0xff]   ;;  %v685_v52 = vrot.slane %v683_v26, 1 }
  0x8c   : > { %3181 = vmatpush1.bf16.msra.mxu0 %v4720_v49  ;;  %3487 = vmatpush1.bf16.msra.mxu1 %v4723_v50  ;;  %v660_v63 = vmul.f32 %v644_v35, %v532_v47  ;;  %v4759_v49 = vld [vmem:[%s6757_s2 + $0x4e8] ss:$16 sps:$4 sm:$0xff]   ;;  %v4764_v50 = vld [vmem:[%s6757_s2 + $0x504] ss:$16 sps:$4 sm:$0xff]   ;;  %v4813_v28 = vld [vmem:[%s6757_s2 + $0x5ec] ss:$16 sps:$4 sm:$0xff]  }
  0x8d   : > { %3182 = vmatprep.subr.bf16.mxu0 %v4728_v34  ;;  %3488 = vmatprep.subr.bf16.mxu1 %v4731_v59  ;;  %v5908_v41 = vpack.c.bf16 %v665_v36, %v661_v40  ;;  %v664_v11 = vmul.f32 %v648_v37, %v536_v48  ;;  %v4765_v34 = vld [vmem:[%s6757_s2 + $0x508] ss:$16 sps:$4 sm:$0xff]   ;;  %v4768_v59 = vld [vmem:[%s6757_s2 + $0x520] ss:$16 sps:$4 sm:$0xff]   ;;  %v4819_v40 = vld [vmem:[%s6757_s2 + $0x60c] ss:$16 sps:$4 sm:$0xff]  }
  0x8e   : > { %v4808_v48 = vld [vmem:[%s6757_s2 + $0x5e0] ss:$16 sps:$4 sm:$0xff]   ;;  %v4811_v42 = vld [vmem:[%s6757_s2 + $0x5e8] ss:$16 sps:$4 sm:$0xff]   ;;  %v726_v35 = vshrl.u32 %v5704_v30, 16 }
  0x8f   : > { %v5921_v53 = vpack.c.bf16 %v664_v11, %v660_v63  ;;  %3169 = vmatprep.mubr.bf16.mxu0 %v5908_v41  ;;  %3475 = vmatprep.mubr.bf16.mxu1 %v5908_v41  ;;  %v4817_v36 = vld [vmem:[%s6757_s2 + $0x608] ss:$16 sps:$4 sm:$0xff]   ;;  %v4822_v63 = vld [vmem:[%s6757_s2 + $0x624] ss:$16 sps:$4 sm:$0xff]   ;;  %v4820_v11 = vld [vmem:[%s6757_s2 + $0x620] ss:$16 sps:$4 sm:$0xff]  }
  0x90   : > { %3183 = vmatpush1.bf16.msra.mxu0 %v4726_v3  ;;  %3489 = vmatpush1.bf16.msra.mxu1 %v4729_v6  ;;  %v4777_v3 = vld [vmem:[%s6757_s2 + $0x548] ss:$16 sps:$4 sm:$0xff]   ;;  %v4782_v6 = vld [vmem:[%s6757_s2 + $0x564] ss:$16 sps:$4 sm:$0xff]   ;;  %v728_v43 = vor.u32 %v726_v35, %v5910_v54  ;;  %v4873_v26 = vld [vmem:[%s6757_s2 + $0x72c] ss:$16 sps:$4 sm:$0xff]  }
  0x91   : > { %3184 = vmatprep.subr.bf16.mxu0 %v4734_v7  ;;  %3490 = vmatprep.subr.bf16.mxu1 %v4737_v8  ;;  %v4785_v7 = vld [vmem:[%s6757_s2 + $0x56c] ss:$16 sps:$4 sm:$0xff]   ;;  %v4780_v8 = vld [vmem:[%s6757_s2 + $0x560] ss:$16 sps:$4 sm:$0xff]   ;;  %v4828_v54 = vld [vmem:[%s6757_s2 + $0x644] ss:$16 sps:$4 sm:$0xff]  }
  0x92   : > { %3170 = vmatmul.mubr.bf16.gmra.mrb[4].mxu0 %v5921_v53  ;;  %3476 = vmatmul.mubr.bf16.gmra.mrb[4].mxu1 %v5921_v53  ;;  %v4880_v35 = vld [vmem:[%s6757_s2 + $0x760] ss:$16 sps:$4 sm:$0xff]  }
  0x93   : > { %3210 = vmatprep.mubr.bf16.mxu0 %v698_v31  ;;  %3516 = vmatprep.mubr.bf16.mxu1 %v698_v31  ;;  %v4823_v31 = vld [vmem:[%s6757_s2 + $0x628] ss:$16 sps:$4 sm:$0xff]  }
  0x94   : > { %3185 = vmatpush1.bf16.msra.mxu0 %v4732_v9  ;;  %3491 = vmatpush1.bf16.msra.mxu1 %v4735_v10  ;;  %v4783_v9 = vld [vmem:[%s6757_s2 + $0x568] ss:$16 sps:$4 sm:$0xff]   ;;  %v4788_v10 = vld [vmem:[%s6757_s2 + $0x584] ss:$16 sps:$4 sm:$0xff]  }
  0x95   : > { %3186 = vmatprep.subr.bf16.mxu0 %v4740_v15  ;;  %3492 = vmatprep.subr.bf16.mxu1 %v4743_v16  ;;  %v4791_v15 = vld [vmem:[%s6757_s2 + $0x58c] ss:$16 sps:$4 sm:$0xff]   ;;  %v4786_v16 = vld [vmem:[%s6757_s2 + $0x580] ss:$16 sps:$4 sm:$0xff]  }
  0x98   : > { %3187 = vmatpush1.bf16.msra.mxu0 %v4738_v44  ;;  %3493 = vmatpush1.bf16.msra.mxu1 %v4741_v18  ;;  %v4789_v44 = vld [vmem:[%s6757_s2 + $0x588] ss:$16 sps:$4 sm:$0xff]   ;;  %v4797_v18 = vld [vmem:[%s6757_s2 + $0x5ac] ss:$16 sps:$4 sm:$0xff]  }
  0x99   : > { %3188 = vmatprep.subr.bf16.mxu0 %v4746_v21  ;;  %3494 = vmatprep.subr.bf16.mxu1 %v4749_v22  ;;  %v678_v21 = vshll.u32 %v5499_v13, 16  ;;  %v4802_v22 = vld [vmem:[%s6757_s2 + $0x5c4] ss:$16 sps:$4 sm:$0xff]  }
  0x9b   : > { %v680_v47 = vrot.slane %v678_v21, 1  ;;  %v4856_v21 = vld [vmem:[%s6757_s2 + $0x6e0] ss:$16 sps:$4 sm:$0xff]  }
  0x9c   : > { %3189 = vmatpush1.bf16.msra.mxu0 %v4744_v24  ;;  %3495 = vmatpush1.bf16.msra.mxu1 %v4747_v29  ;;  %v676_v24 = vshrl.u32 %v5499_v13, 16  ;;  %v4816_v29 = vld [vmem:[%s6757_s2 + $0x604] ss:$16 sps:$4 sm:$0xff]  }
  0x9d   : > { %3190 = vmatprep.subr.bf16.mxu0 %v4752_v32  ;;  %3496 = vmatprep.subr.bf16.mxu1 %v4755_v33  ;;  %v4814_v32 = vld [vmem:[%s6757_s2 + $0x600] ss:$16 sps:$4 sm:$0xff]   ;;  %v714_v33 = vshll.u32 %v5734_v56, 16 }
  0x9e   : > { %v681_v62 = vor.u32 %v680_v47, %v676_v24  ;;  %v4862_v24 = vld [vmem:[%s6757_s2 + $0x700] ss:$16 sps:$4 sm:$0xff]   ;;  %v4870_v47 = vld [vmem:[%s6757_s2 + $0x724] ss:$16 sps:$4 sm:$0xff]  }
  0xa0   : > { %3191 = vmatpush1.bf16.msra.mxu0 %v4750_v38  ;;  %3497 = vmatpush1.bf16.msra.mxu1 %v4753_v14  ;;  %v686_v37 = vsel %vm674_vm1, %v681_v62, %v685_v52  ;;  %v4825_v38 = vld [vmem:[%s6757_s2 + $0x62c] ss:$16 sps:$4 sm:$0xff]   ;;  %v723_v14 = vshrl.u32 %v5714_v39, 16  ;;  %v4874_v62 = vld [vmem:[%s6757_s2 + $0x740] ss:$16 sps:$4 sm:$0xff]  }
  0xa1   : > { %3192 = vmatprep.subr.bf16.mxu0 %v4758_v46  ;;  %3498 = vmatprep.subr.bf16.mxu1 %v4761_v5  ;;  %v712_v46 = vshrl.u32 %v5734_v56, 16  ;;  %v716_v5 = vrot.slane %v714_v33, 1  ;;  %v4888_v33 = vld [vmem:[%s6757_s2 + $0x784] ss:$16 sps:$4 sm:$0xff]  }
  0xa4   : > { %3193 = vmatpush1.bf16.msra.mxu0 %v4756_v61  ;;  %3499 = vmatpush1.bf16.msra.mxu1 %v4759_v49  ;;  %v719_v61 = vshll.u32 %v5908_v41, 16  ;;  %v4831_v49 = vld [vmem:[%s6757_s2 + $0x64c] ss:$16 sps:$4 sm:$0xff]  }
  0xa5   : > { %3194 = vmatprep.subr.bf16.mxu0 %v4764_v50  ;;  %3500 = vmatprep.subr.bf16.mxu1 %v4767_v51  ;;  %v4826_v50 = vld [vmem:[%s6757_s2 + $0x640] ss:$16 sps:$4 sm:$0xff]   ;;  %v725_v51 = vor.u32 %v723_v14, %v685_v52  ;;  %v4877_v52 = vld [vmem:[%s6757_s2 + $0x748] ss:$16 sps:$4 sm:$0xff]  }
  0xa6   : > { %v4892_v14 = vld [vmem:[%s6757_s2 + $0x7a0] ss:$16 sps:$4 sm:$0xff]  }
  0xa8   : > { %3195 = vmatpush1.bf16.msra.mxu0 %v4762_v12  ;;  %3501 = vmatpush1.bf16.msra.mxu1 %v4765_v34  ;;  %v717_v12 = vor.u32 %v716_v5, %v712_v46  ;;  %v6074_v34 = vrot.slane %v719_v61, 1  ;;  %v4895_v46 = vld [vmem:[%s6757_s2 + $0x7a8] ss:$16 sps:$4 sm:$0xff]   ;;  %v4900_v5 = vld [vmem:[%s6757_s2 + $0x7c4] ss:$16 sps:$4 sm:$0xff]  }
  0xa9   : > { %3196 = vmatprep.subr.bf16.mxu0 %v4770_v57  ;;  %3502 = vmatprep.subr.bf16.mxu1 %v4773_v58  ;;  %v4829_v57 = vld [vmem:[%s6757_s2 + $0x648] ss:$16 sps:$4 sm:$0xff]   ;;  %v4834_v58 = vld [vmem:[%s6757_s2 + $0x664] ss:$16 sps:$4 sm:$0xff]   ;;  %v4903_v61 = vld [vmem:[%s6757_s2 + $0x7cc] ss:$16 sps:$4 sm:$0xff]  }
  0xac   : > { %3197 = vmatpush1.bf16.msra.mxu0 %v4768_v59  ;;  %3503 = vmatpush1.bf16.msra.mxu1 %v4771_v60  ;;  %v4837_v59 = vld [vmem:[%s6757_s2 + $0x66c] ss:$16 sps:$4 sm:$0xff]   ;;  %v4832_v60 = vld [vmem:[%s6757_s2 + $0x660] ss:$16 sps:$4 sm:$0xff]  }
  0xad   : > { %3198 = vmatprep.subr.bf16.mxu0 %v4776_v55  ;;  %3504 = vmatprep.subr.bf16.mxu1 %v4779_v1  ;;  %v722_v55 = vsel %vm674_vm1, %v717_v12, %v6074_v34  ;;  %v4835_v1 = vld [vmem:[%s6757_s2 + $0x668] ss:$16 sps:$4 sm:$0xff]   ;;  %v4906_v12 = vld [vmem:[%s6757_s2 + $0x7e4] ss:$16 sps:$4 sm:$0xff]  }
  0xb0   : > { %3199 = vmatpush1.bf16.msra.mxu0 %v4774_v2  ;;  %3505 = vmatpush1.bf16.msra.mxu1 %v4777_v3  ;;  %v4840_v2 = vld [vmem:[%s6757_s2 + $0x684] ss:$16 sps:$4 sm:$0xff]   ;;  %v4843_v3 = vld [vmem:[%s6757_s2 + $0x68c] ss:$16 sps:$4 sm:$0xff]  }
  0xb1   : > { %3200 = vmatprep.subr.bf16.mxu0 %v4782_v6  ;;  %3506 = vmatprep.subr.bf16.mxu1 %v4785_v7  ;;  %v4838_v6 = vld [vmem:[%s6757_s2 + $0x680] ss:$16 sps:$4 sm:$0xff]   ;;  %v4841_v7 = vld [vmem:[%s6757_s2 + $0x688] ss:$16 sps:$4 sm:$0xff]  }
  0xb4   : > { %3201 = vmatpush1.bf16.msra.mxu0 %v4780_v8  ;;  %3507 = vmatpush1.bf16.msra.mxu1 %v4783_v9  ;;  %v4846_v8 = vld [vmem:[%s6757_s2 + $0x6a4] ss:$16 sps:$4 sm:$0xff]   ;;  %v4849_v9 = vld [vmem:[%s6757_s2 + $0x6ac] ss:$16 sps:$4 sm:$0xff]  }
  0xb5   : > { %3202 = vmatprep.subr.bf16.mxu0 %v4788_v10  ;;  %3508 = vmatprep.subr.bf16.mxu1 %v4791_v15  ;;  %v4844_v10 = vld [vmem:[%s6757_s2 + $0x6a0] ss:$16 sps:$4 sm:$0xff]   ;;  %v4847_v15 = vld [vmem:[%s6757_s2 + $0x6a8] ss:$16 sps:$4 sm:$0xff]  }
  0xb8   : > { %3203 = vmatpush1.bf16.msra.mxu0 %v4786_v16  ;;  %3509 = vmatpush1.bf16.msra.mxu1 %v4789_v44  ;;  %v4852_v16 = vld [vmem:[%s6757_s2 + $0x6c4] ss:$16 sps:$4 sm:$0xff]   ;;  %v4855_v44 = vld [vmem:[%s6757_s2 + $0x6cc] ss:$16 sps:$4 sm:$0xff]  }
  0xb9   : > { %3204 = vmatprep.subr.bf16.mxu0 %v4794_v17  ;;  %3510 = vmatprep.subr.bf16.mxu1 %v4797_v18  ;;  %v4850_v17 = vld [vmem:[%s6757_s2 + $0x6c0] ss:$16 sps:$4 sm:$0xff]   ;;  %v4853_v18 = vld [vmem:[%s6757_s2 + $0x6c8] ss:$16 sps:$4 sm:$0xff]  }
  0xbc   : > { %3205 = vmatpush1.bf16.msra.mxu0 %v4792_v19  ;;  %3511 = vmatpush1.bf16.msra.mxu1 %v4795_v20  ;;  %v4858_v19 = vld [vmem:[%s6757_s2 + $0x6e4] ss:$16 sps:$4 sm:$0xff]   ;;  %v4861_v20 = vld [vmem:[%s6757_s2 + $0x6ec] ss:$16 sps:$4 sm:$0xff]  }
  0xbd   : > { %3206 = vmatprep.subr.bf16.mxu0 %v4802_v22  ;;  %3512 = vmatprep.subr.bf16.mxu1 %v4805_v23  ;;  %v4859_v22 = vld [vmem:[%s6757_s2 + $0x6e8] ss:$16 sps:$4 sm:$0xff]   ;;  %v4864_v23 = vld [vmem:[%s6757_s2 + $0x704] ss:$16 sps:$4 sm:$0xff]  }
  0xc0   : > { %3207 = vmatpush1.bf16.msra.mxu0 %v4800_v45  ;;  %3513 = vmatpush1.bf16.msra.mxu1 %v4803_v25  ;;  %v4867_v45 = vld [vmem:[%s6757_s2 + $0x70c] ss:$16 sps:$4 sm:$0xff]   ;;  %v4865_v25 = vld [vmem:[%s6757_s2 + $0x708] ss:$16 sps:$4 sm:$0xff]  }
  0xc1   : > { %3208 = vmatprep.subr.bf16.mxu0 %v4810_v27  ;;  %3514 = vmatprep.subr.bf16.mxu1 %v4813_v28  ;;  %v4868_v27 = vld [vmem:[%s6757_s2 + $0x720] ss:$16 sps:$4 sm:$0xff]   ;;  %v4871_v28 = vld [vmem:[%s6757_s2 + $0x728] ss:$16 sps:$4 sm:$0xff]  }
  0xc4   : > { %3209 = vmatpush1.bf16.msra.mxu0 %v4808_v48  ;;  %3515 = vmatpush1.bf16.msra.mxu1 %v4811_v42  ;;  %v4876_v48 = vld [vmem:[%s6757_s2 + $0x744] ss:$16 sps:$4 sm:$0xff]   ;;  %v4879_v42 = vld [vmem:[%s6757_s2 + $0x74c] ss:$16 sps:$4 sm:$0xff]  }
  0xc5   : > { %3229 = vmatprep.subr.bf16.mxu0 %v4816_v29  ;;  %3535 = vmatprep.subr.bf16.mxu1 %v4819_v40  ;;  %v4882_v29 = vld [vmem:[%s6757_s2 + $0x764] ss:$16 sps:$4 sm:$0xff]   ;;  %v4885_v40 = vld [vmem:[%s6757_s2 + $0x76c] ss:$16 sps:$4 sm:$0xff]  }
  0xc7   : > { %3211 = vmatmul.mubr.bf16.vlgmr.msra.gmra.mrb[0].mxu0 %v686_v37  ;;  %3517 = vmatmul.mubr.bf16.vlgmr.msra.gmra.mrb[0].mxu1 %v686_v37  ;;  %v4886_v37 = vld [vmem:[%s6757_s2 + $0x780] ss:$16 sps:$4 sm:$0xff]  }
  0xc8   : > { %3230 = vmatpush1.bf16.msra.mxu0 %v4814_v32  ;;  %3536 = vmatpush1.bf16.msra.mxu1 %v4817_v36  ;;  %v4883_v32 = vld [vmem:[%s6757_s2 + $0x768] ss:$16 sps:$4 sm:$0xff]   ;;  %v4891_v36 = vld [vmem:[%s6757_s2 + $0x78c] ss:$16 sps:$4 sm:$0xff]  }
  0xc9   : > { %3231 = vmatprep.subr.bf16.mxu0 %v4822_v63  ;;  %3537 = vmatprep.subr.bf16.mxu1 %v4825_v38  ;;  %v4889_v63 = vld [vmem:[%s6757_s2 + $0x788] ss:$16 sps:$4 sm:$0xff]   ;;  %v4894_v38 = vld [vmem:[%s6757_s2 + $0x7a4] ss:$16 sps:$4 sm:$0xff]  }
  0xca   : > { %3220 = vmatprep.mubr.bf16.mxu0 %v728_v43  ;;  %3526 = vmatprep.mubr.bf16.mxu1 %v728_v43  ;;  %v702_v43 = vshll.u32 %v5748_v0, 16 }
  0xcc   : > { %3232 = vmatpush1.bf16.msra.mxu0 %v4820_v11  ;;  %3538 = vmatpush1.bf16.msra.mxu1 %v4823_v31  ;;  %v4897_v11 = vld [vmem:[%s6757_s2 + $0x7ac] ss:$16 sps:$4 sm:$0xff]   ;;  %v700_v31 = vshrl.u32 %v5748_v0, 16 }
  0xcd   : > { %3233 = vmatprep.subr.bf16.mxu0 %v4828_v54  ;;  %3539 = vmatprep.subr.bf16.mxu1 %v4831_v49  ;;  %v704_v54 = vrot.slane %v702_v43, 1  ;;  %v4898_v49 = vld [vmem:[%s6757_s2 + $0x7c0] ss:$16 sps:$4 sm:$0xff]  }
  0xce   : > { %v4958_v43 = vld [vmem:[%s6757_s2 + $0x900] ss:$16 sps:$4 sm:$0xff]  }
  0xcf   : > { %3221 = vmatmul.mubr.bf16.gmra.mrb[4].mxu0 %v725_v51  ;;  %3527 = vmatmul.mubr.bf16.gmra.mrb[4].mxu1 %v725_v51  ;;  %v707_v51 = vshll.u32 %v5921_v53, 16 }
  0xd0   : > { %3234 = vmatpush1.bf16.msra.mxu0 %v4826_v50  ;;  %3540 = vmatpush1.bf16.msra.mxu1 %v4829_v57  ;;  %v4901_v50 = vld [vmem:[%s6757_s2 + $0x7c8] ss:$16 sps:$4 sm:$0xff]   ;;  %v4909_v57 = vld [vmem:[%s6757_s2 + $0x7ec] ss:$16 sps:$4 sm:$0xff]  }
  0xd1   : > { %3235 = vmatprep.subr.bf16.mxu0 %v4834_v58  ;;  %3541 = vmatprep.subr.bf16.mxu1 %v4837_v59  ;;  %v4904_v58 = vld [vmem:[%s6757_s2 + $0x7e0] ss:$16 sps:$4 sm:$0xff]   ;;  %v4907_v59 = vld [vmem:[%s6757_s2 + $0x7e8] ss:$16 sps:$4 sm:$0xff]  }
  0xd2   : > { %3261 = vmatprep.mubr.bf16.mxu0 %v722_v55  ;;  %3567 = vmatprep.mubr.bf16.mxu1 %v722_v55  ;;  %v709_v55 = vrot.slane %v707_v51, 1  ;;  %v4973_v51 = vld [vmem:[%s6757_s2 + $0x948] ss:$16 sps:$4 sm:$0xff]  }
  0xd4   : > { %3236 = vmatpush1.bf16.msra.mxu0 %v4832_v60  ;;  %3542 = vmatpush1.bf16.msra.mxu1 %v4835_v1  ;;  %v705_v60 = vor.u32 %v704_v54, %v700_v31  ;;  %v4912_v1 = vld [vmem:[%s6757_s2 + $0x804] ss:$16 sps:$4 sm:$0xff]   ;;  %v4967_v31 = vld [vmem:[%s6757_s2 + $0x928] ss:$16 sps:$4 sm:$0xff]  }
  0xd5   : > { %3237 = vmatprep.subr.bf16.mxu0 %v4840_v2  ;;  %3543 = vmatprep.subr.bf16.mxu1 %v4843_v3  ;;  %v4915_v2 = vld [vmem:[%s6757_s2 + $0x80c] ss:$16 sps:$4 sm:$0xff]   ;;  %v732_v3 = vshrl.u32 %v5908_v41, 16  ;;  %v4972_v54 = vld [vmem:[%s6757_s2 + $0x944] ss:$16 sps:$4 sm:$0xff]  }
  0xd8   : > { %3238 = vmatpush1.bf16.msra.mxu0 %v4838_v6  ;;  %3544 = vmatpush1.bf16.msra.mxu1 %v4841_v7  ;;  %v4910_v6 = vld [vmem:[%s6757_s2 + $0x800] ss:$16 sps:$4 sm:$0xff]   ;;  %v4913_v7 = vld [vmem:[%s6757_s2 + $0x808] ss:$16 sps:$4 sm:$0xff]  }
  0xd9   : > { %3239 = vmatprep.subr.bf16.mxu0 %v4846_v8  ;;  %3545 = vmatprep.subr.bf16.mxu1 %v4849_v9  ;;  %v710_v8 = vsel %vm674_vm1, %v705_v60, %v709_v55  ;;  %v4918_v9 = vld [vmem:[%s6757_s2 + $0x824] ss:$16 sps:$4 sm:$0xff]  }
  0xda   : > { %v4984_v60 = vld [vmem:[%s6757_s2 + $0x984] ss:$16 sps:$4 sm:$0xff]  }
  0xdc   : > { %3240 = vmatpush1.bf16.msra.mxu0 %v4844_v10  ;;  %3546 = vmatpush1.bf16.msra.mxu1 %v4847_v15  ;;  %v4921_v10 = vld [vmem:[%s6757_s2 + $0x82c] ss:$16 sps:$4 sm:$0xff]   ;;  %v734_v15 = vor.u32 %v732_v3, %v6074_v34  ;;  %v4924_v34 = vld [vmem:[%s6757_s2 + $0x844] ss:$16 sps:$4 sm:$0xff]  }
  0xdd   : > { %3241 = vmatprep.subr.bf16.mxu0 %v4852_v16  ;;  %3547 = vmatprep.subr.bf16.mxu1 %v4855_v44  ;;  %v729_v16 = vshrl.u32 %v5921_v53, 16  ;;  %v4916_v44 = vld [vmem:[%s6757_s2 + $0x820] ss:$16 sps:$4 sm:$0xff]   ;;  %v4990_v3 = vld [vmem:[%s6757_s2 + $0x9a4] ss:$16 sps:$4 sm:$0xff]  }
  0xe0   : > { %3242 = vmatpush1.bf16.msra.mxu0 %v4850_v17  ;;  %3548 = vmatpush1.bf16.msra.mxu1 %v4853_v18  ;;  %v4919_v17 = vld [vmem:[%s6757_s2 + $0x828] ss:$16 sps:$4 sm:$0xff]   ;;  %v4927_v18 = vld [vmem:[%s6757_s2 + $0x84c] ss:$16 sps:$4 sm:$0xff]  }
  0xe1   : > { %3243 = vmatprep.subr.bf16.mxu0 %v4858_v19  ;;  %3549 = vmatprep.subr.bf16.mxu1 %v4861_v20  ;;  %v731_v19 = vor.u32 %v729_v16, %v709_v55  ;;  %v755_v20 = vrot.slane %v5483_v4, 1  ;;  %v4930_v4 = vld [vmem:[%s6757_s2 + $0x864] ss:$16 sps:$4 sm:$0xff]   ;;  %v4987_v55 = vld [vmem:[%s6757_s2 + $0x98c] ss:$16 sps:$4 sm:$0xff]  }
  0xe2   : > { %v4997_v16 = vld [vmem:[%s6757_s2 + $0x9c8] ss:$16 sps:$4 sm:$0xff]  }
  0xe4   : > { %3244 = vmatpush1.bf16.msra.mxu0 %v4856_v21  ;;  %3550 = vmatpush1.bf16.msra.mxu1 %v4859_v22  ;;  %v6276_v21 = vrot.slane %v5704_v30, 1  ;;  %v4922_v22 = vld [vmem:[%s6757_s2 + $0x840] ss:$16 sps:$4 sm:$0xff]   ;;  %v4933_v30 = vld [vmem:[%s6757_s2 + $0x86c] ss:$16 sps:$4 sm:$0xff]  }
  0xe5   : > { %3245 = vmatprep.subr.bf16.mxu0 %v4864_v23  ;;  %3551 = vmatprep.subr.bf16.mxu1 %v4867_v45  ;;  %v4925_v23 = vld [vmem:[%s6757_s2 + $0x848] ss:$16 sps:$4 sm:$0xff]  }
  0xe6   : > { %v757_v45 = vsel %vm751_vm2, %v755_v20, %v6276_v21  ;;  %v753_v20 = vrot.slane %v5714_v39, 1 }
  0xe8   : > { %3246 = vmatpush1.bf16.msra.mxu0 %v4862_v24  ;;  %3552 = vmatpush1.bf16.msra.mxu1 %v4865_v25  ;;  %v4928_v24 = vld [vmem:[%s6757_s2 + $0x860] ss:$16 sps:$4 sm:$0xff]   ;;  %v4931_v25 = vld [vmem:[%s6757_s2 + $0x868] ss:$16 sps:$4 sm:$0xff]  }
  0xe9   : > { %3247 = vmatprep.subr.bf16.mxu0 %v4870_v47  ;;  %3553 = vmatprep.subr.bf16.mxu1 %v4873_v26  ;;  %v4936_v47 = vld [vmem:[%s6757_s2 + $0x884] ss:$16 sps:$4 sm:$0xff]   ;;  %v4939_v26 = vld [vmem:[%s6757_s2 + $0x88c] ss:$16 sps:$4 sm:$0xff]  }
  0xec   : > { %3248 = vmatpush1.bf16.msra.mxu0 %v4868_v27  ;;  %3554 = vmatpush1.bf16.msra.mxu1 %v4871_v28  ;;  %v4934_v27 = vld [vmem:[%s6757_s2 + $0x880] ss:$16 sps:$4 sm:$0xff]   ;;  %v4937_v28 = vld [vmem:[%s6757_s2 + $0x888] ss:$16 sps:$4 sm:$0xff]  }
  0xed   : > { %3249 = vmatprep.subr.bf16.mxu0 %v4876_v48  ;;  %3555 = vmatprep.subr.bf16.mxu1 %v4879_v42  ;;  %v4942_v48 = vld [vmem:[%s6757_s2 + $0x8a4] ss:$16 sps:$4 sm:$0xff]   ;;  %v4945_v42 = vld [vmem:[%s6757_s2 + $0x8ac] ss:$16 sps:$4 sm:$0xff]  }
  0xf0   : > { %3250 = vmatpush1.bf16.msra.mxu0 %v4874_v62  ;;  %3556 = vmatpush1.bf16.msra.mxu1 %v4877_v52  ;;  %v4940_v62 = vld [vmem:[%s6757_s2 + $0x8a0] ss:$16 sps:$4 sm:$0xff]   ;;  %v4943_v52 = vld [vmem:[%s6757_s2 + $0x8a8] ss:$16 sps:$4 sm:$0xff]  }
  0xf1   : > { %3251 = vmatprep.subr.bf16.mxu0 %v4882_v29  ;;  %3557 = vmatprep.subr.bf16.mxu1 %v4885_v40  ;;  %v4948_v29 = vld [vmem:[%s6757_s2 + $0x8c4] ss:$16 sps:$4 sm:$0xff]   ;;  %v4951_v40 = vld [vmem:[%s6757_s2 + $0x8cc] ss:$16 sps:$4 sm:$0xff]  }
  0xf4   : > { %3252 = vmatpush1.bf16.msra.mxu0 %v4880_v35  ;;  %3558 = vmatpush1.bf16.msra.mxu1 %v4883_v32  ;;  %v4946_v35 = vld [vmem:[%s6757_s2 + $0x8c0] ss:$16 sps:$4 sm:$0xff]   ;;  %v4949_v32 = vld [vmem:[%s6757_s2 + $0x8c8] ss:$16 sps:$4 sm:$0xff]  }
  0xf5   : > { %3253 = vmatprep.subr.bf16.mxu0 %v4888_v33  ;;  %3559 = vmatprep.subr.bf16.mxu1 %v4891_v36  ;;  %v4954_v33 = vld [vmem:[%s6757_s2 + $0x8e4] ss:$16 sps:$4 sm:$0xff]   ;;  %v4957_v36 = vld [vmem:[%s6757_s2 + $0x8ec] ss:$16 sps:$4 sm:$0xff]  }
  0xf8   : > { %3254 = vmatpush1.bf16.msra.mxu0 %v4886_v37  ;;  %3560 = vmatpush1.bf16.msra.mxu1 %v4889_v63  ;;  %v4952_v37 = vld [vmem:[%s6757_s2 + $0x8e0] ss:$16 sps:$4 sm:$0xff]   ;;  %v4955_v63 = vld [vmem:[%s6757_s2 + $0x8e8] ss:$16 sps:$4 sm:$0xff]  }
  0xf9   : > { %3255 = vmatprep.subr.bf16.mxu0 %v4894_v38  ;;  %3561 = vmatprep.subr.bf16.mxu1 %v4897_v11  ;;  %v4960_v38 = vld [vmem:[%s6757_s2 + $0x904] ss:$16 sps:$4 sm:$0xff]   ;;  %v4963_v11 = vld [vmem:[%s6757_s2 + $0x90c] ss:$16 sps:$4 sm:$0xff]  }
  0xfc   : > { %3256 = vmatpush1.bf16.msra.mxu0 %v4892_v14  ;;  %3562 = vmatpush1.bf16.msra.mxu1 %v4895_v46  ;;  %v4961_v14 = vld [vmem:[%s6757_s2 + $0x908] ss:$16 sps:$4 sm:$0xff]   ;;  %v4966_v46 = vld [vmem:[%s6757_s2 + $0x924] ss:$16 sps:$4 sm:$0xff]  }
  0xfd   : > { %3257 = vmatprep.subr.bf16.mxu0 %v4900_v5  ;;  %3563 = vmatprep.subr.bf16.mxu1 %v4903_v61  ;;  %v4969_v5 = vld [vmem:[%s6757_s2 + $0x92c] ss:$16 sps:$4 sm:$0xff]   ;;  %v4964_v61 = vld [vmem:[%s6757_s2 + $0x920] ss:$16 sps:$4 sm:$0xff]  }
 0x100   : > { %3258 = vmatpush1.bf16.msra.mxu0 %v4898_v49  ;;  %3564 = vmatpush1.bf16.msra.mxu1 %v4901_v50  ;;  %v4975_v49 = vld [vmem:[%s6757_s2 + $0x94c] ss:$16 sps:$4 sm:$0xff]   ;;  %v4970_v50 = vld [vmem:[%s6757_s2 + $0x940] ss:$16 sps:$4 sm:$0xff]  }
 0x101   : > { %3259 = vmatprep.subr.bf16.mxu0 %v4906_v12  ;;  %3565 = vmatprep.subr.bf16.mxu1 %v4909_v57  ;;  %v4978_v12 = vld [vmem:[%s6757_s2 + $0x964] ss:$16 sps:$4 sm:$0xff]   ;;  %v4981_v57 = vld [vmem:[%s6757_s2 + $0x96c] ss:$16 sps:$4 sm:$0xff]  }
 0x104   : > { %3260 = vmatpush1.bf16.msra.mxu0 %v4904_v58  ;;  %3566 = vmatpush1.bf16.msra.mxu1 %v4907_v59  ;;  %v4976_v58 = vld [vmem:[%s6757_s2 + $0x960] ss:$16 sps:$4 sm:$0xff]   ;;  %v4979_v59 = vld [vmem:[%s6757_s2 + $0x968] ss:$16 sps:$4 sm:$0xff]  }
 0x105   : > { %3280 = vmatprep.subr.bf16.mxu0 %v4912_v1  ;;  %3586 = vmatprep.subr.bf16.mxu1 %v4915_v2  ;;  %v4982_v1 = vld [vmem:[%s6757_s2 + $0x980] ss:$16 sps:$4 sm:$0xff]   ;;  %v4985_v2 = vld [vmem:[%s6757_s2 + $0x988] ss:$16 sps:$4 sm:$0xff]  }
 0x107   : > { %3262 = vmatmul.mubr.bf16.vlgmr.msra.gmra.mrb[0].mxu0 %v710_v8  ;;  %3568 = vmatmul.mubr.bf16.vlgmr.msra.gmra.mrb[0].mxu1 %v710_v8  ;;  %v4991_v8 = vld [vmem:[%s6757_s2 + $0x9a8] ss:$16 sps:$4 sm:$0xff]  }
 0x108   : > { %3281 = vmatpush1.bf16.msra.mxu0 %v4910_v6  ;;  %3587 = vmatpush1.bf16.msra.mxu1 %v4913_v7  ;;  %v4993_v6 = vld [vmem:[%s6757_s2 + $0x9ac] ss:$16 sps:$4 sm:$0xff]   ;;  %v4988_v7 = vld [vmem:[%s6757_s2 + $0x9a0] ss:$16 sps:$4 sm:$0xff]  }
 0x109   : > { %3282 = vmatprep.subr.bf16.mxu0 %v4918_v9  ;;  %3588 = vmatprep.subr.bf16.mxu1 %v4921_v10  ;;  %v4996_v9 = vld [vmem:[%s6757_s2 + $0x9c4] ss:$16 sps:$4 sm:$0xff]   ;;  %v4999_v10 = vld [vmem:[%s6757_s2 + $0x9cc] ss:$16 sps:$4 sm:$0xff]  }
 0x10a   : > { %3271 = vmatprep.mubr.bf16.mxu0 %v734_v15  ;;  %3577 = vmatprep.mubr.bf16.mxu1 %v734_v15  ;;  %v4994_v15 = vld [vmem:[%s6757_s2 + $0x9c0] ss:$16 sps:$4 sm:$0xff]  }
 0x10c   : > { %3283 = vmatpush1.bf16.msra.mxu0 %v4916_v44  ;;  %3589 = vmatpush1.bf16.msra.mxu1 %v4919_v17  ;;  %v5002_v44 = vld [vmem:[%s6757_s2 + $0x9e4] ss:$16 sps:$4 sm:$0xff]   ;;  %v5005_v17 = vld [vmem:[%s6757_s2 + $0x9ec] ss:$16 sps:$4 sm:$0xff]  }
 0x10d   : > { %3284 = vmatprep.subr.bf16.mxu0 %v4924_v34  ;;  %3590 = vmatprep.subr.bf16.mxu1 %v4927_v18  ;;  %v5000_v34 = vld [vmem:[%s6757_s2 + $0x9e0] ss:$16 sps:$4 sm:$0xff]   ;;  %v5003_v18 = vld [vmem:[%s6757_s2 + $0x9e8] ss:$16 sps:$4 sm:$0xff]  }
 0x10f   : > { %3272 = vmatmul.mubr.bf16.gmra.mrb[4].mxu0 %v731_v19  ;;  %3578 = vmatmul.mubr.bf16.gmra.mrb[4].mxu1 %v731_v19  ;;  %v752_v19 = vrot.slane %v5499_v13, 1  ;;  %v5009_v13 = vld [vmem:[%s6757_s2 + $0xa08] ss:$16 sps:$4 sm:$0xff]  }
 0x110   : > { %3285 = vmatpush1.bf16.msra.mxu0 %v4922_v22  ;;  %3591 = vmatpush1.bf16.msra.mxu1 %v4925_v23  ;;  %v5008_v22 = vld [vmem:[%s6757_s2 + $0xa04] ss:$16 sps:$4 sm:$0xff]   ;;  %v5011_v23 = vld [vmem:[%s6757_s2 + $0xa0c] ss:$16 sps:$4 sm:$0xff]  }
 0x111   : > { %3286 = vmatprep.subr.bf16.mxu0 %v4930_v4  ;;  %3592 = vmatprep.subr.bf16.mxu1 %v4933_v30  ;;  %v5006_v4 = vld [vmem:[%s6757_s2 + $0xa00] ss:$16 sps:$4 sm:$0xff]   ;;  %v754_v39 = vsel %vm751_vm2, %v752_v19, %v753_v20  ;;  %v5014_v30 = vld [vmem:[%s6757_s2 + $0xa24] ss:$16 sps:$4 sm:$0xff]  }
 0x112   : > { %3312 = vmatprep.mubr.bf16.mxu0 %v757_v45  ;;  %3618 = vmatprep.mubr.bf16.mxu1 %v757_v45  ;;  %v5017_v45 = vld [vmem:[%s6757_s2 + $0xa2c] ss:$16 sps:$4 sm:$0xff]   ;;  %v5092_v19 = vld [vmem:[%s6757_s2 + $0xbc4] ss:$16 sps:$4 sm:$0xff]  }
 0x114   : > { %3287 = vmatpush1.bf16.msra.mxu0 %v4928_v24  ;;  %3593 = vmatpush1.bf16.msra.mxu1 %v4931_v25  ;;  %v5012_v24 = vld [vmem:[%s6757_s2 + $0xa20] ss:$16 sps:$4 sm:$0xff]   ;;  %v5015_v25 = vld [vmem:[%s6757_s2 + $0xa28] ss:$16 sps:$4 sm:$0xff]  }
 0x115   : > { %3288 = vmatprep.subr.bf16.mxu0 %v4936_v47  ;;  %3594 = vmatprep.subr.bf16.mxu1 %v4939_v26  ;;  %v5020_v47 = vld [vmem:[%s6757_s2 + $0xa44] ss:$16 sps:$4 sm:$0xff]   ;;  %v5023_v26 = vld [vmem:[%s6757_s2 + $0xa4c] ss:$16 sps:$4 sm:$0xff]  }
 0x118   : > { %3289 = vmatpush1.bf16.msra.mxu0 %v4934_v27  ;;  %3595 = vmatpush1.bf16.msra.mxu1 %v4937_v28  ;;  %v761_v27 = vrot.slane %v5734_v56, 1  ;;  %v6479_v28 = vrot.slane %v5908_v41, 1  ;;  %v5029_v56 = vld [vmem:[%s6757_s2 + $0xa6c] ss:$16 sps:$4 sm:$0xff]  }
 0x119   : > { %3290 = vmatprep.subr.bf16.mxu0 %v4942_v48  ;;  %3596 = vmatprep.subr.bf16.mxu1 %v4945_v42  ;;  %v5018_v48 = vld [vmem:[%s6757_s2 + $0xa40] ss:$16 sps:$4 sm:$0xff]   ;;  %v5021_v42 = vld [vmem:[%s6757_s2 + $0xa48] ss:$16 sps:$4 sm:$0xff]  }
 0x11a   : > { %v763_v41 = vsel %vm751_vm2, %v761_v27, %v6479_v28 }
 0x11c   : > { %3291 = vmatpush1.bf16.msra.mxu0 %v4940_v62  ;;  %3597 = vmatpush1.bf16.msra.mxu1 %v4943_v52  ;;  %v5024_v62 = vld [vmem:[%s6757_s2 + $0xa60] ss:$16 sps:$4 sm:$0xff]   ;;  %v5027_v52 = vld [vmem:[%s6757_s2 + $0xa68] ss:$16 sps:$4 sm:$0xff]  }
 0x11d   : > { %3292 = vmatprep.subr.bf16.mxu0 %v4948_v29  ;;  %3598 = vmatprep.subr.bf16.mxu1 %v4951_v40  ;;  %v5032_v29 = vld [vmem:[%s6757_s2 + $0xa84] ss:$16 sps:$4 sm:$0xff]   ;;  %v5035_v40 = vld [vmem:[%s6757_s2 + $0xa8c] ss:$16 sps:$4 sm:$0xff]  }
 0x120   : > { %3293 = vmatpush1.bf16.msra.mxu0 %v4946_v35  ;;  %3599 = vmatpush1.bf16.msra.mxu1 %v4949_v32  ;;  %v5030_v35 = vld [vmem:[%s6757_s2 + $0xa80] ss:$16 sps:$4 sm:$0xff]   ;;  %v5033_v32 = vld [vmem:[%s6757_s2 + $0xa88] ss:$16 sps:$4 sm:$0xff]  }
 0x121   : > { %3294 = vmatprep.subr.bf16.mxu0 %v4954_v33  ;;  %3600 = vmatprep.subr.bf16.mxu1 %v4957_v36  ;;  %v5038_v33 = vld [vmem:[%s6757_s2 + $0xaa4] ss:$16 sps:$4 sm:$0xff]   ;;  %v5041_v36 = vld [vmem:[%s6757_s2 + $0xaac] ss:$16 sps:$4 sm:$0xff]  }
 0x124   : > { %3295 = vmatpush1.bf16.msra.mxu0 %v4952_v37  ;;  %3601 = vmatpush1.bf16.msra.mxu1 %v4955_v63  ;;  %v5036_v37 = vld [vmem:[%s6757_s2 + $0xaa0] ss:$16 sps:$4 sm:$0xff]   ;;  %v5039_v63 = vld [vmem:[%s6757_s2 + $0xaa8] ss:$16 sps:$4 sm:$0xff]  }
 0x125   : > { %3296 = vmatprep.subr.bf16.mxu0 %v4960_v38  ;;  %3602 = vmatprep.subr.bf16.mxu1 %v4963_v11  ;;  %v5044_v38 = vld [vmem:[%s6757_s2 + $0xac4] ss:$16 sps:$4 sm:$0xff]   ;;  %v5047_v11 = vld [vmem:[%s6757_s2 + $0xacc] ss:$16 sps:$4 sm:$0xff]  }
 0x128   : > { %3297 = vmatpush1.bf16.msra.mxu0 %v4958_v43  ;;  %3603 = vmatpush1.bf16.msra.mxu1 %v4961_v14  ;;  %v5042_v43 = vld [vmem:[%s6757_s2 + $0xac0] ss:$16 sps:$4 sm:$0xff]   ;;  %v5045_v14 = vld [vmem:[%s6757_s2 + $0xac8] ss:$16 sps:$4 sm:$0xff]  }
 0x129   : > { %3298 = vmatprep.subr.bf16.mxu0 %v4966_v46  ;;  %3604 = vmatprep.subr.bf16.mxu1 %v4969_v5  ;;  %v5050_v46 = vld [vmem:[%s6757_s2 + $0xae4] ss:$16 sps:$4 sm:$0xff]   ;;  %v5053_v5 = vld [vmem:[%s6757_s2 + $0xaec] ss:$16 sps:$4 sm:$0xff]  }
 0x12c   : > { %3299 = vmatpush1.bf16.msra.mxu0 %v4964_v61  ;;  %3605 = vmatpush1.bf16.msra.mxu1 %v4967_v31  ;;  %v5048_v61 = vld [vmem:[%s6757_s2 + $0xae0] ss:$16 sps:$4 sm:$0xff]   ;;  %v5051_v31 = vld [vmem:[%s6757_s2 + $0xae8] ss:$16 sps:$4 sm:$0xff]  }
 0x12d   : > { %3300 = vmatprep.subr.bf16.mxu0 %v4972_v54  ;;  %3606 = vmatprep.subr.bf16.mxu1 %v4975_v49  ;;  %v5056_v54 = vld [vmem:[%s6757_s2 + $0xb04] ss:$16 sps:$4 sm:$0xff]   ;;  %v5059_v49 = vld [vmem:[%s6757_s2 + $0xb0c] ss:$16 sps:$4 sm:$0xff]  }
 0x130   : > { %3301 = vmatpush1.bf16.msra.mxu0 %v4970_v50  ;;  %3607 = vmatpush1.bf16.msra.mxu1 %v4973_v51  ;;  %v5054_v50 = vld [vmem:[%s6757_s2 + $0xb00] ss:$16 sps:$4 sm:$0xff]   ;;  %v5057_v51 = vld [vmem:[%s6757_s2 + $0xb08] ss:$16 sps:$4 sm:$0xff]  }
 0x131   : > { %3302 = vmatprep.subr.bf16.mxu0 %v4978_v12  ;;  %3608 = vmatprep.subr.bf16.mxu1 %v4981_v57  ;;  %v5062_v12 = vld [vmem:[%s6757_s2 + $0xb24] ss:$16 sps:$4 sm:$0xff]   ;;  %v5065_v57 = vld [vmem:[%s6757_s2 + $0xb2c] ss:$16 sps:$4 sm:$0xff]  }
 0x134   : > { %3303 = vmatpush1.bf16.msra.mxu0 %v4976_v58  ;;  %3609 = vmatpush1.bf16.msra.mxu1 %v4979_v59  ;;  %v5060_v58 = vld [vmem:[%s6757_s2 + $0xb20] ss:$16 sps:$4 sm:$0xff]   ;;  %v5063_v59 = vld [vmem:[%s6757_s2 + $0xb28] ss:$16 sps:$4 sm:$0xff]  }
 0x135   : > { %3304 = vmatprep.subr.bf16.mxu0 %v4984_v60  ;;  %3610 = vmatprep.subr.bf16.mxu1 %v4987_v55  ;;  %v5068_v60 = vld [vmem:[%s6757_s2 + $0xb44] ss:$16 sps:$4 sm:$0xff]   ;;  %v5071_v55 = vld [vmem:[%s6757_s2 + $0xb4c] ss:$16 sps:$4 sm:$0xff]  }
 0x138   : > { %3305 = vmatpush1.bf16.msra.mxu0 %v4982_v1  ;;  %3611 = vmatpush1.bf16.msra.mxu1 %v4985_v2  ;;  %v5066_v1 = vld [vmem:[%s6757_s2 + $0xb40] ss:$16 sps:$4 sm:$0xff]   ;;  %v5069_v2 = vld [vmem:[%s6757_s2 + $0xb48] ss:$16 sps:$4 sm:$0xff]  }
 0x139   : > { %3306 = vmatprep.subr.bf16.mxu0 %v4990_v3  ;;  %3612 = vmatprep.subr.bf16.mxu1 %v4993_v6  ;;  %v5074_v3 = vld [vmem:[%s6757_s2 + $0xb64] ss:$16 sps:$4 sm:$0xff]   ;;  %v5077_v6 = vld [vmem:[%s6757_s2 + $0xb6c] ss:$16 sps:$4 sm:$0xff]  }
 0x13c   : > { %3307 = vmatpush1.bf16.msra.mxu0 %v4988_v7  ;;  %3613 = vmatpush1.bf16.msra.mxu1 %v4991_v8  ;;  %v5072_v7 = vld [vmem:[%s6757_s2 + $0xb60] ss:$16 sps:$4 sm:$0xff]   ;;  %v5075_v8 = vld [vmem:[%s6757_s2 + $0xb68] ss:$16 sps:$4 sm:$0xff]  }
 0x13d   : > { %3308 = vmatprep.subr.bf16.mxu0 %v4996_v9  ;;  %3614 = vmatprep.subr.bf16.mxu1 %v4999_v10  ;;  %v5080_v9 = vld [vmem:[%s6757_s2 + $0xb84] ss:$16 sps:$4 sm:$0xff]   ;;  %v5083_v10 = vld [vmem:[%s6757_s2 + $0xb8c] ss:$16 sps:$4 sm:$0xff]  }
 0x140   : > { %3309 = vmatpush1.bf16.msra.mxu0 %v4994_v15  ;;  %3615 = vmatpush1.bf16.msra.mxu1 %v4997_v16  ;;  %v5078_v15 = vld [vmem:[%s6757_s2 + $0xb80] ss:$16 sps:$4 sm:$0xff]   ;;  %v5081_v16 = vld [vmem:[%s6757_s2 + $0xb88] ss:$16 sps:$4 sm:$0xff]  }
 0x141   : > { %3310 = vmatprep.subr.bf16.mxu0 %v5002_v44  ;;  %3616 = vmatprep.subr.bf16.mxu1 %v5005_v17  ;;  %v5086_v44 = vld [vmem:[%s6757_s2 + $0xba4] ss:$16 sps:$4 sm:$0xff]   ;;  %v5089_v17 = vld [vmem:[%s6757_s2 + $0xbac] ss:$16 sps:$4 sm:$0xff]  }
 0x144   : > { %3311 = vmatpush1.bf16.msra.mxu0 %v5000_v34  ;;  %3617 = vmatpush1.bf16.msra.mxu1 %v5003_v18  ;;  %v5084_v34 = vld [vmem:[%s6757_s2 + $0xba0] ss:$16 sps:$4 sm:$0xff]   ;;  %v5087_v18 = vld [vmem:[%s6757_s2 + $0xba8] ss:$16 sps:$4 sm:$0xff]  }
 0x145   : > { %3331 = vmatprep.subr.bf16.mxu0 %v5008_v22  ;;  %3637 = vmatprep.subr.bf16.mxu1 %v5011_v23  ;;  %v5090_v22 = vld [vmem:[%s6757_s2 + $0xbc0] ss:$16 sps:$4 sm:$0xff]   ;;  %v5093_v23 = vld [vmem:[%s6757_s2 + $0xbc8] ss:$16 sps:$4 sm:$0xff]  }
 0x147   : > { %3313 = vmatmul.mubr.bf16.vlgmr.msra.gmra.mrb[0].mxu0 %v754_v39  ;;  %3619 = vmatmul.mubr.bf16.vlgmr.msra.gmra.mrb[0].mxu1 %v754_v39  ;;  %v5096_v39 = vld [vmem:[%s6757_s2 + $0xbe0] ss:$16 sps:$4 sm:$0xff]  }
 0x148   : > { %3332 = vmatpush1.bf16.msra.mxu0 %v5006_v4  ;;  %3638 = vmatpush1.bf16.msra.mxu1 %v5009_v13  ;;  %v5098_v4 = vld [vmem:[%s6757_s2 + $0xbe4] ss:$16 sps:$4 sm:$0xff]   ;;  %v5101_v13 = vld [vmem:[%s6757_s2 + $0xbec] ss:$16 sps:$4 sm:$0xff]  }
 0x149   : > { %3333 = vmatprep.subr.bf16.mxu0 %v5014_v30  ;;  %3639 = vmatprep.subr.bf16.mxu1 %v5017_v45  ;;  %v5099_v30 = vld [vmem:[%s6757_s2 + $0xbe8] ss:$16 sps:$4 sm:$0xff]   ;;  %v758_v45 = vrot.slane %v5748_v0, 1 }
 0x14a   : > { %3322 = vmatprep.mubr.bf16.mxu0 %v6276_v21  ;;  %3628 = vmatprep.mubr.bf16.mxu1 %v6276_v21  ;;  %v5026_v21 = vld [vmem:[%s6757_s2 + $0xa64] ss:$16 sps:$4 sm:$0xff]  }
 0x14c   : > { %3334 = vmatpush1.bf16.msra.mxu0 %v5012_v24  ;;  %3640 = vmatpush1.bf16.msra.mxu1 %v5015_v25  ;;  %v759_v24 = vrot.slane %v5921_v53, 1 }
 0x14d   : > { %3335 = vmatprep.subr.bf16.mxu0 %v5020_v47  ;;  %3641 = vmatprep.subr.bf16.mxu1 %v5023_v26 }
 0x14e   : > { %v760_v25 = vsel %vm751_vm2, %v758_v45, %v759_v24 }
 0x14f   : > { %3323 = vmatmul.mubr.bf16.gmra.mrb[4].mxu0 %v753_v20  ;;  %3629 = vmatmul.mubr.bf16.gmra.mrb[4].mxu1 %v753_v20  ;;  %v5095_v20 = vld [vmem:[%s6757_s2 + $0xbcc] ss:$16 sps:$4 sm:$0xff]  }
 0x150   : > { %3336 = vmatpush1.bf16.msra.mxu0 %v5018_v48  ;;  %3642 = vmatpush1.bf16.msra.mxu1 %v5021_v42 }
 0x151   : > { %3337 = vmatprep.subr.bf16.mxu0 %v5026_v21  ;;  %3643 = vmatprep.subr.bf16.mxu1 %v5029_v56 }
 0x152   : > { %3363 = vmatprep.mubr.bf16.mxu0 %v763_v41  ;;  %3669 = vmatprep.mubr.bf16.mxu1 %v763_v41 }
 0x154   : > { %3338 = vmatpush1.bf16.msra.mxu0 %v5024_v62  ;;  %3644 = vmatpush1.bf16.msra.mxu1 %v5027_v52 }
 0x155   : > { %3339 = vmatprep.subr.bf16.mxu0 %v5032_v29  ;;  %3645 = vmatprep.subr.bf16.mxu1 %v5035_v40 }
 0x158   : > { %3340 = vmatpush1.bf16.msra.mxu0 %v5030_v35  ;;  %3646 = vmatpush1.bf16.msra.mxu1 %v5033_v32 }
 0x159   : > { %3341 = vmatprep.subr.bf16.mxu0 %v5038_v33  ;;  %3647 = vmatprep.subr.bf16.mxu1 %v5041_v36 }
 0x15c   : > { %3342 = vmatpush1.bf16.msra.mxu0 %v5036_v37  ;;  %3648 = vmatpush1.bf16.msra.mxu1 %v5039_v63 }
 0x15d   : > { %3343 = vmatprep.subr.bf16.mxu0 %v5044_v38  ;;  %3649 = vmatprep.subr.bf16.mxu1 %v5047_v11 }
 0x160   : > { %3344 = vmatpush1.bf16.msra.mxu0 %v5042_v43  ;;  %3650 = vmatpush1.bf16.msra.mxu1 %v5045_v14 }
 0x161   : > { %3345 = vmatprep.subr.bf16.mxu0 %v5050_v46  ;;  %3651 = vmatprep.subr.bf16.mxu1 %v5053_v5 }
 0x164   : > { %3346 = vmatpush1.bf16.msra.mxu0 %v5048_v61  ;;  %3652 = vmatpush1.bf16.msra.mxu1 %v5051_v31 }
 0x165   : > { %3347 = vmatprep.subr.bf16.mxu0 %v5056_v54  ;;  %3653 = vmatprep.subr.bf16.mxu1 %v5059_v49 }
 0x168   : > { %3348 = vmatpush1.bf16.msra.mxu0 %v5054_v50  ;;  %3654 = vmatpush1.bf16.msra.mxu1 %v5057_v51 }
 0x169   : > { %3349 = vmatprep.subr.bf16.mxu0 %v5062_v12  ;;  %3655 = vmatprep.subr.bf16.mxu1 %v5065_v57 }
 0x16c   : > { %3350 = vmatpush1.bf16.msra.mxu0 %v5060_v58  ;;  %3656 = vmatpush1.bf16.msra.mxu1 %v5063_v59 }
 0x16d   : > { %3351 = vmatprep.subr.bf16.mxu0 %v5068_v60  ;;  %3657 = vmatprep.subr.bf16.mxu1 %v5071_v55 }
 0x170   : > { %3352 = vmatpush1.bf16.msra.mxu0 %v5066_v1  ;;  %3658 = vmatpush1.bf16.msra.mxu1 %v5069_v2 }
 0x171   : > { %3353 = vmatprep.subr.bf16.mxu0 %v5074_v3  ;;  %3659 = vmatprep.subr.bf16.mxu1 %v5077_v6 }
 0x174   : > { %3354 = vmatpush1.bf16.msra.mxu0 %v5072_v7  ;;  %3660 = vmatpush1.bf16.msra.mxu1 %v5075_v8 }
 0x175   : > { %3355 = vmatprep.subr.bf16.mxu0 %v5080_v9  ;;  %3661 = vmatprep.subr.bf16.mxu1 %v5083_v10 }
 0x178   : > { %3356 = vmatpush1.bf16.msra.mxu0 %v5078_v15  ;;  %3662 = vmatpush1.bf16.msra.mxu1 %v5081_v16 }
 0x179   : > { %3357 = vmatprep.subr.bf16.mxu0 %v5086_v44  ;;  %3663 = vmatprep.subr.bf16.mxu1 %v5089_v17 }
 0x17c   : > { %3358 = vmatpush1.bf16.msra.mxu0 %v5084_v34  ;;  %3664 = vmatpush1.bf16.msra.mxu1 %v5087_v18 }
 0x17d   : > { %3359 = vmatprep.subr.bf16.mxu0 %v5092_v19  ;;  %3665 = vmatprep.subr.bf16.mxu1 %v5095_v20 }
 0x180   : > { %3360 = vmatpush1.bf16.msra.mxu0 %v5090_v22  ;;  %3666 = vmatpush1.bf16.msra.mxu1 %v5093_v23 }
 0x181   : > { %3361 = vmatprep.subr.bf16.mxu0 %v5098_v4  ;;  %3667 = vmatprep.subr.bf16.mxu1 %v5101_v13 }
 0x184   : > { %3362 = vmatpush1.bf16.msra.mxu0 %v5096_v39  ;;  %3668 = vmatpush1.bf16.msra.mxu1 %v5099_v30 }
 0x187   : > { %3364 = vmatmul.mubr.bf16.vlgmr.msra.gmra.mrb[0].mxu0 %v760_v25  ;;  %3670 = vmatmul.mubr.bf16.vlgmr.msra.gmra.mrb[0].mxu1 %v760_v25 }
 0x188   : > { %3373 = vmatprep.mubr.bf16.mxu0 %v6479_v28  ;;  %3679 = vmatprep.mubr.bf16.mxu1 %v6479_v28 }
 0x18f   : > { %3374 = vmatmul.mubr.bf16.gmra.mrb[4].mxu0 %v759_v24  ;;  %3680 = vmatmul.mubr.bf16.gmra.mrb[4].mxu1 %v759_v24 }
 0x25a   : > { %v6650_v47 = vpop.f32.mrb[0].mxu0  ;;  %v6652_v26 = vpop.f32.mrb[0].mxu1 }
 0x25b   : > { %v3700_v0 = vmul.f32 %v6650_v47, %v6650_v47  ;;  %v3702_v53 = vmul.f32 %v6652_v26, %v6652_v26  ;;  %v6658_v27 = vpop.f32.mrb[1].mxu0  ;;  %v6660_v48 = vpop.f32.mrb[1].mxu1 }
 0x25c   : > { %v3701_v42 = vmul.f32 %v6658_v27, %v6658_v27  ;;  %v3703_v28 = vmul.f32 %v6660_v48, %v6660_v48  ;;  %v6666_v21 = vpop.f32.mrb[2].mxu0  ;;  %v6668_v56 = vpop.f32.mrb[2].mxu1 }
 0x25d   : > { %v3712_v41 = vmul.f32 %v3700_v0, %v6650_v47  ;;  %v3714_v62 = vmul.f32 %v3702_v53, %v6652_v26  ;;  %v3704_v52 = vmul.f32 %v6666_v21, %v6666_v21  ;;  %v6674_v29 = vpop.f32.mrb[3].mxu0  ;;  %v6676_v40 = vpop.f32.mrb[3].mxu1  ;;  %v3706_v33 = vmul.f32 %v6668_v56, %v6668_v56 }
 0x25e   : > { %v3713_v35 = vmul.f32 %v3701_v42, %v6658_v27  ;;  %v3715_v32 = vmul.f32 %v3703_v28, %v6660_v48  ;;  %v3705_v14 = vmul.f32 %v6674_v29, %v6674_v29  ;;  %v3707_v60 = vmul.f32 %v6676_v40, %v6676_v40 }
 0x25f   : > { %v3724_v36 = vmul.f32 0.044715, %v3712_v41  ;;  %v3726_v37 = vmul.f32 0.044715, %v3714_v62  ;;  %v3716_v63 = vmul.f32 %v3704_v52, %v6666_v21  ;;  %v3718_v43 = vmul.f32 %v3706_v33, %v6668_v56 }
 0x260   : > { %v3725_v38 = vmul.f32 0.044715, %v3713_v35  ;;  %v3727_v11 = vmul.f32 0.044715, %v3715_v32  ;;  %v3717_v50 = vmul.f32 %v3705_v14, %v6674_v29  ;;  %v3719_v9 = vmul.f32 %v3707_v60, %v6676_v40 }
 0x261   : > { %v3736_v46 = vadd.f32 %v3724_v36, %v6650_v47  ;;  %v3738_v5 = vadd.f32 %v3726_v37, %v6652_v26  ;;  %v3728_v61 = vmul.f32 0.044715, %v3716_v63  ;;  %v3730_v49 = vmul.f32 0.044715, %v3718_v43 }
 0x262   : > { %v3737_v31 = vadd.f32 %v3725_v38, %v6658_v27  ;;  %v3739_v54 = vadd.f32 %v3727_v11, %v6660_v48  ;;  %v6691_v51 = vpop.f32.mrb[4].mxu0  ;;  %v6693_v12 = vpop.f32.mrb[4].mxu1  ;;  %v3729_v7 = vmul.f32 0.044715, %v3717_v50  ;;  %v3731_v19 = vmul.f32 0.044715, %v3719_v9 }
 0x263   : > { %v3748_v57 = vmul.f32 0.7978846, %v3736_v46  ;;  %v3750_v58 = vmul.f32 0.7978846, %v3738_v5  ;;  %v3740_v59 = vadd.f32 %v3728_v61, %v6666_v21  ;;  %v6698_v55 = vpop.f32.mrb[5].mxu0  ;;  %v6700_v1 = vpop.f32.mrb[5].mxu1  ;;  %v3742_v6 = vadd.f32 %v3730_v49, %v6668_v56 }
 0x264   : > { %v3749_v2 = vmul.f32 0.7978846, %v3737_v31  ;;  %v3751_v3 = vmul.f32 0.7978846, %v3739_v54  ;;  %v3379_v10 = vpop.f32.mrb[6].mxu0  ;;  %v3685_v15 = vpop.f32.mrb[6].mxu1  ;;  %v3741_v44 = vadd.f32 %v3729_v7, %v6674_v29  ;;  %v3708_v17 = vmul.f32 %v6691_v51, %v6691_v51 }
 0x265   : > { %5134 = vtanh.f32 %v3748_v57  ;;  %v3752_v8 = vmul.f32 0.7978846, %v3740_v59  ;;  %v3754_v16 = vmul.f32 0.7978846, %v3742_v6  ;;  %v3380_v34 = vpop.f32.mrb[7].mxu0  ;;  %v3686_v18 = vpop.f32.mrb[7].mxu1  ;;  %v3710_v20 = vmul.f32 %v6693_v12, %v6693_v12 }
 0x266   : > { %5136 = vtanh.f32 %v3750_v58  ;;  %v3753_v22 = vmul.f32 0.7978846, %v3741_v44  ;;  %v3720_v23 = vmul.f32 %v3708_v17, %v6691_v51  ;;  %v3743_v4 = vadd.f32 %v3731_v19, %v6676_v40 }
 0x267   : > { %5138 = vtanh.f32 %v3749_v2  ;;  %v3722_v13 = vmul.f32 %v3710_v20, %v6693_v12  ;;  %v3709_v39 = vmul.f32 %v6698_v55, %v6698_v55  ;;  %v3711_v45 = vmul.f32 %v6700_v1, %v6700_v1 }
 0x268   : > { %5140 = vtanh.f32 %v3751_v3  ;;  %v3732_v30 = vmul.f32 0.044715, %v3720_v23  ;;  %v3755_v24 = vmul.f32 0.7978846, %v3743_v4  ;;  %v3688_v37 = vmul.f32 0.5, %v6650_v47 }
 0x269   : > { %5142 = vtanh.f32 %v3752_v8  ;;  %v3734_v25 = vmul.f32 0.044715, %v3722_v13  ;;  %v3721_v0 = vmul.f32 %v3709_v39, %v6698_v55  ;;  %v3723_v42 = vmul.f32 %v3711_v45, %v6700_v1 }
 0x26a   : > { %5144 = vtanh.f32 %v3754_v16  ;;  %v3744_v53 = vadd.f32 %v3732_v30, %v6691_v51  ;;  %v3690_v43 = vmul.f32 0.5, %v6652_v26  ;;  %v3689_v31 = vmul.f32 0.5, %v6658_v27 }
 0x26b   : > { %5146 = vtanh.f32 %v3753_v22  ;;  %v3746_v28 = vadd.f32 %v3734_v25, %v6693_v12  ;;  %v3733_v41 = vmul.f32 0.044715, %v3721_v0  ;;  %v3735_v52 = vmul.f32 0.044715, %v3723_v42 }
 0x26c   : > { %5148 = vtanh.f32 %v3755_v24  ;;  %v3756_v62 = vmul.f32 0.7978846, %v3744_v53  ;;  %v3691_v47 = vmul.f32 0.5, %v6660_v48  ;;  %v3692_v26 = vmul.f32 0.5, %v6666_v21 }
 0x26d   : > { %v3758_v32 = vmul.f32 0.7978846, %v3746_v28  ;;  %v3745_v33 = vadd.f32 %v3733_v41, %v6698_v55  ;;  %v3747_v38 = vadd.f32 %v3735_v52, %v6700_v1  ;;  %v3694_v6 = vmul.f32 0.5, %v6668_v56 }
 0x26e   : > { %5150 = vtanh.f32 %v3756_v62  ;;  %v3693_v9 = vmul.f32 0.5, %v6674_v29  ;;  %v3695_v17 = vmul.f32 0.5, %v6676_v40  ;;  %v3696_v29 = vmul.f32 0.5, %v6691_v51 }
 0x26f   : > { %v5135_v35 = vpop.eup %5134  ;;  %5152 = vtanh.f32 %v3758_v32  ;;  %v3757_v46 = vmul.f32 0.7978846, %v3745_v33  ;;  %v3759_v49 = vmul.f32 0.7978846, %v3747_v38  ;;  %v3698_v39 = vmul.f32 0.5, %v6693_v12 }
 0x270   : > { %v5137_v36 = vpop.eup %5136  ;;  %v3772_v63 = vadd.f32 1.0, %v5135_v35  ;;  %v3697_v45 = vmul.f32 0.5, %v6698_v55  ;;  %v3699_v0 = vmul.f32 0.5, %v6700_v1 }
 0x271   : > { %v5139_v11 = vpop.eup %5138  ;;  %v3774_v14 = vadd.f32 1.0, %v5137_v36  ;;  %5154 = vtanh.f32 %v3757_v46 }
 0x272   : > { %v5141_v5 = vpop.eup %5140  ;;  %v3784_v61 = vmul.f32 %v3772_v63, %v3688_v37  ;;  %v3773_v54 = vadd.f32 1.0, %v5139_v11  ;;  %5156 = vtanh.f32 %v3759_v49 }
 0x273   : > { %v5143_v50 = vpop.eup %5142  ;;  %v3786_v57 = vmul.f32 %v3774_v14, %v3690_v43  ;;  %v3775_v58 = vadd.f32 1.0, %v5141_v5 }
 0x274   : > { %v5145_v59 = vpop.eup %5144  ;;  %v3785_v60 = vmul.f32 %v3773_v54, %v3689_v31  ;;  %v3776_v2 = vadd.f32 1.0, %v5143_v50 }
 0x275   : > { %v5147_v3 = vpop.eup %5146  ;;  %v3787_v27 = vmul.f32 %v3775_v58, %v3691_v47  ;;  %v3778_v48 = vadd.f32 1.0, %v5145_v59 }
 0x276   : > { %v4399_v7 = vpack.c.bf16 %v3785_v60, %v3784_v61  ;;  %v3788_v8 = vmul.f32 %v3776_v2, %v3692_v26  ;;  %v3777_v21 = vadd.f32 1.0, %v5147_v3  ;;  %v5149_v10 = vpop.eup %5148 }
 0x277   : > { %v4400_v15 = vpack.c.bf16 %v3787_v27, %v3786_v57  ;;  %v3790_v16 = vmul.f32 %v3778_v48, %v3694_v6  ;;  %v3779_v34 = vadd.f32 1.0, %v5149_v10 }
 0x278   : > { %3836 = vst [vmem:[%s6731_s15] sm:$0xff] %v4399_v7  ;;  %v3789_v44 = vmul.f32 %v3777_v21, %v3693_v9  ;;  %v5151_v18 = vpop.eup %5150 }
 0x279   : > { %3837 = vst [vmem:[%s6731_s15 + $0x8] sm:$0xff] %v4400_v15  ;;  %v3791_v56 = vmul.f32 %v3779_v34, %v3695_v17  ;;  %v5153_v20 = vpop.eup %5152  ;;  %v3780_v22 = vadd.f32 1.0, %v5151_v18 }
 0x27a   : > { %v4401_v19 = vpack.c.bf16 %v3789_v44, %v3788_v8  ;;  %v3782_v4 = vadd.f32 1.0, %v5153_v20 }
 0x27b   : > { %v4402_v23 = vpack.c.bf16 %v3791_v56, %v3790_v16  ;;  %v5155_v13 = vpop.eup %5154  ;;  %v3792_v40 = vmul.f32 %v3780_v22, %v3696_v29 }
 0x27c   : > { %3838 = vst [vmem:[%s6731_s15 + $0x10] sm:$0xff] %v4401_v19  ;;  %v5157_v30 = vpop.eup %5156  ;;  %v3781_v24 = vadd.f32 1.0, %v5155_v13  ;;  %v3794_v25 = vmul.f32 %v3782_v4, %v3698_v39 }
 0x27d   : > { %3839 = vst [vmem:[%s6731_s15 + $0x18] sm:$0xff] %v4402_v23  ;;  %v3783_v53 = vadd.f32 1.0, %v5157_v30 }
 0x27e   : > { %v3793_v42 = vmul.f32 %v3781_v24, %v3697_v45 }
 0x27f   : > { %v3795_v28 = vmul.f32 %v3783_v53, %v3699_v0 }
 0x280   : > { %v4403_v41 = vpack.c.bf16 %v3793_v42, %v3792_v40 }
 0x281   : > { %v4404_v51 = vpack.c.bf16 %v3795_v28, %v3794_v25 }
 0x282   : > { %3840 = vst [vmem:[%s6731_s15 + $0x20] sm:$0xff] %v4403_v41 }
 0x283   : > { %3841 = vst [vmem:[%s6731_s15 + $0x28] sm:$0xff] %v4404_v51 }
 0x284 PF: > { %s15_s20 = sadd.s32 1, %s5180_s20   ;;  %s6761_s18 = smov %s5176_s19 }
 0x285   : > { %p12_p5 = scmp.ge.s32.totalorder %s15_s20, 4   ;;  %s6762_s19 = smov %s6764_s21 }
 0x287   :  { %14 = sbr.rel (!%p12_p5) target bundleno = 2 (0x2), region = 79 }

// kernel: feature_extractor.9
= control target key start
LH: loop header
LB: loop body
LE: loop exit
PB: predicated region body
PF: predicated region fallthrough
CT: control target
= control target key end

     0   :  { %s4808_s12 = smov 0   ;;  %s4810_s13 = smov 0   ;;  %s6194_s0 = inlined_call_operand.vmem [shape: bf16[2,24,512], index: 0, kind: input, shape index: {}, may-alias: {0,1}]   ;;  %s6195_s1 = inlined_call_operand.vmem [shape: bf16[2,24,512], index: 1, kind: input, shape index: {}, may-alias: {0,1}]   ;;  %s6196_s2 = inlined_call_operand.vmem [shape: bf16[1536,512], index: 2, kind: input, shape index: {}]   ;;  %s6197_s3 = inlined_call_operand.vmem [shape: bf16[2,24,512], index: 3, kind: output, shape index: {}]  }
   0x1   :  { %s4812_s14 = smov 0  }
   0x2 LB: > { %s25_s15 = sadd.s32 1, %s4782_s13  ;;  %p3623_p0 = scmp.ge.s32.totalorder %s4786_s14, 1  ;;  %s4786_s14 = sphi %s4812_s14, %s13_s14   ;;  %s4782_s13 = sphi %s4810_s13, %s6199_s13   ;;  %s4778_s12 = sphi %s4808_s12, %s6198_s12  }
   0x3   : > { %p27_p1 = scmp.ge.s32.totalorder %s25_s15, 2  ;;  %p191_p2 = scmp.lt.s32.totalorder %s4786_s14, 3 }
   0x5   : > { %s6201_s15 = smov (%p27_p1, %s25_s15), 0  ;;  %p192_p3 = pnand %p3623_p0, %p191_p2 }
   0x6   : > { %v4146_v0 = vld [vmem:[%s6196_s2 + $0x4] ss:$16 sps:$4 sm:$0xff] (!%p192_p3)   ;;  %p239_p4 = scmp.lt.s32.totalorder (!%p192_p3), %s4778_s12, 1  ;;  %v4148_v1 = vld [vmem:[%s6196_s2 + $0xc] ss:$16 sps:$4 sm:$0xff] (!%p192_p3)   ;;  %vm325_vm0 = vcmask (!%p192_p3), 1043456  }
   0x7   : > { %195 = sbr.rel (%p192_p3) target bundleno = 644 (0x284), region = 32  ;;  %2736 = vmatprep.subr.bf16.mxu0 (!%p192_p3), %v4146_v0  ;;  %v4150_v2 = vld [vmem:[%s6196_s2] ss:$16 sps:$4 sm:$0xff] (!%p192_p3)   ;;  %v4151_v3 = vld [vmem:[%s6196_s2 + $0x8] ss:$16 sps:$4 sm:$0xff] (!%p192_p3)   ;;  %3042 = vmatprep.subr.bf16.mxu1 (!%p192_p3), %v4148_v1  ;;  %vm411_vm2 = vcmask (!%p192_p3), 1046528  }
   0x8   : > { %v4152_v4 = vld [vmem:[%s6196_s2 + $0x24] ss:$16 sps:$4 sm:$0xff] (!%p192_p3)   ;;  %2737 = vmatpush1.bf16.msra.mxu0 (!%p192_p3), %v4150_v2  ;;  %3043 = vmatpush1.bf16.msra.mxu1 (!%p192_p3), %v4151_v3  ;;  %v4154_v5 = vld [vmem:[%s6196_s2 + $0x2c] ss:$16 sps:$4 sm:$0xff] (!%p192_p3)   ;;  %v4156_v6 = vld [vmem:[%s6196_s2 + $0x20] ss:$16 sps:$4 sm:$0xff] (!%p192_p3)  }
   0x9   : > { %2738 = vmatprep.subr.bf16.mxu0 (!%p192_p3), %v4152_v4  ;;  %v4157_v7 = vld [vmem:[%s6196_s2 + $0x28] ss:$16 sps:$4 sm:$0xff] (!%p192_p3)   ;;  %3044 = vmatprep.subr.bf16.mxu1 (!%p192_p3), %v4154_v5  ;;  %v4158_v8 = vld [vmem:[%s6196_s2 + $0x44] ss:$16 sps:$4 sm:$0xff] (!%p192_p3)   ;;  %v4160_v9 = vld [vmem:[%s6196_s2 + $0x4c] ss:$16 sps:$4 sm:$0xff] (!%p192_p3)  }
   0xa   : > { %v4162_v10 = vld [vmem:[%s6196_s2 + $0x40] ss:$16 sps:$4 sm:$0xff] (!%p192_p3)   ;;  %v4163_v11 = vld [vmem:[%s6196_s2 + $0x48] ss:$16 sps:$4 sm:$0xff] (!%p192_p3)   ;;  %v4164_v12 = vld [vmem:[%s6196_s2 + $0x64] ss:$16 sps:$4 sm:$0xff] (!%p192_p3)  }
   0xb   : > { %v4166_v13 = vld [vmem:[%s6196_s2 + $0x6c] ss:$16 sps:$4 sm:$0xff] (!%p192_p3)   ;;  %v4168_v14 = vld [vmem:[%s6196_s2 + $0x60] ss:$16 sps:$4 sm:$0xff] (!%p192_p3)   ;;  %v4169_v15 = vld [vmem:[%s6196_s2 + $0x68] ss:$16 sps:$4 sm:$0xff] (!%p192_p3)  }
   0xc   : > { %2739 = vmatpush1.bf16.msra.mxu0 (!%p192_p3), %v4156_v6  ;;  %3045 = vmatpush1.bf16.msra.mxu1 (!%p192_p3), %v4157_v7  ;;  %v4170_v16 = vld [vmem:[%s6196_s2 + $0x84] ss:$16 sps:$4 sm:$0xff] (!%p192_p3)   ;;  %v4172_v17 = vld [vmem:[%s6196_s2 + $0x8c] ss:$16 sps:$4 sm:$0xff] (!%p192_p3)   ;;  %v4174_v18 = vld [vmem:[%s6196_s2 + $0x80] ss:$16 sps:$4 sm:$0xff] (!%p192_p3)  }
   0xd   : > { %2740 = vmatprep.subr.bf16.mxu0 (!%p192_p3), %v4158_v8  ;;  %3046 = vmatprep.subr.bf16.mxu1 (!%p192_p3), %v4160_v9  ;;  %v4175_v19 = vld [vmem:[%s6196_s2 + $0x88] ss:$16 sps:$4 sm:$0xff] (!%p192_p3)   ;;  %v4176_v20 = vld [vmem:[%s6196_s2 + $0xa4] ss:$16 sps:$4 sm:$0xff] (!%p192_p3)   ;;  %v4178_v21 = vld [vmem:[%s6196_s2 + $0xac] ss:$16 sps:$4 sm:$0xff] (!%p192_p3)  }
   0xe   : > { %s6203_s12 = smov (!%p239_p4, %s4778_s12), 1  ;;  %v4180_v22 = vld [vmem:[%s6196_s2 + $0xa0] ss:$16 sps:$4 sm:$0xff]   ;;  %v4181_v23 = vld [vmem:[%s6196_s2 + $0xa8] ss:$16 sps:$4 sm:$0xff]  }
   0xf   : > { %v4182_v24 = vld [vmem:[%s6196_s2 + $0xc4] ss:$16 sps:$4 sm:$0xff]   ;;  %v4184_v25 = vld [vmem:[%s6196_s2 + $0xcc] ss:$16 sps:$4 sm:$0xff]   ;;  %v4186_v26 = vld [vmem:[%s6196_s2 + $0xc0] ss:$16 sps:$4 sm:$0xff]  }
  0x10   : > { %2741 = vmatpush1.bf16.msra.mxu0 %v4162_v10  ;;  %3047 = vmatpush1.bf16.msra.mxu1 %v4163_v11  ;;  %v4187_v27 = vld [vmem:[%s6196_s2 + $0xc8] ss:$16 sps:$4 sm:$0xff]   ;;  %v4188_v28 = vld [vmem:[%s6196_s2 + $0xe4] ss:$16 sps:$4 sm:$0xff]   ;;  %v4190_v29 = vld [vmem:[%s6196_s2 + $0xec] ss:$16 sps:$4 sm:$0xff]  }
  0x11   : > { %2742 = vmatprep.subr.bf16.mxu0 %v4164_v12  ;;  %3048 = vmatprep.subr.bf16.mxu1 %v4166_v13  ;;  %v4192_v30 = vld [vmem:[%s6196_s2 + $0xe0] ss:$16 sps:$4 sm:$0xff]   ;;  %v4193_v31 = vld [vmem:[%s6196_s2 + $0xe8] ss:$16 sps:$4 sm:$0xff]   ;;  %v4194_v32 = vld [vmem:[%s6196_s2 + $0x104] ss:$16 sps:$4 sm:$0xff]  }
  0x12   : > { %v4196_v33 = vld [vmem:[%s6196_s2 + $0x10c] ss:$16 sps:$4 sm:$0xff]   ;;  %v4198_v34 = vld [vmem:[%s6196_s2 + $0x100] ss:$16 sps:$4 sm:$0xff]   ;;  %v4199_v35 = vld [vmem:[%s6196_s2 + $0x108] ss:$16 sps:$4 sm:$0xff]  }
  0x13   : > { %v4200_v36 = vld [vmem:[%s6196_s2 + $0x124] ss:$16 sps:$4 sm:$0xff]   ;;  %v4202_v37 = vld [vmem:[%s6196_s2 + $0x12c] ss:$16 sps:$4 sm:$0xff]   ;;  %v4204_v38 = vld [vmem:[%s6196_s2 + $0x120] ss:$16 sps:$4 sm:$0xff]  }
  0x14   : > { %2743 = vmatpush1.bf16.msra.mxu0 %v4168_v14  ;;  %3049 = vmatpush1.bf16.msra.mxu1 %v4169_v15  ;;  %v4205_v39 = vld [vmem:[%s6196_s2 + $0x128] ss:$16 sps:$4 sm:$0xff]   ;;  %v4206_v40 = vld [vmem:[%s6196_s2 + $0x144] ss:$16 sps:$4 sm:$0xff]   ;;  %s4952_s29 = smul.u32 48, %s6203_s12 }
  0x15   : > { %2744 = vmatprep.subr.bf16.mxu0 %v4170_v16  ;;  %3050 = vmatprep.subr.bf16.mxu1 %v4172_v17  ;;  %v4208_v41 = vld [vmem:[%s6196_s2 + $0x14c] ss:$16 sps:$4 sm:$0xff]   ;;  %v4210_v42 = vld [vmem:[%s6196_s2 + $0x140] ss:$16 sps:$4 sm:$0xff]   ;;  %v4211_v43 = vld [vmem:[%s6196_s2 + $0x148] ss:$16 sps:$4 sm:$0xff]  }
  0x16   : > { %v4212_v44 = vld [vmem:[%s6196_s2 + $0x164] ss:$16 sps:$4 sm:$0xff]   ;;  %s4970_s16 = scalar_lea.vmem %s6194_s0, %s4952_s29  ;;  %v4214_v45 = vld [vmem:[%s6196_s2 + $0x16c] ss:$16 sps:$4 sm:$0xff]   ;;  %v4216_v46 = vld [vmem:[%s6196_s2 + $0x160] ss:$16 sps:$4 sm:$0xff]   ;;  %s6170_s22 = scalar_lea.vmem %s6197_s3, %s4952_s29 }
  0x17   : > { %v4979_v47 = vld [vmem:[%s4970_s16 + $0x4] ss:$16 sps:$4 sm:$0xff]   ;;  %v4217_v48 = vld [vmem:[%s6196_s2 + $0x168] ss:$16 sps:$4 sm:$0xff]   ;;  %v4220_v50 = vld [vmem:[%s6196_s2 + $0x18c] ss:$16 sps:$4 sm:$0xff]  }
  0x18   : > { %2745 = vmatpush1.bf16.msra.mxu0 %v4174_v18  ;;  %3051 = vmatpush1.bf16.msra.mxu1 %v4175_v19  ;;  %v4218_v49 = vld [vmem:[%s6196_s2 + $0x184] ss:$16 sps:$4 sm:$0xff]   ;;  %v4222_v51 = vld [vmem:[%s6196_s2 + $0x180] ss:$16 sps:$4 sm:$0xff]   ;;  %v4223_v52 = vld [vmem:[%s6196_s2 + $0x188] ss:$16 sps:$4 sm:$0xff]  }
  0x19   : > { %2746 = vmatprep.subr.bf16.mxu0 %v4176_v20  ;;  %3052 = vmatprep.subr.bf16.mxu1 %v4178_v21  ;;  %v4224_v53 = vld [vmem:[%s6196_s2 + $0x1a4] ss:$16 sps:$4 sm:$0xff]   ;;  %v4226_v54 = vld [vmem:[%s6196_s2 + $0x1ac] ss:$16 sps:$4 sm:$0xff]   ;;  %v4228_v55 = vld [vmem:[%s6196_s2 + $0x1a0] ss:$16 sps:$4 sm:$0xff]  }
  0x1a   : > { %2768 = vmatprep.mubr.bf16.mxu0 %v4979_v47  ;;  %3074 = vmatprep.mubr.bf16.mxu1 %v4979_v47  ;;  %v4229_v56 = vld [vmem:[%s6196_s2 + $0x1a8] ss:$16 sps:$4 sm:$0xff]   ;;  %v4230_v57 = vld [vmem:[%s6196_s2 + $0x1c4] ss:$16 sps:$4 sm:$0xff]   ;;  %v4232_v58 = vld [vmem:[%s6196_s2 + $0x1cc] ss:$16 sps:$4 sm:$0xff]  }
  0x1b   : > { %v4234_v59 = vld [vmem:[%s6196_s2 + $0x1c0] ss:$16 sps:$4 sm:$0xff]   ;;  %v4235_v60 = vld [vmem:[%s6196_s2 + $0x1c8] ss:$16 sps:$4 sm:$0xff]   ;;  %v4236_v61 = vld [vmem:[%s6196_s2 + $0x1e4] ss:$16 sps:$4 sm:$0xff]  }
  0x1c   : > { %2747 = vmatpush1.bf16.msra.mxu0 %v4180_v22  ;;  %3053 = vmatpush1.bf16.msra.mxu1 %v4181_v23  ;;  %v4238_v62 = vld [vmem:[%s6196_s2 + $0x1ec] ss:$16 sps:$4 sm:$0xff]   ;;  %v4240_v63 = vld [vmem:[%s6196_s2 + $0x1e0] ss:$16 sps:$4 sm:$0xff]   ;;  %v4241_v0 = vld [vmem:[%s6196_s2 + $0x1e8] ss:$16 sps:$4 sm:$0xff]  }
  0x1d   : > { %2748 = vmatprep.subr.bf16.mxu0 %v4182_v24  ;;  %3054 = vmatprep.subr.bf16.mxu1 %v4184_v25  ;;  %v4246_v1 = vld [vmem:[%s6196_s2 + $0x204] ss:$16 sps:$4 sm:$0xff]   ;;  %v4249_v2 = vld [vmem:[%s6196_s2 + $0x20c] ss:$16 sps:$4 sm:$0xff]   ;;  %v4244_v3 = vld [vmem:[%s6196_s2 + $0x200] ss:$16 sps:$4 sm:$0xff]  }
  0x1e   : > { %v4247_v4 = vld [vmem:[%s6196_s2 + $0x208] ss:$16 sps:$4 sm:$0xff]   ;;  %v5047_v5 = vld [vmem:[%s4970_s16] ss:$16 sps:$4 sm:$0xff]   ;;  %v4253_v6 = vld [vmem:[%s6196_s2 + $0x224] ss:$16 sps:$4 sm:$0xff]  }
  0x1f   : > { %v4256_v7 = vld [vmem:[%s6196_s2 + $0x22c] ss:$16 sps:$4 sm:$0xff]   ;;  %v4251_v8 = vld [vmem:[%s6196_s2 + $0x220] ss:$16 sps:$4 sm:$0xff]   ;;  %v4254_v9 = vld [vmem:[%s6196_s2 + $0x228] ss:$16 sps:$4 sm:$0xff]  }
  0x20   : > { %2749 = vmatpush1.bf16.msra.mxu0 %v4186_v26  ;;  %3055 = vmatpush1.bf16.msra.mxu1 %v4187_v27  ;;  %v4259_v10 = vld [vmem:[%s6196_s2 + $0x244] ss:$16 sps:$4 sm:$0xff]   ;;  %v4262_v11 = vld [vmem:[%s6196_s2 + $0x24c] ss:$16 sps:$4 sm:$0xff]   ;;  %v4257_v12 = vld [vmem:[%s6196_s2 + $0x240] ss:$16 sps:$4 sm:$0xff]  }
  0x21   : > { %2750 = vmatprep.subr.bf16.mxu0 %v4188_v28  ;;  %3056 = vmatprep.subr.bf16.mxu1 %v4190_v29  ;;  %v4260_v13 = vld [vmem:[%s6196_s2 + $0x248] ss:$16 sps:$4 sm:$0xff]   ;;  %v4265_v14 = vld [vmem:[%s6196_s2 + $0x264] ss:$16 sps:$4 sm:$0xff]   ;;  %v4268_v15 = vld [vmem:[%s6196_s2 + $0x26c] ss:$16 sps:$4 sm:$0xff]  }
  0x22   : > { %v4263_v16 = vld [vmem:[%s6196_s2 + $0x260] ss:$16 sps:$4 sm:$0xff]   ;;  %v4266_v17 = vld [vmem:[%s6196_s2 + $0x268] ss:$16 sps:$4 sm:$0xff]   ;;  %s4032_s21 = sadd.s32 32, %s4952_s29 }
  0x23   : > { %v4271_v18 = vld [vmem:[%s6196_s2 + $0x284] ss:$16 sps:$4 sm:$0xff]   ;;  %v4274_v19 = vld [vmem:[%s6196_s2 + $0x28c] ss:$16 sps:$4 sm:$0xff]   ;;  %s5097_s28 = scalar_lea.vmem %s6195_s1, %s4032_s21  ;;  %v4269_v20 = vld [vmem:[%s6196_s2 + $0x280] ss:$16 sps:$4 sm:$0xff]  }
  0x24   : > { %2751 = vmatpush1.bf16.msra.mxu0 %v4192_v30  ;;  %3057 = vmatpush1.bf16.msra.mxu1 %v4193_v31  ;;  %v4272_v21 = vld [vmem:[%s6196_s2 + $0x288] ss:$16 sps:$4 sm:$0xff]   ;;  %v4277_v22 = vld [vmem:[%s6196_s2 + $0x2a4] ss:$16 sps:$4 sm:$0xff]   ;;  %v4280_v23 = vld [vmem:[%s6196_s2 + $0x2ac] ss:$16 sps:$4 sm:$0xff]  }
  0x25   : > { %2752 = vmatprep.subr.bf16.mxu0 %v4194_v32  ;;  %3058 = vmatprep.subr.bf16.mxu1 %v4196_v33  ;;  %v281_v24 = vld [vmem:[%s4970_s16 + $0x20] sm:$0xff]  ;;  %v4278_v31 = vld [vmem:[%s6196_s2 + $0x2a8] ss:$16 sps:$4 sm:$0xff]   ;;  %vm342_vm1 = vsmask.f32 7424 }
  0x26   : > { %v283_v25 = vld [vmem:[%s5097_s28] sm:$0xff]  ;;  %v3632_v26 = vcombine.high %v281_v24, %v281_v24  ;;  %v3631_v28 = vcombine.low %v281_v24, %v281_v24  ;;  %v4359_v24 = vld [vmem:[%s6196_s2 + $0x42c] ss:$16 sps:$4 sm:$0xff]  }
  0x27   : > { %v3636_v27 = vcombine.high %v283_v25, %v283_v25  ;;  %v3635_v29 = vcombine.low %v283_v25, %v283_v25  ;;  %v4275_v30 = vld [vmem:[%s6196_s2 + $0x2a0] ss:$16 sps:$4 sm:$0xff]   ;;  %v355_v25 = vshrl.u32 %v4979_v47, 16 }
  0x28   : > { %2753 = vmatpush1.bf16.msra.mxu0 %v4198_v34  ;;  %3059 = vmatpush1.bf16.msra.mxu1 %v4199_v35  ;;  %v4283_v34 = vld [vmem:[%s6196_s2 + $0x2c4] ss:$16 sps:$4 sm:$0xff]   ;;  %v4286_v35 = vld [vmem:[%s6196_s2 + $0x2cc] ss:$16 sps:$4 sm:$0xff]  }
  0x29   : > { %2754 = vmatprep.subr.bf16.mxu0 %v4200_v36  ;;  %3060 = vmatprep.subr.bf16.mxu1 %v4202_v37  ;;  %v5120_v32 = vsel %vm325_vm0, %v3632_v26, %v3636_v27  ;;  %v5123_v33 = vsel %vm325_vm0, %v3631_v28, %v3635_v29  ;;  %v4281_v36 = vld [vmem:[%s6196_s2 + $0x2c0] ss:$16 sps:$4 sm:$0xff]   ;;  %v4284_v37 = vld [vmem:[%s6196_s2 + $0x2c8] ss:$16 sps:$4 sm:$0xff]  }
  0x2a   : > { %v4354_v27 = vld [vmem:[%s6196_s2 + $0x420] ss:$16 sps:$4 sm:$0xff]   ;;  %v4357_v28 = vld [vmem:[%s6196_s2 + $0x428] ss:$16 sps:$4 sm:$0xff]  }
  0x2c   : > { %2755 = vmatpush1.bf16.msra.mxu0 %v4204_v38  ;;  %3061 = vmatpush1.bf16.msra.mxu1 %v4205_v39  ;;  %v5142_v38 = vld [vmem:[%s4970_s16 + $0xc] ss:$16 sps:$4 sm:$0xff]   ;;  %v4289_v39 = vld [vmem:[%s6196_s2 + $0x2e4] ss:$16 sps:$4 sm:$0xff]  }
  0x2d   : > { %2756 = vmatprep.subr.bf16.mxu0 %v4206_v40  ;;  %3062 = vmatprep.subr.bf16.mxu1 %v4208_v41  ;;  %v4292_v40 = vld [vmem:[%s6196_s2 + $0x2ec] ss:$16 sps:$4 sm:$0xff]   ;;  %v4287_v41 = vld [vmem:[%s6196_s2 + $0x2e0] ss:$16 sps:$4 sm:$0xff]  }
  0x30   : > { %2757 = vmatpush1.bf16.msra.mxu0 %v4210_v42  ;;  %3063 = vmatpush1.bf16.msra.mxu1 %v4211_v43  ;;  %v4290_v42 = vld [vmem:[%s6196_s2 + $0x2e8] ss:$16 sps:$4 sm:$0xff]   ;;  %v4295_v43 = vld [vmem:[%s6196_s2 + $0x304] ss:$16 sps:$4 sm:$0xff]  }
  0x31   : > { %2758 = vmatprep.subr.bf16.mxu0 %v4212_v44  ;;  %3064 = vmatprep.subr.bf16.mxu1 %v4214_v45  ;;  %v4298_v44 = vld [vmem:[%s6196_s2 + $0x30c] ss:$16 sps:$4 sm:$0xff]   ;;  %v4293_v45 = vld [vmem:[%s6196_s2 + $0x300] ss:$16 sps:$4 sm:$0xff]  }
  0x34   : > { %2759 = vmatpush1.bf16.msra.mxu0 %v4216_v46  ;;  %3065 = vmatpush1.bf16.msra.mxu1 %v4217_v48  ;;  %v4296_v46 = vld [vmem:[%s6196_s2 + $0x308] ss:$16 sps:$4 sm:$0xff]   ;;  %v4301_v48 = vld [vmem:[%s6196_s2 + $0x324] ss:$16 sps:$4 sm:$0xff]  }
  0x35   : > { %2760 = vmatprep.subr.bf16.mxu0 %v4218_v49  ;;  %3066 = vmatprep.subr.bf16.mxu1 %v4220_v50  ;;  %v4304_v49 = vld [vmem:[%s6196_s2 + $0x32c] ss:$16 sps:$4 sm:$0xff]   ;;  %v4299_v50 = vld [vmem:[%s6196_s2 + $0x320] ss:$16 sps:$4 sm:$0xff]  }
  0x38   : > { %2761 = vmatpush1.bf16.msra.mxu0 %v4222_v51  ;;  %3067 = vmatpush1.bf16.msra.mxu1 %v4223_v52  ;;  %v4302_v51 = vld [vmem:[%s6196_s2 + $0x328] ss:$16 sps:$4 sm:$0xff]   ;;  %v4307_v52 = vld [vmem:[%s6196_s2 + $0x344] ss:$16 sps:$4 sm:$0xff]  }
  0x39   : > { %2762 = vmatprep.subr.bf16.mxu0 %v4224_v53  ;;  %3068 = vmatprep.subr.bf16.mxu1 %v4226_v54  ;;  %v4310_v53 = vld [vmem:[%s6196_s2 + $0x34c] ss:$16 sps:$4 sm:$0xff]   ;;  %v4305_v54 = vld [vmem:[%s6196_s2 + $0x340] ss:$16 sps:$4 sm:$0xff]  }
  0x3c   : > { %2763 = vmatpush1.bf16.msra.mxu0 %v4228_v55  ;;  %3069 = vmatpush1.bf16.msra.mxu1 %v4229_v56  ;;  %v4308_v55 = vld [vmem:[%s6196_s2 + $0x348] ss:$16 sps:$4 sm:$0xff]   ;;  %v4313_v56 = vld [vmem:[%s6196_s2 + $0x364] ss:$16 sps:$4 sm:$0xff]  }
  0x3d   : > { %2764 = vmatprep.subr.bf16.mxu0 %v4230_v57  ;;  %3070 = vmatprep.subr.bf16.mxu1 %v4232_v58  ;;  %v4316_v57 = vld [vmem:[%s6196_s2 + $0x36c] ss:$16 sps:$4 sm:$0xff]   ;;  %v4311_v58 = vld [vmem:[%s6196_s2 + $0x360] ss:$16 sps:$4 sm:$0xff]  }
  0x40   : > { %2765 = vmatpush1.bf16.msra.mxu0 %v4234_v59  ;;  %3071 = vmatpush1.bf16.msra.mxu1 %v4235_v60  ;;  %v4314_v59 = vld [vmem:[%s6196_s2 + $0x368] ss:$16 sps:$4 sm:$0xff]   ;;  %v4319_v60 = vld [vmem:[%s6196_s2 + $0x384] ss:$16 sps:$4 sm:$0xff]  }
  0x41   : > { %2766 = vmatprep.subr.bf16.mxu0 %v4236_v61  ;;  %3072 = vmatprep.subr.bf16.mxu1 %v4238_v62  ;;  %v4322_v61 = vld [vmem:[%s6196_s2 + $0x38c] ss:$16 sps:$4 sm:$0xff]   ;;  %v4317_v62 = vld [vmem:[%s6196_s2 + $0x380] ss:$16 sps:$4 sm:$0xff]  }
  0x44   : > { %2767 = vmatpush1.bf16.msra.mxu0 %v4240_v63  ;;  %3073 = vmatpush1.bf16.msra.mxu1 %v4241_v0  ;;  %v4320_v63 = vld [vmem:[%s6196_s2 + $0x388] ss:$16 sps:$4 sm:$0xff]   ;;  %v4325_v0 = vld [vmem:[%s6196_s2 + $0x3a4] ss:$16 sps:$4 sm:$0xff]  }
  0x45   : > { %2787 = vmatprep.subr.bf16.mxu0 %v4246_v1  ;;  %3093 = vmatprep.subr.bf16.mxu1 %v4249_v2  ;;  %v4328_v1 = vld [vmem:[%s6196_s2 + $0x3ac] ss:$16 sps:$4 sm:$0xff]   ;;  %v4323_v2 = vld [vmem:[%s6196_s2 + $0x3a0] ss:$16 sps:$4 sm:$0xff]  }
  0x47   : > { %2769 = vmatmul.mubr.bf16.vlgmr.msra.gmra.mrb[0].mxu0 %v5047_v5  ;;  %3075 = vmatmul.mubr.bf16.vlgmr.msra.gmra.mrb[0].mxu1 %v5047_v5 }
  0x48   : > { %2788 = vmatpush1.bf16.msra.mxu0 %v4244_v3  ;;  %3094 = vmatpush1.bf16.msra.mxu1 %v4247_v4  ;;  %v4326_v3 = vld [vmem:[%s6196_s2 + $0x3a8] ss:$16 sps:$4 sm:$0xff]   ;;  %v4333_v4 = vld [vmem:[%s6196_s2 + $0x3c4] ss:$16 sps:$4 sm:$0xff]  }
  0x49   : > { %2789 = vmatprep.subr.bf16.mxu0 %v4253_v6  ;;  %3095 = vmatprep.subr.bf16.mxu1 %v4256_v7  ;;  %v4336_v6 = vld [vmem:[%s6196_s2 + $0x3cc] ss:$16 sps:$4 sm:$0xff]   ;;  %v4331_v7 = vld [vmem:[%s6196_s2 + $0x3c0] ss:$16 sps:$4 sm:$0xff]  }
  0x4a   : > { %2778 = vmatprep.mubr.bf16.mxu0 %v5120_v32  ;;  %3084 = vmatprep.mubr.bf16.mxu1 %v5120_v32 }
  0x4c   : > { %2790 = vmatpush1.bf16.msra.mxu0 %v4251_v8  ;;  %3096 = vmatpush1.bf16.msra.mxu1 %v4254_v9  ;;  %v4334_v8 = vld [vmem:[%s6196_s2 + $0x3c8] ss:$16 sps:$4 sm:$0xff]   ;;  %v4341_v9 = vld [vmem:[%s6196_s2 + $0x3e4] ss:$16 sps:$4 sm:$0xff]  }
  0x4d   : > { %2791 = vmatprep.subr.bf16.mxu0 %v4259_v10  ;;  %3097 = vmatprep.subr.bf16.mxu1 %v4262_v11  ;;  %v4344_v10 = vld [vmem:[%s6196_s2 + $0x3ec] ss:$16 sps:$4 sm:$0xff]   ;;  %v4339_v11 = vld [vmem:[%s6196_s2 + $0x3e0] ss:$16 sps:$4 sm:$0xff]  }
  0x4f   : > { %2779 = vmatmul.mubr.bf16.gmra.mrb[4].mxu0 %v5123_v33  ;;  %3085 = vmatmul.mubr.bf16.gmra.mrb[4].mxu1 %v5123_v33 }
  0x50   : > { %2792 = vmatpush1.bf16.msra.mxu0 %v4257_v12  ;;  %3098 = vmatpush1.bf16.msra.mxu1 %v4260_v13  ;;  %v4342_v12 = vld [vmem:[%s6196_s2 + $0x3e8] ss:$16 sps:$4 sm:$0xff]   ;;  %v4349_v13 = vld [vmem:[%s6196_s2 + $0x404] ss:$16 sps:$4 sm:$0xff]  }
  0x51   : > { %2793 = vmatprep.subr.bf16.mxu0 %v4265_v14  ;;  %3099 = vmatprep.subr.bf16.mxu1 %v4268_v15  ;;  %v4352_v14 = vld [vmem:[%s6196_s2 + $0x40c] ss:$16 sps:$4 sm:$0xff]   ;;  %v4347_v15 = vld [vmem:[%s6196_s2 + $0x400] ss:$16 sps:$4 sm:$0xff]  }
  0x52   : > { %2819 = vmatprep.mubr.bf16.mxu0 %v5142_v38  ;;  %3125 = vmatprep.mubr.bf16.mxu1 %v5142_v38 }
  0x54   : > { %2794 = vmatpush1.bf16.msra.mxu0 %v4263_v16  ;;  %3100 = vmatpush1.bf16.msra.mxu1 %v4266_v17  ;;  %v282_v16 = vld [vmem:[%s4970_s16 + $0x28] sm:$0xff] }
  0x55   : > { %2795 = vmatprep.subr.bf16.mxu0 %v4271_v18  ;;  %3101 = vmatprep.subr.bf16.mxu1 %v4274_v19  ;;  %v284_v17 = vld [vmem:[%s5097_s28 + $0x8] sm:$0xff]  ;;  %v357_v18 = vshll.u32 %v4979_v47, 16  ;;  %v4362_v47 = vld [vmem:[%s6196_s2 + $0x444] ss:$16 sps:$4 sm:$0xff]  }
  0x56   : > { %v4350_v19 = vld [vmem:[%s6196_s2 + $0x408] ss:$16 sps:$4 sm:$0xff]  }
  0x57   : > { %v359_v26 = vrot.slane %v357_v18, 1  ;;  %v4425_v18 = vld [vmem:[%s6196_s2 + $0x58c] ss:$16 sps:$4 sm:$0xff]  }
  0x58   : > { %2796 = vmatpush1.bf16.msra.mxu0 %v4269_v20  ;;  %3102 = vmatpush1.bf16.msra.mxu1 %v4272_v21  ;;  %v5270_v20 = vld [vmem:[%s4970_s16 + $0x8] ss:$16 sps:$4 sm:$0xff]   ;;  %v3634_v21 = vcombine.high %v282_v16, %v282_v16 }
  0x59   : > { %2797 = vmatprep.subr.bf16.mxu0 %v4277_v22  ;;  %3103 = vmatprep.subr.bf16.mxu1 %v4280_v23  ;;  %v3638_v22 = vcombine.high %v284_v17, %v284_v17  ;;  %v4356_v23 = vld [vmem:[%s6196_s2 + $0x424] ss:$16 sps:$4 sm:$0xff]  }
  0x5b   : > { %v5288_v29 = vsel %vm325_vm0, %v3634_v21, %v3638_v22  ;;  %v4423_v21 = vld [vmem:[%s6196_s2 + $0x588] ss:$16 sps:$4 sm:$0xff]   ;;  %v4428_v22 = vld [vmem:[%s6196_s2 + $0x5a4] ss:$16 sps:$4 sm:$0xff]  }
  0x5c   : > { %2798 = vmatpush1.bf16.msra.mxu0 %v4275_v30  ;;  %3104 = vmatpush1.bf16.msra.mxu1 %v4278_v31  ;;  %v361_v30 = vshll.u32 %v5120_v32, 16  ;;  %v3633_v31 = vcombine.low %v282_v16, %v282_v16  ;;  %v4417_v16 = vld [vmem:[%s6196_s2 + $0x568] ss:$16 sps:$4 sm:$0xff]  }
  0x5d   : > { %2799 = vmatprep.subr.bf16.mxu0 %v4283_v34  ;;  %3105 = vmatprep.subr.bf16.mxu1 %v4286_v35  ;;  %v3637_v34 = vcombine.low %v284_v17, %v284_v17  ;;  %v4365_v35 = vld [vmem:[%s6196_s2 + $0x44c] ss:$16 sps:$4 sm:$0xff]   ;;  %v4422_v17 = vld [vmem:[%s6196_s2 + $0x584] ss:$16 sps:$4 sm:$0xff]  }
  0x60   : > { %2800 = vmatpush1.bf16.msra.mxu0 %v4281_v36  ;;  %3106 = vmatpush1.bf16.msra.mxu1 %v4284_v37  ;;  %v4360_v36 = vld [vmem:[%s6196_s2 + $0x440] ss:$16 sps:$4 sm:$0xff]   ;;  %v4363_v37 = vld [vmem:[%s6196_s2 + $0x448] ss:$16 sps:$4 sm:$0xff]  }
  0x61   : > { %2801 = vmatprep.subr.bf16.mxu0 %v4289_v39  ;;  %3107 = vmatprep.subr.bf16.mxu1 %v4292_v40  ;;  %v360_v39 = vor.u32 %v359_v26, %v355_v25  ;;  %v5305_v40 = vrot.slane %v361_v30, 1  ;;  %v4429_v25 = vld [vmem:[%s6196_s2 + $0x5a8] ss:$16 sps:$4 sm:$0xff]   ;;  %v4436_v26 = vld [vmem:[%s6196_s2 + $0x5c4] ss:$16 sps:$4 sm:$0xff]  }
  0x62   : > { %v4434_v30 = vld [vmem:[%s6196_s2 + $0x5c0] ss:$16 sps:$4 sm:$0xff]  }
  0x64   : > { %2802 = vmatpush1.bf16.msra.mxu0 %v4287_v41  ;;  %3108 = vmatpush1.bf16.msra.mxu1 %v4290_v42  ;;  %v4368_v41 = vld [vmem:[%s6196_s2 + $0x464] ss:$16 sps:$4 sm:$0xff]   ;;  %v5311_v42 = vsel %vm325_vm0, %v3633_v31, %v3637_v34  ;;  %v344_v31 = vshrl.u32 %v5047_v5, 16 }
  0x65   : > { %2803 = vmatprep.subr.bf16.mxu0 %v4295_v43  ;;  %3109 = vmatprep.subr.bf16.mxu1 %v4298_v44  ;;  %v4371_v43 = vld [vmem:[%s6196_s2 + $0x46c] ss:$16 sps:$4 sm:$0xff]   ;;  %v4366_v44 = vld [vmem:[%s6196_s2 + $0x460] ss:$16 sps:$4 sm:$0xff]   ;;  %v4444_v34 = vld [vmem:[%s6196_s2 + $0x5e4] ss:$16 sps:$4 sm:$0xff]  }
  0x68   : > { %2804 = vmatpush1.bf16.msra.mxu0 %v4293_v45  ;;  %3110 = vmatpush1.bf16.msra.mxu1 %v4296_v46  ;;  %v4369_v45 = vld [vmem:[%s6196_s2 + $0x468] ss:$16 sps:$4 sm:$0xff]   ;;  %v364_v46 = vsel %vm342_vm1, %v360_v39, %v5305_v40  ;;  %v4442_v39 = vld [vmem:[%s6196_s2 + $0x5e0] ss:$16 sps:$4 sm:$0xff]  }
  0x69   : > { %2805 = vmatprep.subr.bf16.mxu0 %v4301_v48  ;;  %3111 = vmatprep.subr.bf16.mxu1 %v4304_v49  ;;  %v4374_v48 = vld [vmem:[%s6196_s2 + $0x484] ss:$16 sps:$4 sm:$0xff]   ;;  %v4377_v49 = vld [vmem:[%s6196_s2 + $0x48c] ss:$16 sps:$4 sm:$0xff]  }
  0x6c   : > { %2806 = vmatpush1.bf16.msra.mxu0 %v4299_v50  ;;  %3112 = vmatpush1.bf16.msra.mxu1 %v4302_v51  ;;  %v4372_v50 = vld [vmem:[%s6196_s2 + $0x480] ss:$16 sps:$4 sm:$0xff]   ;;  %v4375_v51 = vld [vmem:[%s6196_s2 + $0x488] ss:$16 sps:$4 sm:$0xff]  }
  0x6d   : > { %2807 = vmatprep.subr.bf16.mxu0 %v4307_v52  ;;  %3113 = vmatprep.subr.bf16.mxu1 %v4310_v53  ;;  %v4380_v52 = vld [vmem:[%s6196_s2 + $0x4a4] ss:$16 sps:$4 sm:$0xff]   ;;  %v4383_v53 = vld [vmem:[%s6196_s2 + $0x4ac] ss:$16 sps:$4 sm:$0xff]  }
  0x70   : > { %2808 = vmatpush1.bf16.msra.mxu0 %v4305_v54  ;;  %3114 = vmatpush1.bf16.msra.mxu1 %v4308_v55  ;;  %v4378_v54 = vld [vmem:[%s6196_s2 + $0x4a0] ss:$16 sps:$4 sm:$0xff]   ;;  %v4381_v55 = vld [vmem:[%s6196_s2 + $0x4a8] ss:$16 sps:$4 sm:$0xff]  }
  0x71   : > { %2809 = vmatprep.subr.bf16.mxu0 %v4313_v56  ;;  %3115 = vmatprep.subr.bf16.mxu1 %v4316_v57  ;;  %v4386_v56 = vld [vmem:[%s6196_s2 + $0x4c4] ss:$16 sps:$4 sm:$0xff]   ;;  %v4389_v57 = vld [vmem:[%s6196_s2 + $0x4cc] ss:$16 sps:$4 sm:$0xff]  }
  0x74   : > { %2810 = vmatpush1.bf16.msra.mxu0 %v4311_v58  ;;  %3116 = vmatpush1.bf16.msra.mxu1 %v4314_v59  ;;  %v4384_v58 = vld [vmem:[%s6196_s2 + $0x4c0] ss:$16 sps:$4 sm:$0xff]   ;;  %v4387_v59 = vld [vmem:[%s6196_s2 + $0x4c8] ss:$16 sps:$4 sm:$0xff]  }
  0x75   : > { %2811 = vmatprep.subr.bf16.mxu0 %v4319_v60  ;;  %3117 = vmatprep.subr.bf16.mxu1 %v4322_v61  ;;  %v4392_v60 = vld [vmem:[%s6196_s2 + $0x4e4] ss:$16 sps:$4 sm:$0xff]   ;;  %v4395_v61 = vld [vmem:[%s6196_s2 + $0x4ec] ss:$16 sps:$4 sm:$0xff]  }
  0x78   : > { %2812 = vmatpush1.bf16.msra.mxu0 %v4317_v62  ;;  %3118 = vmatpush1.bf16.msra.mxu1 %v4320_v63  ;;  %v4390_v62 = vld [vmem:[%s6196_s2 + $0x4e0] ss:$16 sps:$4 sm:$0xff]   ;;  %v4393_v63 = vld [vmem:[%s6196_s2 + $0x4e8] ss:$16 sps:$4 sm:$0xff]  }
  0x79   : > { %2813 = vmatprep.subr.bf16.mxu0 %v4325_v0  ;;  %3119 = vmatprep.subr.bf16.mxu1 %v4328_v1  ;;  %v4398_v0 = vld [vmem:[%s6196_s2 + $0x504] ss:$16 sps:$4 sm:$0xff]   ;;  %v4401_v1 = vld [vmem:[%s6196_s2 + $0x50c] ss:$16 sps:$4 sm:$0xff]  }
  0x7c   : > { %2814 = vmatpush1.bf16.msra.mxu0 %v4323_v2  ;;  %3120 = vmatpush1.bf16.msra.mxu1 %v4326_v3  ;;  %v4396_v2 = vld [vmem:[%s6196_s2 + $0x500] ss:$16 sps:$4 sm:$0xff]   ;;  %v4399_v3 = vld [vmem:[%s6196_s2 + $0x508] ss:$16 sps:$4 sm:$0xff]  }
  0x7d   : > { %2815 = vmatprep.subr.bf16.mxu0 %v4333_v4  ;;  %3121 = vmatprep.subr.bf16.mxu1 %v4336_v6  ;;  %v4404_v4 = vld [vmem:[%s6196_s2 + $0x524] ss:$16 sps:$4 sm:$0xff]   ;;  %v4407_v6 = vld [vmem:[%s6196_s2 + $0x52c] ss:$16 sps:$4 sm:$0xff]  }
  0x80   : > { %2816 = vmatpush1.bf16.msra.mxu0 %v4331_v7  ;;  %3122 = vmatpush1.bf16.msra.mxu1 %v4334_v8  ;;  %v4402_v7 = vld [vmem:[%s6196_s2 + $0x520] ss:$16 sps:$4 sm:$0xff]   ;;  %v4405_v8 = vld [vmem:[%s6196_s2 + $0x528] ss:$16 sps:$4 sm:$0xff]  }
  0x81   : > { %2817 = vmatprep.subr.bf16.mxu0 %v4341_v9  ;;  %3123 = vmatprep.subr.bf16.mxu1 %v4344_v10  ;;  %v4410_v9 = vld [vmem:[%s6196_s2 + $0x544] ss:$16 sps:$4 sm:$0xff]   ;;  %v4413_v10 = vld [vmem:[%s6196_s2 + $0x54c] ss:$16 sps:$4 sm:$0xff]  }
  0x84   : > { %2818 = vmatpush1.bf16.msra.mxu0 %v4339_v11  ;;  %3124 = vmatpush1.bf16.msra.mxu1 %v4342_v12  ;;  %v4408_v11 = vld [vmem:[%s6196_s2 + $0x540] ss:$16 sps:$4 sm:$0xff]   ;;  %v4411_v12 = vld [vmem:[%s6196_s2 + $0x548] ss:$16 sps:$4 sm:$0xff]  }
  0x85   : > { %2838 = vmatprep.subr.bf16.mxu0 %v4349_v13  ;;  %3144 = vmatprep.subr.bf16.mxu1 %v4352_v14  ;;  %v4416_v13 = vld [vmem:[%s6196_s2 + $0x564] ss:$16 sps:$4 sm:$0xff]   ;;  %v4419_v14 = vld [vmem:[%s6196_s2 + $0x56c] ss:$16 sps:$4 sm:$0xff]  }
  0x87   : > { %2820 = vmatmul.mubr.bf16.vlgmr.msra.gmra.mrb[0].mxu0 %v5270_v20  ;;  %3126 = vmatmul.mubr.bf16.vlgmr.msra.gmra.mrb[0].mxu1 %v5270_v20 }
  0x88   : > { %2839 = vmatpush1.bf16.msra.mxu0 %v4347_v15  ;;  %3145 = vmatpush1.bf16.msra.mxu1 %v4350_v19  ;;  %v4414_v15 = vld [vmem:[%s6196_s2 + $0x560] ss:$16 sps:$4 sm:$0xff]  }
  0x89   : > { %2840 = vmatprep.subr.bf16.mxu0 %v4356_v23  ;;  %3146 = vmatprep.subr.bf16.mxu1 %v4359_v24  ;;  %v4420_v19 = vld [vmem:[%s6196_s2 + $0x580] ss:$16 sps:$4 sm:$0xff]   ;;  %v4431_v23 = vld [vmem:[%s6196_s2 + $0x5ac] ss:$16 sps:$4 sm:$0xff]  }
  0x8a   : > { %2829 = vmatprep.mubr.bf16.mxu0 %v5288_v29  ;;  %3135 = vmatprep.mubr.bf16.mxu1 %v5288_v29  ;;  %v4426_v24 = vld [vmem:[%s6196_s2 + $0x5a0] ss:$16 sps:$4 sm:$0xff]  }
  0x8c   : > { %2841 = vmatpush1.bf16.msra.mxu0 %v4354_v27  ;;  %3147 = vmatpush1.bf16.msra.mxu1 %v4357_v28  ;;  %v346_v27 = vshll.u32 %v5047_v5, 16  ;;  %v4439_v28 = vld [vmem:[%s6196_s2 + $0x5cc] ss:$16 sps:$4 sm:$0xff]   ;;  %v4445_v5 = vld [vmem:[%s6196_s2 + $0x5e8] ss:$16 sps:$4 sm:$0xff]  }
  0x8d   : > { %2842 = vmatprep.subr.bf16.mxu0 %v4362_v47  ;;  %3148 = vmatprep.subr.bf16.mxu1 %v4365_v35  ;;  %v4437_v47 = vld [vmem:[%s6196_s2 + $0x5c8] ss:$16 sps:$4 sm:$0xff]  }
  0x8e   : > { %v348_v35 = vrot.slane %v346_v27, 1  ;;  %v4496_v27 = vld [vmem:[%s6196_s2 + $0x700] ss:$16 sps:$4 sm:$0xff]  }
  0x8f   : > { %2830 = vmatmul.mubr.bf16.gmra.mrb[4].mxu0 %v5311_v42  ;;  %3136 = vmatmul.mubr.bf16.gmra.mrb[4].mxu1 %v5311_v42 }
  0x90   : > { %2843 = vmatpush1.bf16.msra.mxu0 %v4360_v36  ;;  %3149 = vmatpush1.bf16.msra.mxu1 %v4363_v37  ;;  %v350_v36 = vshll.u32 %v5123_v33, 16  ;;  %v4447_v37 = vld [vmem:[%s6196_s2 + $0x5ec] ss:$16 sps:$4 sm:$0xff]  }
  0x91   : > { %2844 = vmatprep.subr.bf16.mxu0 %v4368_v41  ;;  %3150 = vmatprep.subr.bf16.mxu1 %v4371_v43  ;;  %v4450_v41 = vld [vmem:[%s6196_s2 + $0x604] ss:$16 sps:$4 sm:$0xff]   ;;  %v349_v43 = vor.u32 %v348_v35, %v344_v31  ;;  %v4502_v31 = vld [vmem:[%s6196_s2 + $0x720] ss:$16 sps:$4 sm:$0xff]  }
  0x92   : > { %2870 = vmatprep.mubr.bf16.mxu0 %v364_v46  ;;  %3176 = vmatprep.mubr.bf16.mxu1 %v364_v46  ;;  %v390_v46 = vshrl.u32 %v5120_v32, 16  ;;  %v4510_v35 = vld [vmem:[%s6196_s2 + $0x744] ss:$16 sps:$4 sm:$0xff]  }
  0x94   : > { %2845 = vmatpush1.bf16.msra.mxu0 %v4366_v44  ;;  %3151 = vmatpush1.bf16.msra.mxu1 %v4369_v45  ;;  %v352_v44 = vrot.slane %v350_v36, 1  ;;  %v4453_v45 = vld [vmem:[%s6196_s2 + $0x60c] ss:$16 sps:$4 sm:$0xff]  }
  0x95   : > { %2846 = vmatprep.subr.bf16.mxu0 %v4374_v48  ;;  %3152 = vmatprep.subr.bf16.mxu1 %v4377_v49  ;;  %v379_v48 = vshll.u32 %v5142_v38, 16  ;;  %v4448_v49 = vld [vmem:[%s6196_s2 + $0x600] ss:$16 sps:$4 sm:$0xff]   ;;  %v4513_v36 = vld [vmem:[%s6196_s2 + $0x74c] ss:$16 sps:$4 sm:$0xff]  }
  0x98   : > { %2847 = vmatpush1.bf16.msra.mxu0 %v4372_v50  ;;  %3153 = vmatpush1.bf16.msra.mxu1 %v4375_v51  ;;  %v4451_v50 = vld [vmem:[%s6196_s2 + $0x608] ss:$16 sps:$4 sm:$0xff]   ;;  %v353_v51 = vsel %vm342_vm1, %v349_v43, %v352_v44  ;;  %v4514_v43 = vld [vmem:[%s6196_s2 + $0x760] ss:$16 sps:$4 sm:$0xff]  }
  0x99   : > { %2848 = vmatprep.subr.bf16.mxu0 %v4380_v52  ;;  %3154 = vmatprep.subr.bf16.mxu1 %v4383_v53  ;;  %v4456_v52 = vld [vmem:[%s6196_s2 + $0x624] ss:$16 sps:$4 sm:$0xff]   ;;  %v4459_v53 = vld [vmem:[%s6196_s2 + $0x62c] ss:$16 sps:$4 sm:$0xff]  }
  0x9c   : > { %2849 = vmatpush1.bf16.msra.mxu0 %v4378_v54  ;;  %3155 = vmatpush1.bf16.msra.mxu1 %v4381_v55  ;;  %v392_v54 = vor.u32 %v390_v46, %v5305_v40  ;;  %v387_v55 = vshrl.u32 %v5123_v33, 16  ;;  %v4462_v40 = vld [vmem:[%s6196_s2 + $0x644] ss:$16 sps:$4 sm:$0xff]   ;;  %v4525_v46 = vld [vmem:[%s6196_s2 + $0x78c] ss:$16 sps:$4 sm:$0xff]  }
  0x9d   : > { %2850 = vmatprep.subr.bf16.mxu0 %v4386_v56  ;;  %3156 = vmatprep.subr.bf16.mxu1 %v4389_v57  ;;  %v377_v56 = vshrl.u32 %v5142_v38, 16  ;;  %v381_v57 = vrot.slane %v379_v48, 1  ;;  %v4465_v38 = vld [vmem:[%s6196_s2 + $0x64c] ss:$16 sps:$4 sm:$0xff]   ;;  %v4520_v48 = vld [vmem:[%s6196_s2 + $0x780] ss:$16 sps:$4 sm:$0xff]  }
  0xa0   : > { %2851 = vmatpush1.bf16.msra.mxu0 %v4384_v58  ;;  %3157 = vmatpush1.bf16.msra.mxu1 %v4387_v59  ;;  %v4454_v58 = vld [vmem:[%s6196_s2 + $0x620] ss:$16 sps:$4 sm:$0xff]   ;;  %v4457_v59 = vld [vmem:[%s6196_s2 + $0x628] ss:$16 sps:$4 sm:$0xff]  }
  0xa1   : > { %2852 = vmatprep.subr.bf16.mxu0 %v4392_v60  ;;  %3158 = vmatprep.subr.bf16.mxu1 %v4395_v61  ;;  %v383_v60 = vshll.u32 %v5288_v29, 16  ;;  %v4460_v61 = vld [vmem:[%s6196_s2 + $0x640] ss:$16 sps:$4 sm:$0xff]  }
  0xa4   : > { %2853 = vmatpush1.bf16.msra.mxu0 %v4390_v62  ;;  %3159 = vmatpush1.bf16.msra.mxu1 %v4393_v63  ;;  %v4463_v62 = vld [vmem:[%s6196_s2 + $0x648] ss:$16 sps:$4 sm:$0xff]   ;;  %v389_v63 = vor.u32 %v387_v55, %v352_v44  ;;  %v368_v55 = vshll.u32 %v5270_v20, 16 }
  0xa5   : > { %2854 = vmatprep.subr.bf16.mxu0 %v4398_v0  ;;  %3160 = vmatprep.subr.bf16.mxu1 %v4401_v1  ;;  %v382_v0 = vor.u32 %v381_v57, %v377_v56  ;;  %v5516_v1 = vrot.slane %v383_v60, 1  ;;  %v4517_v44 = vld [vmem:[%s6196_s2 + $0x768] ss:$16 sps:$4 sm:$0xff]   ;;  %v4537_v56 = vld [vmem:[%s6196_s2 + $0x7cc] ss:$16 sps:$4 sm:$0xff]  }
  0xa6   : > { %v4532_v57 = vld [vmem:[%s6196_s2 + $0x7c0] ss:$16 sps:$4 sm:$0xff]   ;;  %v4540_v60 = vld [vmem:[%s6196_s2 + $0x7e4] ss:$16 sps:$4 sm:$0xff]  }
  0xa8   : > { %2855 = vmatpush1.bf16.msra.mxu0 %v4396_v2  ;;  %3161 = vmatpush1.bf16.msra.mxu1 %v4399_v3  ;;  %v4468_v2 = vld [vmem:[%s6196_s2 + $0x664] ss:$16 sps:$4 sm:$0xff]   ;;  %v4471_v3 = vld [vmem:[%s6196_s2 + $0x66c] ss:$16 sps:$4 sm:$0xff]  }
  0xa9   : > { %2856 = vmatprep.subr.bf16.mxu0 %v4404_v4  ;;  %3162 = vmatprep.subr.bf16.mxu1 %v4407_v6  ;;  %v4466_v4 = vld [vmem:[%s6196_s2 + $0x660] ss:$16 sps:$4 sm:$0xff]   ;;  %v4469_v6 = vld [vmem:[%s6196_s2 + $0x668] ss:$16 sps:$4 sm:$0xff]  }
  0xac   : > { %2857 = vmatpush1.bf16.msra.mxu0 %v4402_v7  ;;  %3163 = vmatpush1.bf16.msra.mxu1 %v4405_v8  ;;  %v386_v7 = vsel %vm342_vm1, %v382_v0, %v5516_v1  ;;  %v4474_v8 = vld [vmem:[%s6196_s2 + $0x684] ss:$16 sps:$4 sm:$0xff]  }
  0xad   : > { %2858 = vmatprep.subr.bf16.mxu0 %v4410_v9  ;;  %3164 = vmatprep.subr.bf16.mxu1 %v4413_v10  ;;  %v4477_v9 = vld [vmem:[%s6196_s2 + $0x68c] ss:$16 sps:$4 sm:$0xff]   ;;  %v4472_v10 = vld [vmem:[%s6196_s2 + $0x680] ss:$16 sps:$4 sm:$0xff]  }
  0xb0   : > { %2859 = vmatpush1.bf16.msra.mxu0 %v4408_v11  ;;  %3165 = vmatpush1.bf16.msra.mxu1 %v4411_v12  ;;  %v4475_v11 = vld [vmem:[%s6196_s2 + $0x688] ss:$16 sps:$4 sm:$0xff]   ;;  %v4480_v12 = vld [vmem:[%s6196_s2 + $0x6a4] ss:$16 sps:$4 sm:$0xff]  }
  0xb1   : > { %2860 = vmatprep.subr.bf16.mxu0 %v4416_v13  ;;  %3166 = vmatprep.subr.bf16.mxu1 %v4419_v14  ;;  %v4483_v13 = vld [vmem:[%s6196_s2 + $0x6ac] ss:$16 sps:$4 sm:$0xff]   ;;  %v4478_v14 = vld [vmem:[%s6196_s2 + $0x6a0] ss:$16 sps:$4 sm:$0xff]  }
  0xb4   : > { %2861 = vmatpush1.bf16.msra.mxu0 %v4414_v15  ;;  %3167 = vmatpush1.bf16.msra.mxu1 %v4417_v16  ;;  %v4481_v15 = vld [vmem:[%s6196_s2 + $0x6a8] ss:$16 sps:$4 sm:$0xff]   ;;  %v4486_v16 = vld [vmem:[%s6196_s2 + $0x6c4] ss:$16 sps:$4 sm:$0xff]  }
  0xb5   : > { %2862 = vmatprep.subr.bf16.mxu0 %v4422_v17  ;;  %3168 = vmatprep.subr.bf16.mxu1 %v4425_v18  ;;  %v4489_v17 = vld [vmem:[%s6196_s2 + $0x6cc] ss:$16 sps:$4 sm:$0xff]   ;;  %v4484_v18 = vld [vmem:[%s6196_s2 + $0x6c0] ss:$16 sps:$4 sm:$0xff]  }
  0xb8   : > { %2863 = vmatpush1.bf16.msra.mxu0 %v4420_v19  ;;  %3169 = vmatpush1.bf16.msra.mxu1 %v4423_v21  ;;  %v4487_v19 = vld [vmem:[%s6196_s2 + $0x6c8] ss:$16 sps:$4 sm:$0xff]   ;;  %v4492_v21 = vld [vmem:[%s6196_s2 + $0x6e4] ss:$16 sps:$4 sm:$0xff]  }
  0xb9   : > { %2864 = vmatprep.subr.bf16.mxu0 %v4428_v22  ;;  %3170 = vmatprep.subr.bf16.mxu1 %v4431_v23  ;;  %v4495_v22 = vld [vmem:[%s6196_s2 + $0x6ec] ss:$16 sps:$4 sm:$0xff]   ;;  %v4490_v23 = vld [vmem:[%s6196_s2 + $0x6e0] ss:$16 sps:$4 sm:$0xff]  }
  0xbc   : > { %2865 = vmatpush1.bf16.msra.mxu0 %v4426_v24  ;;  %3171 = vmatpush1.bf16.msra.mxu1 %v4429_v25  ;;  %v4493_v24 = vld [vmem:[%s6196_s2 + $0x6e8] ss:$16 sps:$4 sm:$0xff]   ;;  %v4498_v25 = vld [vmem:[%s6196_s2 + $0x704] ss:$16 sps:$4 sm:$0xff]  }
  0xbd   : > { %2866 = vmatprep.subr.bf16.mxu0 %v4436_v26  ;;  %3172 = vmatprep.subr.bf16.mxu1 %v4439_v28  ;;  %v4501_v26 = vld [vmem:[%s6196_s2 + $0x70c] ss:$16 sps:$4 sm:$0xff]   ;;  %v4499_v28 = vld [vmem:[%s6196_s2 + $0x708] ss:$16 sps:$4 sm:$0xff]  }
  0xc0   : > { %2867 = vmatpush1.bf16.msra.mxu0 %v4434_v30  ;;  %3173 = vmatpush1.bf16.msra.mxu1 %v4437_v47  ;;  %v4504_v30 = vld [vmem:[%s6196_s2 + $0x724] ss:$16 sps:$4 sm:$0xff]   ;;  %v4507_v47 = vld [vmem:[%s6196_s2 + $0x72c] ss:$16 sps:$4 sm:$0xff]  }
  0xc1   : > { %2868 = vmatprep.subr.bf16.mxu0 %v4444_v34  ;;  %3174 = vmatprep.subr.bf16.mxu1 %v4447_v37  ;;  %v4505_v34 = vld [vmem:[%s6196_s2 + $0x728] ss:$16 sps:$4 sm:$0xff]   ;;  %v4508_v37 = vld [vmem:[%s6196_s2 + $0x740] ss:$16 sps:$4 sm:$0xff]  }
  0xc4   : > { %2869 = vmatpush1.bf16.msra.mxu0 %v4442_v39  ;;  %3175 = vmatpush1.bf16.msra.mxu1 %v4445_v5  ;;  %v4511_v39 = vld [vmem:[%s6196_s2 + $0x748] ss:$16 sps:$4 sm:$0xff]   ;;  %v4516_v5 = vld [vmem:[%s6196_s2 + $0x764] ss:$16 sps:$4 sm:$0xff]  }
  0xc5   : > { %2889 = vmatprep.subr.bf16.mxu0 %v4450_v41  ;;  %3195 = vmatprep.subr.bf16.mxu1 %v4453_v45  ;;  %v4519_v41 = vld [vmem:[%s6196_s2 + $0x76c] ss:$16 sps:$4 sm:$0xff]   ;;  %v4522_v45 = vld [vmem:[%s6196_s2 + $0x784] ss:$16 sps:$4 sm:$0xff]  }
  0xc7   : > { %2871 = vmatmul.mubr.bf16.vlgmr.msra.gmra.mrb[0].mxu0 %v353_v51  ;;  %3177 = vmatmul.mubr.bf16.vlgmr.msra.gmra.mrb[0].mxu1 %v353_v51  ;;  %v4531_v51 = vld [vmem:[%s6196_s2 + $0x7ac] ss:$16 sps:$4 sm:$0xff]  }
  0xc8   : > { %2890 = vmatpush1.bf16.msra.mxu0 %v4448_v49  ;;  %3196 = vmatpush1.bf16.msra.mxu1 %v4451_v50  ;;  %v4523_v49 = vld [vmem:[%s6196_s2 + $0x788] ss:$16 sps:$4 sm:$0xff]   ;;  %v4528_v50 = vld [vmem:[%s6196_s2 + $0x7a4] ss:$16 sps:$4 sm:$0xff]  }
  0xc9   : > { %2891 = vmatprep.subr.bf16.mxu0 %v4456_v52  ;;  %3197 = vmatprep.subr.bf16.mxu1 %v4459_v53  ;;  %v4526_v52 = vld [vmem:[%s6196_s2 + $0x7a0] ss:$16 sps:$4 sm:$0xff]   ;;  %v4529_v53 = vld [vmem:[%s6196_s2 + $0x7a8] ss:$16 sps:$4 sm:$0xff]  }
  0xca   : > { %2880 = vmatprep.mubr.bf16.mxu0 %v392_v54  ;;  %3186 = vmatprep.mubr.bf16.mxu1 %v392_v54  ;;  %v4534_v54 = vld [vmem:[%s6196_s2 + $0x7c4] ss:$16 sps:$4 sm:$0xff]  }
  0xcc   : > { %2892 = vmatpush1.bf16.msra.mxu0 %v4454_v58  ;;  %3198 = vmatpush1.bf16.msra.mxu1 %v4457_v59  ;;  %v4535_v58 = vld [vmem:[%s6196_s2 + $0x7c8] ss:$16 sps:$4 sm:$0xff]   ;;  %v366_v59 = vshrl.u32 %v5270_v20, 16 }
  0xcd   : > { %2893 = vmatprep.subr.bf16.mxu0 %v4462_v40  ;;  %3199 = vmatprep.subr.bf16.mxu1 %v4465_v38  ;;  %v370_v40 = vrot.slane %v368_v55, 1  ;;  %v372_v38 = vshll.u32 %v5311_v42, 16  ;;  %v4541_v20 = vld [vmem:[%s6196_s2 + $0x7e8] ss:$16 sps:$4 sm:$0xff]  }
  0xce   : > { %v4601_v55 = vld [vmem:[%s6196_s2 + $0x928] ss:$16 sps:$4 sm:$0xff]  }
  0xcf   : > { %2881 = vmatmul.mubr.bf16.gmra.mrb[4].mxu0 %v389_v63  ;;  %3187 = vmatmul.mubr.bf16.gmra.mrb[4].mxu1 %v389_v63  ;;  %v4546_v63 = vld [vmem:[%s6196_s2 + $0x804] ss:$16 sps:$4 sm:$0xff]   ;;  %v371_v0 = vor.u32 %v370_v40, %v366_v59  ;;  %v4607_v59 = vld [vmem:[%s6196_s2 + $0x948] ss:$16 sps:$4 sm:$0xff]   ;;  %v4615_v40 = vld [vmem:[%s6196_s2 + $0x96c] ss:$16 sps:$4 sm:$0xff]  }
  0xd0   : > { %2894 = vmatpush1.bf16.msra.mxu0 %v4460_v61  ;;  %3200 = vmatpush1.bf16.msra.mxu1 %v4463_v62  ;;  %v4543_v61 = vld [vmem:[%s6196_s2 + $0x7ec] ss:$16 sps:$4 sm:$0xff]   ;;  %v4538_v62 = vld [vmem:[%s6196_s2 + $0x7e0] ss:$16 sps:$4 sm:$0xff]  }
  0xd1   : > { %2895 = vmatprep.subr.bf16.mxu0 %v4468_v2  ;;  %3201 = vmatprep.subr.bf16.mxu1 %v4471_v3  ;;  %v374_v2 = vrot.slane %v372_v38, 1  ;;  %v4549_v3 = vld [vmem:[%s6196_s2 + $0x80c] ss:$16 sps:$4 sm:$0xff]   ;;  %v4610_v38 = vld [vmem:[%s6196_s2 + $0x960] ss:$16 sps:$4 sm:$0xff]  }
  0xd2   : > { %2921 = vmatprep.mubr.bf16.mxu0 %v386_v7  ;;  %3227 = vmatprep.mubr.bf16.mxu1 %v386_v7  ;;  %v4547_v7 = vld [vmem:[%s6196_s2 + $0x808] ss:$16 sps:$4 sm:$0xff]  }
  0xd4   : > { %2896 = vmatpush1.bf16.msra.mxu0 %v4466_v4  ;;  %3202 = vmatpush1.bf16.msra.mxu1 %v4469_v6  ;;  %v396_v4 = vshrl.u32 %v5288_v29, 16  ;;  %v4544_v6 = vld [vmem:[%s6196_s2 + $0x800] ss:$16 sps:$4 sm:$0xff]  }
  0xd5   : > { %2897 = vmatprep.subr.bf16.mxu0 %v4474_v8  ;;  %3203 = vmatprep.subr.bf16.mxu1 %v4477_v9  ;;  %v375_v8 = vsel %vm342_vm1, %v371_v0, %v374_v2  ;;  %v4552_v9 = vld [vmem:[%s6196_s2 + $0x824] ss:$16 sps:$4 sm:$0xff]   ;;  %v4619_v0 = vld [vmem:[%s6196_s2 + $0x988] ss:$16 sps:$4 sm:$0xff]  }
  0xd8   : > { %2898 = vmatpush1.bf16.msra.mxu0 %v4472_v10  ;;  %3204 = vmatpush1.bf16.msra.mxu1 %v4475_v11  ;;  %v4555_v10 = vld [vmem:[%s6196_s2 + $0x82c] ss:$16 sps:$4 sm:$0xff]   ;;  %v398_v11 = vor.u32 %v396_v4, %v5516_v1  ;;  %v4558_v1 = vld [vmem:[%s6196_s2 + $0x844] ss:$16 sps:$4 sm:$0xff]   ;;  %v4622_v4 = vld [vmem:[%s6196_s2 + $0x9a0] ss:$16 sps:$4 sm:$0xff]  }
  0xd9   : > { %2899 = vmatprep.subr.bf16.mxu0 %v4480_v12  ;;  %3205 = vmatprep.subr.bf16.mxu1 %v4483_v13  ;;  %v393_v12 = vshrl.u32 %v5311_v42, 16  ;;  %v4550_v13 = vld [vmem:[%s6196_s2 + $0x820] ss:$16 sps:$4 sm:$0xff]  }
  0xdc   : > { %2900 = vmatpush1.bf16.msra.mxu0 %v4478_v14  ;;  %3206 = vmatpush1.bf16.msra.mxu1 %v4481_v15  ;;  %v4553_v14 = vld [vmem:[%s6196_s2 + $0x828] ss:$16 sps:$4 sm:$0xff]   ;;  %v4561_v15 = vld [vmem:[%s6196_s2 + $0x84c] ss:$16 sps:$4 sm:$0xff]  }
  0xdd   : > { %2901 = vmatprep.subr.bf16.mxu0 %v4486_v16  ;;  %3207 = vmatprep.subr.bf16.mxu1 %v4489_v17  ;;  %v395_v16 = vor.u32 %v393_v12, %v374_v2  ;;  %v4760_v17 = vld [vmem:[%s4970_s16 + $0x4] ss:$16 sps:$4 sm:$0xff]   ;;  %v4639_v12 = vld [vmem:[%s6196_s2 + $0x9ec] ss:$16 sps:$4 sm:$0xff]  }
  0xde   : > { %v4624_v2 = vld [vmem:[%s6196_s2 + $0x9a4] ss:$16 sps:$4 sm:$0xff]  }
  0xe0   : > { %2902 = vmatpush1.bf16.msra.mxu0 %v4484_v18  ;;  %3208 = vmatpush1.bf16.msra.mxu1 %v4487_v19  ;;  %v415_v18 = vrot.slane %v4760_v17, 1  ;;  %v5715_v19 = vrot.slane %v5120_v32, 1  ;;  %v4567_v32 = vld [vmem:[%s6196_s2 + $0x86c] ss:$16 sps:$4 sm:$0xff]   ;;  %v4642_v17 = vld [vmem:[%s6196_s2 + $0xa04] ss:$16 sps:$4 sm:$0xff]  }
  0xe1   : > { %2903 = vmatprep.subr.bf16.mxu0 %v4492_v21  ;;  %3209 = vmatprep.subr.bf16.mxu1 %v4495_v22  ;;  %v4556_v21 = vld [vmem:[%s6196_s2 + $0x840] ss:$16 sps:$4 sm:$0xff]   ;;  %v4559_v22 = vld [vmem:[%s6196_s2 + $0x848] ss:$16 sps:$4 sm:$0xff]  }
  0xe4   : > { %2904 = vmatpush1.bf16.msra.mxu0 %v4490_v23  ;;  %3210 = vmatpush1.bf16.msra.mxu1 %v4493_v24  ;;  %v4564_v23 = vld [vmem:[%s6196_s2 + $0x864] ss:$16 sps:$4 sm:$0xff]   ;;  %v417_v24 = vsel %vm411_vm2, %v415_v18, %v5715_v19  ;;  %v4645_v18 = vld [vmem:[%s6196_s2 + $0xa0c] ss:$16 sps:$4 sm:$0xff]  }
  0xe5   : > { %2905 = vmatprep.subr.bf16.mxu0 %v4498_v25  ;;  %3211 = vmatprep.subr.bf16.mxu1 %v4501_v26  ;;  %v4562_v25 = vld [vmem:[%s6196_s2 + $0x860] ss:$16 sps:$4 sm:$0xff]   ;;  %v4565_v26 = vld [vmem:[%s6196_s2 + $0x868] ss:$16 sps:$4 sm:$0xff]  }
  0xe8   : > { %2906 = vmatpush1.bf16.msra.mxu0 %v4496_v27  ;;  %3212 = vmatpush1.bf16.msra.mxu1 %v4499_v28  ;;  %v4570_v27 = vld [vmem:[%s6196_s2 + $0x884] ss:$16 sps:$4 sm:$0xff]   ;;  %v4573_v28 = vld [vmem:[%s6196_s2 + $0x88c] ss:$16 sps:$4 sm:$0xff]  }
  0xe9   : > { %2907 = vmatprep.subr.bf16.mxu0 %v4504_v30  ;;  %3213 = vmatprep.subr.bf16.mxu1 %v4507_v47  ;;  %v4568_v30 = vld [vmem:[%s6196_s2 + $0x880] ss:$16 sps:$4 sm:$0xff]   ;;  %v4571_v47 = vld [vmem:[%s6196_s2 + $0x888] ss:$16 sps:$4 sm:$0xff]  }
  0xec   : > { %2908 = vmatpush1.bf16.msra.mxu0 %v4502_v31  ;;  %3214 = vmatpush1.bf16.msra.mxu1 %v4505_v34  ;;  %v4576_v31 = vld [vmem:[%s6196_s2 + $0x8a4] ss:$16 sps:$4 sm:$0xff]   ;;  %v4579_v34 = vld [vmem:[%s6196_s2 + $0x8ac] ss:$16 sps:$4 sm:$0xff]  }
  0xed   : > { %2909 = vmatprep.subr.bf16.mxu0 %v4510_v35  ;;  %3215 = vmatprep.subr.bf16.mxu1 %v4513_v36  ;;  %v4574_v35 = vld [vmem:[%s6196_s2 + $0x8a0] ss:$16 sps:$4 sm:$0xff]   ;;  %v4577_v36 = vld [vmem:[%s6196_s2 + $0x8a8] ss:$16 sps:$4 sm:$0xff]  }
  0xf0   : > { %2910 = vmatpush1.bf16.msra.mxu0 %v4508_v37  ;;  %3216 = vmatpush1.bf16.msra.mxu1 %v4511_v39  ;;  %v4582_v37 = vld [vmem:[%s6196_s2 + $0x8c4] ss:$16 sps:$4 sm:$0xff]   ;;  %v4585_v39 = vld [vmem:[%s6196_s2 + $0x8cc] ss:$16 sps:$4 sm:$0xff]  }
  0xf1   : > { %2911 = vmatprep.subr.bf16.mxu0 %v4516_v5  ;;  %3217 = vmatprep.subr.bf16.mxu1 %v4519_v41  ;;  %v4580_v5 = vld [vmem:[%s6196_s2 + $0x8c0] ss:$16 sps:$4 sm:$0xff]   ;;  %v4583_v41 = vld [vmem:[%s6196_s2 + $0x8c8] ss:$16 sps:$4 sm:$0xff]  }
  0xf4   : > { %2912 = vmatpush1.bf16.msra.mxu0 %v4514_v43  ;;  %3218 = vmatpush1.bf16.msra.mxu1 %v4517_v44  ;;  %v4588_v43 = vld [vmem:[%s6196_s2 + $0x8e4] ss:$16 sps:$4 sm:$0xff]   ;;  %v4591_v44 = vld [vmem:[%s6196_s2 + $0x8ec] ss:$16 sps:$4 sm:$0xff]  }
  0xf5   : > { %2913 = vmatprep.subr.bf16.mxu0 %v4522_v45  ;;  %3219 = vmatprep.subr.bf16.mxu1 %v4525_v46  ;;  %v4586_v45 = vld [vmem:[%s6196_s2 + $0x8e0] ss:$16 sps:$4 sm:$0xff]   ;;  %v4589_v46 = vld [vmem:[%s6196_s2 + $0x8e8] ss:$16 sps:$4 sm:$0xff]  }
  0xf8   : > { %2914 = vmatpush1.bf16.msra.mxu0 %v4520_v48  ;;  %3220 = vmatpush1.bf16.msra.mxu1 %v4523_v49  ;;  %v4594_v48 = vld [vmem:[%s6196_s2 + $0x904] ss:$16 sps:$4 sm:$0xff]   ;;  %v4597_v49 = vld [vmem:[%s6196_s2 + $0x90c] ss:$16 sps:$4 sm:$0xff]  }
  0xf9   : > { %2915 = vmatprep.subr.bf16.mxu0 %v4528_v50  ;;  %3221 = vmatprep.subr.bf16.mxu1 %v4531_v51  ;;  %v4592_v50 = vld [vmem:[%s6196_s2 + $0x900] ss:$16 sps:$4 sm:$0xff]   ;;  %v4595_v51 = vld [vmem:[%s6196_s2 + $0x908] ss:$16 sps:$4 sm:$0xff]  }
  0xfc   : > { %2916 = vmatpush1.bf16.msra.mxu0 %v4526_v52  ;;  %3222 = vmatpush1.bf16.msra.mxu1 %v4529_v53  ;;  %v4600_v52 = vld [vmem:[%s6196_s2 + $0x924] ss:$16 sps:$4 sm:$0xff]   ;;  %v4603_v53 = vld [vmem:[%s6196_s2 + $0x92c] ss:$16 sps:$4 sm:$0xff]  }
  0xfd   : > { %2917 = vmatprep.subr.bf16.mxu0 %v4534_v54  ;;  %3223 = vmatprep.subr.bf16.mxu1 %v4537_v56  ;;  %v4598_v54 = vld [vmem:[%s6196_s2 + $0x920] ss:$16 sps:$4 sm:$0xff]   ;;  %v4606_v56 = vld [vmem:[%s6196_s2 + $0x944] ss:$16 sps:$4 sm:$0xff]  }
 0x100   : > { %2918 = vmatpush1.bf16.msra.mxu0 %v4532_v57  ;;  %3224 = vmatpush1.bf16.msra.mxu1 %v4535_v58  ;;  %v4609_v57 = vld [vmem:[%s6196_s2 + $0x94c] ss:$16 sps:$4 sm:$0xff]   ;;  %v4604_v58 = vld [vmem:[%s6196_s2 + $0x940] ss:$16 sps:$4 sm:$0xff]  }
 0x101   : > { %2919 = vmatprep.subr.bf16.mxu0 %v4540_v60  ;;  %3225 = vmatprep.subr.bf16.mxu1 %v4543_v61  ;;  %v4612_v60 = vld [vmem:[%s6196_s2 + $0x964] ss:$16 sps:$4 sm:$0xff]   ;;  %v4613_v61 = vld [vmem:[%s6196_s2 + $0x968] ss:$16 sps:$4 sm:$0xff]  }
 0x104   : > { %2920 = vmatpush1.bf16.msra.mxu0 %v4538_v62  ;;  %3226 = vmatpush1.bf16.msra.mxu1 %v4541_v20  ;;  %v4618_v62 = vld [vmem:[%s6196_s2 + $0x984] ss:$16 sps:$4 sm:$0xff]   ;;  %v4621_v20 = vld [vmem:[%s6196_s2 + $0x98c] ss:$16 sps:$4 sm:$0xff]  }
 0x105   : > { %2940 = vmatprep.subr.bf16.mxu0 %v4546_v63  ;;  %3246 = vmatprep.subr.bf16.mxu1 %v4549_v3  ;;  %v4616_v63 = vld [vmem:[%s6196_s2 + $0x980] ss:$16 sps:$4 sm:$0xff]   ;;  %v4627_v3 = vld [vmem:[%s6196_s2 + $0x9ac] ss:$16 sps:$4 sm:$0xff]  }
 0x107   : > { %2922 = vmatmul.mubr.bf16.vlgmr.msra.gmra.mrb[0].mxu0 %v375_v8  ;;  %3228 = vmatmul.mubr.bf16.vlgmr.msra.gmra.mrb[0].mxu1 %v375_v8  ;;  %v4633_v8 = vld [vmem:[%s6196_s2 + $0x9cc] ss:$16 sps:$4 sm:$0xff]  }
 0x108   : > { %2941 = vmatpush1.bf16.msra.mxu0 %v4544_v6  ;;  %3247 = vmatpush1.bf16.msra.mxu1 %v4547_v7  ;;  %v4625_v6 = vld [vmem:[%s6196_s2 + $0x9a8] ss:$16 sps:$4 sm:$0xff]   ;;  %v4630_v7 = vld [vmem:[%s6196_s2 + $0x9c4] ss:$16 sps:$4 sm:$0xff]  }
 0x109   : > { %2942 = vmatprep.subr.bf16.mxu0 %v4552_v9  ;;  %3248 = vmatprep.subr.bf16.mxu1 %v4555_v10  ;;  %v4628_v9 = vld [vmem:[%s6196_s2 + $0x9c0] ss:$16 sps:$4 sm:$0xff]   ;;  %v4631_v10 = vld [vmem:[%s6196_s2 + $0x9c8] ss:$16 sps:$4 sm:$0xff]  }
 0x10a   : > { %2931 = vmatprep.mubr.bf16.mxu0 %v398_v11  ;;  %3237 = vmatprep.mubr.bf16.mxu1 %v398_v11  ;;  %v4636_v11 = vld [vmem:[%s6196_s2 + $0x9e4] ss:$16 sps:$4 sm:$0xff]  }
 0x10c   : > { %2943 = vmatpush1.bf16.msra.mxu0 %v4550_v13  ;;  %3249 = vmatpush1.bf16.msra.mxu1 %v4553_v14  ;;  %v4634_v13 = vld [vmem:[%s6196_s2 + $0x9e0] ss:$16 sps:$4 sm:$0xff]   ;;  %v4637_v14 = vld [vmem:[%s6196_s2 + $0x9e8] ss:$16 sps:$4 sm:$0xff]  }
 0x10d   : > { %2944 = vmatprep.subr.bf16.mxu0 %v4558_v1  ;;  %3250 = vmatprep.subr.bf16.mxu1 %v4561_v15  ;;  %v4761_v1 = vld [vmem:[%s4970_s16] ss:$16 sps:$4 sm:$0xff]  }
 0x10e   : > { %v412_v15 = vrot.slane %v4761_v1, 1  ;;  %v4721_v1 = vld [vmem:[%s6196_s2 + $0xba8] ss:$16 sps:$4 sm:$0xff]  }
 0x10f   : > { %2932 = vmatmul.mubr.bf16.gmra.mrb[4].mxu0 %v395_v16  ;;  %3238 = vmatmul.mubr.bf16.gmra.mrb[4].mxu1 %v395_v16  ;;  %v413_v16 = vrot.slane %v5123_v33, 1  ;;  %v4643_v33 = vld [vmem:[%s6196_s2 + $0xa08] ss:$16 sps:$4 sm:$0xff]  }
 0x110   : > { %2945 = vmatpush1.bf16.msra.mxu0 %v4556_v21  ;;  %3251 = vmatpush1.bf16.msra.mxu1 %v4559_v22  ;;  %v4640_v21 = vld [vmem:[%s6196_s2 + $0xa00] ss:$16 sps:$4 sm:$0xff]  }
 0x111   : > { %2946 = vmatprep.subr.bf16.mxu0 %v4564_v23  ;;  %3252 = vmatprep.subr.bf16.mxu1 %v4567_v32  ;;  %v414_v22 = vsel %vm411_vm2, %v412_v15, %v413_v16  ;;  %v4648_v23 = vld [vmem:[%s6196_s2 + $0xa24] ss:$16 sps:$4 sm:$0xff]   ;;  %v4651_v32 = vld [vmem:[%s6196_s2 + $0xa2c] ss:$16 sps:$4 sm:$0xff]  }
 0x112   : > { %2972 = vmatprep.mubr.bf16.mxu0 %v417_v24  ;;  %3278 = vmatprep.mubr.bf16.mxu1 %v417_v24  ;;  %v4646_v24 = vld [vmem:[%s6196_s2 + $0xa20] ss:$16 sps:$4 sm:$0xff]   ;;  %v4726_v15 = vld [vmem:[%s6196_s2 + $0xbc4] ss:$16 sps:$4 sm:$0xff]  }
 0x114   : > { %2947 = vmatpush1.bf16.msra.mxu0 %v4562_v25  ;;  %3253 = vmatpush1.bf16.msra.mxu1 %v4565_v26  ;;  %v4649_v25 = vld [vmem:[%s6196_s2 + $0xa28] ss:$16 sps:$4 sm:$0xff]   ;;  %v4654_v26 = vld [vmem:[%s6196_s2 + $0xa44] ss:$16 sps:$4 sm:$0xff]  }
 0x115   : > { %2948 = vmatprep.subr.bf16.mxu0 %v4570_v27  ;;  %3254 = vmatprep.subr.bf16.mxu1 %v4573_v28  ;;  %v4657_v27 = vld [vmem:[%s6196_s2 + $0xa4c] ss:$16 sps:$4 sm:$0xff]  }
 0x116   : > { %v4762_v28 = vld [vmem:[%s4970_s16 + $0xc] ss:$16 sps:$4 sm:$0xff]  }
 0x118   : > { %2949 = vmatpush1.bf16.msra.mxu0 %v4568_v30  ;;  %3255 = vmatpush1.bf16.msra.mxu1 %v4571_v47  ;;  %v421_v30 = vrot.slane %v4762_v28, 1  ;;  %v5918_v47 = vrot.slane %v5288_v29, 1  ;;  %v4663_v29 = vld [vmem:[%s6196_s2 + $0xa6c] ss:$16 sps:$4 sm:$0xff]  }
 0x119   : > { %2950 = vmatprep.subr.bf16.mxu0 %v4576_v31  ;;  %3256 = vmatprep.subr.bf16.mxu1 %v4579_v34  ;;  %v4652_v31 = vld [vmem:[%s6196_s2 + $0xa40] ss:$16 sps:$4 sm:$0xff]   ;;  %v4655_v34 = vld [vmem:[%s6196_s2 + $0xa48] ss:$16 sps:$4 sm:$0xff]  }
 0x11c   : > { %2951 = vmatpush1.bf16.msra.mxu0 %v4574_v35  ;;  %3257 = vmatpush1.bf16.msra.mxu1 %v4577_v36  ;;  %v423_v35 = vsel %vm411_vm2, %v421_v30, %v5918_v47  ;;  %v4658_v36 = vld [vmem:[%s6196_s2 + $0xa60] ss:$16 sps:$4 sm:$0xff]  }
 0x11d   : > { %2952 = vmatprep.subr.bf16.mxu0 %v4582_v37  ;;  %3258 = vmatprep.subr.bf16.mxu1 %v4585_v39  ;;  %v4661_v37 = vld [vmem:[%s6196_s2 + $0xa68] ss:$16 sps:$4 sm:$0xff]   ;;  %v4666_v39 = vld [vmem:[%s6196_s2 + $0xa84] ss:$16 sps:$4 sm:$0xff]  }
 0x120   : > { %2953 = vmatpush1.bf16.msra.mxu0 %v4580_v5  ;;  %3259 = vmatpush1.bf16.msra.mxu1 %v4583_v41  ;;  %v4669_v5 = vld [vmem:[%s6196_s2 + $0xa8c] ss:$16 sps:$4 sm:$0xff]   ;;  %v4664_v41 = vld [vmem:[%s6196_s2 + $0xa80] ss:$16 sps:$4 sm:$0xff]  }
 0x121   : > { %2954 = vmatprep.subr.bf16.mxu0 %v4588_v43  ;;  %3260 = vmatprep.subr.bf16.mxu1 %v4591_v44  ;;  %v4667_v43 = vld [vmem:[%s6196_s2 + $0xa88] ss:$16 sps:$4 sm:$0xff]   ;;  %v4672_v44 = vld [vmem:[%s6196_s2 + $0xaa4] ss:$16 sps:$4 sm:$0xff]  }
 0x124   : > { %2955 = vmatpush1.bf16.msra.mxu0 %v4586_v45  ;;  %3261 = vmatpush1.bf16.msra.mxu1 %v4589_v46  ;;  %v4675_v45 = vld [vmem:[%s6196_s2 + $0xaac] ss:$16 sps:$4 sm:$0xff]   ;;  %v4670_v46 = vld [vmem:[%s6196_s2 + $0xaa0] ss:$16 sps:$4 sm:$0xff]  }
 0x125   : > { %2956 = vmatprep.subr.bf16.mxu0 %v4594_v48  ;;  %3262 = vmatprep.subr.bf16.mxu1 %v4597_v49  ;;  %v4673_v48 = vld [vmem:[%s6196_s2 + $0xaa8] ss:$16 sps:$4 sm:$0xff]   ;;  %v4678_v49 = vld [vmem:[%s6196_s2 + $0xac4] ss:$16 sps:$4 sm:$0xff]  }
 0x128   : > { %2957 = vmatpush1.bf16.msra.mxu0 %v4592_v50  ;;  %3263 = vmatpush1.bf16.msra.mxu1 %v4595_v51  ;;  %v4681_v50 = vld [vmem:[%s6196_s2 + $0xacc] ss:$16 sps:$4 sm:$0xff]   ;;  %v4676_v51 = vld [vmem:[%s6196_s2 + $0xac0] ss:$16 sps:$4 sm:$0xff]  }
 0x129   : > { %2958 = vmatprep.subr.bf16.mxu0 %v4600_v52  ;;  %3264 = vmatprep.subr.bf16.mxu1 %v4603_v53  ;;  %v4679_v52 = vld [vmem:[%s6196_s2 + $0xac8] ss:$16 sps:$4 sm:$0xff]   ;;  %v4684_v53 = vld [vmem:[%s6196_s2 + $0xae4] ss:$16 sps:$4 sm:$0xff]  }
 0x12c   : > { %2959 = vmatpush1.bf16.msra.mxu0 %v4598_v54  ;;  %3265 = vmatpush1.bf16.msra.mxu1 %v4601_v55  ;;  %v4687_v54 = vld [vmem:[%s6196_s2 + $0xaec] ss:$16 sps:$4 sm:$0xff]   ;;  %v4682_v55 = vld [vmem:[%s6196_s2 + $0xae0] ss:$16 sps:$4 sm:$0xff]  }
 0x12d   : > { %2960 = vmatprep.subr.bf16.mxu0 %v4606_v56  ;;  %3266 = vmatprep.subr.bf16.mxu1 %v4609_v57  ;;  %v4685_v56 = vld [vmem:[%s6196_s2 + $0xae8] ss:$16 sps:$4 sm:$0xff]   ;;  %v4690_v57 = vld [vmem:[%s6196_s2 + $0xb04] ss:$16 sps:$4 sm:$0xff]  }
 0x130   : > { %2961 = vmatpush1.bf16.msra.mxu0 %v4604_v58  ;;  %3267 = vmatpush1.bf16.msra.mxu1 %v4607_v59  ;;  %v4693_v58 = vld [vmem:[%s6196_s2 + $0xb0c] ss:$16 sps:$4 sm:$0xff]   ;;  %v4688_v59 = vld [vmem:[%s6196_s2 + $0xb00] ss:$16 sps:$4 sm:$0xff]  }
 0x131   : > { %2962 = vmatprep.subr.bf16.mxu0 %v4612_v60  ;;  %3268 = vmatprep.subr.bf16.mxu1 %v4615_v40  ;;  %v4691_v60 = vld [vmem:[%s6196_s2 + $0xb08] ss:$16 sps:$4 sm:$0xff]   ;;  %v4696_v40 = vld [vmem:[%s6196_s2 + $0xb24] ss:$16 sps:$4 sm:$0xff]  }
 0x134   : > { %2963 = vmatpush1.bf16.msra.mxu0 %v4610_v38  ;;  %3269 = vmatpush1.bf16.msra.mxu1 %v4613_v61  ;;  %v4699_v38 = vld [vmem:[%s6196_s2 + $0xb2c] ss:$16 sps:$4 sm:$0xff]   ;;  %v4694_v61 = vld [vmem:[%s6196_s2 + $0xb20] ss:$16 sps:$4 sm:$0xff]  }
 0x135   : > { %2964 = vmatprep.subr.bf16.mxu0 %v4618_v62  ;;  %3270 = vmatprep.subr.bf16.mxu1 %v4621_v20  ;;  %v4697_v62 = vld [vmem:[%s6196_s2 + $0xb28] ss:$16 sps:$4 sm:$0xff]   ;;  %v4702_v20 = vld [vmem:[%s6196_s2 + $0xb44] ss:$16 sps:$4 sm:$0xff]  }
 0x138   : > { %2965 = vmatpush1.bf16.msra.mxu0 %v4616_v63  ;;  %3271 = vmatpush1.bf16.msra.mxu1 %v4619_v0  ;;  %v4705_v63 = vld [vmem:[%s6196_s2 + $0xb4c] ss:$16 sps:$4 sm:$0xff]   ;;  %v4700_v0 = vld [vmem:[%s6196_s2 + $0xb40] ss:$16 sps:$4 sm:$0xff]  }
 0x139   : > { %2966 = vmatprep.subr.bf16.mxu0 %v4624_v2  ;;  %3272 = vmatprep.subr.bf16.mxu1 %v4627_v3  ;;  %v4703_v2 = vld [vmem:[%s6196_s2 + $0xb48] ss:$16 sps:$4 sm:$0xff]   ;;  %v4708_v3 = vld [vmem:[%s6196_s2 + $0xb64] ss:$16 sps:$4 sm:$0xff]  }
 0x13c   : > { %2967 = vmatpush1.bf16.msra.mxu0 %v4622_v4  ;;  %3273 = vmatpush1.bf16.msra.mxu1 %v4625_v6  ;;  %v4711_v4 = vld [vmem:[%s6196_s2 + $0xb6c] ss:$16 sps:$4 sm:$0xff]   ;;  %v4706_v6 = vld [vmem:[%s6196_s2 + $0xb60] ss:$16 sps:$4 sm:$0xff]  }
 0x13d   : > { %2968 = vmatprep.subr.bf16.mxu0 %v4630_v7  ;;  %3274 = vmatprep.subr.bf16.mxu1 %v4633_v8  ;;  %v4709_v7 = vld [vmem:[%s6196_s2 + $0xb68] ss:$16 sps:$4 sm:$0xff]   ;;  %v4714_v8 = vld [vmem:[%s6196_s2 + $0xb84] ss:$16 sps:$4 sm:$0xff]  }
 0x140   : > { %2969 = vmatpush1.bf16.msra.mxu0 %v4628_v9  ;;  %3275 = vmatpush1.bf16.msra.mxu1 %v4631_v10  ;;  %v4717_v9 = vld [vmem:[%s6196_s2 + $0xb8c] ss:$16 sps:$4 sm:$0xff]   ;;  %v4712_v10 = vld [vmem:[%s6196_s2 + $0xb80] ss:$16 sps:$4 sm:$0xff]  }
 0x141   : > { %2970 = vmatprep.subr.bf16.mxu0 %v4636_v11  ;;  %3276 = vmatprep.subr.bf16.mxu1 %v4639_v12  ;;  %v4715_v11 = vld [vmem:[%s6196_s2 + $0xb88] ss:$16 sps:$4 sm:$0xff]   ;;  %v4720_v12 = vld [vmem:[%s6196_s2 + $0xba4] ss:$16 sps:$4 sm:$0xff]  }
 0x144   : > { %2971 = vmatpush1.bf16.msra.mxu0 %v4634_v13  ;;  %3277 = vmatpush1.bf16.msra.mxu1 %v4637_v14  ;;  %v4723_v13 = vld [vmem:[%s6196_s2 + $0xbac] ss:$16 sps:$4 sm:$0xff]   ;;  %v4718_v14 = vld [vmem:[%s6196_s2 + $0xba0] ss:$16 sps:$4 sm:$0xff]  }
 0x145   : > { %2991 = vmatprep.subr.bf16.mxu0 %v4642_v17  ;;  %3297 = vmatprep.subr.bf16.mxu1 %v4645_v18  ;;  %v4724_v17 = vld [vmem:[%s6196_s2 + $0xbc0] ss:$16 sps:$4 sm:$0xff]   ;;  %v4727_v18 = vld [vmem:[%s6196_s2 + $0xbc8] ss:$16 sps:$4 sm:$0xff]  }
 0x147   : > { %2973 = vmatmul.mubr.bf16.vlgmr.msra.gmra.mrb[0].mxu0 %v414_v22  ;;  %3279 = vmatmul.mubr.bf16.vlgmr.msra.gmra.mrb[0].mxu1 %v414_v22  ;;  %v4730_v22 = vld [vmem:[%s6196_s2 + $0xbe0] ss:$16 sps:$4 sm:$0xff]  }
 0x148   : > { %2992 = vmatpush1.bf16.msra.mxu0 %v4640_v21  ;;  %3298 = vmatpush1.bf16.msra.mxu1 %v4643_v33  ;;  %v4732_v21 = vld [vmem:[%s6196_s2 + $0xbe4] ss:$16 sps:$4 sm:$0xff]   ;;  %v4735_v33 = vld [vmem:[%s6196_s2 + $0xbec] ss:$16 sps:$4 sm:$0xff]  }
 0x149   : > { %2993 = vmatprep.subr.bf16.mxu0 %v4648_v23  ;;  %3299 = vmatprep.subr.bf16.mxu1 %v4651_v32  ;;  %v4733_v23 = vld [vmem:[%s6196_s2 + $0xbe8] ss:$16 sps:$4 sm:$0xff]  }
 0x14a   : > { %2982 = vmatprep.mubr.bf16.mxu0 %v5715_v19  ;;  %3288 = vmatprep.mubr.bf16.mxu1 %v5715_v19  ;;  %v4660_v19 = vld [vmem:[%s6196_s2 + $0xa64] ss:$16 sps:$4 sm:$0xff]   ;;  %v4763_v32 = vld [vmem:[%s4970_s16 + $0x8] ss:$16 sps:$4 sm:$0xff]  }
 0x14c   : > { %2994 = vmatpush1.bf16.msra.mxu0 %v4646_v24  ;;  %3300 = vmatpush1.bf16.msra.mxu1 %v4649_v25  ;;  %v418_v24 = vrot.slane %v4763_v32, 1  ;;  %v419_v25 = vrot.slane %v5311_v42, 1 }
 0x14d   : > { %2995 = vmatprep.subr.bf16.mxu0 %v4654_v26  ;;  %3301 = vmatprep.subr.bf16.mxu1 %v4657_v27 }
 0x14e   : > { %v420_v26 = vsel %vm411_vm2, %v418_v24, %v419_v25 }
 0x14f   : > { %2983 = vmatmul.mubr.bf16.gmra.mrb[4].mxu0 %v413_v16  ;;  %3289 = vmatmul.mubr.bf16.gmra.mrb[4].mxu1 %v413_v16  ;;  %v4729_v16 = vld [vmem:[%s6196_s2 + $0xbcc] ss:$16 sps:$4 sm:$0xff]  }
 0x150   : > { %2996 = vmatpush1.bf16.msra.mxu0 %v4652_v31  ;;  %3302 = vmatpush1.bf16.msra.mxu1 %v4655_v34 }
 0x151   : > { %2997 = vmatprep.subr.bf16.mxu0 %v4660_v19  ;;  %3303 = vmatprep.subr.bf16.mxu1 %v4663_v29 }
 0x152   : > { %3023 = vmatprep.mubr.bf16.mxu0 %v423_v35  ;;  %3329 = vmatprep.mubr.bf16.mxu1 %v423_v35 }
 0x154   : > { %2998 = vmatpush1.bf16.msra.mxu0 %v4658_v36  ;;  %3304 = vmatpush1.bf16.msra.mxu1 %v4661_v37 }
 0x155   : > { %2999 = vmatprep.subr.bf16.mxu0 %v4666_v39  ;;  %3305 = vmatprep.subr.bf16.mxu1 %v4669_v5 }
 0x158   : > { %3000 = vmatpush1.bf16.msra.mxu0 %v4664_v41  ;;  %3306 = vmatpush1.bf16.msra.mxu1 %v4667_v43 }
 0x159   : > { %3001 = vmatprep.subr.bf16.mxu0 %v4672_v44  ;;  %3307 = vmatprep.subr.bf16.mxu1 %v4675_v45 }
 0x15c   : > { %3002 = vmatpush1.bf16.msra.mxu0 %v4670_v46  ;;  %3308 = vmatpush1.bf16.msra.mxu1 %v4673_v48 }
 0x15d   : > { %3003 = vmatprep.subr.bf16.mxu0 %v4678_v49  ;;  %3309 = vmatprep.subr.bf16.mxu1 %v4681_v50 }
 0x160   : > { %3004 = vmatpush1.bf16.msra.mxu0 %v4676_v51  ;;  %3310 = vmatpush1.bf16.msra.mxu1 %v4679_v52 }
 0x161   : > { %3005 = vmatprep.subr.bf16.mxu0 %v4684_v53  ;;  %3311 = vmatprep.subr.bf16.mxu1 %v4687_v54 }
 0x164   : > { %3006 = vmatpush1.bf16.msra.mxu0 %v4682_v55  ;;  %3312 = vmatpush1.bf16.msra.mxu1 %v4685_v56 }
 0x165   : > { %3007 = vmatprep.subr.bf16.mxu0 %v4690_v57  ;;  %3313 = vmatprep.subr.bf16.mxu1 %v4693_v58 }
 0x168   : > { %3008 = vmatpush1.bf16.msra.mxu0 %v4688_v59  ;;  %3314 = vmatpush1.bf16.msra.mxu1 %v4691_v60 }
 0x169   : > { %3009 = vmatprep.subr.bf16.mxu0 %v4696_v40  ;;  %3315 = vmatprep.subr.bf16.mxu1 %v4699_v38 }
 0x16c   : > { %3010 = vmatpush1.bf16.msra.mxu0 %v4694_v61  ;;  %3316 = vmatpush1.bf16.msra.mxu1 %v4697_v62 }
 0x16d   : > { %3011 = vmatprep.subr.bf16.mxu0 %v4702_v20  ;;  %3317 = vmatprep.subr.bf16.mxu1 %v4705_v63 }
 0x170   : > { %3012 = vmatpush1.bf16.msra.mxu0 %v4700_v0  ;;  %3318 = vmatpush1.bf16.msra.mxu1 %v4703_v2 }
 0x171   : > { %3013 = vmatprep.subr.bf16.mxu0 %v4708_v3  ;;  %3319 = vmatprep.subr.bf16.mxu1 %v4711_v4 }
 0x174   : > { %3014 = vmatpush1.bf16.msra.mxu0 %v4706_v6  ;;  %3320 = vmatpush1.bf16.msra.mxu1 %v4709_v7 }
 0x175   : > { %3015 = vmatprep.subr.bf16.mxu0 %v4714_v8  ;;  %3321 = vmatprep.subr.bf16.mxu1 %v4717_v9 }
 0x178   : > { %3016 = vmatpush1.bf16.msra.mxu0 %v4712_v10  ;;  %3322 = vmatpush1.bf16.msra.mxu1 %v4715_v11 }
 0x179   : > { %3017 = vmatprep.subr.bf16.mxu0 %v4720_v12  ;;  %3323 = vmatprep.subr.bf16.mxu1 %v4723_v13 }
 0x17c   : > { %3018 = vmatpush1.bf16.msra.mxu0 %v4718_v14  ;;  %3324 = vmatpush1.bf16.msra.mxu1 %v4721_v1 }
 0x17d   : > { %3019 = vmatprep.subr.bf16.mxu0 %v4726_v15  ;;  %3325 = vmatprep.subr.bf16.mxu1 %v4729_v16 }
 0x180   : > { %3020 = vmatpush1.bf16.msra.mxu0 %v4724_v17  ;;  %3326 = vmatpush1.bf16.msra.mxu1 %v4727_v18 }
 0x181   : > { %3021 = vmatprep.subr.bf16.mxu0 %v4732_v21  ;;  %3327 = vmatprep.subr.bf16.mxu1 %v4735_v33 }
 0x184   : > { %3022 = vmatpush1.bf16.msra.mxu0 %v4730_v22  ;;  %3328 = vmatpush1.bf16.msra.mxu1 %v4733_v23 }
 0x187   : > { %3024 = vmatmul.mubr.bf16.vlgmr.msra.gmra.mrb[0].mxu0 %v420_v26  ;;  %3330 = vmatmul.mubr.bf16.vlgmr.msra.gmra.mrb[0].mxu1 %v420_v26 }
 0x188   : > { %3033 = vmatprep.mubr.bf16.mxu0 %v5918_v47  ;;  %3339 = vmatprep.mubr.bf16.mxu1 %v5918_v47 }
 0x18f   : > { %3034 = vmatmul.mubr.bf16.gmra.mrb[4].mxu0 %v419_v25  ;;  %3340 = vmatmul.mubr.bf16.gmra.mrb[4].mxu1 %v419_v25 }
 0x25a   : > { %v6089_v27 = vpop.f32.mrb[0].mxu0  ;;  %v6091_v28 = vpop.f32.mrb[0].mxu1 }
 0x25b   : > { %v3360_v42 = vmul.f32 %v6089_v27, %v6089_v27  ;;  %v3362_v30 = vmul.f32 %v6091_v28, %v6091_v28  ;;  %v6097_v31 = vpop.f32.mrb[1].mxu0  ;;  %v6099_v34 = vpop.f32.mrb[1].mxu1 }
 0x25c   : > { %v3361_v19 = vmul.f32 %v6097_v31, %v6097_v31  ;;  %v3363_v47 = vmul.f32 %v6099_v34, %v6099_v34  ;;  %v6105_v29 = vpop.f32.mrb[2].mxu0  ;;  %v6107_v35 = vpop.f32.mrb[2].mxu1 }
 0x25d   : > { %v3372_v36 = vmul.f32 %v3360_v42, %v6089_v27  ;;  %v3374_v37 = vmul.f32 %v3362_v30, %v6091_v28  ;;  %v3364_v39 = vmul.f32 %v6105_v29, %v6105_v29  ;;  %v6113_v5 = vpop.f32.mrb[3].mxu0  ;;  %v6115_v41 = vpop.f32.mrb[3].mxu1  ;;  %v3366_v45 = vmul.f32 %v6107_v35, %v6107_v35 }
 0x25e   : > { %v3373_v43 = vmul.f32 %v3361_v19, %v6097_v31  ;;  %v3375_v44 = vmul.f32 %v3363_v47, %v6099_v34  ;;  %v3365_v53 = vmul.f32 %v6113_v5, %v6113_v5  ;;  %v3367_v63 = vmul.f32 %v6115_v41, %v6115_v41 }
 0x25f   : > { %v3384_v46 = vmul.f32 0.044715, %v3372_v36  ;;  %v3386_v48 = vmul.f32 0.044715, %v3374_v37  ;;  %v3376_v49 = vmul.f32 %v3364_v39, %v6105_v29  ;;  %v3378_v52 = vmul.f32 %v3366_v45, %v6107_v35 }
 0x260   : > { %v3385_v50 = vmul.f32 0.044715, %v3373_v43  ;;  %v3387_v51 = vmul.f32 0.044715, %v3375_v44  ;;  %v3377_v60 = vmul.f32 %v3365_v53, %v6113_v5  ;;  %v3379_v9 = vmul.f32 %v3367_v63, %v6115_v41 }
 0x261   : > { %v3396_v54 = vadd.f32 %v3384_v46, %v6089_v27  ;;  %v3398_v55 = vadd.f32 %v3386_v48, %v6091_v28  ;;  %v3388_v56 = vmul.f32 0.044715, %v3376_v49  ;;  %v3390_v59 = vmul.f32 0.044715, %v3378_v52 }
 0x262   : > { %v3397_v57 = vadd.f32 %v3385_v50, %v6097_v31  ;;  %v3399_v58 = vadd.f32 %v3387_v51, %v6099_v34  ;;  %v6130_v40 = vpop.f32.mrb[4].mxu0  ;;  %v6132_v38 = vpop.f32.mrb[4].mxu1  ;;  %v3389_v7 = vmul.f32 0.044715, %v3377_v60  ;;  %v3391_v16 = vmul.f32 0.044715, %v3379_v9 }
 0x263   : > { %v3408_v61 = vmul.f32 0.7978846, %v3396_v54  ;;  %v3410_v62 = vmul.f32 0.7978846, %v3398_v55  ;;  %v3400_v20 = vadd.f32 %v3388_v56, %v6105_v29  ;;  %v6137_v0 = vpop.f32.mrb[5].mxu0  ;;  %v6139_v2 = vpop.f32.mrb[5].mxu1  ;;  %v3402_v6 = vadd.f32 %v3390_v59, %v6107_v35 }
 0x264   : > { %v3409_v3 = vmul.f32 0.7978846, %v3397_v57  ;;  %v3411_v4 = vmul.f32 0.7978846, %v3399_v58  ;;  %v3039_v10 = vpop.f32.mrb[6].mxu0  ;;  %v3345_v11 = vpop.f32.mrb[6].mxu1  ;;  %v3401_v13 = vadd.f32 %v3389_v7, %v6113_v5  ;;  %v3368_v14 = vmul.f32 %v6130_v40, %v6130_v40 }
 0x265   : > { %4736 = vtanh.f32 %v3408_v61  ;;  %v3412_v8 = vmul.f32 0.7978846, %v3400_v20  ;;  %v3414_v12 = vmul.f32 0.7978846, %v3402_v6  ;;  %v3040_v1 = vpop.f32.mrb[7].mxu0  ;;  %v3346_v15 = vpop.f32.mrb[7].mxu1  ;;  %v3370_v17 = vmul.f32 %v6132_v38, %v6132_v38 }
 0x266   : > { %4738 = vtanh.f32 %v3410_v62  ;;  %v3413_v18 = vmul.f32 0.7978846, %v3401_v13  ;;  %v3380_v21 = vmul.f32 %v3368_v14, %v6130_v40  ;;  %v3403_v33 = vadd.f32 %v3391_v16, %v6115_v41 }
 0x267   : > { %4740 = vtanh.f32 %v3409_v3  ;;  %v3382_v22 = vmul.f32 %v3370_v17, %v6132_v38  ;;  %v3369_v23 = vmul.f32 %v6137_v0, %v6137_v0  ;;  %v3371_v24 = vmul.f32 %v6139_v2, %v6139_v2 }
 0x268   : > { %4742 = vtanh.f32 %v3411_v4  ;;  %v3392_v32 = vmul.f32 0.044715, %v3380_v21  ;;  %v3415_v25 = vmul.f32 0.7978846, %v3403_v33  ;;  %v3348_v48 = vmul.f32 0.5, %v6089_v27 }
 0x269   : > { %4744 = vtanh.f32 %v3412_v8  ;;  %v3394_v26 = vmul.f32 0.044715, %v3382_v22  ;;  %v3381_v42 = vmul.f32 %v3369_v23, %v6137_v0  ;;  %v3383_v19 = vmul.f32 %v3371_v24, %v6139_v2 }
 0x26a   : > { %4746 = vtanh.f32 %v3414_v12  ;;  %v3404_v30 = vadd.f32 %v3392_v32, %v6130_v40  ;;  %v3350_v52 = vmul.f32 0.5, %v6091_v28  ;;  %v3349_v57 = vmul.f32 0.5, %v6097_v31 }
 0x26b   : > { %4748 = vtanh.f32 %v3413_v18  ;;  %v3406_v47 = vadd.f32 %v3394_v26, %v6132_v38  ;;  %v3393_v36 = vmul.f32 0.044715, %v3381_v42  ;;  %v3395_v39 = vmul.f32 0.044715, %v3383_v19 }
 0x26c   : > { %4750 = vtanh.f32 %v3415_v25  ;;  %v3416_v37 = vmul.f32 0.7978846, %v3404_v30  ;;  %v3351_v27 = vmul.f32 0.5, %v6099_v34  ;;  %v3352_v28 = vmul.f32 0.5, %v6105_v29 }
 0x26d   : > { %v3418_v44 = vmul.f32 0.7978846, %v3406_v47  ;;  %v3405_v45 = vadd.f32 %v3393_v36, %v6137_v0  ;;  %v3407_v50 = vadd.f32 %v3395_v39, %v6139_v2  ;;  %v3354_v6 = vmul.f32 0.5, %v6107_v35 }
 0x26e   : > { %4752 = vtanh.f32 %v3416_v37  ;;  %v3353_v9 = vmul.f32 0.5, %v6113_v5  ;;  %v3355_v14 = vmul.f32 0.5, %v6115_v41  ;;  %v3356_v5 = vmul.f32 0.5, %v6130_v40 }
 0x26f   : > { %v4737_v43 = vpop.eup %4736  ;;  %4754 = vtanh.f32 %v3418_v44  ;;  %v3417_v54 = vmul.f32 0.7978846, %v3405_v45  ;;  %v3419_v59 = vmul.f32 0.7978846, %v3407_v50  ;;  %v3358_v23 = vmul.f32 0.5, %v6132_v38 }
 0x270   : > { %v4739_v46 = vpop.eup %4738  ;;  %v3432_v49 = vadd.f32 1.0, %v4737_v43  ;;  %v3357_v24 = vmul.f32 0.5, %v6137_v0  ;;  %v3359_v42 = vmul.f32 0.5, %v6139_v2 }
 0x271   : > { %v4741_v51 = vpop.eup %4740  ;;  %v3434_v53 = vadd.f32 1.0, %v4739_v46  ;;  %4756 = vtanh.f32 %v3417_v54 }
 0x272   : > { %v4743_v55 = vpop.eup %4742  ;;  %v3444_v56 = vmul.f32 %v3432_v49, %v3348_v48  ;;  %v3433_v58 = vadd.f32 1.0, %v4741_v51  ;;  %4758 = vtanh.f32 %v3419_v59 }
 0x273   : > { %v4745_v60 = vpop.eup %4744  ;;  %v3446_v61 = vmul.f32 %v3434_v53, %v3350_v52  ;;  %v3435_v62 = vadd.f32 1.0, %v4743_v55 }
 0x274   : > { %v4747_v20 = vpop.eup %4746  ;;  %v3445_v63 = vmul.f32 %v3433_v58, %v3349_v57  ;;  %v3436_v3 = vadd.f32 1.0, %v4745_v60 }
 0x275   : > { %v4749_v4 = vpop.eup %4748  ;;  %v3447_v31 = vmul.f32 %v3435_v62, %v3351_v27  ;;  %v3438_v34 = vadd.f32 1.0, %v4747_v20 }
 0x276   : > { %v4033_v7 = vpack.c.bf16 %v3445_v63, %v3444_v56  ;;  %v3448_v8 = vmul.f32 %v3436_v3, %v3352_v28  ;;  %v3437_v29 = vadd.f32 1.0, %v4749_v4  ;;  %v4751_v10 = vpop.eup %4750 }
 0x277   : > { %v4034_v11 = vpack.c.bf16 %v3447_v31, %v3446_v61  ;;  %v3450_v12 = vmul.f32 %v3438_v34, %v3354_v6  ;;  %v3439_v1 = vadd.f32 1.0, %v4751_v10 }
 0x278   : > { %3496 = vst [vmem:[%s6170_s22] sm:$0xff] %v4033_v7  ;;  %v3449_v13 = vmul.f32 %v3437_v29, %v3353_v9  ;;  %v4753_v15 = vpop.eup %4752 }
 0x279   : > { %3497 = vst [vmem:[%s6170_s22 + $0x8] sm:$0xff] %v4034_v11  ;;  %v3451_v35 = vmul.f32 %v3439_v1, %v3355_v14  ;;  %v4755_v17 = vpop.eup %4754  ;;  %v3440_v18 = vadd.f32 1.0, %v4753_v15 }
 0x27a   : > { %v4035_v16 = vpack.c.bf16 %v3449_v13, %v3448_v8  ;;  %v3442_v33 = vadd.f32 1.0, %v4755_v17 }
 0x27b   : > { %v4036_v21 = vpack.c.bf16 %v3451_v35, %v3450_v12  ;;  %v4757_v22 = vpop.eup %4756  ;;  %v3452_v41 = vmul.f32 %v3440_v18, %v3356_v5 }
 0x27c   : > { %3498 = vst [vmem:[%s6170_s22 + $0x10] sm:$0xff] %v4035_v16  ;;  %v4759_v32 = vpop.eup %4758  ;;  %v3441_v25 = vadd.f32 1.0, %v4757_v22  ;;  %v3454_v26 = vmul.f32 %v3442_v33, %v3358_v23 }
 0x27d   : > { %3499 = vst [vmem:[%s6170_s22 + $0x18] sm:$0xff] %v4036_v21  ;;  %v3443_v30 = vadd.f32 1.0, %v4759_v32 }
 0x27e   : > { %v3453_v19 = vmul.f32 %v3441_v25, %v3357_v24 }
 0x27f   : > { %v3455_v47 = vmul.f32 %v3443_v30, %v3359_v42 }
 0x280   : > { %v4037_v36 = vpack.c.bf16 %v3453_v19, %v3452_v41 }
 0x281   : > { %v4038_v40 = vpack.c.bf16 %v3455_v47, %v3454_v26 }
 0x282   : > { %3500 = vst [vmem:[%s6170_s22 + $0x20] sm:$0xff] %v4037_v36 }
 0x283   : > { %3501 = vst [vmem:[%s6170_s22 + $0x28] sm:$0xff] %v4038_v40 }
 0x284 PF: > { %s13_s14 = sadd.s32 1, %s4786_s14   ;;  %s6198_s12 = smov %s4782_s13 }
 0x285   : > { %p10_p5 = scmp.ge.s32.totalorder %s13_s14, 4   ;;  %s6199_s13 = smov %s6201_s15 }
 0x287   :  { %12 = sbr.rel (!%p10_p5) target bundleno = 2 (0x2), region = 65 }

// kernel: feature_extractor.11
= control target key start
LH: loop header
LB: loop body
LE: loop exit
PB: predicated region body
PF: predicated region fallthrough
CT: control target
= control target key end

     0   :  { %s4576_s12 = smov 0   ;;  %s4578_s13 = smov 0   ;;  %s5881_s0 = inlined_call_operand.vmem [shape: bf16[2,24,512], index: 0, kind: input, shape index: {}, may-alias: {0,1}]   ;;  %s5882_s1 = inlined_call_operand.vmem [shape: bf16[2,24,512], index: 1, kind: input, shape index: {}, may-alias: {0,1}]   ;;  %s5883_s2 = inlined_call_operand.vmem [shape: bf16[1536,512], index: 2, kind: input, shape index: {}]   ;;  %s5884_s3 = inlined_call_operand.vmem [shape: bf16[2,16,512], index: 3, kind: output, shape index: {}]  }
   0x1   :  { %s4580_s14 = smov 0  }
   0x2 LB: > { %s25_s15 = sadd.s32 1, %s4550_s13  ;;  %p3449_p0 = scmp.ge.s32.totalorder %s4554_s14, 1  ;;  %s4554_s14 = sphi %s4580_s14, %s13_s14   ;;  %s4550_s13 = sphi %s4578_s13, %s5886_s13   ;;  %s4546_s12 = sphi %s4576_s12, %s5885_s12  }
   0x3   : > { %p27_p1 = scmp.ge.s32.totalorder %s25_s15, 2  ;;  %p201_p2 = scmp.lt.s32.totalorder %s4554_s14, 3 }
   0x5   : > { %s5888_s15 = smov (%p27_p1, %s25_s15), 0  ;;  %p202_p3 = pnand %p3449_p0, %p201_p2 }
   0x6   : > { %v3926_v0 = vld [vmem:[%s5883_s2 + $0x4] ss:$16 sps:$4 sm:$0xff] (!%p202_p3)   ;;  %p259_p4 = scmp.lt.s32.totalorder (!%p202_p3), %s4546_s12, 1  ;;  %v3928_v1 = vld [vmem:[%s5883_s2 + $0xc] ss:$16 sps:$4 sm:$0xff] (!%p202_p3)   ;;  %vm391_vm1 = vcmask (!%p202_p3), 1046528  }
   0x7   : > { %205 = sbr.rel (%p202_p3) target bundleno = 638 (0x27e), region = 32  ;;  %2712 = vmatprep.subr.bf16.mxu0 (!%p202_p3), %v3926_v0  ;;  %v3930_v2 = vld [vmem:[%s5883_s2] ss:$16 sps:$4 sm:$0xff] (!%p202_p3)   ;;  %v3931_v3 = vld [vmem:[%s5883_s2 + $0x8] ss:$16 sps:$4 sm:$0xff] (!%p202_p3)   ;;  %2970 = vmatprep.subr.bf16.mxu1 (!%p202_p3), %v3928_v1 }
   0x8   : > { %v3932_v4 = vld [vmem:[%s5883_s2 + $0x24] ss:$16 sps:$4 sm:$0xff] (!%p202_p3)   ;;  %2713 = vmatpush1.bf16.msra.mxu0 (!%p202_p3), %v3930_v2  ;;  %2971 = vmatpush1.bf16.msra.mxu1 (!%p202_p3), %v3931_v3  ;;  %v3934_v5 = vld [vmem:[%s5883_s2 + $0x2c] ss:$16 sps:$4 sm:$0xff] (!%p202_p3)   ;;  %v3936_v6 = vld [vmem:[%s5883_s2 + $0x20] ss:$16 sps:$4 sm:$0xff] (!%p202_p3)  }
   0x9   : > { %2714 = vmatprep.subr.bf16.mxu0 (!%p202_p3), %v3932_v4  ;;  %v3937_v7 = vld [vmem:[%s5883_s2 + $0x28] ss:$16 sps:$4 sm:$0xff] (!%p202_p3)   ;;  %2972 = vmatprep.subr.bf16.mxu1 (!%p202_p3), %v3934_v5  ;;  %v3938_v8 = vld [vmem:[%s5883_s2 + $0x44] ss:$16 sps:$4 sm:$0xff] (!%p202_p3)   ;;  %v3940_v9 = vld [vmem:[%s5883_s2 + $0x4c] ss:$16 sps:$4 sm:$0xff] (!%p202_p3)  }
   0xa   : > { %v3942_v10 = vld [vmem:[%s5883_s2 + $0x40] ss:$16 sps:$4 sm:$0xff] (!%p202_p3)   ;;  %v3943_v11 = vld [vmem:[%s5883_s2 + $0x48] ss:$16 sps:$4 sm:$0xff] (!%p202_p3)   ;;  %v3944_v12 = vld [vmem:[%s5883_s2 + $0x64] ss:$16 sps:$4 sm:$0xff] (!%p202_p3)  }
   0xb   : > { %v3946_v13 = vld [vmem:[%s5883_s2 + $0x6c] ss:$16 sps:$4 sm:$0xff] (!%p202_p3)   ;;  %v3948_v14 = vld [vmem:[%s5883_s2 + $0x60] ss:$16 sps:$4 sm:$0xff] (!%p202_p3)   ;;  %v3949_v15 = vld [vmem:[%s5883_s2 + $0x68] ss:$16 sps:$4 sm:$0xff] (!%p202_p3)  }
   0xc   : > { %2715 = vmatpush1.bf16.msra.mxu0 (!%p202_p3), %v3936_v6  ;;  %2973 = vmatpush1.bf16.msra.mxu1 (!%p202_p3), %v3937_v7  ;;  %v3950_v16 = vld [vmem:[%s5883_s2 + $0x84] ss:$16 sps:$4 sm:$0xff] (!%p202_p3)   ;;  %v3952_v17 = vld [vmem:[%s5883_s2 + $0x8c] ss:$16 sps:$4 sm:$0xff] (!%p202_p3)   ;;  %v3954_v18 = vld [vmem:[%s5883_s2 + $0x80] ss:$16 sps:$4 sm:$0xff] (!%p202_p3)  }
   0xd   : > { %2716 = vmatprep.subr.bf16.mxu0 (!%p202_p3), %v3938_v8  ;;  %2974 = vmatprep.subr.bf16.mxu1 (!%p202_p3), %v3940_v9  ;;  %v3955_v19 = vld [vmem:[%s5883_s2 + $0x88] ss:$16 sps:$4 sm:$0xff] (!%p202_p3)   ;;  %v3956_v20 = vld [vmem:[%s5883_s2 + $0xa4] ss:$16 sps:$4 sm:$0xff] (!%p202_p3)   ;;  %v3958_v21 = vld [vmem:[%s5883_s2 + $0xac] ss:$16 sps:$4 sm:$0xff] (!%p202_p3)  }
   0xe   : > { %s5890_s12 = smov (!%p259_p4, %s4546_s12), 1  ;;  %v3960_v22 = vld [vmem:[%s5883_s2 + $0xa0] ss:$16 sps:$4 sm:$0xff]   ;;  %v3961_v23 = vld [vmem:[%s5883_s2 + $0xa8] ss:$16 sps:$4 sm:$0xff]  }
   0xf   : > { %v3962_v24 = vld [vmem:[%s5883_s2 + $0xc4] ss:$16 sps:$4 sm:$0xff]   ;;  %v3964_v25 = vld [vmem:[%s5883_s2 + $0xcc] ss:$16 sps:$4 sm:$0xff]   ;;  %v3966_v26 = vld [vmem:[%s5883_s2 + $0xc0] ss:$16 sps:$4 sm:$0xff]  }
  0x10   : > { %2717 = vmatpush1.bf16.msra.mxu0 %v3942_v10  ;;  %2975 = vmatpush1.bf16.msra.mxu1 %v3943_v11  ;;  %v3967_v27 = vld [vmem:[%s5883_s2 + $0xc8] ss:$16 sps:$4 sm:$0xff]   ;;  %v3968_v28 = vld [vmem:[%s5883_s2 + $0xe4] ss:$16 sps:$4 sm:$0xff]   ;;  %v3970_v29 = vld [vmem:[%s5883_s2 + $0xec] ss:$16 sps:$4 sm:$0xff]  }
  0x11   : > { %2718 = vmatprep.subr.bf16.mxu0 %v3944_v12  ;;  %2976 = vmatprep.subr.bf16.mxu1 %v3946_v13  ;;  %v3972_v30 = vld [vmem:[%s5883_s2 + $0xe0] ss:$16 sps:$4 sm:$0xff]   ;;  %v3973_v31 = vld [vmem:[%s5883_s2 + $0xe8] ss:$16 sps:$4 sm:$0xff]   ;;  %v3974_v32 = vld [vmem:[%s5883_s2 + $0x104] ss:$16 sps:$4 sm:$0xff]  }
  0x12   : > { %v3976_v33 = vld [vmem:[%s5883_s2 + $0x10c] ss:$16 sps:$4 sm:$0xff]   ;;  %v3978_v34 = vld [vmem:[%s5883_s2 + $0x100] ss:$16 sps:$4 sm:$0xff]   ;;  %v3979_v35 = vld [vmem:[%s5883_s2 + $0x108] ss:$16 sps:$4 sm:$0xff]  }
  0x13   : > { %v3980_v36 = vld [vmem:[%s5883_s2 + $0x124] ss:$16 sps:$4 sm:$0xff]   ;;  %v3982_v37 = vld [vmem:[%s5883_s2 + $0x12c] ss:$16 sps:$4 sm:$0xff]   ;;  %v3984_v38 = vld [vmem:[%s5883_s2 + $0x120] ss:$16 sps:$4 sm:$0xff]  }
  0x14   : > { %2719 = vmatpush1.bf16.msra.mxu0 %v3948_v14  ;;  %2977 = vmatpush1.bf16.msra.mxu1 %v3949_v15  ;;  %v3985_v39 = vld [vmem:[%s5883_s2 + $0x128] ss:$16 sps:$4 sm:$0xff]   ;;  %v3986_v40 = vld [vmem:[%s5883_s2 + $0x144] ss:$16 sps:$4 sm:$0xff]   ;;  %s3899_s29 = smul.u32 48, %s5890_s12 }
  0x15   : > { %2720 = vmatprep.subr.bf16.mxu0 %v3950_v16  ;;  %2978 = vmatprep.subr.bf16.mxu1 %v3952_v17  ;;  %v3988_v41 = vld [vmem:[%s5883_s2 + $0x14c] ss:$16 sps:$4 sm:$0xff]   ;;  %v3990_v42 = vld [vmem:[%s5883_s2 + $0x140] ss:$16 sps:$4 sm:$0xff]   ;;  %v3991_v43 = vld [vmem:[%s5883_s2 + $0x148] ss:$16 sps:$4 sm:$0xff]  }
  0x16   : > { %v3992_v44 = vld [vmem:[%s5883_s2 + $0x164] ss:$16 sps:$4 sm:$0xff]   ;;  %s4737_s17 = scalar_lea.vmem %s5881_s0, %s3899_s29  ;;  %v3994_v45 = vld [vmem:[%s5883_s2 + $0x16c] ss:$16 sps:$4 sm:$0xff]   ;;  %v3996_v46 = vld [vmem:[%s5883_s2 + $0x160] ss:$16 sps:$4 sm:$0xff]  }
  0x17   : > { %v4746_v47 = vld [vmem:[%s4737_s17 + $0x4] ss:$16 sps:$4 sm:$0xff]   ;;  %v3997_v48 = vld [vmem:[%s5883_s2 + $0x168] ss:$16 sps:$4 sm:$0xff]   ;;  %v4000_v50 = vld [vmem:[%s5883_s2 + $0x18c] ss:$16 sps:$4 sm:$0xff]  }
  0x18   : > { %2721 = vmatpush1.bf16.msra.mxu0 %v3954_v18  ;;  %2979 = vmatpush1.bf16.msra.mxu1 %v3955_v19  ;;  %v3998_v49 = vld [vmem:[%s5883_s2 + $0x184] ss:$16 sps:$4 sm:$0xff]   ;;  %v4002_v51 = vld [vmem:[%s5883_s2 + $0x180] ss:$16 sps:$4 sm:$0xff]   ;;  %v4003_v52 = vld [vmem:[%s5883_s2 + $0x188] ss:$16 sps:$4 sm:$0xff]  }
  0x19   : > { %2722 = vmatprep.subr.bf16.mxu0 %v3956_v20  ;;  %2980 = vmatprep.subr.bf16.mxu1 %v3958_v21  ;;  %v4004_v53 = vld [vmem:[%s5883_s2 + $0x1a4] ss:$16 sps:$4 sm:$0xff]   ;;  %v4006_v54 = vld [vmem:[%s5883_s2 + $0x1ac] ss:$16 sps:$4 sm:$0xff]   ;;  %v4008_v55 = vld [vmem:[%s5883_s2 + $0x1a0] ss:$16 sps:$4 sm:$0xff]  }
  0x1a   : > { %2744 = vmatprep.mubr.bf16.mxu0 %v4746_v47  ;;  %3002 = vmatprep.mubr.bf16.mxu1 %v4746_v47  ;;  %v4009_v56 = vld [vmem:[%s5883_s2 + $0x1a8] ss:$16 sps:$4 sm:$0xff]   ;;  %v4010_v57 = vld [vmem:[%s5883_s2 + $0x1c4] ss:$16 sps:$4 sm:$0xff]   ;;  %v4012_v58 = vld [vmem:[%s5883_s2 + $0x1cc] ss:$16 sps:$4 sm:$0xff]  }
  0x1b   : > { %v4014_v59 = vld [vmem:[%s5883_s2 + $0x1c0] ss:$16 sps:$4 sm:$0xff]   ;;  %v4015_v60 = vld [vmem:[%s5883_s2 + $0x1c8] ss:$16 sps:$4 sm:$0xff]   ;;  %v4016_v61 = vld [vmem:[%s5883_s2 + $0x1e4] ss:$16 sps:$4 sm:$0xff]  }
  0x1c   : > { %2723 = vmatpush1.bf16.msra.mxu0 %v3960_v22  ;;  %2981 = vmatpush1.bf16.msra.mxu1 %v3961_v23  ;;  %v4018_v62 = vld [vmem:[%s5883_s2 + $0x1ec] ss:$16 sps:$4 sm:$0xff]   ;;  %v4020_v63 = vld [vmem:[%s5883_s2 + $0x1e0] ss:$16 sps:$4 sm:$0xff]   ;;  %v4021_v0 = vld [vmem:[%s5883_s2 + $0x1e8] ss:$16 sps:$4 sm:$0xff]  }
  0x1d   : > { %2724 = vmatprep.subr.bf16.mxu0 %v3962_v24  ;;  %2982 = vmatprep.subr.bf16.mxu1 %v3964_v25  ;;  %v4026_v1 = vld [vmem:[%s5883_s2 + $0x204] ss:$16 sps:$4 sm:$0xff]   ;;  %v4029_v2 = vld [vmem:[%s5883_s2 + $0x20c] ss:$16 sps:$4 sm:$0xff]   ;;  %v4024_v3 = vld [vmem:[%s5883_s2 + $0x200] ss:$16 sps:$4 sm:$0xff]  }
  0x1e   : > { %v4027_v4 = vld [vmem:[%s5883_s2 + $0x208] ss:$16 sps:$4 sm:$0xff]   ;;  %v4814_v5 = vld [vmem:[%s4737_s17] ss:$16 sps:$4 sm:$0xff]   ;;  %v4033_v6 = vld [vmem:[%s5883_s2 + $0x224] ss:$16 sps:$4 sm:$0xff]  }
  0x1f   : > { %v4036_v7 = vld [vmem:[%s5883_s2 + $0x22c] ss:$16 sps:$4 sm:$0xff]   ;;  %v4031_v8 = vld [vmem:[%s5883_s2 + $0x220] ss:$16 sps:$4 sm:$0xff]   ;;  %v4034_v9 = vld [vmem:[%s5883_s2 + $0x228] ss:$16 sps:$4 sm:$0xff]  }
  0x20   : > { %2725 = vmatpush1.bf16.msra.mxu0 %v3966_v26  ;;  %2983 = vmatpush1.bf16.msra.mxu1 %v3967_v27  ;;  %v4039_v10 = vld [vmem:[%s5883_s2 + $0x244] ss:$16 sps:$4 sm:$0xff]   ;;  %v4042_v11 = vld [vmem:[%s5883_s2 + $0x24c] ss:$16 sps:$4 sm:$0xff]   ;;  %v4037_v12 = vld [vmem:[%s5883_s2 + $0x240] ss:$16 sps:$4 sm:$0xff]  }
  0x21   : > { %2726 = vmatprep.subr.bf16.mxu0 %v3968_v28  ;;  %2984 = vmatprep.subr.bf16.mxu1 %v3970_v29  ;;  %v4040_v13 = vld [vmem:[%s5883_s2 + $0x248] ss:$16 sps:$4 sm:$0xff]   ;;  %v4045_v14 = vld [vmem:[%s5883_s2 + $0x264] ss:$16 sps:$4 sm:$0xff]   ;;  %v4048_v15 = vld [vmem:[%s5883_s2 + $0x26c] ss:$16 sps:$4 sm:$0xff]  }
  0x22   : > { %v4043_v16 = vld [vmem:[%s5883_s2 + $0x260] ss:$16 sps:$4 sm:$0xff]   ;;  %v4046_v17 = vld [vmem:[%s5883_s2 + $0x268] ss:$16 sps:$4 sm:$0xff]   ;;  %v4051_v18 = vld [vmem:[%s5883_s2 + $0x284] ss:$16 sps:$4 sm:$0xff]  }
  0x23   : > { %v4054_v19 = vld [vmem:[%s5883_s2 + $0x28c] ss:$16 sps:$4 sm:$0xff]   ;;  %v4049_v20 = vld [vmem:[%s5883_s2 + $0x280] ss:$16 sps:$4 sm:$0xff]   ;;  %v4052_v21 = vld [vmem:[%s5883_s2 + $0x288] ss:$16 sps:$4 sm:$0xff]  }
  0x24   : > { %2727 = vmatpush1.bf16.msra.mxu0 %v3972_v30  ;;  %2985 = vmatpush1.bf16.msra.mxu1 %v3973_v31  ;;  %v4057_v22 = vld [vmem:[%s5883_s2 + $0x2a4] ss:$16 sps:$4 sm:$0xff]   ;;  %v4060_v23 = vld [vmem:[%s5883_s2 + $0x2ac] ss:$16 sps:$4 sm:$0xff]   ;;  %v4055_v24 = vld [vmem:[%s5883_s2 + $0x2a0] ss:$16 sps:$4 sm:$0xff]  }
  0x25   : > { %2728 = vmatprep.subr.bf16.mxu0 %v3974_v32  ;;  %2986 = vmatprep.subr.bf16.mxu1 %v3976_v33  ;;  %v4058_v25 = vld [vmem:[%s5883_s2 + $0x2a8] ss:$16 sps:$4 sm:$0xff]   ;;  %v4063_v26 = vld [vmem:[%s5883_s2 + $0x2c4] ss:$16 sps:$4 sm:$0xff]   ;;  %v4066_v27 = vld [vmem:[%s5883_s2 + $0x2cc] ss:$16 sps:$4 sm:$0xff]  }
  0x26   : > { %v4061_v28 = vld [vmem:[%s5883_s2 + $0x2c0] ss:$16 sps:$4 sm:$0xff]   ;;  %v4888_v29 = vld [vmem:[%s4737_s17 + $0xc] ss:$16 sps:$4 sm:$0xff]   ;;  %v4064_v30 = vld [vmem:[%s5883_s2 + $0x2c8] ss:$16 sps:$4 sm:$0xff]  }
  0x27   : > { %v4069_v31 = vld [vmem:[%s5883_s2 + $0x2e4] ss:$16 sps:$4 sm:$0xff]   ;;  %v4072_v32 = vld [vmem:[%s5883_s2 + $0x2ec] ss:$16 sps:$4 sm:$0xff]   ;;  %v4067_v33 = vld [vmem:[%s5883_s2 + $0x2e0] ss:$16 sps:$4 sm:$0xff]  }
  0x28   : > { %2729 = vmatpush1.bf16.msra.mxu0 %v3978_v34  ;;  %2987 = vmatpush1.bf16.msra.mxu1 %v3979_v35  ;;  %v4070_v34 = vld [vmem:[%s5883_s2 + $0x2e8] ss:$16 sps:$4 sm:$0xff]   ;;  %v4075_v35 = vld [vmem:[%s5883_s2 + $0x304] ss:$16 sps:$4 sm:$0xff]   ;;  %s3853_s18 = sadd.s32 32, %s3899_s29 }
  0x29   : > { %2730 = vmatprep.subr.bf16.mxu0 %v3980_v36  ;;  %2988 = vmatprep.subr.bf16.mxu1 %v3982_v37  ;;  %v4078_v36 = vld [vmem:[%s5883_s2 + $0x30c] ss:$16 sps:$4 sm:$0xff]   ;;  %v4073_v37 = vld [vmem:[%s5883_s2 + $0x300] ss:$16 sps:$4 sm:$0xff]   ;;  %s5024_s26 = scalar_lea.vmem %s5882_s1, %s3853_s18  ;;  %vm338_vm0 = vsmask.f32 7424 }
  0x2c   : > { %2731 = vmatpush1.bf16.msra.mxu0 %v3984_v38  ;;  %2989 = vmatpush1.bf16.msra.mxu1 %v3985_v39  ;;  %v4076_v38 = vld [vmem:[%s5883_s2 + $0x308] ss:$16 sps:$4 sm:$0xff]   ;;  %v4081_v39 = vld [vmem:[%s5883_s2 + $0x324] ss:$16 sps:$4 sm:$0xff]  }
  0x2d   : > { %2732 = vmatprep.subr.bf16.mxu0 %v3986_v40  ;;  %2990 = vmatprep.subr.bf16.mxu1 %v3988_v41  ;;  %v4084_v40 = vld [vmem:[%s5883_s2 + $0x32c] ss:$16 sps:$4 sm:$0xff]   ;;  %v4079_v41 = vld [vmem:[%s5883_s2 + $0x320] ss:$16 sps:$4 sm:$0xff]  }
  0x30   : > { %2733 = vmatpush1.bf16.msra.mxu0 %v3990_v42  ;;  %2991 = vmatpush1.bf16.msra.mxu1 %v3991_v43  ;;  %v4082_v42 = vld [vmem:[%s5883_s2 + $0x328] ss:$16 sps:$4 sm:$0xff]   ;;  %v4087_v43 = vld [vmem:[%s5883_s2 + $0x344] ss:$16 sps:$4 sm:$0xff]  }
  0x31   : > { %2734 = vmatprep.subr.bf16.mxu0 %v3992_v44  ;;  %2992 = vmatprep.subr.bf16.mxu1 %v3994_v45  ;;  %v4090_v44 = vld [vmem:[%s5883_s2 + $0x34c] ss:$16 sps:$4 sm:$0xff]   ;;  %v4085_v45 = vld [vmem:[%s5883_s2 + $0x340] ss:$16 sps:$4 sm:$0xff]  }
  0x34   : > { %2735 = vmatpush1.bf16.msra.mxu0 %v3996_v46  ;;  %2993 = vmatpush1.bf16.msra.mxu1 %v3997_v48  ;;  %v4088_v46 = vld [vmem:[%s5883_s2 + $0x348] ss:$16 sps:$4 sm:$0xff]   ;;  %v4093_v48 = vld [vmem:[%s5883_s2 + $0x364] ss:$16 sps:$4 sm:$0xff]  }
  0x35   : > { %2736 = vmatprep.subr.bf16.mxu0 %v3998_v49  ;;  %2994 = vmatprep.subr.bf16.mxu1 %v4000_v50  ;;  %v4096_v49 = vld [vmem:[%s5883_s2 + $0x36c] ss:$16 sps:$4 sm:$0xff]   ;;  %v4091_v50 = vld [vmem:[%s5883_s2 + $0x360] ss:$16 sps:$4 sm:$0xff]  }
  0x38   : > { %2737 = vmatpush1.bf16.msra.mxu0 %v4002_v51  ;;  %2995 = vmatpush1.bf16.msra.mxu1 %v4003_v52  ;;  %v4094_v51 = vld [vmem:[%s5883_s2 + $0x368] ss:$16 sps:$4 sm:$0xff]   ;;  %v4099_v52 = vld [vmem:[%s5883_s2 + $0x384] ss:$16 sps:$4 sm:$0xff]  }
  0x39   : > { %2738 = vmatprep.subr.bf16.mxu0 %v4004_v53  ;;  %2996 = vmatprep.subr.bf16.mxu1 %v4006_v54  ;;  %v4102_v53 = vld [vmem:[%s5883_s2 + $0x38c] ss:$16 sps:$4 sm:$0xff]   ;;  %v4097_v54 = vld [vmem:[%s5883_s2 + $0x380] ss:$16 sps:$4 sm:$0xff]  }
  0x3c   : > { %2739 = vmatpush1.bf16.msra.mxu0 %v4008_v55  ;;  %2997 = vmatpush1.bf16.msra.mxu1 %v4009_v56  ;;  %v4100_v55 = vld [vmem:[%s5883_s2 + $0x388] ss:$16 sps:$4 sm:$0xff]   ;;  %v4105_v56 = vld [vmem:[%s5883_s2 + $0x3a4] ss:$16 sps:$4 sm:$0xff]  }
  0x3d   : > { %2740 = vmatprep.subr.bf16.mxu0 %v4010_v57  ;;  %2998 = vmatprep.subr.bf16.mxu1 %v4012_v58  ;;  %v4108_v57 = vld [vmem:[%s5883_s2 + $0x3ac] ss:$16 sps:$4 sm:$0xff]   ;;  %v4103_v58 = vld [vmem:[%s5883_s2 + $0x3a0] ss:$16 sps:$4 sm:$0xff]  }
  0x40   : > { %2741 = vmatpush1.bf16.msra.mxu0 %v4014_v59  ;;  %2999 = vmatpush1.bf16.msra.mxu1 %v4015_v60  ;;  %v4106_v59 = vld [vmem:[%s5883_s2 + $0x3a8] ss:$16 sps:$4 sm:$0xff]   ;;  %v4111_v60 = vld [vmem:[%s5883_s2 + $0x3c4] ss:$16 sps:$4 sm:$0xff]  }
  0x41   : > { %2742 = vmatprep.subr.bf16.mxu0 %v4016_v61  ;;  %3000 = vmatprep.subr.bf16.mxu1 %v4018_v62  ;;  %v4114_v61 = vld [vmem:[%s5883_s2 + $0x3cc] ss:$16 sps:$4 sm:$0xff]   ;;  %v4109_v62 = vld [vmem:[%s5883_s2 + $0x3c0] ss:$16 sps:$4 sm:$0xff]  }
  0x44   : > { %2743 = vmatpush1.bf16.msra.mxu0 %v4020_v63  ;;  %3001 = vmatpush1.bf16.msra.mxu1 %v4021_v0  ;;  %v4112_v63 = vld [vmem:[%s5883_s2 + $0x3c8] ss:$16 sps:$4 sm:$0xff]   ;;  %v4117_v0 = vld [vmem:[%s5883_s2 + $0x3e4] ss:$16 sps:$4 sm:$0xff]  }
  0x45   : > { %2755 = vmatprep.subr.bf16.mxu0 %v4026_v1  ;;  %3013 = vmatprep.subr.bf16.mxu1 %v4029_v2  ;;  %v4120_v1 = vld [vmem:[%s5883_s2 + $0x3ec] ss:$16 sps:$4 sm:$0xff]   ;;  %v4115_v2 = vld [vmem:[%s5883_s2 + $0x3e0] ss:$16 sps:$4 sm:$0xff]  }
  0x47   : > { %2745 = vmatmul.mubr.bf16.vlgmr.msra.gmra.mrb[0].mxu0 %v4814_v5  ;;  %3003 = vmatmul.mubr.bf16.vlgmr.msra.gmra.mrb[0].mxu1 %v4814_v5 }
  0x48   : > { %2756 = vmatpush1.bf16.msra.mxu0 %v4024_v3  ;;  %3014 = vmatpush1.bf16.msra.mxu1 %v4027_v4  ;;  %v4118_v3 = vld [vmem:[%s5883_s2 + $0x3e8] ss:$16 sps:$4 sm:$0xff]   ;;  %v4125_v4 = vld [vmem:[%s5883_s2 + $0x404] ss:$16 sps:$4 sm:$0xff]  }
  0x49   : > { %2757 = vmatprep.subr.bf16.mxu0 %v4033_v6  ;;  %3015 = vmatprep.subr.bf16.mxu1 %v4036_v7  ;;  %v4128_v6 = vld [vmem:[%s5883_s2 + $0x40c] ss:$16 sps:$4 sm:$0xff]   ;;  %v354_v7 = vshll.u32 %v4746_v47, 16 }
  0x4a   : > { %2787 = vmatprep.mubr.bf16.mxu0 %v4888_v29  ;;  %3045 = vmatprep.mubr.bf16.mxu1 %v4888_v29 }
  0x4c   : > { %2758 = vmatpush1.bf16.msra.mxu0 %v4031_v8  ;;  %3016 = vmatpush1.bf16.msra.mxu1 %v4034_v9  ;;  %v4123_v8 = vld [vmem:[%s5883_s2 + $0x400] ss:$16 sps:$4 sm:$0xff]   ;;  %v4126_v9 = vld [vmem:[%s5883_s2 + $0x408] ss:$16 sps:$4 sm:$0xff]  }
  0x4d   : > { %2759 = vmatprep.subr.bf16.mxu0 %v4039_v10  ;;  %3017 = vmatprep.subr.bf16.mxu1 %v4042_v11  ;;  %v5019_v10 = vld [vmem:[%s4737_s17 + $0x8] ss:$16 sps:$4 sm:$0xff]   ;;  %v4132_v11 = vld [vmem:[%s5883_s2 + $0x424] ss:$16 sps:$4 sm:$0xff]  }
  0x50   : > { %2760 = vmatpush1.bf16.msra.mxu0 %v4037_v12  ;;  %3018 = vmatpush1.bf16.msra.mxu1 %v4040_v13  ;;  %v4135_v12 = vld [vmem:[%s5883_s2 + $0x42c] ss:$16 sps:$4 sm:$0xff]   ;;  %v352_v13 = vshrl.u32 %v4746_v47, 16  ;;  %v4133_v47 = vld [vmem:[%s5883_s2 + $0x428] ss:$16 sps:$4 sm:$0xff]  }
  0x51   : > { %2761 = vmatprep.subr.bf16.mxu0 %v4045_v14  ;;  %3019 = vmatprep.subr.bf16.mxu1 %v4048_v15  ;;  %v356_v14 = vrot.slane %v354_v7, 1  ;;  %v5034_v15 = vld [vmem:[%s5024_s26] sm:$0xff] }
  0x52   : > { %v4202_v7 = vld [vmem:[%s5883_s2 + $0x5a0] ss:$16 sps:$4 sm:$0xff]  }
  0x54   : > { %2762 = vmatpush1.bf16.msra.mxu0 %v4043_v16  ;;  %3020 = vmatpush1.bf16.msra.mxu1 %v4046_v17  ;;  %v4130_v16 = vld [vmem:[%s5883_s2 + $0x420] ss:$16 sps:$4 sm:$0xff]   ;;  %v5043_v17 = vcombine.high %v5034_v15, %v5034_v15 }
  0x55   : > { %2763 = vmatprep.subr.bf16.mxu0 %v4051_v18  ;;  %3021 = vmatprep.subr.bf16.mxu1 %v4054_v19  ;;  %v4138_v18 = vld [vmem:[%s5883_s2 + $0x444] ss:$16 sps:$4 sm:$0xff]   ;;  %v4141_v19 = vld [vmem:[%s5883_s2 + $0x44c] ss:$16 sps:$4 sm:$0xff]  }
  0x58   : > { %2764 = vmatpush1.bf16.msra.mxu0 %v4049_v20  ;;  %3022 = vmatpush1.bf16.msra.mxu1 %v4052_v21  ;;  %v357_v20 = vor.u32 %v356_v14, %v352_v13  ;;  %v359_v21 = vshll.u32 %v5043_v17, 16  ;;  %v5203_v13 = vld [vmem:[%s5024_s26 + $0x8] sm:$0xff] }
  0x59   : > { %2765 = vmatprep.subr.bf16.mxu0 %v4057_v22  ;;  %3023 = vmatprep.subr.bf16.mxu1 %v4060_v23  ;;  %v4136_v23 = vld [vmem:[%s5883_s2 + $0x440] ss:$16 sps:$4 sm:$0xff]   ;;  %v4213_v14 = vld [vmem:[%s5883_s2 + $0x5cc] ss:$16 sps:$4 sm:$0xff]  }
  0x5a   : > { %v361_v22 = vrot.slane %v359_v21, 1 }
  0x5c   : > { %2766 = vmatpush1.bf16.msra.mxu0 %v4055_v24  ;;  %3024 = vmatpush1.bf16.msra.mxu1 %v4058_v25  ;;  %v4139_v24 = vld [vmem:[%s5883_s2 + $0x448] ss:$16 sps:$4 sm:$0xff]   ;;  %v4144_v25 = vld [vmem:[%s5883_s2 + $0x464] ss:$16 sps:$4 sm:$0xff]  }
  0x5d   : > { %2767 = vmatprep.subr.bf16.mxu0 %v4063_v26  ;;  %3025 = vmatprep.subr.bf16.mxu1 %v4066_v27  ;;  %v4147_v26 = vld [vmem:[%s5883_s2 + $0x46c] ss:$16 sps:$4 sm:$0xff]   ;;  %v362_v27 = vsel %vm338_vm0, %v357_v20, %v361_v22  ;;  %v4216_v20 = vld [vmem:[%s5883_s2 + $0x5e4] ss:$16 sps:$4 sm:$0xff]  }
  0x60   : > { %2768 = vmatpush1.bf16.msra.mxu0 %v4061_v28  ;;  %3026 = vmatpush1.bf16.msra.mxu1 %v4064_v30  ;;  %v4142_v28 = vld [vmem:[%s5883_s2 + $0x460] ss:$16 sps:$4 sm:$0xff]   ;;  %v4145_v30 = vld [vmem:[%s5883_s2 + $0x468] ss:$16 sps:$4 sm:$0xff]  }
  0x61   : > { %2769 = vmatprep.subr.bf16.mxu0 %v4069_v31  ;;  %3027 = vmatprep.subr.bf16.mxu1 %v4072_v32  ;;  %v4150_v31 = vld [vmem:[%s5883_s2 + $0x484] ss:$16 sps:$4 sm:$0xff]   ;;  %v4153_v32 = vld [vmem:[%s5883_s2 + $0x48c] ss:$16 sps:$4 sm:$0xff]  }
  0x64   : > { %2770 = vmatpush1.bf16.msra.mxu0 %v4067_v33  ;;  %3028 = vmatpush1.bf16.msra.mxu1 %v4070_v34  ;;  %v4148_v33 = vld [vmem:[%s5883_s2 + $0x480] ss:$16 sps:$4 sm:$0xff]   ;;  %v4151_v34 = vld [vmem:[%s5883_s2 + $0x488] ss:$16 sps:$4 sm:$0xff]  }
  0x65   : > { %2771 = vmatprep.subr.bf16.mxu0 %v4075_v35  ;;  %3029 = vmatprep.subr.bf16.mxu1 %v4078_v36  ;;  %v4156_v35 = vld [vmem:[%s5883_s2 + $0x4a4] ss:$16 sps:$4 sm:$0xff]   ;;  %v4159_v36 = vld [vmem:[%s5883_s2 + $0x4ac] ss:$16 sps:$4 sm:$0xff]  }
  0x68   : > { %2772 = vmatpush1.bf16.msra.mxu0 %v4073_v37  ;;  %3030 = vmatpush1.bf16.msra.mxu1 %v4076_v38  ;;  %v4154_v37 = vld [vmem:[%s5883_s2 + $0x4a0] ss:$16 sps:$4 sm:$0xff]   ;;  %v4157_v38 = vld [vmem:[%s5883_s2 + $0x4a8] ss:$16 sps:$4 sm:$0xff]  }
  0x69   : > { %2773 = vmatprep.subr.bf16.mxu0 %v4081_v39  ;;  %3031 = vmatprep.subr.bf16.mxu1 %v4084_v40  ;;  %v4162_v39 = vld [vmem:[%s5883_s2 + $0x4c4] ss:$16 sps:$4 sm:$0xff]   ;;  %v4165_v40 = vld [vmem:[%s5883_s2 + $0x4cc] ss:$16 sps:$4 sm:$0xff]  }
  0x6c   : > { %2774 = vmatpush1.bf16.msra.mxu0 %v4079_v41  ;;  %3032 = vmatpush1.bf16.msra.mxu1 %v4082_v42  ;;  %v4160_v41 = vld [vmem:[%s5883_s2 + $0x4c0] ss:$16 sps:$4 sm:$0xff]   ;;  %v4163_v42 = vld [vmem:[%s5883_s2 + $0x4c8] ss:$16 sps:$4 sm:$0xff]  }
  0x6d   : > { %2775 = vmatprep.subr.bf16.mxu0 %v4087_v43  ;;  %3033 = vmatprep.subr.bf16.mxu1 %v4090_v44  ;;  %v4168_v43 = vld [vmem:[%s5883_s2 + $0x4e4] ss:$16 sps:$4 sm:$0xff]   ;;  %v4171_v44 = vld [vmem:[%s5883_s2 + $0x4ec] ss:$16 sps:$4 sm:$0xff]  }
  0x70   : > { %2776 = vmatpush1.bf16.msra.mxu0 %v4085_v45  ;;  %3034 = vmatpush1.bf16.msra.mxu1 %v4088_v46  ;;  %v4166_v45 = vld [vmem:[%s5883_s2 + $0x4e0] ss:$16 sps:$4 sm:$0xff]   ;;  %v4169_v46 = vld [vmem:[%s5883_s2 + $0x4e8] ss:$16 sps:$4 sm:$0xff]  }
  0x71   : > { %2777 = vmatprep.subr.bf16.mxu0 %v4093_v48  ;;  %3035 = vmatprep.subr.bf16.mxu1 %v4096_v49  ;;  %v4174_v48 = vld [vmem:[%s5883_s2 + $0x504] ss:$16 sps:$4 sm:$0xff]   ;;  %v4177_v49 = vld [vmem:[%s5883_s2 + $0x50c] ss:$16 sps:$4 sm:$0xff]  }
  0x74   : > { %2778 = vmatpush1.bf16.msra.mxu0 %v4091_v50  ;;  %3036 = vmatpush1.bf16.msra.mxu1 %v4094_v51  ;;  %v4172_v50 = vld [vmem:[%s5883_s2 + $0x500] ss:$16 sps:$4 sm:$0xff]   ;;  %v4175_v51 = vld [vmem:[%s5883_s2 + $0x508] ss:$16 sps:$4 sm:$0xff]  }
  0x75   : > { %2779 = vmatprep.subr.bf16.mxu0 %v4099_v52  ;;  %3037 = vmatprep.subr.bf16.mxu1 %v4102_v53  ;;  %v4180_v52 = vld [vmem:[%s5883_s2 + $0x524] ss:$16 sps:$4 sm:$0xff]   ;;  %v4183_v53 = vld [vmem:[%s5883_s2 + $0x52c] ss:$16 sps:$4 sm:$0xff]  }
  0x78   : > { %2780 = vmatpush1.bf16.msra.mxu0 %v4097_v54  ;;  %3038 = vmatpush1.bf16.msra.mxu1 %v4100_v55  ;;  %v4178_v54 = vld [vmem:[%s5883_s2 + $0x520] ss:$16 sps:$4 sm:$0xff]   ;;  %v4181_v55 = vld [vmem:[%s5883_s2 + $0x528] ss:$16 sps:$4 sm:$0xff]  }
  0x79   : > { %2781 = vmatprep.subr.bf16.mxu0 %v4105_v56  ;;  %3039 = vmatprep.subr.bf16.mxu1 %v4108_v57  ;;  %v4186_v56 = vld [vmem:[%s5883_s2 + $0x544] ss:$16 sps:$4 sm:$0xff]   ;;  %v4189_v57 = vld [vmem:[%s5883_s2 + $0x54c] ss:$16 sps:$4 sm:$0xff]  }
  0x7c   : > { %2782 = vmatpush1.bf16.msra.mxu0 %v4103_v58  ;;  %3040 = vmatpush1.bf16.msra.mxu1 %v4106_v59  ;;  %v4184_v58 = vld [vmem:[%s5883_s2 + $0x540] ss:$16 sps:$4 sm:$0xff]   ;;  %v4187_v59 = vld [vmem:[%s5883_s2 + $0x548] ss:$16 sps:$4 sm:$0xff]  }
  0x7d   : > { %2783 = vmatprep.subr.bf16.mxu0 %v4111_v60  ;;  %3041 = vmatprep.subr.bf16.mxu1 %v4114_v61  ;;  %v4192_v60 = vld [vmem:[%s5883_s2 + $0x564] ss:$16 sps:$4 sm:$0xff]   ;;  %v4195_v61 = vld [vmem:[%s5883_s2 + $0x56c] ss:$16 sps:$4 sm:$0xff]  }
  0x80   : > { %2784 = vmatpush1.bf16.msra.mxu0 %v4109_v62  ;;  %3042 = vmatpush1.bf16.msra.mxu1 %v4112_v63  ;;  %v4190_v62 = vld [vmem:[%s5883_s2 + $0x560] ss:$16 sps:$4 sm:$0xff]   ;;  %v4193_v63 = vld [vmem:[%s5883_s2 + $0x568] ss:$16 sps:$4 sm:$0xff]  }
  0x81   : > { %2785 = vmatprep.subr.bf16.mxu0 %v4117_v0  ;;  %3043 = vmatprep.subr.bf16.mxu1 %v4120_v1  ;;  %v4198_v0 = vld [vmem:[%s5883_s2 + $0x584] ss:$16 sps:$4 sm:$0xff]   ;;  %v4201_v1 = vld [vmem:[%s5883_s2 + $0x58c] ss:$16 sps:$4 sm:$0xff]  }
  0x84   : > { %2786 = vmatpush1.bf16.msra.mxu0 %v4115_v2  ;;  %3044 = vmatpush1.bf16.msra.mxu1 %v4118_v3  ;;  %v4196_v2 = vld [vmem:[%s5883_s2 + $0x580] ss:$16 sps:$4 sm:$0xff]   ;;  %v4199_v3 = vld [vmem:[%s5883_s2 + $0x588] ss:$16 sps:$4 sm:$0xff]  }
  0x85   : > { %2798 = vmatprep.subr.bf16.mxu0 %v4125_v4  ;;  %3056 = vmatprep.subr.bf16.mxu1 %v4128_v6  ;;  %v4204_v4 = vld [vmem:[%s5883_s2 + $0x5a4] ss:$16 sps:$4 sm:$0xff]   ;;  %v4207_v6 = vld [vmem:[%s5883_s2 + $0x5ac] ss:$16 sps:$4 sm:$0xff]  }
  0x87   : > { %2788 = vmatmul.mubr.bf16.vlgmr.msra.gmra.mrb[0].mxu0 %v5019_v10  ;;  %3046 = vmatmul.mubr.bf16.vlgmr.msra.gmra.mrb[0].mxu1 %v5019_v10 }
  0x88   : > { %2799 = vmatpush1.bf16.msra.mxu0 %v4123_v8  ;;  %3057 = vmatpush1.bf16.msra.mxu1 %v4126_v9  ;;  %v4205_v8 = vld [vmem:[%s5883_s2 + $0x5a8] ss:$16 sps:$4 sm:$0xff]   ;;  %v4210_v9 = vld [vmem:[%s5883_s2 + $0x5c4] ss:$16 sps:$4 sm:$0xff]  }
  0x89   : > { %2800 = vmatprep.subr.bf16.mxu0 %v4132_v11  ;;  %3058 = vmatprep.subr.bf16.mxu1 %v4135_v12  ;;  %v5199_v11 = vcombine.low %v5034_v15, %v5034_v15  ;;  %v342_v12 = vshll.u32 %v4814_v5, 16  ;;  %v4211_v15 = vld [vmem:[%s5883_s2 + $0x5c8] ss:$16 sps:$4 sm:$0xff]  }
  0x8a   : > { %2830 = vmatprep.mubr.bf16.mxu0 %v362_v27  ;;  %3088 = vmatprep.mubr.bf16.mxu1 %v362_v27 }
  0x8b   : > { %v344_v21 = vrot.slane %v342_v12, 1  ;;  %v347_v22 = vshll.u32 %v5199_v11, 16  ;;  %v4276_v12 = vld [vmem:[%s5883_s2 + $0x720] ss:$16 sps:$4 sm:$0xff]  }
  0x8c   : > { %2801 = vmatpush1.bf16.msra.mxu0 %v4130_v16  ;;  %3059 = vmatpush1.bf16.msra.mxu1 %v4133_v47  ;;  %v378_v16 = vshll.u32 %v4888_v29, 16  ;;  %v4208_v47 = vld [vmem:[%s5883_s2 + $0x5c0] ss:$16 sps:$4 sm:$0xff]  }
  0x8d   : > { %2802 = vmatprep.subr.bf16.mxu0 %v4138_v18  ;;  %3060 = vmatprep.subr.bf16.mxu1 %v4141_v19  ;;  %v340_v18 = vshrl.u32 %v4814_v5, 16  ;;  %v5218_v19 = vcombine.high %v5203_v13, %v5203_v13  ;;  %v376_v5 = vshrl.u32 %v4888_v29, 16  ;;  %v4226_v29 = vld [vmem:[%s5883_s2 + $0x60c] ss:$16 sps:$4 sm:$0xff]  }
  0x8f   : > { %v383_v27 = vshll.u32 %v5218_v19, 16 }
  0x90   : > { %2803 = vmatpush1.bf16.msra.mxu0 %v4136_v23  ;;  %3061 = vmatpush1.bf16.msra.mxu1 %v4139_v24  ;;  %v4219_v23 = vld [vmem:[%s5883_s2 + $0x5ec] ss:$16 sps:$4 sm:$0xff]   ;;  %v380_v24 = vrot.slane %v378_v16, 1  ;;  %v4284_v16 = vld [vmem:[%s5883_s2 + $0x744] ss:$16 sps:$4 sm:$0xff]  }
  0x91   : > { %2804 = vmatprep.subr.bf16.mxu0 %v4144_v25  ;;  %3062 = vmatprep.subr.bf16.mxu1 %v4147_v26  ;;  %v4214_v25 = vld [vmem:[%s5883_s2 + $0x5e0] ss:$16 sps:$4 sm:$0xff]   ;;  %v4217_v26 = vld [vmem:[%s5883_s2 + $0x5e8] ss:$16 sps:$4 sm:$0xff]  }
  0x94   : > { %2805 = vmatpush1.bf16.msra.mxu0 %v4142_v28  ;;  %3063 = vmatpush1.bf16.msra.mxu1 %v4145_v30  ;;  %v4223_v28 = vld [vmem:[%s5883_s2 + $0x604] ss:$16 sps:$4 sm:$0xff]   ;;  %v345_v30 = vor.u32 %v344_v21, %v340_v18  ;;  %v4285_v18 = vld [vmem:[%s5883_s2 + $0x748] ss:$16 sps:$4 sm:$0xff]   ;;  %v4293_v21 = vld [vmem:[%s5883_s2 + $0x76c] ss:$16 sps:$4 sm:$0xff]  }
  0x95   : > { %2806 = vmatprep.subr.bf16.mxu0 %v4150_v31  ;;  %3064 = vmatprep.subr.bf16.mxu1 %v4153_v32  ;;  %v349_v31 = vrot.slane %v347_v22, 1  ;;  %v4221_v32 = vld [vmem:[%s5883_s2 + $0x600] ss:$16 sps:$4 sm:$0xff]  }
  0x96   : > { %v4288_v22 = vld [vmem:[%s5883_s2 + $0x760] ss:$16 sps:$4 sm:$0xff]  }
  0x98   : > { %2807 = vmatpush1.bf16.msra.mxu0 %v4148_v33  ;;  %3065 = vmatpush1.bf16.msra.mxu1 %v4151_v34  ;;  %v4224_v33 = vld [vmem:[%s5883_s2 + $0x608] ss:$16 sps:$4 sm:$0xff]   ;;  %v381_v34 = vor.u32 %v380_v24, %v376_v5  ;;  %v4296_v5 = vld [vmem:[%s5883_s2 + $0x784] ss:$16 sps:$4 sm:$0xff]   ;;  %v4299_v24 = vld [vmem:[%s5883_s2 + $0x78c] ss:$16 sps:$4 sm:$0xff]  }
  0x99   : > { %2808 = vmatprep.subr.bf16.mxu0 %v4156_v35  ;;  %3066 = vmatprep.subr.bf16.mxu1 %v4159_v36  ;;  %v385_v35 = vrot.slane %v383_v27, 1  ;;  %v350_v36 = vsel %vm338_vm0, %v345_v30, %v349_v31  ;;  %v4302_v27 = vld [vmem:[%s5883_s2 + $0x7a4] ss:$16 sps:$4 sm:$0xff]   ;;  %v4300_v30 = vld [vmem:[%s5883_s2 + $0x7a0] ss:$16 sps:$4 sm:$0xff]  }
  0x9a   : > { %v4303_v31 = vld [vmem:[%s5883_s2 + $0x7a8] ss:$16 sps:$4 sm:$0xff]  }
  0x9c   : > { %2809 = vmatpush1.bf16.msra.mxu0 %v4154_v37  ;;  %3067 = vmatpush1.bf16.msra.mxu1 %v4157_v38  ;;  %v4230_v37 = vld [vmem:[%s5883_s2 + $0x624] ss:$16 sps:$4 sm:$0xff]   ;;  %v4233_v38 = vld [vmem:[%s5883_s2 + $0x62c] ss:$16 sps:$4 sm:$0xff]  }
  0x9d   : > { %2810 = vmatprep.subr.bf16.mxu0 %v4162_v39  ;;  %3068 = vmatprep.subr.bf16.mxu1 %v4165_v40  ;;  %v4228_v39 = vld [vmem:[%s5883_s2 + $0x620] ss:$16 sps:$4 sm:$0xff]   ;;  %v4231_v40 = vld [vmem:[%s5883_s2 + $0x628] ss:$16 sps:$4 sm:$0xff]  }
  0xa0   : > { %2811 = vmatpush1.bf16.msra.mxu0 %v4160_v41  ;;  %3069 = vmatpush1.bf16.msra.mxu1 %v4163_v42  ;;  %v386_v41 = vsel %vm338_vm0, %v381_v34, %v385_v35  ;;  %v4236_v42 = vld [vmem:[%s5883_s2 + $0x644] ss:$16 sps:$4 sm:$0xff]   ;;  %v4311_v34 = vld [vmem:[%s5883_s2 + $0x7cc] ss:$16 sps:$4 sm:$0xff]   ;;  %v4306_v35 = vld [vmem:[%s5883_s2 + $0x7c0] ss:$16 sps:$4 sm:$0xff]  }
  0xa1   : > { %2812 = vmatprep.subr.bf16.mxu0 %v4168_v43  ;;  %3070 = vmatprep.subr.bf16.mxu1 %v4171_v44  ;;  %v4239_v43 = vld [vmem:[%s5883_s2 + $0x64c] ss:$16 sps:$4 sm:$0xff]   ;;  %v4234_v44 = vld [vmem:[%s5883_s2 + $0x640] ss:$16 sps:$4 sm:$0xff]  }
  0xa4   : > { %2813 = vmatpush1.bf16.msra.mxu0 %v4166_v45  ;;  %3071 = vmatpush1.bf16.msra.mxu1 %v4169_v46  ;;  %v4237_v45 = vld [vmem:[%s5883_s2 + $0x648] ss:$16 sps:$4 sm:$0xff]   ;;  %v4242_v46 = vld [vmem:[%s5883_s2 + $0x664] ss:$16 sps:$4 sm:$0xff]  }
  0xa5   : > { %2814 = vmatprep.subr.bf16.mxu0 %v4174_v48  ;;  %3072 = vmatprep.subr.bf16.mxu1 %v4177_v49  ;;  %v4245_v48 = vld [vmem:[%s5883_s2 + $0x66c] ss:$16 sps:$4 sm:$0xff]   ;;  %v4240_v49 = vld [vmem:[%s5883_s2 + $0x660] ss:$16 sps:$4 sm:$0xff]  }
  0xa8   : > { %2815 = vmatpush1.bf16.msra.mxu0 %v4172_v50  ;;  %3073 = vmatpush1.bf16.msra.mxu1 %v4175_v51  ;;  %v4243_v50 = vld [vmem:[%s5883_s2 + $0x668] ss:$16 sps:$4 sm:$0xff]   ;;  %v4248_v51 = vld [vmem:[%s5883_s2 + $0x684] ss:$16 sps:$4 sm:$0xff]  }
  0xa9   : > { %2816 = vmatprep.subr.bf16.mxu0 %v4180_v52  ;;  %3074 = vmatprep.subr.bf16.mxu1 %v4183_v53  ;;  %v4251_v52 = vld [vmem:[%s5883_s2 + $0x68c] ss:$16 sps:$4 sm:$0xff]   ;;  %v4246_v53 = vld [vmem:[%s5883_s2 + $0x680] ss:$16 sps:$4 sm:$0xff]  }
  0xac   : > { %2817 = vmatpush1.bf16.msra.mxu0 %v4178_v54  ;;  %3075 = vmatpush1.bf16.msra.mxu1 %v4181_v55  ;;  %v4249_v54 = vld [vmem:[%s5883_s2 + $0x688] ss:$16 sps:$4 sm:$0xff]   ;;  %v4254_v55 = vld [vmem:[%s5883_s2 + $0x6a4] ss:$16 sps:$4 sm:$0xff]  }
  0xad   : > { %2818 = vmatprep.subr.bf16.mxu0 %v4186_v56  ;;  %3076 = vmatprep.subr.bf16.mxu1 %v4189_v57  ;;  %v4257_v56 = vld [vmem:[%s5883_s2 + $0x6ac] ss:$16 sps:$4 sm:$0xff]   ;;  %v4252_v57 = vld [vmem:[%s5883_s2 + $0x6a0] ss:$16 sps:$4 sm:$0xff]  }
  0xb0   : > { %2819 = vmatpush1.bf16.msra.mxu0 %v4184_v58  ;;  %3077 = vmatpush1.bf16.msra.mxu1 %v4187_v59  ;;  %v4255_v58 = vld [vmem:[%s5883_s2 + $0x6a8] ss:$16 sps:$4 sm:$0xff]   ;;  %v4260_v59 = vld [vmem:[%s5883_s2 + $0x6c4] ss:$16 sps:$4 sm:$0xff]  }
  0xb1   : > { %2820 = vmatprep.subr.bf16.mxu0 %v4192_v60  ;;  %3078 = vmatprep.subr.bf16.mxu1 %v4195_v61  ;;  %v4263_v60 = vld [vmem:[%s5883_s2 + $0x6cc] ss:$16 sps:$4 sm:$0xff]   ;;  %v4258_v61 = vld [vmem:[%s5883_s2 + $0x6c0] ss:$16 sps:$4 sm:$0xff]  }
  0xb4   : > { %2821 = vmatpush1.bf16.msra.mxu0 %v4190_v62  ;;  %3079 = vmatpush1.bf16.msra.mxu1 %v4193_v63  ;;  %v4261_v62 = vld [vmem:[%s5883_s2 + $0x6c8] ss:$16 sps:$4 sm:$0xff]   ;;  %v4266_v63 = vld [vmem:[%s5883_s2 + $0x6e4] ss:$16 sps:$4 sm:$0xff]  }
  0xb5   : > { %2822 = vmatprep.subr.bf16.mxu0 %v4198_v0  ;;  %3080 = vmatprep.subr.bf16.mxu1 %v4201_v1  ;;  %v4269_v0 = vld [vmem:[%s5883_s2 + $0x6ec] ss:$16 sps:$4 sm:$0xff]   ;;  %v4264_v1 = vld [vmem:[%s5883_s2 + $0x6e0] ss:$16 sps:$4 sm:$0xff]  }
  0xb8   : > { %2823 = vmatpush1.bf16.msra.mxu0 %v4196_v2  ;;  %3081 = vmatpush1.bf16.msra.mxu1 %v4199_v3  ;;  %v4267_v2 = vld [vmem:[%s5883_s2 + $0x6e8] ss:$16 sps:$4 sm:$0xff]   ;;  %v4272_v3 = vld [vmem:[%s5883_s2 + $0x704] ss:$16 sps:$4 sm:$0xff]  }
  0xb9   : > { %2824 = vmatprep.subr.bf16.mxu0 %v4204_v4  ;;  %3082 = vmatprep.subr.bf16.mxu1 %v4207_v6  ;;  %v4275_v4 = vld [vmem:[%s5883_s2 + $0x70c] ss:$16 sps:$4 sm:$0xff]   ;;  %v4270_v6 = vld [vmem:[%s5883_s2 + $0x700] ss:$16 sps:$4 sm:$0xff]  }
  0xbc   : > { %2825 = vmatpush1.bf16.msra.mxu0 %v4202_v7  ;;  %3083 = vmatpush1.bf16.msra.mxu1 %v4205_v8  ;;  %v4273_v7 = vld [vmem:[%s5883_s2 + $0x708] ss:$16 sps:$4 sm:$0xff]   ;;  %v4278_v8 = vld [vmem:[%s5883_s2 + $0x724] ss:$16 sps:$4 sm:$0xff]  }
  0xbd   : > { %2826 = vmatprep.subr.bf16.mxu0 %v4210_v9  ;;  %3084 = vmatprep.subr.bf16.mxu1 %v4213_v14  ;;  %v4281_v9 = vld [vmem:[%s5883_s2 + $0x72c] ss:$16 sps:$4 sm:$0xff]   ;;  %v4279_v14 = vld [vmem:[%s5883_s2 + $0x728] ss:$16 sps:$4 sm:$0xff]  }
  0xc0   : > { %2827 = vmatpush1.bf16.msra.mxu0 %v4208_v47  ;;  %3085 = vmatpush1.bf16.msra.mxu1 %v4211_v15  ;;  %v4287_v47 = vld [vmem:[%s5883_s2 + $0x74c] ss:$16 sps:$4 sm:$0xff]   ;;  %v4282_v15 = vld [vmem:[%s5883_s2 + $0x740] ss:$16 sps:$4 sm:$0xff]  }
  0xc1   : > { %2828 = vmatprep.subr.bf16.mxu0 %v4216_v20  ;;  %3086 = vmatprep.subr.bf16.mxu1 %v4219_v23  ;;  %v4290_v20 = vld [vmem:[%s5883_s2 + $0x764] ss:$16 sps:$4 sm:$0xff]   ;;  %v4291_v23 = vld [vmem:[%s5883_s2 + $0x768] ss:$16 sps:$4 sm:$0xff]  }
  0xc4   : > { %2829 = vmatpush1.bf16.msra.mxu0 %v4214_v25  ;;  %3087 = vmatpush1.bf16.msra.mxu1 %v4217_v26  ;;  %v4294_v25 = vld [vmem:[%s5883_s2 + $0x780] ss:$16 sps:$4 sm:$0xff]   ;;  %v4297_v26 = vld [vmem:[%s5883_s2 + $0x788] ss:$16 sps:$4 sm:$0xff]  }
  0xc5   : > { %2841 = vmatprep.subr.bf16.mxu0 %v4223_v28  ;;  %3099 = vmatprep.subr.bf16.mxu1 %v4226_v29  ;;  %v4305_v28 = vld [vmem:[%s5883_s2 + $0x7ac] ss:$16 sps:$4 sm:$0xff]   ;;  %v4308_v29 = vld [vmem:[%s5883_s2 + $0x7c4] ss:$16 sps:$4 sm:$0xff]  }
  0xc7   : > { %2831 = vmatmul.mubr.bf16.vlgmr.msra.gmra.mrb[0].mxu0 %v350_v36  ;;  %3089 = vmatmul.mubr.bf16.vlgmr.msra.gmra.mrb[0].mxu1 %v350_v36  ;;  %v4309_v36 = vld [vmem:[%s5883_s2 + $0x7c8] ss:$16 sps:$4 sm:$0xff]  }
  0xc8   : > { %2842 = vmatpush1.bf16.msra.mxu0 %v4221_v32  ;;  %3100 = vmatpush1.bf16.msra.mxu1 %v4224_v33  ;;  %v5410_v32 = vcombine.low %v5203_v13, %v5203_v13  ;;  %v366_v33 = vshll.u32 %v5019_v10, 16  ;;  %v4314_v13 = vld [vmem:[%s5883_s2 + $0x7e4] ss:$16 sps:$4 sm:$0xff]  }
  0xc9   : > { %2843 = vmatprep.subr.bf16.mxu0 %v4230_v37  ;;  %3101 = vmatprep.subr.bf16.mxu1 %v4233_v38  ;;  %v364_v37 = vshrl.u32 %v5019_v10, 16  ;;  %v4312_v10 = vld [vmem:[%s5883_s2 + $0x7e0] ss:$16 sps:$4 sm:$0xff]  }
  0xca   : > { %2873 = vmatprep.mubr.bf16.mxu0 %v386_v41  ;;  %3131 = vmatprep.mubr.bf16.mxu1 %v386_v41  ;;  %v368_v38 = vrot.slane %v366_v33, 1  ;;  %v4315_v41 = vld [vmem:[%s5883_s2 + $0x7e8] ss:$16 sps:$4 sm:$0xff]  }
  0xcb   : > { %v4383_v33 = vld [vmem:[%s5883_s2 + $0x948] ss:$16 sps:$4 sm:$0xff]  }
  0xcc   : > { %2844 = vmatpush1.bf16.msra.mxu0 %v4228_v39  ;;  %3102 = vmatpush1.bf16.msra.mxu1 %v4231_v40  ;;  %v371_v39 = vshll.u32 %v5410_v32, 16  ;;  %v4317_v40 = vld [vmem:[%s5883_s2 + $0x7ec] ss:$16 sps:$4 sm:$0xff]  }
  0xcd   : > { %2845 = vmatprep.subr.bf16.mxu0 %v4236_v42  ;;  %3103 = vmatprep.subr.bf16.mxu1 %v4239_v43  ;;  %v4321_v42 = vld [vmem:[%s5883_s2 + $0x804] ss:$16 sps:$4 sm:$0xff]   ;;  %v369_v43 = vor.u32 %v368_v38, %v364_v37  ;;  %v4389_v37 = vld [vmem:[%s5883_s2 + $0x968] ss:$16 sps:$4 sm:$0xff]   ;;  %v4397_v38 = vld [vmem:[%s5883_s2 + $0x98c] ss:$16 sps:$4 sm:$0xff]  }
  0xd0   : > { %2846 = vmatpush1.bf16.msra.mxu0 %v4234_v44  ;;  %3104 = vmatpush1.bf16.msra.mxu1 %v4237_v45  ;;  %v373_v44 = vrot.slane %v371_v39, 1  ;;  %v4324_v45 = vld [vmem:[%s5883_s2 + $0x80c] ss:$16 sps:$4 sm:$0xff]   ;;  %v4392_v39 = vld [vmem:[%s5883_s2 + $0x980] ss:$16 sps:$4 sm:$0xff]  }
  0xd1   : > { %2847 = vmatprep.subr.bf16.mxu0 %v4242_v46  ;;  %3105 = vmatprep.subr.bf16.mxu1 %v4245_v48  ;;  %v4319_v46 = vld [vmem:[%s5883_s2 + $0x800] ss:$16 sps:$4 sm:$0xff]   ;;  %v4322_v48 = vld [vmem:[%s5883_s2 + $0x808] ss:$16 sps:$4 sm:$0xff]  }
  0xd4   : > { %2848 = vmatpush1.bf16.msra.mxu0 %v4240_v49  ;;  %3106 = vmatpush1.bf16.msra.mxu1 %v4243_v50  ;;  %v4528_v49 = vld [vmem:[%s4737_s17 + $0x4] ss:$16 sps:$4 sm:$0xff]  }
  0xd5   : > { %2849 = vmatprep.subr.bf16.mxu0 %v4248_v51  ;;  %3107 = vmatprep.subr.bf16.mxu1 %v4251_v52  ;;  %v395_v50 = vrot.slane %v4528_v49, 1  ;;  %v396_v51 = vrot.slane %v5043_v17, 1  ;;  %v374_v52 = vsel %vm338_vm0, %v369_v43, %v373_v44  ;;  %v4326_v17 = vld [vmem:[%s5883_s2 + $0x820] ss:$16 sps:$4 sm:$0xff]   ;;  %v4401_v43 = vld [vmem:[%s5883_s2 + $0x9a8] ss:$16 sps:$4 sm:$0xff]  }
  0xd6   : > { %v4406_v44 = vld [vmem:[%s5883_s2 + $0x9c4] ss:$16 sps:$4 sm:$0xff]  }
  0xd7   : > { %v4412_v49 = vld [vmem:[%s5883_s2 + $0x9e4] ss:$16 sps:$4 sm:$0xff]  }
  0xd8   : > { %2850 = vmatpush1.bf16.msra.mxu0 %v4246_v53  ;;  %3108 = vmatpush1.bf16.msra.mxu1 %v4249_v54  ;;  %v4328_v53 = vld [vmem:[%s5883_s2 + $0x824] ss:$16 sps:$4 sm:$0xff]   ;;  %v4331_v54 = vld [vmem:[%s5883_s2 + $0x82c] ss:$16 sps:$4 sm:$0xff]  }
  0xd9   : > { %2851 = vmatprep.subr.bf16.mxu0 %v4254_v55  ;;  %3109 = vmatprep.subr.bf16.mxu1 %v4257_v56  ;;  %v397_v55 = vsel %vm391_vm1, %v395_v50, %v396_v51  ;;  %v4329_v56 = vld [vmem:[%s5883_s2 + $0x828] ss:$16 sps:$4 sm:$0xff]   ;;  %v4415_v50 = vld [vmem:[%s5883_s2 + $0x9ec] ss:$16 sps:$4 sm:$0xff]   ;;  %v4410_v51 = vld [vmem:[%s5883_s2 + $0x9e0] ss:$16 sps:$4 sm:$0xff]  }
  0xdc   : > { %2852 = vmatpush1.bf16.msra.mxu0 %v4252_v57  ;;  %3110 = vmatpush1.bf16.msra.mxu1 %v4255_v58  ;;  %v4334_v57 = vld [vmem:[%s5883_s2 + $0x844] ss:$16 sps:$4 sm:$0xff]   ;;  %v4337_v58 = vld [vmem:[%s5883_s2 + $0x84c] ss:$16 sps:$4 sm:$0xff]  }
  0xdd   : > { %2853 = vmatprep.subr.bf16.mxu0 %v4260_v59  ;;  %3111 = vmatprep.subr.bf16.mxu1 %v4263_v60  ;;  %v4332_v59 = vld [vmem:[%s5883_s2 + $0x840] ss:$16 sps:$4 sm:$0xff]   ;;  %v4335_v60 = vld [vmem:[%s5883_s2 + $0x848] ss:$16 sps:$4 sm:$0xff]  }
  0xe0   : > { %2854 = vmatpush1.bf16.msra.mxu0 %v4258_v61  ;;  %3112 = vmatpush1.bf16.msra.mxu1 %v4261_v62  ;;  %v4340_v61 = vld [vmem:[%s5883_s2 + $0x864] ss:$16 sps:$4 sm:$0xff]   ;;  %v4343_v62 = vld [vmem:[%s5883_s2 + $0x86c] ss:$16 sps:$4 sm:$0xff]  }
  0xe1   : > { %2855 = vmatprep.subr.bf16.mxu0 %v4266_v63  ;;  %3113 = vmatprep.subr.bf16.mxu1 %v4269_v0  ;;  %v4338_v63 = vld [vmem:[%s5883_s2 + $0x860] ss:$16 sps:$4 sm:$0xff]   ;;  %v4341_v0 = vld [vmem:[%s5883_s2 + $0x868] ss:$16 sps:$4 sm:$0xff]  }
  0xe4   : > { %2856 = vmatpush1.bf16.msra.mxu0 %v4264_v1  ;;  %3114 = vmatpush1.bf16.msra.mxu1 %v4267_v2  ;;  %v4346_v1 = vld [vmem:[%s5883_s2 + $0x884] ss:$16 sps:$4 sm:$0xff]   ;;  %v4349_v2 = vld [vmem:[%s5883_s2 + $0x88c] ss:$16 sps:$4 sm:$0xff]  }
  0xe5   : > { %2857 = vmatprep.subr.bf16.mxu0 %v4272_v3  ;;  %3115 = vmatprep.subr.bf16.mxu1 %v4275_v4  ;;  %v4344_v3 = vld [vmem:[%s5883_s2 + $0x880] ss:$16 sps:$4 sm:$0xff]   ;;  %v4347_v4 = vld [vmem:[%s5883_s2 + $0x888] ss:$16 sps:$4 sm:$0xff]  }
  0xe8   : > { %2858 = vmatpush1.bf16.msra.mxu0 %v4270_v6  ;;  %3116 = vmatpush1.bf16.msra.mxu1 %v4273_v7  ;;  %v4352_v6 = vld [vmem:[%s5883_s2 + $0x8a4] ss:$16 sps:$4 sm:$0xff]   ;;  %v4355_v7 = vld [vmem:[%s5883_s2 + $0x8ac] ss:$16 sps:$4 sm:$0xff]  }
  0xe9   : > { %2859 = vmatprep.subr.bf16.mxu0 %v4278_v8  ;;  %3117 = vmatprep.subr.bf16.mxu1 %v4281_v9  ;;  %v4350_v8 = vld [vmem:[%s5883_s2 + $0x8a0] ss:$16 sps:$4 sm:$0xff]   ;;  %v4353_v9 = vld [vmem:[%s5883_s2 + $0x8a8] ss:$16 sps:$4 sm:$0xff]  }
  0xec   : > { %2860 = vmatpush1.bf16.msra.mxu0 %v4276_v12  ;;  %3118 = vmatpush1.bf16.msra.mxu1 %v4279_v14  ;;  %v4358_v12 = vld [vmem:[%s5883_s2 + $0x8c4] ss:$16 sps:$4 sm:$0xff]   ;;  %v4361_v14 = vld [vmem:[%s5883_s2 + $0x8cc] ss:$16 sps:$4 sm:$0xff]  }
  0xed   : > { %2861 = vmatprep.subr.bf16.mxu0 %v4284_v16  ;;  %3119 = vmatprep.subr.bf16.mxu1 %v4287_v47  ;;  %v4356_v16 = vld [vmem:[%s5883_s2 + $0x8c0] ss:$16 sps:$4 sm:$0xff]   ;;  %v4359_v47 = vld [vmem:[%s5883_s2 + $0x8c8] ss:$16 sps:$4 sm:$0xff]  }
  0xf0   : > { %2862 = vmatpush1.bf16.msra.mxu0 %v4282_v15  ;;  %3120 = vmatpush1.bf16.msra.mxu1 %v4285_v18  ;;  %v4364_v15 = vld [vmem:[%s5883_s2 + $0x8e4] ss:$16 sps:$4 sm:$0xff]   ;;  %v4367_v18 = vld [vmem:[%s5883_s2 + $0x8ec] ss:$16 sps:$4 sm:$0xff]  }
  0xf1   : > { %2863 = vmatprep.subr.bf16.mxu0 %v4290_v20  ;;  %3121 = vmatprep.subr.bf16.mxu1 %v4293_v21  ;;  %v4362_v20 = vld [vmem:[%s5883_s2 + $0x8e0] ss:$16 sps:$4 sm:$0xff]   ;;  %v4365_v21 = vld [vmem:[%s5883_s2 + $0x8e8] ss:$16 sps:$4 sm:$0xff]  }
  0xf4   : > { %2864 = vmatpush1.bf16.msra.mxu0 %v4288_v22  ;;  %3122 = vmatpush1.bf16.msra.mxu1 %v4291_v23  ;;  %v4370_v22 = vld [vmem:[%s5883_s2 + $0x904] ss:$16 sps:$4 sm:$0xff]   ;;  %v4373_v23 = vld [vmem:[%s5883_s2 + $0x90c] ss:$16 sps:$4 sm:$0xff]  }
  0xf5   : > { %2865 = vmatprep.subr.bf16.mxu0 %v4296_v5  ;;  %3123 = vmatprep.subr.bf16.mxu1 %v4299_v24  ;;  %v4368_v5 = vld [vmem:[%s5883_s2 + $0x900] ss:$16 sps:$4 sm:$0xff]   ;;  %v4371_v24 = vld [vmem:[%s5883_s2 + $0x908] ss:$16 sps:$4 sm:$0xff]  }
  0xf8   : > { %2866 = vmatpush1.bf16.msra.mxu0 %v4294_v25  ;;  %3124 = vmatpush1.bf16.msra.mxu1 %v4297_v26  ;;  %v4376_v25 = vld [vmem:[%s5883_s2 + $0x924] ss:$16 sps:$4 sm:$0xff]   ;;  %v4379_v26 = vld [vmem:[%s5883_s2 + $0x92c] ss:$16 sps:$4 sm:$0xff]  }
  0xf9   : > { %2867 = vmatprep.subr.bf16.mxu0 %v4302_v27  ;;  %3125 = vmatprep.subr.bf16.mxu1 %v4305_v28  ;;  %v4374_v27 = vld [vmem:[%s5883_s2 + $0x920] ss:$16 sps:$4 sm:$0xff]   ;;  %v4377_v28 = vld [vmem:[%s5883_s2 + $0x928] ss:$16 sps:$4 sm:$0xff]  }
  0xfc   : > { %2868 = vmatpush1.bf16.msra.mxu0 %v4300_v30  ;;  %3126 = vmatpush1.bf16.msra.mxu1 %v4303_v31  ;;  %v4382_v30 = vld [vmem:[%s5883_s2 + $0x944] ss:$16 sps:$4 sm:$0xff]   ;;  %v4385_v31 = vld [vmem:[%s5883_s2 + $0x94c] ss:$16 sps:$4 sm:$0xff]  }
  0xfd   : > { %2869 = vmatprep.subr.bf16.mxu0 %v4308_v29  ;;  %3127 = vmatprep.subr.bf16.mxu1 %v4311_v34  ;;  %v4380_v29 = vld [vmem:[%s5883_s2 + $0x940] ss:$16 sps:$4 sm:$0xff]   ;;  %v4388_v34 = vld [vmem:[%s5883_s2 + $0x964] ss:$16 sps:$4 sm:$0xff]  }
 0x100   : > { %2870 = vmatpush1.bf16.msra.mxu0 %v4306_v35  ;;  %3128 = vmatpush1.bf16.msra.mxu1 %v4309_v36  ;;  %v4391_v35 = vld [vmem:[%s5883_s2 + $0x96c] ss:$16 sps:$4 sm:$0xff]   ;;  %v4386_v36 = vld [vmem:[%s5883_s2 + $0x960] ss:$16 sps:$4 sm:$0xff]  }
 0x101   : > { %2871 = vmatprep.subr.bf16.mxu0 %v4314_v13  ;;  %3129 = vmatprep.subr.bf16.mxu1 %v4317_v40  ;;  %v4394_v13 = vld [vmem:[%s5883_s2 + $0x984] ss:$16 sps:$4 sm:$0xff]   ;;  %v4395_v40 = vld [vmem:[%s5883_s2 + $0x988] ss:$16 sps:$4 sm:$0xff]  }
 0x104   : > { %2872 = vmatpush1.bf16.msra.mxu0 %v4312_v10  ;;  %3130 = vmatpush1.bf16.msra.mxu1 %v4315_v41  ;;  %v4400_v10 = vld [vmem:[%s5883_s2 + $0x9a4] ss:$16 sps:$4 sm:$0xff]   ;;  %v4403_v41 = vld [vmem:[%s5883_s2 + $0x9ac] ss:$16 sps:$4 sm:$0xff]  }
 0x105   : > { %2884 = vmatprep.subr.bf16.mxu0 %v4321_v42  ;;  %3142 = vmatprep.subr.bf16.mxu1 %v4324_v45  ;;  %v4398_v42 = vld [vmem:[%s5883_s2 + $0x9a0] ss:$16 sps:$4 sm:$0xff]   ;;  %v4409_v45 = vld [vmem:[%s5883_s2 + $0x9cc] ss:$16 sps:$4 sm:$0xff]  }
 0x107   : > { %2874 = vmatmul.mubr.bf16.vlgmr.msra.gmra.mrb[0].mxu0 %v374_v52  ;;  %3132 = vmatmul.mubr.bf16.vlgmr.msra.gmra.mrb[0].mxu1 %v374_v52  ;;  %v4413_v52 = vld [vmem:[%s5883_s2 + $0x9e8] ss:$16 sps:$4 sm:$0xff]  }
 0x108   : > { %2885 = vmatpush1.bf16.msra.mxu0 %v4319_v46  ;;  %3143 = vmatpush1.bf16.msra.mxu1 %v4322_v48  ;;  %v4404_v46 = vld [vmem:[%s5883_s2 + $0x9c0] ss:$16 sps:$4 sm:$0xff]   ;;  %v4407_v48 = vld [vmem:[%s5883_s2 + $0x9c8] ss:$16 sps:$4 sm:$0xff]  }
 0x109   : > { %2886 = vmatprep.subr.bf16.mxu0 %v4328_v53  ;;  %3144 = vmatprep.subr.bf16.mxu1 %v4331_v54  ;;  %v4529_v53 = vld [vmem:[%s4737_s17] ss:$16 sps:$4 sm:$0xff]  }
 0x10a   : > { %2916 = vmatprep.mubr.bf16.mxu0 %v397_v55  ;;  %3174 = vmatprep.mubr.bf16.mxu1 %v397_v55  ;;  %v392_v54 = vrot.slane %v4529_v53, 1  ;;  %v393_v55 = vrot.slane %v5199_v11, 1  ;;  %v4416_v11 = vld [vmem:[%s5883_s2 + $0xa00] ss:$16 sps:$4 sm:$0xff]   ;;  %v4497_v53 = vld [vmem:[%s5883_s2 + $0xba8] ss:$16 sps:$4 sm:$0xff]  }
 0x10c   : > { %2887 = vmatpush1.bf16.msra.mxu0 %v4326_v17  ;;  %3145 = vmatpush1.bf16.msra.mxu1 %v4329_v56  ;;  %v4418_v17 = vld [vmem:[%s5883_s2 + $0xa04] ss:$16 sps:$4 sm:$0xff]   ;;  %v4421_v56 = vld [vmem:[%s5883_s2 + $0xa0c] ss:$16 sps:$4 sm:$0xff]  }
 0x10d   : > { %2888 = vmatprep.subr.bf16.mxu0 %v4334_v57  ;;  %3146 = vmatprep.subr.bf16.mxu1 %v4337_v58  ;;  %v4530_v57 = vld [vmem:[%s4737_s17 + $0xc] ss:$16 sps:$4 sm:$0xff]  }
 0x10e   : > { %v401_v58 = vrot.slane %v4530_v57, 1  ;;  %v4508_v57 = vld [vmem:[%s5883_s2 + $0xbe4] ss:$16 sps:$4 sm:$0xff]  }
 0x110   : > { %2889 = vmatpush1.bf16.msra.mxu0 %v4332_v59  ;;  %3147 = vmatpush1.bf16.msra.mxu1 %v4335_v60  ;;  %v402_v59 = vrot.slane %v5218_v19, 1  ;;  %v4419_v60 = vld [vmem:[%s5883_s2 + $0xa08] ss:$16 sps:$4 sm:$0xff]   ;;  %v4427_v19 = vld [vmem:[%s5883_s2 + $0xa2c] ss:$16 sps:$4 sm:$0xff]  }
 0x111   : > { %2890 = vmatprep.subr.bf16.mxu0 %v4340_v61  ;;  %3148 = vmatprep.subr.bf16.mxu1 %v4343_v62  ;;  %v394_v61 = vsel %vm391_vm1, %v392_v54, %v393_v55  ;;  %v4424_v62 = vld [vmem:[%s5883_s2 + $0xa24] ss:$16 sps:$4 sm:$0xff]   ;;  %v4505_v55 = vld [vmem:[%s5883_s2 + $0xbcc] ss:$16 sps:$4 sm:$0xff]  }
 0x112   : > { %v4502_v54 = vld [vmem:[%s5883_s2 + $0xbc4] ss:$16 sps:$4 sm:$0xff]  }
 0x114   : > { %2891 = vmatpush1.bf16.msra.mxu0 %v4338_v63  ;;  %3149 = vmatpush1.bf16.msra.mxu1 %v4341_v0  ;;  %v403_v63 = vsel %vm391_vm1, %v401_v58, %v402_v59  ;;  %v4422_v0 = vld [vmem:[%s5883_s2 + $0xa20] ss:$16 sps:$4 sm:$0xff]   ;;  %v4511_v58 = vld [vmem:[%s5883_s2 + $0xbec] ss:$16 sps:$4 sm:$0xff]  }
 0x115   : > { %2892 = vmatprep.subr.bf16.mxu0 %v4346_v1  ;;  %3150 = vmatprep.subr.bf16.mxu1 %v4349_v2  ;;  %v4425_v1 = vld [vmem:[%s5883_s2 + $0xa28] ss:$16 sps:$4 sm:$0xff]   ;;  %v4430_v2 = vld [vmem:[%s5883_s2 + $0xa44] ss:$16 sps:$4 sm:$0xff]   ;;  %v4506_v59 = vld [vmem:[%s5883_s2 + $0xbe0] ss:$16 sps:$4 sm:$0xff]  }
 0x118   : > { %2893 = vmatpush1.bf16.msra.mxu0 %v4344_v3  ;;  %3151 = vmatpush1.bf16.msra.mxu1 %v4347_v4  ;;  %v4433_v3 = vld [vmem:[%s5883_s2 + $0xa4c] ss:$16 sps:$4 sm:$0xff]   ;;  %v4428_v4 = vld [vmem:[%s5883_s2 + $0xa40] ss:$16 sps:$4 sm:$0xff]  }
 0x119   : > { %2894 = vmatprep.subr.bf16.mxu0 %v4352_v6  ;;  %3152 = vmatprep.subr.bf16.mxu1 %v4355_v7  ;;  %v4431_v6 = vld [vmem:[%s5883_s2 + $0xa48] ss:$16 sps:$4 sm:$0xff]   ;;  %v4436_v7 = vld [vmem:[%s5883_s2 + $0xa64] ss:$16 sps:$4 sm:$0xff]  }
 0x11c   : > { %2895 = vmatpush1.bf16.msra.mxu0 %v4350_v8  ;;  %3153 = vmatpush1.bf16.msra.mxu1 %v4353_v9  ;;  %v4439_v8 = vld [vmem:[%s5883_s2 + $0xa6c] ss:$16 sps:$4 sm:$0xff]   ;;  %v4434_v9 = vld [vmem:[%s5883_s2 + $0xa60] ss:$16 sps:$4 sm:$0xff]  }
 0x11d   : > { %2896 = vmatprep.subr.bf16.mxu0 %v4358_v12  ;;  %3154 = vmatprep.subr.bf16.mxu1 %v4361_v14  ;;  %v4437_v12 = vld [vmem:[%s5883_s2 + $0xa68] ss:$16 sps:$4 sm:$0xff]   ;;  %v4442_v14 = vld [vmem:[%s5883_s2 + $0xa84] ss:$16 sps:$4 sm:$0xff]  }
 0x120   : > { %2897 = vmatpush1.bf16.msra.mxu0 %v4356_v16  ;;  %3155 = vmatpush1.bf16.msra.mxu1 %v4359_v47  ;;  %v4445_v16 = vld [vmem:[%s5883_s2 + $0xa8c] ss:$16 sps:$4 sm:$0xff]   ;;  %v4440_v47 = vld [vmem:[%s5883_s2 + $0xa80] ss:$16 sps:$4 sm:$0xff]  }
 0x121   : > { %2898 = vmatprep.subr.bf16.mxu0 %v4364_v15  ;;  %3156 = vmatprep.subr.bf16.mxu1 %v4367_v18  ;;  %v4443_v15 = vld [vmem:[%s5883_s2 + $0xa88] ss:$16 sps:$4 sm:$0xff]   ;;  %v4448_v18 = vld [vmem:[%s5883_s2 + $0xaa4] ss:$16 sps:$4 sm:$0xff]  }
 0x124   : > { %2899 = vmatpush1.bf16.msra.mxu0 %v4362_v20  ;;  %3157 = vmatpush1.bf16.msra.mxu1 %v4365_v21  ;;  %v4451_v20 = vld [vmem:[%s5883_s2 + $0xaac] ss:$16 sps:$4 sm:$0xff]   ;;  %v4446_v21 = vld [vmem:[%s5883_s2 + $0xaa0] ss:$16 sps:$4 sm:$0xff]  }
 0x125   : > { %2900 = vmatprep.subr.bf16.mxu0 %v4370_v22  ;;  %3158 = vmatprep.subr.bf16.mxu1 %v4373_v23  ;;  %v4449_v22 = vld [vmem:[%s5883_s2 + $0xaa8] ss:$16 sps:$4 sm:$0xff]   ;;  %v4454_v23 = vld [vmem:[%s5883_s2 + $0xac4] ss:$16 sps:$4 sm:$0xff]  }
 0x128   : > { %2901 = vmatpush1.bf16.msra.mxu0 %v4368_v5  ;;  %3159 = vmatpush1.bf16.msra.mxu1 %v4371_v24  ;;  %v4457_v5 = vld [vmem:[%s5883_s2 + $0xacc] ss:$16 sps:$4 sm:$0xff]   ;;  %v4452_v24 = vld [vmem:[%s5883_s2 + $0xac0] ss:$16 sps:$4 sm:$0xff]  }
 0x129   : > { %2902 = vmatprep.subr.bf16.mxu0 %v4376_v25  ;;  %3160 = vmatprep.subr.bf16.mxu1 %v4379_v26  ;;  %v4455_v25 = vld [vmem:[%s5883_s2 + $0xac8] ss:$16 sps:$4 sm:$0xff]   ;;  %v4460_v26 = vld [vmem:[%s5883_s2 + $0xae4] ss:$16 sps:$4 sm:$0xff]  }
 0x12c   : > { %2903 = vmatpush1.bf16.msra.mxu0 %v4374_v27  ;;  %3161 = vmatpush1.bf16.msra.mxu1 %v4377_v28  ;;  %v4463_v27 = vld [vmem:[%s5883_s2 + $0xaec] ss:$16 sps:$4 sm:$0xff]   ;;  %v4458_v28 = vld [vmem:[%s5883_s2 + $0xae0] ss:$16 sps:$4 sm:$0xff]  }
 0x12d   : > { %2904 = vmatprep.subr.bf16.mxu0 %v4382_v30  ;;  %3162 = vmatprep.subr.bf16.mxu1 %v4385_v31  ;;  %v4461_v30 = vld [vmem:[%s5883_s2 + $0xae8] ss:$16 sps:$4 sm:$0xff]   ;;  %v4466_v31 = vld [vmem:[%s5883_s2 + $0xb04] ss:$16 sps:$4 sm:$0xff]  }
 0x130   : > { %2905 = vmatpush1.bf16.msra.mxu0 %v4380_v29  ;;  %3163 = vmatpush1.bf16.msra.mxu1 %v4383_v33  ;;  %v4469_v29 = vld [vmem:[%s5883_s2 + $0xb0c] ss:$16 sps:$4 sm:$0xff]   ;;  %v4464_v33 = vld [vmem:[%s5883_s2 + $0xb00] ss:$16 sps:$4 sm:$0xff]  }
 0x131   : > { %2906 = vmatprep.subr.bf16.mxu0 %v4388_v34  ;;  %3164 = vmatprep.subr.bf16.mxu1 %v4391_v35  ;;  %v4467_v34 = vld [vmem:[%s5883_s2 + $0xb08] ss:$16 sps:$4 sm:$0xff]   ;;  %v4472_v35 = vld [vmem:[%s5883_s2 + $0xb24] ss:$16 sps:$4 sm:$0xff]  }
 0x134   : > { %2907 = vmatpush1.bf16.msra.mxu0 %v4386_v36  ;;  %3165 = vmatpush1.bf16.msra.mxu1 %v4389_v37  ;;  %v4475_v36 = vld [vmem:[%s5883_s2 + $0xb2c] ss:$16 sps:$4 sm:$0xff]   ;;  %v4470_v37 = vld [vmem:[%s5883_s2 + $0xb20] ss:$16 sps:$4 sm:$0xff]  }
 0x135   : > { %2908 = vmatprep.subr.bf16.mxu0 %v4394_v13  ;;  %3166 = vmatprep.subr.bf16.mxu1 %v4397_v38  ;;  %v4473_v13 = vld [vmem:[%s5883_s2 + $0xb28] ss:$16 sps:$4 sm:$0xff]   ;;  %v4478_v38 = vld [vmem:[%s5883_s2 + $0xb44] ss:$16 sps:$4 sm:$0xff]  }
 0x138   : > { %2909 = vmatpush1.bf16.msra.mxu0 %v4392_v39  ;;  %3167 = vmatpush1.bf16.msra.mxu1 %v4395_v40  ;;  %v4481_v39 = vld [vmem:[%s5883_s2 + $0xb4c] ss:$16 sps:$4 sm:$0xff]   ;;  %v4476_v40 = vld [vmem:[%s5883_s2 + $0xb40] ss:$16 sps:$4 sm:$0xff]  }
 0x139   : > { %2910 = vmatprep.subr.bf16.mxu0 %v4400_v10  ;;  %3168 = vmatprep.subr.bf16.mxu1 %v4403_v41  ;;  %v4479_v10 = vld [vmem:[%s5883_s2 + $0xb48] ss:$16 sps:$4 sm:$0xff]   ;;  %v4484_v41 = vld [vmem:[%s5883_s2 + $0xb64] ss:$16 sps:$4 sm:$0xff]  }
 0x13c   : > { %2911 = vmatpush1.bf16.msra.mxu0 %v4398_v42  ;;  %3169 = vmatpush1.bf16.msra.mxu1 %v4401_v43  ;;  %v4487_v42 = vld [vmem:[%s5883_s2 + $0xb6c] ss:$16 sps:$4 sm:$0xff]   ;;  %v4482_v43 = vld [vmem:[%s5883_s2 + $0xb60] ss:$16 sps:$4 sm:$0xff]  }
 0x13d   : > { %2912 = vmatprep.subr.bf16.mxu0 %v4406_v44  ;;  %3170 = vmatprep.subr.bf16.mxu1 %v4409_v45  ;;  %v4485_v44 = vld [vmem:[%s5883_s2 + $0xb68] ss:$16 sps:$4 sm:$0xff]   ;;  %v4490_v45 = vld [vmem:[%s5883_s2 + $0xb84] ss:$16 sps:$4 sm:$0xff]  }
 0x140   : > { %2913 = vmatpush1.bf16.msra.mxu0 %v4404_v46  ;;  %3171 = vmatpush1.bf16.msra.mxu1 %v4407_v48  ;;  %v4493_v46 = vld [vmem:[%s5883_s2 + $0xb8c] ss:$16 sps:$4 sm:$0xff]   ;;  %v4488_v48 = vld [vmem:[%s5883_s2 + $0xb80] ss:$16 sps:$4 sm:$0xff]  }
 0x141   : > { %2914 = vmatprep.subr.bf16.mxu0 %v4412_v49  ;;  %3172 = vmatprep.subr.bf16.mxu1 %v4415_v50  ;;  %v4491_v49 = vld [vmem:[%s5883_s2 + $0xb88] ss:$16 sps:$4 sm:$0xff]   ;;  %v4496_v50 = vld [vmem:[%s5883_s2 + $0xba4] ss:$16 sps:$4 sm:$0xff]  }
 0x144   : > { %2915 = vmatpush1.bf16.msra.mxu0 %v4410_v51  ;;  %3173 = vmatpush1.bf16.msra.mxu1 %v4413_v52  ;;  %v4499_v51 = vld [vmem:[%s5883_s2 + $0xbac] ss:$16 sps:$4 sm:$0xff]   ;;  %v4494_v52 = vld [vmem:[%s5883_s2 + $0xba0] ss:$16 sps:$4 sm:$0xff]  }
 0x145   : > { %2927 = vmatprep.subr.bf16.mxu0 %v4418_v17  ;;  %3185 = vmatprep.subr.bf16.mxu1 %v4421_v56  ;;  %v4500_v17 = vld [vmem:[%s5883_s2 + $0xbc0] ss:$16 sps:$4 sm:$0xff]   ;;  %v4503_v56 = vld [vmem:[%s5883_s2 + $0xbc8] ss:$16 sps:$4 sm:$0xff]  }
 0x147   : > { %2917 = vmatmul.mubr.bf16.vlgmr.msra.gmra.mrb[0].mxu0 %v394_v61  ;;  %3175 = vmatmul.mubr.bf16.vlgmr.msra.gmra.mrb[0].mxu1 %v394_v61 }
 0x148   : > { %2928 = vmatpush1.bf16.msra.mxu0 %v4416_v11  ;;  %3186 = vmatpush1.bf16.msra.mxu1 %v4419_v60  ;;  %v4509_v11 = vld [vmem:[%s5883_s2 + $0xbe8] ss:$16 sps:$4 sm:$0xff]  }
 0x149   : > { %2929 = vmatprep.subr.bf16.mxu0 %v4424_v62  ;;  %3187 = vmatprep.subr.bf16.mxu1 %v4427_v19  ;;  %v4531_v60 = vld [vmem:[%s4737_s17 + $0x8] ss:$16 sps:$4 sm:$0xff]   ;;  %v399_v62 = vrot.slane %v5410_v32, 1  ;;  %s3854_s17 = sshll.u32 %s5890_s12, 5 }
 0x14a   : > { %2959 = vmatprep.mubr.bf16.mxu0 %v403_v63  ;;  %3217 = vmatprep.mubr.bf16.mxu1 %v403_v63  ;;  %v398_v61 = vrot.slane %v4531_v60, 1  ;;  %s300_s6 = scalar_lea.vmem %s5884_s3, %s3854_s17 }
 0x14c   : > { %2930 = vmatpush1.bf16.msra.mxu0 %v4422_v0  ;;  %3188 = vmatpush1.bf16.msra.mxu1 %v4425_v1  ;;  %v400_v19 = vsel %vm391_vm1, %v398_v61, %v399_v62 }
 0x14d   : > { %2931 = vmatprep.subr.bf16.mxu0 %v4430_v2  ;;  %3189 = vmatprep.subr.bf16.mxu1 %v4433_v3 }
 0x150   : > { %2932 = vmatpush1.bf16.msra.mxu0 %v4428_v4  ;;  %3190 = vmatpush1.bf16.msra.mxu1 %v4431_v6 }
 0x151   : > { %2933 = vmatprep.subr.bf16.mxu0 %v4436_v7  ;;  %3191 = vmatprep.subr.bf16.mxu1 %v4439_v8 }
 0x154   : > { %2934 = vmatpush1.bf16.msra.mxu0 %v4434_v9  ;;  %3192 = vmatpush1.bf16.msra.mxu1 %v4437_v12 }
 0x155   : > { %2935 = vmatprep.subr.bf16.mxu0 %v4442_v14  ;;  %3193 = vmatprep.subr.bf16.mxu1 %v4445_v16 }
 0x158   : > { %2936 = vmatpush1.bf16.msra.mxu0 %v4440_v47  ;;  %3194 = vmatpush1.bf16.msra.mxu1 %v4443_v15 }
 0x159   : > { %2937 = vmatprep.subr.bf16.mxu0 %v4448_v18  ;;  %3195 = vmatprep.subr.bf16.mxu1 %v4451_v20 }
 0x15c   : > { %2938 = vmatpush1.bf16.msra.mxu0 %v4446_v21  ;;  %3196 = vmatpush1.bf16.msra.mxu1 %v4449_v22 }
 0x15d   : > { %2939 = vmatprep.subr.bf16.mxu0 %v4454_v23  ;;  %3197 = vmatprep.subr.bf16.mxu1 %v4457_v5 }
 0x160   : > { %2940 = vmatpush1.bf16.msra.mxu0 %v4452_v24  ;;  %3198 = vmatpush1.bf16.msra.mxu1 %v4455_v25 }
 0x161   : > { %2941 = vmatprep.subr.bf16.mxu0 %v4460_v26  ;;  %3199 = vmatprep.subr.bf16.mxu1 %v4463_v27 }
 0x164   : > { %2942 = vmatpush1.bf16.msra.mxu0 %v4458_v28  ;;  %3200 = vmatpush1.bf16.msra.mxu1 %v4461_v30 }
 0x165   : > { %2943 = vmatprep.subr.bf16.mxu0 %v4466_v31  ;;  %3201 = vmatprep.subr.bf16.mxu1 %v4469_v29 }
 0x168   : > { %2944 = vmatpush1.bf16.msra.mxu0 %v4464_v33  ;;  %3202 = vmatpush1.bf16.msra.mxu1 %v4467_v34 }
 0x169   : > { %2945 = vmatprep.subr.bf16.mxu0 %v4472_v35  ;;  %3203 = vmatprep.subr.bf16.mxu1 %v4475_v36 }
 0x16c   : > { %2946 = vmatpush1.bf16.msra.mxu0 %v4470_v37  ;;  %3204 = vmatpush1.bf16.msra.mxu1 %v4473_v13 }
 0x16d   : > { %2947 = vmatprep.subr.bf16.mxu0 %v4478_v38  ;;  %3205 = vmatprep.subr.bf16.mxu1 %v4481_v39 }
 0x170   : > { %2948 = vmatpush1.bf16.msra.mxu0 %v4476_v40  ;;  %3206 = vmatpush1.bf16.msra.mxu1 %v4479_v10 }
 0x171   : > { %2949 = vmatprep.subr.bf16.mxu0 %v4484_v41  ;;  %3207 = vmatprep.subr.bf16.mxu1 %v4487_v42 }
 0x174   : > { %2950 = vmatpush1.bf16.msra.mxu0 %v4482_v43  ;;  %3208 = vmatpush1.bf16.msra.mxu1 %v4485_v44 }
 0x175   : > { %2951 = vmatprep.subr.bf16.mxu0 %v4490_v45  ;;  %3209 = vmatprep.subr.bf16.mxu1 %v4493_v46 }
 0x178   : > { %2952 = vmatpush1.bf16.msra.mxu0 %v4488_v48  ;;  %3210 = vmatpush1.bf16.msra.mxu1 %v4491_v49 }
 0x179   : > { %2953 = vmatprep.subr.bf16.mxu0 %v4496_v50  ;;  %3211 = vmatprep.subr.bf16.mxu1 %v4499_v51 }
 0x17c   : > { %2954 = vmatpush1.bf16.msra.mxu0 %v4494_v52  ;;  %3212 = vmatpush1.bf16.msra.mxu1 %v4497_v53 }
 0x17d   : > { %2955 = vmatprep.subr.bf16.mxu0 %v4502_v54  ;;  %3213 = vmatprep.subr.bf16.mxu1 %v4505_v55 }
 0x180   : > { %2956 = vmatpush1.bf16.msra.mxu0 %v4500_v17  ;;  %3214 = vmatpush1.bf16.msra.mxu1 %v4503_v56 }
 0x181   : > { %2957 = vmatprep.subr.bf16.mxu0 %v4508_v57  ;;  %3215 = vmatprep.subr.bf16.mxu1 %v4511_v58 }
 0x184   : > { %2958 = vmatpush1.bf16.msra.mxu0 %v4506_v59  ;;  %3216 = vmatpush1.bf16.msra.mxu1 %v4509_v11 }
 0x187   : > { %2960 = vmatmul.mubr.bf16.vlgmr.msra.gmra.mrb[0].mxu0 %v400_v19  ;;  %3218 = vmatmul.mubr.bf16.vlgmr.msra.gmra.mrb[0].mxu1 %v400_v19 }
 0x25a   : > { %v2961_v63 = vpop.f32.mrb[0].mxu0  ;;  %v3219_v0 = vpop.f32.mrb[0].mxu1 }
 0x25b   : > { %v3236_v1 = vmul.f32 %v2961_v63, %v2961_v63  ;;  %v3238_v2 = vmul.f32 %v3219_v0, %v3219_v0  ;;  %v2963_v3 = vpop.f32.mrb[1].mxu0  ;;  %v5833_v4 = vpop.f32.mrb[1].mxu1  ;;  %v3228_v52 = vmul.f32 0.5, %v2961_v63  ;;  %v3230_v55 = vmul.f32 0.5, %v3219_v0 }
 0x25c   : > { %v3237_v6 = vmul.f32 %v2963_v3, %v2963_v3  ;;  %v3239_v7 = vmul.f32 %v5833_v4, %v5833_v4  ;;  %v5837_v32 = vpop.f32.mrb[2].mxu0  ;;  %v5839_v8 = vpop.f32.mrb[2].mxu1  ;;  %v3229_v58 = vmul.f32 0.5, %v2963_v3  ;;  %v3231_v61 = vmul.f32 0.5, %v5833_v4 }
 0x25d   : > { %v3244_v9 = vmul.f32 %v3236_v1, %v2961_v63  ;;  %v3246_v12 = vmul.f32 %v3238_v2, %v3219_v0  ;;  %v3240_v14 = vmul.f32 %v5837_v32, %v5837_v32  ;;  %v5843_v16 = vpop.f32.mrb[3].mxu0  ;;  %v5845_v47 = vpop.f32.mrb[3].mxu1  ;;  %v3242_v20 = vmul.f32 %v5839_v8, %v5839_v8 }
 0x25e   : > { %v3245_v15 = vmul.f32 %v3237_v6, %v2963_v3  ;;  %v3247_v18 = vmul.f32 %v3239_v7, %v5833_v4  ;;  %v3241_v26 = vmul.f32 %v5843_v16, %v5843_v16  ;;  %v3243_v13 = vmul.f32 %v5845_v47, %v5845_v47 }
 0x25f   : > { %v3252_v21 = vmul.f32 0.044715, %v3244_v9  ;;  %v3254_v22 = vmul.f32 0.044715, %v3246_v12  ;;  %v3248_v23 = vmul.f32 %v3240_v14, %v5837_v32  ;;  %v3250_v25 = vmul.f32 %v3242_v20, %v5839_v8 }
 0x260   : > { %v3253_v5 = vmul.f32 0.044715, %v3245_v15  ;;  %v3255_v24 = vmul.f32 0.044715, %v3247_v18  ;;  %v3249_v34 = vmul.f32 %v3241_v26, %v5843_v16  ;;  %v3251_v42 = vmul.f32 %v3243_v13, %v5845_v47 }
 0x261   : > { %v3260_v27 = vadd.f32 %v3252_v21, %v2961_v63  ;;  %v3262_v28 = vadd.f32 %v3254_v22, %v3219_v0  ;;  %v3256_v30 = vmul.f32 0.044715, %v3248_v23  ;;  %v3258_v33 = vmul.f32 0.044715, %v3250_v25 }
 0x262   : > { %v3261_v31 = vadd.f32 %v3253_v5, %v2963_v3  ;;  %v3263_v29 = vadd.f32 %v3255_v24, %v5833_v4  ;;  %v3257_v10 = vmul.f32 0.044715, %v3249_v34  ;;  %v3259_v45 = vmul.f32 0.044715, %v3251_v42 }
 0x263   : > { %v3268_v35 = vmul.f32 0.7978846, %v3260_v27  ;;  %v3270_v36 = vmul.f32 0.7978846, %v3262_v28  ;;  %v3264_v37 = vadd.f32 %v3256_v30, %v5837_v32  ;;  %v3266_v40 = vadd.f32 %v3258_v33, %v5839_v8 }
 0x264   : > { %v3269_v38 = vmul.f32 0.7978846, %v3261_v31  ;;  %v3271_v39 = vmul.f32 0.7978846, %v3263_v29  ;;  %v3265_v44 = vadd.f32 %v3257_v10, %v5843_v16  ;;  %v3267_v48 = vadd.f32 %v3259_v45, %v5845_v47 }
 0x265   : > { %4512 = vtanh.f32 %v3268_v35  ;;  %v3272_v41 = vmul.f32 0.7978846, %v3264_v37  ;;  %v3274_v43 = vmul.f32 0.7978846, %v3266_v40  ;;  %v3232_v2 = vmul.f32 0.5, %v5837_v32 }
 0x266   : > { %4514 = vtanh.f32 %v3270_v36  ;;  %v3273_v46 = vmul.f32 0.7978846, %v3265_v44  ;;  %v3275_v49 = vmul.f32 0.7978846, %v3267_v48  ;;  %v3234_v7 = vmul.f32 0.5, %v5839_v8 }
 0x267   : > { %4516 = vtanh.f32 %v3269_v38  ;;  %v3233_v14 = vmul.f32 0.5, %v5843_v16  ;;  %v3235_v21 = vmul.f32 0.5, %v5845_v47 }
 0x268   : > { %4518 = vtanh.f32 %v3271_v39 }
 0x269   : > { %4520 = vtanh.f32 %v3272_v41 }
 0x26a   : > { %4522 = vtanh.f32 %v3274_v43 }
 0x26b   : > { %4524 = vtanh.f32 %v3273_v46 }
 0x26c   : > { %4526 = vtanh.f32 %v3275_v49 }
 0x26f   : > { %v4513_v50 = vpop.eup %4512 }
 0x270   : > { %v4515_v51 = vpop.eup %4514  ;;  %v3284_v53 = vadd.f32 1.0, %v4513_v50 }
 0x271   : > { %v4517_v54 = vpop.eup %4516  ;;  %v3286_v17 = vadd.f32 1.0, %v4515_v51 }
 0x272   : > { %v4519_v56 = vpop.eup %4518  ;;  %v3292_v57 = vmul.f32 %v3284_v53, %v3228_v52  ;;  %v3285_v59 = vadd.f32 1.0, %v4517_v54 }
 0x273   : > { %v4521_v11 = vpop.eup %4520  ;;  %v3294_v60 = vmul.f32 %v3286_v17, %v3230_v55  ;;  %v3287_v62 = vadd.f32 1.0, %v4519_v56 }
 0x274   : > { %v4523_v19 = vpop.eup %4522  ;;  %v3293_v1 = vmul.f32 %v3285_v59, %v3229_v58  ;;  %v3288_v6 = vadd.f32 1.0, %v4521_v11 }
 0x275   : > { %v4525_v63 = vpop.eup %4524  ;;  %v3295_v0 = vmul.f32 %v3287_v62, %v3231_v61  ;;  %v3290_v3 = vadd.f32 1.0, %v4523_v19 }
 0x276   : > { %v3855_v9 = vpack.c.bf16 %v3293_v1, %v3292_v57  ;;  %v3296_v12 = vmul.f32 %v3288_v6, %v3232_v2  ;;  %v3289_v4 = vadd.f32 1.0, %v4525_v63  ;;  %v4527_v15 = vpop.eup %4526 }
 0x277   : > { %v3856_v18 = vpack.c.bf16 %v3295_v0, %v3294_v60  ;;  %v3298_v20 = vmul.f32 %v3290_v3, %v3234_v7  ;;  %v3291_v22 = vadd.f32 1.0, %v4527_v15 }
 0x278   : > { %3324 = vst [vmem:[%s300_s6] sm:$0xff] %v3855_v9  ;;  %v3297_v32 = vmul.f32 %v3289_v4, %v3233_v14 }
 0x279   : > { %3325 = vst [vmem:[%s300_s6 + $0x8] sm:$0xff] %v3856_v18  ;;  %v3299_v5 = vmul.f32 %v3291_v22, %v3235_v21 }
 0x27a   : > { %v3857_v23 = vpack.c.bf16 %v3297_v32, %v3296_v12 }
 0x27b   : > { %v3858_v24 = vpack.c.bf16 %v3299_v5, %v3298_v20 }
 0x27c   : > { %3326 = vst [vmem:[%s300_s6 + $0x10] sm:$0xff] %v3857_v23 }
 0x27d   : > { %3327 = vst [vmem:[%s300_s6 + $0x18] sm:$0xff] %v3858_v24 }
 0x27e PF: > { %s13_s14 = sadd.s32 1, %s4554_s14   ;;  %s5885_s12 = smov %s4550_s13 }
 0x27f   : > { %p10_p5 = scmp.ge.s32.totalorder %s13_s14, 4   ;;  %s5886_s13 = smov %s5888_s15 }
 0x281   :  { %12 = sbr.rel (!%p10_p5) target bundleno = 2 (0x2), region = 65 }

// kernel: feature_extractor.12
= control target key start
LH: loop header
LB: loop body
LE: loop exit
PB: predicated region body
PF: predicated region fallthrough
CT: control target
= control target key end

     0   :  { %s3255_s12 = smov 0   ;;  %s3257_s13 = smov 0   ;;  %s4151_s0 = inlined_call_operand.vmem [shape: bf16[2,16,512], index: 0, kind: input, shape index: {}, may-alias: {0,1}]   ;;  %s4152_s1 = inlined_call_operand.vmem [shape: bf16[2,16,512], index: 1, kind: input, shape index: {}, may-alias: {0,1}]   ;;  %s4153_s2 = inlined_call_operand.vmem [shape: bf16[1024,512], index: 2, kind: input, shape index: {}]   ;;  %s4154_s3 = inlined_call_operand.vmem [shape: bf16[2,16,512], index: 3, kind: output, shape index: {}]  }
   0x1   :  { %s3259_s14 = smov 0  }
   0x2 LB: > { %s25_s15 = sadd.s32 1, %s3229_s13  ;;  %p2467_p0 = scmp.ge.s32.totalorder %s3233_s14, 1  ;;  %s3233_s14 = sphi %s3259_s14, %s13_s14   ;;  %s3229_s13 = sphi %s3257_s13, %s4156_s13   ;;  %s3225_s12 = sphi %s3255_s12, %s4155_s12  }
   0x3   : > { %p27_p1 = scmp.ge.s32.totalorder %s25_s15, 2  ;;  %p191_p2 = scmp.lt.s32.totalorder %s3233_s14, 3 }
   0x5   : > { %s4158_s15 = smov (%p27_p1, %s25_s15), 0  ;;  %p192_p3 = pnand %p2467_p0, %p191_p2 }
   0x6   : > { %v2801_v0 = vld [vmem:[%s4153_s2 + $0x4] ss:$16 sps:$4 sm:$0xff] (!%p192_p3)   ;;  %v2803_v1 = vld [vmem:[%s4153_s2 + $0xc] ss:$16 sps:$4 sm:$0xff] (!%p192_p3)   ;;  %v2805_v2 = vld [vmem:[%s4153_s2] ss:$16 sps:$4 sm:$0xff] (!%p192_p3)  }
   0x7   : > { %195 = sbr.rel (%p192_p3) target bundleno = 510 (0x1fe), region = 32  ;;  %1902 = vmatprep.subr.bf16.mxu0 (!%p192_p3), %v2801_v0  ;;  %v2806_v3 = vld [vmem:[%s4153_s2 + $0x8] ss:$16 sps:$4 sm:$0xff] (!%p192_p3)   ;;  %2074 = vmatprep.subr.bf16.mxu1 (!%p192_p3), %v2803_v1  ;;  %v2807_v4 = vld [vmem:[%s4153_s2 + $0x24] ss:$16 sps:$4 sm:$0xff] (!%p192_p3)   ;;  %p239_p4 = scmp.lt.s32.totalorder (!%p192_p3), %s3225_s12, 1 }
   0x8   : > { %1903 = vmatpush1.bf16.msra.mxu0 (!%p192_p3), %v2805_v2  ;;  %2075 = vmatpush1.bf16.msra.mxu1 (!%p192_p3), %v2806_v3  ;;  %v2809_v5 = vld [vmem:[%s4153_s2 + $0x2c] ss:$16 sps:$4 sm:$0xff] (!%p192_p3)   ;;  %v2811_v6 = vld [vmem:[%s4153_s2 + $0x20] ss:$16 sps:$4 sm:$0xff] (!%p192_p3)   ;;  %v2812_v7 = vld [vmem:[%s4153_s2 + $0x28] ss:$16 sps:$4 sm:$0xff] (!%p192_p3)  }
   0x9   : > { %1904 = vmatprep.subr.bf16.mxu0 (!%p192_p3), %v2807_v4  ;;  %2076 = vmatprep.subr.bf16.mxu1 (!%p192_p3), %v2809_v5  ;;  %v2813_v8 = vld [vmem:[%s4153_s2 + $0x44] ss:$16 sps:$4 sm:$0xff] (!%p192_p3)   ;;  %v2815_v9 = vld [vmem:[%s4153_s2 + $0x4c] ss:$16 sps:$4 sm:$0xff] (!%p192_p3)   ;;  %v2817_v10 = vld [vmem:[%s4153_s2 + $0x40] ss:$16 sps:$4 sm:$0xff] (!%p192_p3)  }
   0xa   : > { %v2818_v11 = vld [vmem:[%s4153_s2 + $0x48] ss:$16 sps:$4 sm:$0xff] (!%p192_p3)   ;;  %v2819_v12 = vld [vmem:[%s4153_s2 + $0x64] ss:$16 sps:$4 sm:$0xff] (!%p192_p3)   ;;  %v2821_v13 = vld [vmem:[%s4153_s2 + $0x6c] ss:$16 sps:$4 sm:$0xff] (!%p192_p3)  }
   0xb   : > { %v2823_v14 = vld [vmem:[%s4153_s2 + $0x60] ss:$16 sps:$4 sm:$0xff] (!%p192_p3)   ;;  %v2824_v15 = vld [vmem:[%s4153_s2 + $0x68] ss:$16 sps:$4 sm:$0xff] (!%p192_p3)   ;;  %v2825_v16 = vld [vmem:[%s4153_s2 + $0x84] ss:$16 sps:$4 sm:$0xff] (!%p192_p3)  }
   0xc   : > { %1905 = vmatpush1.bf16.msra.mxu0 (!%p192_p3), %v2811_v6  ;;  %2077 = vmatpush1.bf16.msra.mxu1 (!%p192_p3), %v2812_v7  ;;  %v2827_v17 = vld [vmem:[%s4153_s2 + $0x8c] ss:$16 sps:$4 sm:$0xff] (!%p192_p3)   ;;  %v2829_v18 = vld [vmem:[%s4153_s2 + $0x80] ss:$16 sps:$4 sm:$0xff] (!%p192_p3)   ;;  %v2830_v19 = vld [vmem:[%s4153_s2 + $0x88] ss:$16 sps:$4 sm:$0xff] (!%p192_p3)  }
   0xd   : > { %1906 = vmatprep.subr.bf16.mxu0 (!%p192_p3), %v2813_v8  ;;  %2078 = vmatprep.subr.bf16.mxu1 (!%p192_p3), %v2815_v9  ;;  %v2831_v20 = vld [vmem:[%s4153_s2 + $0xa4] ss:$16 sps:$4 sm:$0xff] (!%p192_p3)   ;;  %v2833_v21 = vld [vmem:[%s4153_s2 + $0xac] ss:$16 sps:$4 sm:$0xff] (!%p192_p3)   ;;  %v2835_v22 = vld [vmem:[%s4153_s2 + $0xa0] ss:$16 sps:$4 sm:$0xff] (!%p192_p3)  }
   0xe   : > { %v2836_v23 = vld [vmem:[%s4153_s2 + $0xa8] ss:$16 sps:$4 sm:$0xff]   ;;  %v2837_v24 = vld [vmem:[%s4153_s2 + $0xc4] ss:$16 sps:$4 sm:$0xff]   ;;  %v2839_v25 = vld [vmem:[%s4153_s2 + $0xcc] ss:$16 sps:$4 sm:$0xff]  }
   0xf   : > { %v2841_v26 = vld [vmem:[%s4153_s2 + $0xc0] ss:$16 sps:$4 sm:$0xff]   ;;  %v2842_v27 = vld [vmem:[%s4153_s2 + $0xc8] ss:$16 sps:$4 sm:$0xff]   ;;  %v2843_v28 = vld [vmem:[%s4153_s2 + $0xe4] ss:$16 sps:$4 sm:$0xff]  }
  0x10   : > { %1907 = vmatpush1.bf16.msra.mxu0 %v2817_v10  ;;  %2079 = vmatpush1.bf16.msra.mxu1 %v2818_v11  ;;  %v2845_v29 = vld [vmem:[%s4153_s2 + $0xec] ss:$16 sps:$4 sm:$0xff]   ;;  %v2847_v30 = vld [vmem:[%s4153_s2 + $0xe0] ss:$16 sps:$4 sm:$0xff]   ;;  %v2848_v31 = vld [vmem:[%s4153_s2 + $0xe8] ss:$16 sps:$4 sm:$0xff]  }
  0x11   : > { %1908 = vmatprep.subr.bf16.mxu0 %v2819_v12  ;;  %2080 = vmatprep.subr.bf16.mxu1 %v2821_v13  ;;  %v2849_v32 = vld [vmem:[%s4153_s2 + $0x104] ss:$16 sps:$4 sm:$0xff]   ;;  %v2851_v33 = vld [vmem:[%s4153_s2 + $0x10c] ss:$16 sps:$4 sm:$0xff]   ;;  %v2853_v34 = vld [vmem:[%s4153_s2 + $0x100] ss:$16 sps:$4 sm:$0xff]  }
  0x12   : > { %v2854_v35 = vld [vmem:[%s4153_s2 + $0x108] ss:$16 sps:$4 sm:$0xff]   ;;  %v2855_v36 = vld [vmem:[%s4153_s2 + $0x124] ss:$16 sps:$4 sm:$0xff]   ;;  %v2857_v37 = vld [vmem:[%s4153_s2 + $0x12c] ss:$16 sps:$4 sm:$0xff]  }
  0x13   : > { %s4160_s12 = smov (!%p239_p4, %s3225_s12), 1  ;;  %v2859_v38 = vld [vmem:[%s4153_s2 + $0x120] ss:$16 sps:$4 sm:$0xff]   ;;  %v2860_v39 = vld [vmem:[%s4153_s2 + $0x128] ss:$16 sps:$4 sm:$0xff]  }
  0x14   : > { %1909 = vmatpush1.bf16.msra.mxu0 %v2823_v14  ;;  %2081 = vmatpush1.bf16.msra.mxu1 %v2824_v15  ;;  %v2861_v40 = vld [vmem:[%s4153_s2 + $0x144] ss:$16 sps:$4 sm:$0xff]   ;;  %v2863_v41 = vld [vmem:[%s4153_s2 + $0x14c] ss:$16 sps:$4 sm:$0xff]   ;;  %s3403_s4 = sshll.u32 %s4160_s12, 5 }
  0x15   : > { %1910 = vmatprep.subr.bf16.mxu0 %v2825_v16  ;;  %2082 = vmatprep.subr.bf16.mxu1 %v2827_v17  ;;  %v2865_v42 = vld [vmem:[%s4153_s2 + $0x140] ss:$16 sps:$4 sm:$0xff]   ;;  %v2866_v43 = vld [vmem:[%s4153_s2 + $0x148] ss:$16 sps:$4 sm:$0xff]   ;;  %v2867_v44 = vld [vmem:[%s4153_s2 + $0x164] ss:$16 sps:$4 sm:$0xff]   ;;  %s3418_s12 = scalar_lea.vmem %s4151_s0, %s3403_s4  ;;  %s275_s20 = scalar_lea.vmem %s4154_s3, %s3403_s4 }
  0x16   : > { %v2869_v45 = vld [vmem:[%s4153_s2 + $0x16c] ss:$16 sps:$4 sm:$0xff]   ;;  %v2871_v46 = vld [vmem:[%s4153_s2 + $0x160] ss:$16 sps:$4 sm:$0xff]   ;;  %v3427_v47 = vld [vmem:[%s3418_s12 + $0x4] ss:$16 sps:$4 sm:$0xff]  }
  0x17   : > { %v2872_v48 = vld [vmem:[%s4153_s2 + $0x168] ss:$16 sps:$4 sm:$0xff]   ;;  %v2873_v49 = vld [vmem:[%s4153_s2 + $0x184] ss:$16 sps:$4 sm:$0xff]   ;;  %v2875_v50 = vld [vmem:[%s4153_s2 + $0x18c] ss:$16 sps:$4 sm:$0xff]   ;;  %1934 = vmatprep.mubr.bf16.mxu0 %v3427_v47  ;;  %2106 = vmatprep.mubr.bf16.mxu1 %v3427_v47 }
  0x18   : > { %1911 = vmatpush1.bf16.msra.mxu0 %v2829_v18  ;;  %2083 = vmatpush1.bf16.msra.mxu1 %v2830_v19  ;;  %v2877_v51 = vld [vmem:[%s4153_s2 + $0x180] ss:$16 sps:$4 sm:$0xff]   ;;  %v2878_v52 = vld [vmem:[%s4153_s2 + $0x188] ss:$16 sps:$4 sm:$0xff]   ;;  %v2879_v53 = vld [vmem:[%s4153_s2 + $0x1a4] ss:$16 sps:$4 sm:$0xff]  }
  0x19   : > { %1912 = vmatprep.subr.bf16.mxu0 %v2831_v20  ;;  %2084 = vmatprep.subr.bf16.mxu1 %v2833_v21  ;;  %v2881_v54 = vld [vmem:[%s4153_s2 + $0x1ac] ss:$16 sps:$4 sm:$0xff]   ;;  %v2883_v55 = vld [vmem:[%s4153_s2 + $0x1a0] ss:$16 sps:$4 sm:$0xff]   ;;  %v2884_v56 = vld [vmem:[%s4153_s2 + $0x1a8] ss:$16 sps:$4 sm:$0xff]  }
  0x1a   : > { %v2885_v57 = vld [vmem:[%s4153_s2 + $0x1c4] ss:$16 sps:$4 sm:$0xff]   ;;  %v2887_v58 = vld [vmem:[%s4153_s2 + $0x1cc] ss:$16 sps:$4 sm:$0xff]   ;;  %v2889_v59 = vld [vmem:[%s4153_s2 + $0x1c0] ss:$16 sps:$4 sm:$0xff]  }
  0x1b   : > { %v2890_v60 = vld [vmem:[%s4153_s2 + $0x1c8] ss:$16 sps:$4 sm:$0xff]   ;;  %v2891_v61 = vld [vmem:[%s4153_s2 + $0x1e4] ss:$16 sps:$4 sm:$0xff]   ;;  %v2893_v62 = vld [vmem:[%s4153_s2 + $0x1ec] ss:$16 sps:$4 sm:$0xff]  }
  0x1c   : > { %1913 = vmatpush1.bf16.msra.mxu0 %v2835_v22  ;;  %2085 = vmatpush1.bf16.msra.mxu1 %v2836_v23  ;;  %v2895_v63 = vld [vmem:[%s4153_s2 + $0x1e0] ss:$16 sps:$4 sm:$0xff]   ;;  %v2896_v0 = vld [vmem:[%s4153_s2 + $0x1e8] ss:$16 sps:$4 sm:$0xff]   ;;  %v2901_v1 = vld [vmem:[%s4153_s2 + $0x204] ss:$16 sps:$4 sm:$0xff]  }
  0x1d   : > { %1914 = vmatprep.subr.bf16.mxu0 %v2837_v24  ;;  %2086 = vmatprep.subr.bf16.mxu1 %v2839_v25  ;;  %v2904_v2 = vld [vmem:[%s4153_s2 + $0x20c] ss:$16 sps:$4 sm:$0xff]   ;;  %v2899_v3 = vld [vmem:[%s4153_s2 + $0x200] ss:$16 sps:$4 sm:$0xff]   ;;  %v2902_v4 = vld [vmem:[%s4153_s2 + $0x208] ss:$16 sps:$4 sm:$0xff]  }
  0x1e   : > { %v3495_v5 = vld [vmem:[%s3418_s12] ss:$16 sps:$4 sm:$0xff]   ;;  %v2908_v6 = vld [vmem:[%s4153_s2 + $0x224] ss:$16 sps:$4 sm:$0xff]   ;;  %v2911_v7 = vld [vmem:[%s4153_s2 + $0x22c] ss:$16 sps:$4 sm:$0xff]  }
  0x1f   : > { %v2906_v8 = vld [vmem:[%s4153_s2 + $0x220] ss:$16 sps:$4 sm:$0xff]   ;;  %v2909_v9 = vld [vmem:[%s4153_s2 + $0x228] ss:$16 sps:$4 sm:$0xff]   ;;  %v2914_v10 = vld [vmem:[%s4153_s2 + $0x244] ss:$16 sps:$4 sm:$0xff]  }
  0x20   : > { %1915 = vmatpush1.bf16.msra.mxu0 %v2841_v26  ;;  %2087 = vmatpush1.bf16.msra.mxu1 %v2842_v27  ;;  %v2917_v11 = vld [vmem:[%s4153_s2 + $0x24c] ss:$16 sps:$4 sm:$0xff]   ;;  %v2912_v12 = vld [vmem:[%s4153_s2 + $0x240] ss:$16 sps:$4 sm:$0xff]   ;;  %v2915_v13 = vld [vmem:[%s4153_s2 + $0x248] ss:$16 sps:$4 sm:$0xff]  }
  0x21   : > { %1916 = vmatprep.subr.bf16.mxu0 %v2843_v28  ;;  %2088 = vmatprep.subr.bf16.mxu1 %v2845_v29  ;;  %v2920_v14 = vld [vmem:[%s4153_s2 + $0x264] ss:$16 sps:$4 sm:$0xff]   ;;  %v2923_v15 = vld [vmem:[%s4153_s2 + $0x26c] ss:$16 sps:$4 sm:$0xff]   ;;  %v2918_v16 = vld [vmem:[%s4153_s2 + $0x260] ss:$16 sps:$4 sm:$0xff]  }
  0x22   : > { %v2921_v17 = vld [vmem:[%s4153_s2 + $0x268] ss:$16 sps:$4 sm:$0xff]   ;;  %v2926_v18 = vld [vmem:[%s4153_s2 + $0x284] ss:$16 sps:$4 sm:$0xff]   ;;  %v2929_v19 = vld [vmem:[%s4153_s2 + $0x28c] ss:$16 sps:$4 sm:$0xff]  }
  0x23   : > { %v2924_v20 = vld [vmem:[%s4153_s2 + $0x280] ss:$16 sps:$4 sm:$0xff]   ;;  %v2927_v21 = vld [vmem:[%s4153_s2 + $0x288] ss:$16 sps:$4 sm:$0xff]   ;;  %v2932_v22 = vld [vmem:[%s4153_s2 + $0x2a4] ss:$16 sps:$4 sm:$0xff]  }
  0x24   : > { %1917 = vmatpush1.bf16.msra.mxu0 %v2847_v30  ;;  %2089 = vmatpush1.bf16.msra.mxu1 %v2848_v31  ;;  %v2935_v23 = vld [vmem:[%s4153_s2 + $0x2ac] ss:$16 sps:$4 sm:$0xff]   ;;  %v2930_v24 = vld [vmem:[%s4153_s2 + $0x2a0] ss:$16 sps:$4 sm:$0xff]   ;;  %v2933_v25 = vld [vmem:[%s4153_s2 + $0x2a8] ss:$16 sps:$4 sm:$0xff]  }
  0x25   : > { %1918 = vmatprep.subr.bf16.mxu0 %v2849_v32  ;;  %2090 = vmatprep.subr.bf16.mxu1 %v2851_v33  ;;  %v2938_v26 = vld [vmem:[%s4153_s2 + $0x2c4] ss:$16 sps:$4 sm:$0xff]   ;;  %v2941_v27 = vld [vmem:[%s4153_s2 + $0x2cc] ss:$16 sps:$4 sm:$0xff]   ;;  %v2936_v28 = vld [vmem:[%s4153_s2 + $0x2c0] ss:$16 sps:$4 sm:$0xff]  }
  0x26   : > { %v3569_v29 = vld [vmem:[%s3418_s12 + $0xc] ss:$16 sps:$4 sm:$0xff]   ;;  %v2939_v30 = vld [vmem:[%s4153_s2 + $0x2c8] ss:$16 sps:$4 sm:$0xff]   ;;  %v2944_v31 = vld [vmem:[%s4153_s2 + $0x2e4] ss:$16 sps:$4 sm:$0xff]  }
  0x27   : > { %v2947_v32 = vld [vmem:[%s4153_s2 + $0x2ec] ss:$16 sps:$4 sm:$0xff]   ;;  %v2942_v33 = vld [vmem:[%s4153_s2 + $0x2e0] ss:$16 sps:$4 sm:$0xff]   ;;  %s2746_s5 = sadd.s32 16, %s3403_s4 }
  0x28   : > { %1919 = vmatpush1.bf16.msra.mxu0 %v2853_v34  ;;  %2091 = vmatpush1.bf16.msra.mxu1 %v2854_v35  ;;  %v2945_v34 = vld [vmem:[%s4153_s2 + $0x2e8] ss:$16 sps:$4 sm:$0xff]   ;;  %v2950_v35 = vld [vmem:[%s4153_s2 + $0x304] ss:$16 sps:$4 sm:$0xff]   ;;  %s3704_s18 = scalar_lea.vmem %s4152_s1, %s2746_s5  ;;  %vm313_vm0 = vsmask.f32 7424 }
  0x29   : > { %1920 = vmatprep.subr.bf16.mxu0 %v2855_v36  ;;  %2092 = vmatprep.subr.bf16.mxu1 %v2857_v37  ;;  %v2953_v36 = vld [vmem:[%s4153_s2 + $0x30c] ss:$16 sps:$4 sm:$0xff]   ;;  %v2948_v37 = vld [vmem:[%s4153_s2 + $0x300] ss:$16 sps:$4 sm:$0xff]  }
  0x2c   : > { %1921 = vmatpush1.bf16.msra.mxu0 %v2859_v38  ;;  %2093 = vmatpush1.bf16.msra.mxu1 %v2860_v39  ;;  %v2951_v38 = vld [vmem:[%s4153_s2 + $0x308] ss:$16 sps:$4 sm:$0xff]   ;;  %v2956_v39 = vld [vmem:[%s4153_s2 + $0x324] ss:$16 sps:$4 sm:$0xff]  }
  0x2d   : > { %1922 = vmatprep.subr.bf16.mxu0 %v2861_v40  ;;  %2094 = vmatprep.subr.bf16.mxu1 %v2863_v41  ;;  %v2959_v40 = vld [vmem:[%s4153_s2 + $0x32c] ss:$16 sps:$4 sm:$0xff]   ;;  %v2954_v41 = vld [vmem:[%s4153_s2 + $0x320] ss:$16 sps:$4 sm:$0xff]  }
  0x30   : > { %1923 = vmatpush1.bf16.msra.mxu0 %v2865_v42  ;;  %2095 = vmatpush1.bf16.msra.mxu1 %v2866_v43  ;;  %v2957_v42 = vld [vmem:[%s4153_s2 + $0x328] ss:$16 sps:$4 sm:$0xff]   ;;  %v2962_v43 = vld [vmem:[%s4153_s2 + $0x344] ss:$16 sps:$4 sm:$0xff]  }
  0x31   : > { %1924 = vmatprep.subr.bf16.mxu0 %v2867_v44  ;;  %2096 = vmatprep.subr.bf16.mxu1 %v2869_v45  ;;  %v2965_v44 = vld [vmem:[%s4153_s2 + $0x34c] ss:$16 sps:$4 sm:$0xff]   ;;  %v2960_v45 = vld [vmem:[%s4153_s2 + $0x340] ss:$16 sps:$4 sm:$0xff]  }
  0x34   : > { %1925 = vmatpush1.bf16.msra.mxu0 %v2871_v46  ;;  %2097 = vmatpush1.bf16.msra.mxu1 %v2872_v48  ;;  %v2963_v46 = vld [vmem:[%s4153_s2 + $0x348] ss:$16 sps:$4 sm:$0xff]   ;;  %v2968_v48 = vld [vmem:[%s4153_s2 + $0x364] ss:$16 sps:$4 sm:$0xff]  }
  0x35   : > { %1926 = vmatprep.subr.bf16.mxu0 %v2873_v49  ;;  %2098 = vmatprep.subr.bf16.mxu1 %v2875_v50  ;;  %v2971_v49 = vld [vmem:[%s4153_s2 + $0x36c] ss:$16 sps:$4 sm:$0xff]   ;;  %v2966_v50 = vld [vmem:[%s4153_s2 + $0x360] ss:$16 sps:$4 sm:$0xff]  }
  0x38   : > { %1927 = vmatpush1.bf16.msra.mxu0 %v2877_v51  ;;  %2099 = vmatpush1.bf16.msra.mxu1 %v2878_v52  ;;  %v2969_v51 = vld [vmem:[%s4153_s2 + $0x368] ss:$16 sps:$4 sm:$0xff]   ;;  %v2974_v52 = vld [vmem:[%s4153_s2 + $0x384] ss:$16 sps:$4 sm:$0xff]  }
  0x39   : > { %1928 = vmatprep.subr.bf16.mxu0 %v2879_v53  ;;  %2100 = vmatprep.subr.bf16.mxu1 %v2881_v54  ;;  %v2977_v53 = vld [vmem:[%s4153_s2 + $0x38c] ss:$16 sps:$4 sm:$0xff]   ;;  %v2972_v54 = vld [vmem:[%s4153_s2 + $0x380] ss:$16 sps:$4 sm:$0xff]  }
  0x3c   : > { %1929 = vmatpush1.bf16.msra.mxu0 %v2883_v55  ;;  %2101 = vmatpush1.bf16.msra.mxu1 %v2884_v56  ;;  %v2975_v55 = vld [vmem:[%s4153_s2 + $0x388] ss:$16 sps:$4 sm:$0xff]   ;;  %v2980_v56 = vld [vmem:[%s4153_s2 + $0x3a4] ss:$16 sps:$4 sm:$0xff]  }
  0x3d   : > { %1930 = vmatprep.subr.bf16.mxu0 %v2885_v57  ;;  %2102 = vmatprep.subr.bf16.mxu1 %v2887_v58  ;;  %v2983_v57 = vld [vmem:[%s4153_s2 + $0x3ac] ss:$16 sps:$4 sm:$0xff]   ;;  %v2978_v58 = vld [vmem:[%s4153_s2 + $0x3a0] ss:$16 sps:$4 sm:$0xff]  }
  0x40   : > { %1931 = vmatpush1.bf16.msra.mxu0 %v2889_v59  ;;  %2103 = vmatpush1.bf16.msra.mxu1 %v2890_v60  ;;  %v2981_v59 = vld [vmem:[%s4153_s2 + $0x3a8] ss:$16 sps:$4 sm:$0xff]   ;;  %v2986_v60 = vld [vmem:[%s4153_s2 + $0x3c4] ss:$16 sps:$4 sm:$0xff]  }
  0x41   : > { %1932 = vmatprep.subr.bf16.mxu0 %v2891_v61  ;;  %2104 = vmatprep.subr.bf16.mxu1 %v2893_v62  ;;  %v2989_v61 = vld [vmem:[%s4153_s2 + $0x3cc] ss:$16 sps:$4 sm:$0xff]   ;;  %v2984_v62 = vld [vmem:[%s4153_s2 + $0x3c0] ss:$16 sps:$4 sm:$0xff]  }
  0x44   : > { %1933 = vmatpush1.bf16.msra.mxu0 %v2895_v63  ;;  %2105 = vmatpush1.bf16.msra.mxu1 %v2896_v0  ;;  %v2987_v63 = vld [vmem:[%s4153_s2 + $0x3c8] ss:$16 sps:$4 sm:$0xff]   ;;  %v2992_v0 = vld [vmem:[%s4153_s2 + $0x3e4] ss:$16 sps:$4 sm:$0xff]  }
  0x45   : > { %1945 = vmatprep.subr.bf16.mxu0 %v2901_v1  ;;  %2117 = vmatprep.subr.bf16.mxu1 %v2904_v2  ;;  %v2995_v1 = vld [vmem:[%s4153_s2 + $0x3ec] ss:$16 sps:$4 sm:$0xff]   ;;  %v2990_v2 = vld [vmem:[%s4153_s2 + $0x3e0] ss:$16 sps:$4 sm:$0xff]  }
  0x47   : > { %1935 = vmatmul.mubr.bf16.vlgmr.msra.gmra.mrb[0].mxu0 %v3495_v5  ;;  %2107 = vmatmul.mubr.bf16.vlgmr.msra.gmra.mrb[0].mxu1 %v3495_v5 }
  0x48   : > { %1946 = vmatpush1.bf16.msra.mxu0 %v2899_v3  ;;  %2118 = vmatpush1.bf16.msra.mxu1 %v2902_v4  ;;  %v2993_v3 = vld [vmem:[%s4153_s2 + $0x3e8] ss:$16 sps:$4 sm:$0xff]   ;;  %v3000_v4 = vld [vmem:[%s4153_s2 + $0x404] ss:$16 sps:$4 sm:$0xff]  }
  0x49   : > { %1947 = vmatprep.subr.bf16.mxu0 %v2908_v6  ;;  %2119 = vmatprep.subr.bf16.mxu1 %v2911_v7  ;;  %v3003_v6 = vld [vmem:[%s4153_s2 + $0x40c] ss:$16 sps:$4 sm:$0xff]   ;;  %v329_v7 = vshll.u32 %v3427_v47, 16 }
  0x4a   : > { %1977 = vmatprep.mubr.bf16.mxu0 %v3569_v29  ;;  %2149 = vmatprep.mubr.bf16.mxu1 %v3569_v29 }
  0x4c   : > { %1948 = vmatpush1.bf16.msra.mxu0 %v2906_v8  ;;  %2120 = vmatpush1.bf16.msra.mxu1 %v2909_v9  ;;  %v2998_v8 = vld [vmem:[%s4153_s2 + $0x400] ss:$16 sps:$4 sm:$0xff]   ;;  %v3001_v9 = vld [vmem:[%s4153_s2 + $0x408] ss:$16 sps:$4 sm:$0xff]  }
  0x4d   : > { %1949 = vmatprep.subr.bf16.mxu0 %v2914_v10  ;;  %2121 = vmatprep.subr.bf16.mxu1 %v2917_v11  ;;  %v3699_v10 = vld [vmem:[%s3418_s12 + $0x8] ss:$16 sps:$4 sm:$0xff]   ;;  %v3007_v11 = vld [vmem:[%s4153_s2 + $0x424] ss:$16 sps:$4 sm:$0xff]  }
  0x50   : > { %1950 = vmatpush1.bf16.msra.mxu0 %v2912_v12  ;;  %2122 = vmatpush1.bf16.msra.mxu1 %v2915_v13  ;;  %v3010_v12 = vld [vmem:[%s4153_s2 + $0x42c] ss:$16 sps:$4 sm:$0xff]   ;;  %v327_v13 = vshrl.u32 %v3427_v47, 16  ;;  %v3008_v47 = vld [vmem:[%s4153_s2 + $0x428] ss:$16 sps:$4 sm:$0xff]  }
  0x51   : > { %1951 = vmatprep.subr.bf16.mxu0 %v2920_v14  ;;  %2123 = vmatprep.subr.bf16.mxu1 %v2923_v15  ;;  %v331_v14 = vrot.slane %v329_v7, 1  ;;  %v3714_v15 = vld [vmem:[%s3704_s18] sm:$0xff] }
  0x54   : > { %1952 = vmatpush1.bf16.msra.mxu0 %v2918_v16  ;;  %2124 = vmatpush1.bf16.msra.mxu1 %v2921_v17  ;;  %v3005_v16 = vld [vmem:[%s4153_s2 + $0x420] ss:$16 sps:$4 sm:$0xff]   ;;  %v2479_v17 = vcombine.high %v3714_v15, %v3714_v15 }
  0x55   : > { %1953 = vmatprep.subr.bf16.mxu0 %v2926_v18  ;;  %2125 = vmatprep.subr.bf16.mxu1 %v2929_v19  ;;  %v3013_v18 = vld [vmem:[%s4153_s2 + $0x444] ss:$16 sps:$4 sm:$0xff]   ;;  %v3016_v19 = vld [vmem:[%s4153_s2 + $0x44c] ss:$16 sps:$4 sm:$0xff]  }
  0x58   : > { %1954 = vmatpush1.bf16.msra.mxu0 %v2924_v20  ;;  %2126 = vmatpush1.bf16.msra.mxu1 %v2927_v21  ;;  %v332_v20 = vor.u32 %v331_v14, %v327_v13  ;;  %v334_v21 = vshll.u32 %v2479_v17, 16  ;;  %v3080_v17 = vld [vmem:[%s4153_s2 + $0x5a8] ss:$16 sps:$4 sm:$0xff]  }
  0x59   : > { %1955 = vmatprep.subr.bf16.mxu0 %v2932_v22  ;;  %2127 = vmatprep.subr.bf16.mxu1 %v2935_v23  ;;  %v3011_v23 = vld [vmem:[%s4153_s2 + $0x440] ss:$16 sps:$4 sm:$0xff]  }
  0x5a   : > { %v336_v22 = vrot.slane %v334_v21, 1 }
  0x5c   : > { %1956 = vmatpush1.bf16.msra.mxu0 %v2930_v24  ;;  %2128 = vmatpush1.bf16.msra.mxu1 %v2933_v25  ;;  %v3014_v24 = vld [vmem:[%s4153_s2 + $0x448] ss:$16 sps:$4 sm:$0xff]   ;;  %v3019_v25 = vld [vmem:[%s4153_s2 + $0x464] ss:$16 sps:$4 sm:$0xff]  }
  0x5d   : > { %1957 = vmatprep.subr.bf16.mxu0 %v2938_v26  ;;  %2129 = vmatprep.subr.bf16.mxu1 %v2941_v27  ;;  %v3022_v26 = vld [vmem:[%s4153_s2 + $0x46c] ss:$16 sps:$4 sm:$0xff]   ;;  %v337_v27 = vsel %vm313_vm0, %v332_v20, %v336_v22  ;;  %v315_v22 = vshrl.u32 %v3495_v5, 16 }
  0x5e   : > { %v3088_v20 = vld [vmem:[%s4153_s2 + $0x5cc] ss:$16 sps:$4 sm:$0xff]  }
  0x60   : > { %1958 = vmatpush1.bf16.msra.mxu0 %v2936_v28  ;;  %2130 = vmatpush1.bf16.msra.mxu1 %v2939_v30  ;;  %v3017_v28 = vld [vmem:[%s4153_s2 + $0x460] ss:$16 sps:$4 sm:$0xff]   ;;  %v3020_v30 = vld [vmem:[%s4153_s2 + $0x468] ss:$16 sps:$4 sm:$0xff]  }
  0x61   : > { %1959 = vmatprep.subr.bf16.mxu0 %v2944_v31  ;;  %2131 = vmatprep.subr.bf16.mxu1 %v2947_v32  ;;  %v3025_v31 = vld [vmem:[%s4153_s2 + $0x484] ss:$16 sps:$4 sm:$0xff]   ;;  %v3028_v32 = vld [vmem:[%s4153_s2 + $0x48c] ss:$16 sps:$4 sm:$0xff]  }
  0x64   : > { %1960 = vmatpush1.bf16.msra.mxu0 %v2942_v33  ;;  %2132 = vmatpush1.bf16.msra.mxu1 %v2945_v34  ;;  %v3023_v33 = vld [vmem:[%s4153_s2 + $0x480] ss:$16 sps:$4 sm:$0xff]   ;;  %v3026_v34 = vld [vmem:[%s4153_s2 + $0x488] ss:$16 sps:$4 sm:$0xff]  }
  0x65   : > { %1961 = vmatprep.subr.bf16.mxu0 %v2950_v35  ;;  %2133 = vmatprep.subr.bf16.mxu1 %v2953_v36  ;;  %v3031_v35 = vld [vmem:[%s4153_s2 + $0x4a4] ss:$16 sps:$4 sm:$0xff]   ;;  %v3034_v36 = vld [vmem:[%s4153_s2 + $0x4ac] ss:$16 sps:$4 sm:$0xff]  }
  0x68   : > { %1962 = vmatpush1.bf16.msra.mxu0 %v2948_v37  ;;  %2134 = vmatpush1.bf16.msra.mxu1 %v2951_v38  ;;  %v3029_v37 = vld [vmem:[%s4153_s2 + $0x4a0] ss:$16 sps:$4 sm:$0xff]   ;;  %v3032_v38 = vld [vmem:[%s4153_s2 + $0x4a8] ss:$16 sps:$4 sm:$0xff]  }
  0x69   : > { %1963 = vmatprep.subr.bf16.mxu0 %v2956_v39  ;;  %2135 = vmatprep.subr.bf16.mxu1 %v2959_v40  ;;  %v3037_v39 = vld [vmem:[%s4153_s2 + $0x4c4] ss:$16 sps:$4 sm:$0xff]   ;;  %v3040_v40 = vld [vmem:[%s4153_s2 + $0x4cc] ss:$16 sps:$4 sm:$0xff]  }
  0x6c   : > { %1964 = vmatpush1.bf16.msra.mxu0 %v2954_v41  ;;  %2136 = vmatpush1.bf16.msra.mxu1 %v2957_v42  ;;  %v3035_v41 = vld [vmem:[%s4153_s2 + $0x4c0] ss:$16 sps:$4 sm:$0xff]   ;;  %v3038_v42 = vld [vmem:[%s4153_s2 + $0x4c8] ss:$16 sps:$4 sm:$0xff]  }
  0x6d   : > { %1965 = vmatprep.subr.bf16.mxu0 %v2962_v43  ;;  %2137 = vmatprep.subr.bf16.mxu1 %v2965_v44  ;;  %v3043_v43 = vld [vmem:[%s4153_s2 + $0x4e4] ss:$16 sps:$4 sm:$0xff]   ;;  %v3046_v44 = vld [vmem:[%s4153_s2 + $0x4ec] ss:$16 sps:$4 sm:$0xff]  }
  0x70   : > { %1966 = vmatpush1.bf16.msra.mxu0 %v2960_v45  ;;  %2138 = vmatpush1.bf16.msra.mxu1 %v2963_v46  ;;  %v3041_v45 = vld [vmem:[%s4153_s2 + $0x4e0] ss:$16 sps:$4 sm:$0xff]   ;;  %v3044_v46 = vld [vmem:[%s4153_s2 + $0x4e8] ss:$16 sps:$4 sm:$0xff]  }
  0x71   : > { %1967 = vmatprep.subr.bf16.mxu0 %v2968_v48  ;;  %2139 = vmatprep.subr.bf16.mxu1 %v2971_v49  ;;  %v3049_v48 = vld [vmem:[%s4153_s2 + $0x504] ss:$16 sps:$4 sm:$0xff]   ;;  %v3052_v49 = vld [vmem:[%s4153_s2 + $0x50c] ss:$16 sps:$4 sm:$0xff]  }
  0x74   : > { %1968 = vmatpush1.bf16.msra.mxu0 %v2966_v50  ;;  %2140 = vmatpush1.bf16.msra.mxu1 %v2969_v51  ;;  %v3047_v50 = vld [vmem:[%s4153_s2 + $0x500] ss:$16 sps:$4 sm:$0xff]   ;;  %v3050_v51 = vld [vmem:[%s4153_s2 + $0x508] ss:$16 sps:$4 sm:$0xff]  }
  0x75   : > { %1969 = vmatprep.subr.bf16.mxu0 %v2974_v52  ;;  %2141 = vmatprep.subr.bf16.mxu1 %v2977_v53  ;;  %v3055_v52 = vld [vmem:[%s4153_s2 + $0x524] ss:$16 sps:$4 sm:$0xff]   ;;  %v3058_v53 = vld [vmem:[%s4153_s2 + $0x52c] ss:$16 sps:$4 sm:$0xff]  }
  0x78   : > { %1970 = vmatpush1.bf16.msra.mxu0 %v2972_v54  ;;  %2142 = vmatpush1.bf16.msra.mxu1 %v2975_v55  ;;  %v3053_v54 = vld [vmem:[%s4153_s2 + $0x520] ss:$16 sps:$4 sm:$0xff]   ;;  %v3056_v55 = vld [vmem:[%s4153_s2 + $0x528] ss:$16 sps:$4 sm:$0xff]  }
  0x79   : > { %1971 = vmatprep.subr.bf16.mxu0 %v2980_v56  ;;  %2143 = vmatprep.subr.bf16.mxu1 %v2983_v57  ;;  %v3061_v56 = vld [vmem:[%s4153_s2 + $0x544] ss:$16 sps:$4 sm:$0xff]   ;;  %v3064_v57 = vld [vmem:[%s4153_s2 + $0x54c] ss:$16 sps:$4 sm:$0xff]  }
  0x7c   : > { %1972 = vmatpush1.bf16.msra.mxu0 %v2978_v58  ;;  %2144 = vmatpush1.bf16.msra.mxu1 %v2981_v59  ;;  %v3059_v58 = vld [vmem:[%s4153_s2 + $0x540] ss:$16 sps:$4 sm:$0xff]   ;;  %v3062_v59 = vld [vmem:[%s4153_s2 + $0x548] ss:$16 sps:$4 sm:$0xff]  }
  0x7d   : > { %1973 = vmatprep.subr.bf16.mxu0 %v2986_v60  ;;  %2145 = vmatprep.subr.bf16.mxu1 %v2989_v61  ;;  %v3067_v60 = vld [vmem:[%s4153_s2 + $0x564] ss:$16 sps:$4 sm:$0xff]   ;;  %v3070_v61 = vld [vmem:[%s4153_s2 + $0x56c] ss:$16 sps:$4 sm:$0xff]  }
  0x80   : > { %1974 = vmatpush1.bf16.msra.mxu0 %v2984_v62  ;;  %2146 = vmatpush1.bf16.msra.mxu1 %v2987_v63  ;;  %v341_v62 = vshll.u32 %v3699_v10, 16  ;;  %v3065_v63 = vld [vmem:[%s4153_s2 + $0x560] ss:$16 sps:$4 sm:$0xff]  }
  0x81   : > { %1975 = vmatprep.subr.bf16.mxu0 %v2992_v0  ;;  %2147 = vmatprep.subr.bf16.mxu1 %v2995_v1  ;;  %v3068_v0 = vld [vmem:[%s4153_s2 + $0x568] ss:$16 sps:$4 sm:$0xff]   ;;  %v3073_v1 = vld [vmem:[%s4153_s2 + $0x584] ss:$16 sps:$4 sm:$0xff]  }
  0x84   : > { %1976 = vmatpush1.bf16.msra.mxu0 %v2990_v2  ;;  %2148 = vmatpush1.bf16.msra.mxu1 %v2993_v3  ;;  %v3076_v2 = vld [vmem:[%s4153_s2 + $0x58c] ss:$16 sps:$4 sm:$0xff]   ;;  %v339_v3 = vshrl.u32 %v3699_v10, 16 }
  0x85   : > { %1988 = vmatprep.subr.bf16.mxu0 %v3000_v4  ;;  %2160 = vmatprep.subr.bf16.mxu1 %v3003_v6  ;;  %v343_v4 = vrot.slane %v341_v62, 1  ;;  %v282_v6 = vld [vmem:[%s3704_s18 + $0x8] sm:$0xff] }
  0x86   : > { %v2480_v7 = vcombine.low %v282_v6, %v282_v6  ;;  %v3132_v62 = vld [vmem:[%s4153_s2 + $0x6ac] ss:$16 sps:$4 sm:$0xff]  }
  0x87   : > { %1978 = vmatmul.mubr.bf16.vlgmr.msra.gmra.mrb[0].mxu0 %v3699_v10  ;;  %2150 = vmatmul.mubr.bf16.vlgmr.msra.gmra.mrb[0].mxu1 %v3699_v10  ;;  %v3082_v10 = vld [vmem:[%s4153_s2 + $0x5ac] ss:$16 sps:$4 sm:$0xff]  }
  0x88   : > { %1989 = vmatpush1.bf16.msra.mxu0 %v2998_v8  ;;  %2161 = vmatpush1.bf16.msra.mxu1 %v3001_v9  ;;  %v3071_v8 = vld [vmem:[%s4153_s2 + $0x580] ss:$16 sps:$4 sm:$0xff]   ;;  %v3074_v9 = vld [vmem:[%s4153_s2 + $0x588] ss:$16 sps:$4 sm:$0xff]   ;;  %v346_v13 = vshll.u32 %v2480_v7, 16 }
  0x89   : > { %1990 = vmatprep.subr.bf16.mxu0 %v3007_v11  ;;  %2162 = vmatprep.subr.bf16.mxu1 %v3010_v12  ;;  %v3079_v11 = vld [vmem:[%s4153_s2 + $0x5a4] ss:$16 sps:$4 sm:$0xff]   ;;  %v344_v12 = vor.u32 %v343_v4, %v339_v3  ;;  %v3133_v3 = vld [vmem:[%s4153_s2 + $0x6c0] ss:$16 sps:$4 sm:$0xff]   ;;  %v3136_v4 = vld [vmem:[%s4153_s2 + $0x6c8] ss:$16 sps:$4 sm:$0xff]  }
  0x8a   : > { %2020 = vmatprep.mubr.bf16.mxu0 %v337_v27  ;;  %2192 = vmatprep.mubr.bf16.mxu1 %v337_v27  ;;  %v348_v14 = vrot.slane %v346_v13, 1  ;;  %v3144_v7 = vld [vmem:[%s4153_s2 + $0x6ec] ss:$16 sps:$4 sm:$0xff]   ;;  %v3148_v13 = vld [vmem:[%s4153_s2 + $0x708] ss:$16 sps:$4 sm:$0xff]  }
  0x8c   : > { %1991 = vmatpush1.bf16.msra.mxu0 %v3005_v16  ;;  %2163 = vmatpush1.bf16.msra.mxu1 %v3008_v47  ;;  %v3077_v16 = vld [vmem:[%s4153_s2 + $0x5a0] ss:$16 sps:$4 sm:$0xff]   ;;  %v2478_v47 = vcombine.low %v3714_v15, %v3714_v15  ;;  %v3884_v21 = vsel %vm313_vm0, %v344_v12, %v348_v14  ;;  %v353_v15 = vshll.u32 %v3569_v29, 16  ;;  %v3153_v14 = vld [vmem:[%s4153_s2 + $0x724] ss:$16 sps:$4 sm:$0xff]  }
  0x8d   : > { %1992 = vmatprep.subr.bf16.mxu0 %v3013_v18  ;;  %2164 = vmatprep.subr.bf16.mxu1 %v3016_v19  ;;  %v317_v18 = vshll.u32 %v3495_v5, 16  ;;  %v3085_v19 = vld [vmem:[%s4153_s2 + $0x5c4] ss:$16 sps:$4 sm:$0xff]   ;;  %v3145_v12 = vld [vmem:[%s4153_s2 + $0x700] ss:$16 sps:$4 sm:$0xff]  }
  0x8e   : > { %v322_v27 = vshll.u32 %v2478_v47, 16  ;;  %v3091_v5 = vld [vmem:[%s4153_s2 + $0x5e4] ss:$16 sps:$4 sm:$0xff]   ;;  %v3154_v47 = vld [vmem:[%s4153_s2 + $0x728] ss:$16 sps:$4 sm:$0xff]  }
  0x90   : > { %1993 = vmatpush1.bf16.msra.mxu0 %v3011_v23  ;;  %2165 = vmatpush1.bf16.msra.mxu1 %v3014_v24  ;;  %v2481_v23 = vcombine.high %v282_v6, %v282_v6  ;;  %v3083_v24 = vld [vmem:[%s4153_s2 + $0x5c0] ss:$16 sps:$4 sm:$0xff]   ;;  %v3141_v6 = vld [vmem:[%s4153_s2 + $0x6e4] ss:$16 sps:$4 sm:$0xff]  }
  0x91   : > { %1994 = vmatprep.subr.bf16.mxu0 %v3019_v25  ;;  %2166 = vmatprep.subr.bf16.mxu1 %v3022_v26  ;;  %v3086_v25 = vld [vmem:[%s4153_s2 + $0x5c8] ss:$16 sps:$4 sm:$0xff]   ;;  %v319_v26 = vrot.slane %v317_v18, 1  ;;  %v3159_v18 = vld [vmem:[%s4153_s2 + $0x744] ss:$16 sps:$4 sm:$0xff]  }
  0x94   : > { %1995 = vmatpush1.bf16.msra.mxu0 %v3017_v28  ;;  %2167 = vmatpush1.bf16.msra.mxu1 %v3020_v30  ;;  %v3094_v28 = vld [vmem:[%s4153_s2 + $0x5ec] ss:$16 sps:$4 sm:$0xff]   ;;  %v351_v30 = vshrl.u32 %v3569_v29, 16  ;;  %v3098_v29 = vld [vmem:[%s4153_s2 + $0x604] ss:$16 sps:$4 sm:$0xff]  }
  0x95   : > { %1996 = vmatprep.subr.bf16.mxu0 %v3025_v31  ;;  %2168 = vmatprep.subr.bf16.mxu1 %v3028_v32  ;;  %v355_v31 = vrot.slane %v353_v15, 1  ;;  %v358_v32 = vshll.u32 %v2481_v23, 16  ;;  %v3165_v23 = vld [vmem:[%s4153_s2 + $0x764] ss:$16 sps:$4 sm:$0xff]   ;;  %v3168_v15 = vld [vmem:[%s4153_s2 + $0x76c] ss:$16 sps:$4 sm:$0xff]  }
  0x98   : > { %1997 = vmatpush1.bf16.msra.mxu0 %v3023_v33  ;;  %2169 = vmatpush1.bf16.msra.mxu1 %v3026_v34  ;;  %v3089_v33 = vld [vmem:[%s4153_s2 + $0x5e0] ss:$16 sps:$4 sm:$0xff]   ;;  %v3092_v34 = vld [vmem:[%s4153_s2 + $0x5e8] ss:$16 sps:$4 sm:$0xff]  }
  0x99   : > { %1998 = vmatprep.subr.bf16.mxu0 %v3031_v35  ;;  %2170 = vmatprep.subr.bf16.mxu1 %v3034_v36  ;;  %v320_v35 = vor.u32 %v319_v26, %v315_v22  ;;  %v324_v36 = vrot.slane %v322_v27, 1  ;;  %v3160_v22 = vld [vmem:[%s4153_s2 + $0x748] ss:$16 sps:$4 sm:$0xff]   ;;  %v3171_v26 = vld [vmem:[%s4153_s2 + $0x784] ss:$16 sps:$4 sm:$0xff]  }
  0x9a   : > { %v3174_v27 = vld [vmem:[%s4153_s2 + $0x78c] ss:$16 sps:$4 sm:$0xff]  }
  0x9c   : > { %1999 = vmatpush1.bf16.msra.mxu0 %v3029_v37  ;;  %2171 = vmatpush1.bf16.msra.mxu1 %v3032_v38  ;;  %v3101_v37 = vld [vmem:[%s4153_s2 + $0x60c] ss:$16 sps:$4 sm:$0xff]   ;;  %v356_v38 = vor.u32 %v355_v31, %v351_v30  ;;  %v3177_v30 = vld [vmem:[%s4153_s2 + $0x7a4] ss:$16 sps:$4 sm:$0xff]  }
  0x9d   : > { %2000 = vmatprep.subr.bf16.mxu0 %v3037_v39  ;;  %2172 = vmatprep.subr.bf16.mxu1 %v3040_v40  ;;  %v360_v39 = vrot.slane %v358_v32, 1  ;;  %v3096_v40 = vld [vmem:[%s4153_s2 + $0x600] ss:$16 sps:$4 sm:$0xff]   ;;  %v3180_v31 = vld [vmem:[%s4153_s2 + $0x7ac] ss:$16 sps:$4 sm:$0xff]  }
  0x9e   : > { %v3175_v32 = vld [vmem:[%s4153_s2 + $0x7a0] ss:$16 sps:$4 sm:$0xff]  }
  0xa0   : > { %2001 = vmatpush1.bf16.msra.mxu0 %v3035_v41  ;;  %2173 = vmatpush1.bf16.msra.mxu1 %v3038_v42  ;;  %v3099_v41 = vld [vmem:[%s4153_s2 + $0x608] ss:$16 sps:$4 sm:$0xff]   ;;  %v325_v42 = vsel %vm313_vm0, %v320_v35, %v324_v36  ;;  %v3186_v35 = vld [vmem:[%s4153_s2 + $0x7cc] ss:$16 sps:$4 sm:$0xff]   ;;  %v3181_v36 = vld [vmem:[%s4153_s2 + $0x7c0] ss:$16 sps:$4 sm:$0xff]  }
  0xa1   : > { %2002 = vmatprep.subr.bf16.mxu0 %v3043_v43  ;;  %2174 = vmatprep.subr.bf16.mxu1 %v3046_v44  ;;  %v3105_v43 = vld [vmem:[%s4153_s2 + $0x624] ss:$16 sps:$4 sm:$0xff]   ;;  %v3108_v44 = vld [vmem:[%s4153_s2 + $0x62c] ss:$16 sps:$4 sm:$0xff]  }
  0xa4   : > { %2003 = vmatpush1.bf16.msra.mxu0 %v3041_v45  ;;  %2175 = vmatpush1.bf16.msra.mxu1 %v3044_v46  ;;  %v361_v45 = vsel %vm313_vm0, %v356_v38, %v360_v39  ;;  %v3103_v46 = vld [vmem:[%s4153_s2 + $0x620] ss:$16 sps:$4 sm:$0xff]   ;;  %v3192_v38 = vld [vmem:[%s4153_s2 + $0x7ec] ss:$16 sps:$4 sm:$0xff]  }
  0xa5   : > { %2004 = vmatprep.subr.bf16.mxu0 %v3049_v48  ;;  %2176 = vmatprep.subr.bf16.mxu1 %v3052_v49  ;;  %v3106_v48 = vld [vmem:[%s4153_s2 + $0x628] ss:$16 sps:$4 sm:$0xff]   ;;  %v3111_v49 = vld [vmem:[%s4153_s2 + $0x644] ss:$16 sps:$4 sm:$0xff]   ;;  %v3187_v39 = vld [vmem:[%s4153_s2 + $0x7e0] ss:$16 sps:$4 sm:$0xff]  }
  0xa8   : > { %2005 = vmatpush1.bf16.msra.mxu0 %v3047_v50  ;;  %2177 = vmatpush1.bf16.msra.mxu1 %v3050_v51  ;;  %v3114_v50 = vld [vmem:[%s4153_s2 + $0x64c] ss:$16 sps:$4 sm:$0xff]   ;;  %v3109_v51 = vld [vmem:[%s4153_s2 + $0x640] ss:$16 sps:$4 sm:$0xff]  }
  0xa9   : > { %2006 = vmatprep.subr.bf16.mxu0 %v3055_v52  ;;  %2178 = vmatprep.subr.bf16.mxu1 %v3058_v53  ;;  %v3112_v52 = vld [vmem:[%s4153_s2 + $0x648] ss:$16 sps:$4 sm:$0xff]   ;;  %v3117_v53 = vld [vmem:[%s4153_s2 + $0x664] ss:$16 sps:$4 sm:$0xff]  }
  0xac   : > { %2007 = vmatpush1.bf16.msra.mxu0 %v3053_v54  ;;  %2179 = vmatpush1.bf16.msra.mxu1 %v3056_v55  ;;  %v3120_v54 = vld [vmem:[%s4153_s2 + $0x66c] ss:$16 sps:$4 sm:$0xff]   ;;  %v3115_v55 = vld [vmem:[%s4153_s2 + $0x660] ss:$16 sps:$4 sm:$0xff]  }
  0xad   : > { %2008 = vmatprep.subr.bf16.mxu0 %v3061_v56  ;;  %2180 = vmatprep.subr.bf16.mxu1 %v3064_v57  ;;  %v3118_v56 = vld [vmem:[%s4153_s2 + $0x668] ss:$16 sps:$4 sm:$0xff]   ;;  %v3123_v57 = vld [vmem:[%s4153_s2 + $0x684] ss:$16 sps:$4 sm:$0xff]  }
  0xb0   : > { %2009 = vmatpush1.bf16.msra.mxu0 %v3059_v58  ;;  %2181 = vmatpush1.bf16.msra.mxu1 %v3062_v59  ;;  %v3126_v58 = vld [vmem:[%s4153_s2 + $0x68c] ss:$16 sps:$4 sm:$0xff]   ;;  %v3121_v59 = vld [vmem:[%s4153_s2 + $0x680] ss:$16 sps:$4 sm:$0xff]  }
  0xb1   : > { %2010 = vmatprep.subr.bf16.mxu0 %v3067_v60  ;;  %2182 = vmatprep.subr.bf16.mxu1 %v3070_v61  ;;  %v3124_v60 = vld [vmem:[%s4153_s2 + $0x688] ss:$16 sps:$4 sm:$0xff]   ;;  %v3129_v61 = vld [vmem:[%s4153_s2 + $0x6a4] ss:$16 sps:$4 sm:$0xff]  }
  0xb4   : > { %2011 = vmatpush1.bf16.msra.mxu0 %v3065_v63  ;;  %2183 = vmatpush1.bf16.msra.mxu1 %v3068_v0  ;;  %v3127_v63 = vld [vmem:[%s4153_s2 + $0x6a0] ss:$16 sps:$4 sm:$0xff]   ;;  %v3130_v0 = vld [vmem:[%s4153_s2 + $0x6a8] ss:$16 sps:$4 sm:$0xff]  }
  0xb5   : > { %2012 = vmatprep.subr.bf16.mxu0 %v3073_v1  ;;  %2184 = vmatprep.subr.bf16.mxu1 %v3076_v2  ;;  %v3135_v1 = vld [vmem:[%s4153_s2 + $0x6c4] ss:$16 sps:$4 sm:$0xff]   ;;  %v3138_v2 = vld [vmem:[%s4153_s2 + $0x6cc] ss:$16 sps:$4 sm:$0xff]  }
  0xb8   : > { %2013 = vmatpush1.bf16.msra.mxu0 %v3071_v8  ;;  %2185 = vmatpush1.bf16.msra.mxu1 %v3074_v9  ;;  %v3139_v8 = vld [vmem:[%s4153_s2 + $0x6e0] ss:$16 sps:$4 sm:$0xff]   ;;  %v3142_v9 = vld [vmem:[%s4153_s2 + $0x6e8] ss:$16 sps:$4 sm:$0xff]  }
  0xb9   : > { %2014 = vmatprep.subr.bf16.mxu0 %v3079_v11  ;;  %2186 = vmatprep.subr.bf16.mxu1 %v3082_v10  ;;  %v3147_v11 = vld [vmem:[%s4153_s2 + $0x704] ss:$16 sps:$4 sm:$0xff]   ;;  %v3150_v10 = vld [vmem:[%s4153_s2 + $0x70c] ss:$16 sps:$4 sm:$0xff]  }
  0xbc   : > { %2015 = vmatpush1.bf16.msra.mxu0 %v3077_v16  ;;  %2187 = vmatpush1.bf16.msra.mxu1 %v3080_v17  ;;  %v3156_v16 = vld [vmem:[%s4153_s2 + $0x72c] ss:$16 sps:$4 sm:$0xff]   ;;  %v3151_v17 = vld [vmem:[%s4153_s2 + $0x720] ss:$16 sps:$4 sm:$0xff]  }
  0xbd   : > { %2016 = vmatprep.subr.bf16.mxu0 %v3085_v19  ;;  %2188 = vmatprep.subr.bf16.mxu1 %v3088_v20  ;;  %v3162_v19 = vld [vmem:[%s4153_s2 + $0x74c] ss:$16 sps:$4 sm:$0xff]   ;;  %v3157_v20 = vld [vmem:[%s4153_s2 + $0x740] ss:$16 sps:$4 sm:$0xff]  }
  0xc0   : > { %2017 = vmatpush1.bf16.msra.mxu0 %v3083_v24  ;;  %2189 = vmatpush1.bf16.msra.mxu1 %v3086_v25  ;;  %v3163_v24 = vld [vmem:[%s4153_s2 + $0x760] ss:$16 sps:$4 sm:$0xff]   ;;  %v3166_v25 = vld [vmem:[%s4153_s2 + $0x768] ss:$16 sps:$4 sm:$0xff]  }
  0xc1   : > { %2018 = vmatprep.subr.bf16.mxu0 %v3091_v5  ;;  %2190 = vmatprep.subr.bf16.mxu1 %v3094_v28  ;;  %v3169_v5 = vld [vmem:[%s4153_s2 + $0x780] ss:$16 sps:$4 sm:$0xff]   ;;  %v3172_v28 = vld [vmem:[%s4153_s2 + $0x788] ss:$16 sps:$4 sm:$0xff]  }
  0xc4   : > { %2019 = vmatpush1.bf16.msra.mxu0 %v3089_v33  ;;  %2191 = vmatpush1.bf16.msra.mxu1 %v3092_v34  ;;  %v3178_v33 = vld [vmem:[%s4153_s2 + $0x7a8] ss:$16 sps:$4 sm:$0xff]   ;;  %v3183_v34 = vld [vmem:[%s4153_s2 + $0x7c4] ss:$16 sps:$4 sm:$0xff]  }
  0xc5   : > { %2031 = vmatprep.subr.bf16.mxu0 %v3098_v29  ;;  %2203 = vmatprep.subr.bf16.mxu1 %v3101_v37  ;;  %v3184_v29 = vld [vmem:[%s4153_s2 + $0x7c8] ss:$16 sps:$4 sm:$0xff]   ;;  %v3189_v37 = vld [vmem:[%s4153_s2 + $0x7e4] ss:$16 sps:$4 sm:$0xff]  }
  0xc7   : > { %2021 = vmatmul.mubr.bf16.vlgmr.msra.gmra.mrb[0].mxu0 %v325_v42  ;;  %2193 = vmatmul.mubr.bf16.vlgmr.msra.gmra.mrb[0].mxu1 %v325_v42 }
  0xc8   : > { %2032 = vmatpush1.bf16.msra.mxu0 %v3096_v40  ;;  %2204 = vmatpush1.bf16.msra.mxu1 %v3099_v41  ;;  %v3190_v40 = vld [vmem:[%s4153_s2 + $0x7e8] ss:$16 sps:$4 sm:$0xff]  }
  0xc9   : > { %2033 = vmatprep.subr.bf16.mxu0 %v3105_v43  ;;  %2205 = vmatprep.subr.bf16.mxu1 %v3108_v44 }
  0xca   : > { %2063 = vmatprep.mubr.bf16.mxu0 %v361_v45  ;;  %2235 = vmatprep.mubr.bf16.mxu1 %v361_v45 }
  0xcc   : > { %2034 = vmatpush1.bf16.msra.mxu0 %v3103_v46  ;;  %2206 = vmatpush1.bf16.msra.mxu1 %v3106_v48 }
  0xcd   : > { %2035 = vmatprep.subr.bf16.mxu0 %v3111_v49  ;;  %2207 = vmatprep.subr.bf16.mxu1 %v3114_v50 }
  0xd0   : > { %2036 = vmatpush1.bf16.msra.mxu0 %v3109_v51  ;;  %2208 = vmatpush1.bf16.msra.mxu1 %v3112_v52 }
  0xd1   : > { %2037 = vmatprep.subr.bf16.mxu0 %v3117_v53  ;;  %2209 = vmatprep.subr.bf16.mxu1 %v3120_v54 }
  0xd4   : > { %2038 = vmatpush1.bf16.msra.mxu0 %v3115_v55  ;;  %2210 = vmatpush1.bf16.msra.mxu1 %v3118_v56 }
  0xd5   : > { %2039 = vmatprep.subr.bf16.mxu0 %v3123_v57  ;;  %2211 = vmatprep.subr.bf16.mxu1 %v3126_v58 }
  0xd8   : > { %2040 = vmatpush1.bf16.msra.mxu0 %v3121_v59  ;;  %2212 = vmatpush1.bf16.msra.mxu1 %v3124_v60 }
  0xd9   : > { %2041 = vmatprep.subr.bf16.mxu0 %v3129_v61  ;;  %2213 = vmatprep.subr.bf16.mxu1 %v3132_v62 }
  0xdc   : > { %2042 = vmatpush1.bf16.msra.mxu0 %v3127_v63  ;;  %2214 = vmatpush1.bf16.msra.mxu1 %v3130_v0 }
  0xdd   : > { %2043 = vmatprep.subr.bf16.mxu0 %v3135_v1  ;;  %2215 = vmatprep.subr.bf16.mxu1 %v3138_v2 }
  0xe0   : > { %2044 = vmatpush1.bf16.msra.mxu0 %v3133_v3  ;;  %2216 = vmatpush1.bf16.msra.mxu1 %v3136_v4 }
  0xe1   : > { %2045 = vmatprep.subr.bf16.mxu0 %v3141_v6  ;;  %2217 = vmatprep.subr.bf16.mxu1 %v3144_v7 }
  0xe4   : > { %2046 = vmatpush1.bf16.msra.mxu0 %v3139_v8  ;;  %2218 = vmatpush1.bf16.msra.mxu1 %v3142_v9 }
  0xe5   : > { %2047 = vmatprep.subr.bf16.mxu0 %v3147_v11  ;;  %2219 = vmatprep.subr.bf16.mxu1 %v3150_v10 }
  0xe8   : > { %2048 = vmatpush1.bf16.msra.mxu0 %v3145_v12  ;;  %2220 = vmatpush1.bf16.msra.mxu1 %v3148_v13 }
  0xe9   : > { %2049 = vmatprep.subr.bf16.mxu0 %v3153_v14  ;;  %2221 = vmatprep.subr.bf16.mxu1 %v3156_v16 }
  0xec   : > { %2050 = vmatpush1.bf16.msra.mxu0 %v3151_v17  ;;  %2222 = vmatpush1.bf16.msra.mxu1 %v3154_v47 }
  0xed   : > { %2051 = vmatprep.subr.bf16.mxu0 %v3159_v18  ;;  %2223 = vmatprep.subr.bf16.mxu1 %v3162_v19 }
  0xf0   : > { %2052 = vmatpush1.bf16.msra.mxu0 %v3157_v20  ;;  %2224 = vmatpush1.bf16.msra.mxu1 %v3160_v22 }
  0xf1   : > { %2053 = vmatprep.subr.bf16.mxu0 %v3165_v23  ;;  %2225 = vmatprep.subr.bf16.mxu1 %v3168_v15 }
  0xf4   : > { %2054 = vmatpush1.bf16.msra.mxu0 %v3163_v24  ;;  %2226 = vmatpush1.bf16.msra.mxu1 %v3166_v25 }
  0xf5   : > { %2055 = vmatprep.subr.bf16.mxu0 %v3171_v26  ;;  %2227 = vmatprep.subr.bf16.mxu1 %v3174_v27 }
  0xf8   : > { %2056 = vmatpush1.bf16.msra.mxu0 %v3169_v5  ;;  %2228 = vmatpush1.bf16.msra.mxu1 %v3172_v28 }
  0xf9   : > { %2057 = vmatprep.subr.bf16.mxu0 %v3177_v30  ;;  %2229 = vmatprep.subr.bf16.mxu1 %v3180_v31 }
  0xfc   : > { %2058 = vmatpush1.bf16.msra.mxu0 %v3175_v32  ;;  %2230 = vmatpush1.bf16.msra.mxu1 %v3178_v33 }
  0xfd   : > { %2059 = vmatprep.subr.bf16.mxu0 %v3183_v34  ;;  %2231 = vmatprep.subr.bf16.mxu1 %v3186_v35 }
 0x100   : > { %2060 = vmatpush1.bf16.msra.mxu0 %v3181_v36  ;;  %2232 = vmatpush1.bf16.msra.mxu1 %v3184_v29 }
 0x101   : > { %2061 = vmatprep.subr.bf16.mxu0 %v3189_v37  ;;  %2233 = vmatprep.subr.bf16.mxu1 %v3192_v38 }
 0x104   : > { %2062 = vmatpush1.bf16.msra.mxu0 %v3187_v39  ;;  %2234 = vmatpush1.bf16.msra.mxu1 %v3190_v40 }
 0x107   : > { %2064 = vmatmul.mubr.bf16.vlgmr.msra.gmra.mrb[0].mxu0 %v3884_v21  ;;  %2236 = vmatmul.mubr.bf16.vlgmr.msra.gmra.mrb[0].mxu1 %v3884_v21 }
 0x1da   : > { %v2065_v41 = vpop.f32.mrb[0].mxu0  ;;  %v2237_v42 = vpop.f32.mrb[0].mxu1 }
 0x1db   : > { %v2254_v43 = vmul.f32 %v2065_v41, %v2065_v41  ;;  %v2256_v44 = vmul.f32 %v2237_v42, %v2237_v42  ;;  %v2067_v45 = vpop.f32.mrb[1].mxu0  ;;  %v4103_v46 = vpop.f32.mrb[1].mxu1  ;;  %v2246_v5 = vmul.f32 0.5, %v2065_v41  ;;  %v2248_v31 = vmul.f32 0.5, %v2237_v42 }
 0x1dc   : > { %v2255_v48 = vmul.f32 %v2067_v45, %v2067_v45  ;;  %v2257_v49 = vmul.f32 %v4103_v46, %v4103_v46  ;;  %v4107_v50 = vpop.f32.mrb[2].mxu0  ;;  %v4109_v51 = vpop.f32.mrb[2].mxu1  ;;  %v2247_v35 = vmul.f32 0.5, %v2067_v45  ;;  %v2249_v38 = vmul.f32 0.5, %v4103_v46 }
 0x1dd   : > { %v2262_v52 = vmul.f32 %v2254_v43, %v2065_v41  ;;  %v2264_v53 = vmul.f32 %v2256_v44, %v2237_v42  ;;  %v2258_v21 = vmul.f32 %v4107_v50, %v4107_v50  ;;  %v4113_v54 = vpop.f32.mrb[3].mxu0  ;;  %v4115_v55 = vpop.f32.mrb[3].mxu1  ;;  %v2260_v58 = vmul.f32 %v4109_v51, %v4109_v51 }
 0x1de   : > { %v2263_v56 = vmul.f32 %v2255_v48, %v2067_v45  ;;  %v2265_v57 = vmul.f32 %v2257_v49, %v4103_v46  ;;  %v2259_v1 = vmul.f32 %v4113_v54, %v4113_v54  ;;  %v2261_v13 = vmul.f32 %v4115_v55, %v4115_v55 }
 0x1df   : > { %v2270_v59 = vmul.f32 0.044715, %v2262_v52  ;;  %v2272_v60 = vmul.f32 0.044715, %v2264_v53  ;;  %v2266_v61 = vmul.f32 %v2258_v21, %v4107_v50  ;;  %v2268_v0 = vmul.f32 %v2260_v58, %v4109_v51 }
 0x1e0   : > { %v2271_v62 = vmul.f32 0.044715, %v2263_v56  ;;  %v2273_v63 = vmul.f32 0.044715, %v2265_v57  ;;  %v2267_v9 = vmul.f32 %v2259_v1, %v4113_v54  ;;  %v2269_v19 = vmul.f32 %v2261_v13, %v4115_v55 }
 0x1e1   : > { %v2278_v2 = vadd.f32 %v2270_v59, %v2065_v41  ;;  %v2280_v3 = vadd.f32 %v2272_v60, %v2237_v42  ;;  %v2274_v4 = vmul.f32 0.044715, %v2266_v61  ;;  %v2276_v8 = vmul.f32 0.044715, %v2268_v0 }
 0x1e2   : > { %v2279_v6 = vadd.f32 %v2271_v62, %v2067_v45  ;;  %v2281_v7 = vadd.f32 %v2273_v63, %v4103_v46  ;;  %v2275_v47 = vmul.f32 0.044715, %v2267_v9  ;;  %v2277_v23 = vmul.f32 0.044715, %v2269_v19 }
 0x1e3   : > { %v2286_v11 = vmul.f32 0.7978846, %v2278_v2  ;;  %v2288_v10 = vmul.f32 0.7978846, %v2280_v3  ;;  %v2282_v12 = vadd.f32 %v2274_v4, %v4107_v50  ;;  %v2284_v17 = vadd.f32 %v2276_v8, %v4109_v51 }
 0x1e4   : > { %v2287_v14 = vmul.f32 0.7978846, %v2279_v6  ;;  %v2289_v16 = vmul.f32 0.7978846, %v2281_v7  ;;  %v2283_v22 = vadd.f32 %v2275_v47, %v4113_v54  ;;  %v2285_v24 = vadd.f32 %v2277_v23, %v4115_v55 }
 0x1e5   : > { %3195 = vtanh.f32 %v2286_v11  ;;  %v2290_v18 = vmul.f32 0.7978846, %v2282_v12  ;;  %v2292_v20 = vmul.f32 0.7978846, %v2284_v17  ;;  %v2250_v44 = vmul.f32 0.5, %v4107_v50 }
 0x1e6   : > { %3197 = vtanh.f32 %v2288_v10  ;;  %v2291_v15 = vmul.f32 0.7978846, %v2283_v22  ;;  %v2293_v25 = vmul.f32 0.7978846, %v2285_v24  ;;  %v2252_v49 = vmul.f32 0.5, %v4109_v51 }
 0x1e7   : > { %3199 = vtanh.f32 %v2287_v14  ;;  %v2251_v21 = vmul.f32 0.5, %v4113_v54  ;;  %v2253_v59 = vmul.f32 0.5, %v4115_v55 }
 0x1e8   : > { %3201 = vtanh.f32 %v2289_v16 }
 0x1e9   : > { %3203 = vtanh.f32 %v2290_v18 }
 0x1ea   : > { %3205 = vtanh.f32 %v2292_v20 }
 0x1eb   : > { %3207 = vtanh.f32 %v2291_v15 }
 0x1ec   : > { %3209 = vtanh.f32 %v2293_v25 }
 0x1ef   : > { %v3196_v26 = vpop.eup %3195 }
 0x1f0   : > { %v3198_v27 = vpop.eup %3197  ;;  %v2302_v28 = vadd.f32 1.0, %v3196_v26 }
 0x1f1   : > { %v3200_v30 = vpop.eup %3199  ;;  %v2304_v32 = vadd.f32 1.0, %v3198_v27 }
 0x1f2   : > { %v3202_v33 = vpop.eup %3201  ;;  %v2310_v34 = vmul.f32 %v2302_v28, %v2246_v5  ;;  %v2303_v36 = vadd.f32 1.0, %v3200_v30 }
 0x1f3   : > { %v3204_v29 = vpop.eup %3203  ;;  %v2312_v37 = vmul.f32 %v2304_v32, %v2248_v31  ;;  %v2305_v39 = vadd.f32 1.0, %v3202_v33 }
 0x1f4   : > { %v3206_v40 = vpop.eup %3205  ;;  %v2311_v43 = vmul.f32 %v2303_v36, %v2247_v35  ;;  %v2306_v48 = vadd.f32 1.0, %v3204_v29 }
 0x1f5   : > { %v3208_v41 = vpop.eup %3207  ;;  %v2313_v42 = vmul.f32 %v2305_v39, %v2249_v38  ;;  %v2308_v45 = vadd.f32 1.0, %v3206_v40 }
 0x1f6   : > { %v2748_v52 = vpack.c.bf16 %v2311_v43, %v2310_v34  ;;  %v2314_v53 = vmul.f32 %v2306_v48, %v2250_v44  ;;  %v2307_v46 = vadd.f32 1.0, %v3208_v41  ;;  %v3210_v56 = vpop.eup %3209 }
 0x1f7   : > { %v2749_v57 = vpack.c.bf16 %v2313_v42, %v2312_v37  ;;  %v2316_v58 = vmul.f32 %v2308_v45, %v2252_v49  ;;  %v2309_v60 = vadd.f32 1.0, %v3210_v56 }
 0x1f8   : > { %2342 = vst [vmem:[%s275_s20] sm:$0xff] %v2748_v52  ;;  %v2315_v50 = vmul.f32 %v2307_v46, %v2251_v21 }
 0x1f9   : > { %2343 = vst [vmem:[%s275_s20 + $0x8] sm:$0xff] %v2749_v57  ;;  %v2317_v62 = vmul.f32 %v2309_v60, %v2253_v59 }
 0x1fa   : > { %v2750_v61 = vpack.c.bf16 %v2315_v50, %v2314_v53 }
 0x1fb   : > { %v2751_v63 = vpack.c.bf16 %v2317_v62, %v2316_v58 }
 0x1fc   : > { %2344 = vst [vmem:[%s275_s20 + $0x10] sm:$0xff] %v2750_v61 }
 0x1fd   : > { %2345 = vst [vmem:[%s275_s20 + $0x18] sm:$0xff] %v2751_v63 }
 0x1fe PF: > { %s13_s14 = sadd.s32 1, %s3233_s14   ;;  %s4155_s12 = smov %s3229_s13 }
 0x1ff   : > { %p10_p5 = scmp.ge.s32.totalorder %s13_s14, 4   ;;  %s4156_s13 = smov %s4158_s15 }
 0x201   :  { %12 = sbr.rel (!%p10_p5) target bundleno = 2 (0x2), region = 65 }

// kernel: feature_extractor.13
= control target key start
LH: loop header
LB: loop body
LE: loop exit
PB: predicated region body
PF: predicated region fallthrough
CT: control target
= control target key end

     0   :  { %s3227_s12 = smov 0   ;;  %s3229_s13 = smov 0   ;;  %s4141_s0 = inlined_call_operand.vmem [shape: bf16[2,16,512], index: 0, kind: input, shape index: {}, may-alias: {0,1}]   ;;  %s4142_s1 = inlined_call_operand.vmem [shape: bf16[2,16,512], index: 1, kind: input, shape index: {}, may-alias: {0,1}]   ;;  %s4143_s2 = inlined_call_operand.vmem [shape: bf16[1024,512], index: 2, kind: input, shape index: {}]   ;;  %s4144_s3 = inlined_call_operand.vmem [shape: f32[2,16,512], index: 3, kind: output, shape index: {}]  }
   0x1   :  { %s3231_s14 = smov 0  }
   0x2 LB: > { %s25_s15 = sadd.s32 1, %s3201_s13  ;;  %p2447_p0 = scmp.ge.s32.totalorder %s3205_s14, 1  ;;  %s3205_s14 = sphi %s3231_s14, %s13_s14   ;;  %s3201_s13 = sphi %s3229_s13, %s4146_s13   ;;  %s3197_s12 = sphi %s3227_s12, %s4145_s12  }
   0x3   : > { %p27_p1 = scmp.ge.s32.totalorder %s25_s15, 2  ;;  %p191_p2 = scmp.lt.s32.totalorder %s3205_s14, 3 }
   0x5   : > { %s4148_s15 = smov (%p27_p1, %s25_s15), 0  ;;  %p192_p3 = pnand %p2447_p0, %p191_p2 }
   0x6   : > { %v2773_v0 = vld [vmem:[%s4143_s2 + $0x4] ss:$16 sps:$4 sm:$0xff] (!%p192_p3)   ;;  %v2775_v1 = vld [vmem:[%s4143_s2 + $0xc] ss:$16 sps:$4 sm:$0xff] (!%p192_p3)   ;;  %v2777_v2 = vld [vmem:[%s4143_s2] ss:$16 sps:$4 sm:$0xff] (!%p192_p3)  }
   0x7   : > { %195 = sbr.rel (%p192_p3) target bundleno = 508 (0x1fc), region = 32  ;;  %1902 = vmatprep.subr.bf16.mxu0 (!%p192_p3), %v2773_v0  ;;  %v2778_v3 = vld [vmem:[%s4143_s2 + $0x8] ss:$16 sps:$4 sm:$0xff] (!%p192_p3)   ;;  %2074 = vmatprep.subr.bf16.mxu1 (!%p192_p3), %v2775_v1  ;;  %v2779_v4 = vld [vmem:[%s4143_s2 + $0x24] ss:$16 sps:$4 sm:$0xff] (!%p192_p3)   ;;  %p239_p4 = scmp.lt.s32.totalorder (!%p192_p3), %s3197_s12, 1 }
   0x8   : > { %1903 = vmatpush1.bf16.msra.mxu0 (!%p192_p3), %v2777_v2  ;;  %2075 = vmatpush1.bf16.msra.mxu1 (!%p192_p3), %v2778_v3  ;;  %v2781_v5 = vld [vmem:[%s4143_s2 + $0x2c] ss:$16 sps:$4 sm:$0xff] (!%p192_p3)   ;;  %v2783_v6 = vld [vmem:[%s4143_s2 + $0x20] ss:$16 sps:$4 sm:$0xff] (!%p192_p3)   ;;  %v2784_v7 = vld [vmem:[%s4143_s2 + $0x28] ss:$16 sps:$4 sm:$0xff] (!%p192_p3)  }
   0x9   : > { %1904 = vmatprep.subr.bf16.mxu0 (!%p192_p3), %v2779_v4  ;;  %2076 = vmatprep.subr.bf16.mxu1 (!%p192_p3), %v2781_v5  ;;  %v2785_v8 = vld [vmem:[%s4143_s2 + $0x44] ss:$16 sps:$4 sm:$0xff] (!%p192_p3)   ;;  %v2787_v9 = vld [vmem:[%s4143_s2 + $0x4c] ss:$16 sps:$4 sm:$0xff] (!%p192_p3)   ;;  %v2789_v10 = vld [vmem:[%s4143_s2 + $0x40] ss:$16 sps:$4 sm:$0xff] (!%p192_p3)  }
   0xa   : > { %v2790_v11 = vld [vmem:[%s4143_s2 + $0x48] ss:$16 sps:$4 sm:$0xff] (!%p192_p3)   ;;  %v2791_v12 = vld [vmem:[%s4143_s2 + $0x64] ss:$16 sps:$4 sm:$0xff] (!%p192_p3)   ;;  %v2793_v13 = vld [vmem:[%s4143_s2 + $0x6c] ss:$16 sps:$4 sm:$0xff] (!%p192_p3)  }
   0xb   : > { %v2795_v14 = vld [vmem:[%s4143_s2 + $0x60] ss:$16 sps:$4 sm:$0xff] (!%p192_p3)   ;;  %v2796_v15 = vld [vmem:[%s4143_s2 + $0x68] ss:$16 sps:$4 sm:$0xff] (!%p192_p3)   ;;  %v2797_v16 = vld [vmem:[%s4143_s2 + $0x84] ss:$16 sps:$4 sm:$0xff] (!%p192_p3)  }
   0xc   : > { %1905 = vmatpush1.bf16.msra.mxu0 (!%p192_p3), %v2783_v6  ;;  %2077 = vmatpush1.bf16.msra.mxu1 (!%p192_p3), %v2784_v7  ;;  %v2799_v17 = vld [vmem:[%s4143_s2 + $0x8c] ss:$16 sps:$4 sm:$0xff] (!%p192_p3)   ;;  %v2801_v18 = vld [vmem:[%s4143_s2 + $0x80] ss:$16 sps:$4 sm:$0xff] (!%p192_p3)   ;;  %v2802_v19 = vld [vmem:[%s4143_s2 + $0x88] ss:$16 sps:$4 sm:$0xff] (!%p192_p3)  }
   0xd   : > { %1906 = vmatprep.subr.bf16.mxu0 (!%p192_p3), %v2785_v8  ;;  %2078 = vmatprep.subr.bf16.mxu1 (!%p192_p3), %v2787_v9  ;;  %v2803_v20 = vld [vmem:[%s4143_s2 + $0xa4] ss:$16 sps:$4 sm:$0xff] (!%p192_p3)   ;;  %v2805_v21 = vld [vmem:[%s4143_s2 + $0xac] ss:$16 sps:$4 sm:$0xff] (!%p192_p3)   ;;  %v2807_v22 = vld [vmem:[%s4143_s2 + $0xa0] ss:$16 sps:$4 sm:$0xff] (!%p192_p3)  }
   0xe   : > { %v2808_v23 = vld [vmem:[%s4143_s2 + $0xa8] ss:$16 sps:$4 sm:$0xff]   ;;  %v2809_v24 = vld [vmem:[%s4143_s2 + $0xc4] ss:$16 sps:$4 sm:$0xff]   ;;  %v2811_v25 = vld [vmem:[%s4143_s2 + $0xcc] ss:$16 sps:$4 sm:$0xff]  }
   0xf   : > { %v2813_v26 = vld [vmem:[%s4143_s2 + $0xc0] ss:$16 sps:$4 sm:$0xff]   ;;  %v2814_v27 = vld [vmem:[%s4143_s2 + $0xc8] ss:$16 sps:$4 sm:$0xff]   ;;  %v2815_v28 = vld [vmem:[%s4143_s2 + $0xe4] ss:$16 sps:$4 sm:$0xff]  }
  0x10   : > { %1907 = vmatpush1.bf16.msra.mxu0 %v2789_v10  ;;  %2079 = vmatpush1.bf16.msra.mxu1 %v2790_v11  ;;  %v2817_v29 = vld [vmem:[%s4143_s2 + $0xec] ss:$16 sps:$4 sm:$0xff]   ;;  %v2819_v30 = vld [vmem:[%s4143_s2 + $0xe0] ss:$16 sps:$4 sm:$0xff]   ;;  %v2820_v31 = vld [vmem:[%s4143_s2 + $0xe8] ss:$16 sps:$4 sm:$0xff]  }
  0x11   : > { %1908 = vmatprep.subr.bf16.mxu0 %v2791_v12  ;;  %2080 = vmatprep.subr.bf16.mxu1 %v2793_v13  ;;  %v2821_v32 = vld [vmem:[%s4143_s2 + $0x104] ss:$16 sps:$4 sm:$0xff]   ;;  %v2823_v33 = vld [vmem:[%s4143_s2 + $0x10c] ss:$16 sps:$4 sm:$0xff]   ;;  %v2825_v34 = vld [vmem:[%s4143_s2 + $0x100] ss:$16 sps:$4 sm:$0xff]  }
  0x12   : > { %v2826_v35 = vld [vmem:[%s4143_s2 + $0x108] ss:$16 sps:$4 sm:$0xff]   ;;  %v2827_v36 = vld [vmem:[%s4143_s2 + $0x124] ss:$16 sps:$4 sm:$0xff]   ;;  %v2829_v37 = vld [vmem:[%s4143_s2 + $0x12c] ss:$16 sps:$4 sm:$0xff]  }
  0x13   : > { %s4150_s12 = smov (!%p239_p4, %s3197_s12), 1  ;;  %v2831_v38 = vld [vmem:[%s4143_s2 + $0x120] ss:$16 sps:$4 sm:$0xff]   ;;  %v2832_v39 = vld [vmem:[%s4143_s2 + $0x128] ss:$16 sps:$4 sm:$0xff]  }
  0x14   : > { %1909 = vmatpush1.bf16.msra.mxu0 %v2795_v14  ;;  %2081 = vmatpush1.bf16.msra.mxu1 %v2796_v15  ;;  %v2833_v40 = vld [vmem:[%s4143_s2 + $0x144] ss:$16 sps:$4 sm:$0xff]   ;;  %v2835_v41 = vld [vmem:[%s4143_s2 + $0x14c] ss:$16 sps:$4 sm:$0xff]   ;;  %s2720_s4 = sshll.u32 %s4150_s12, 5  ;;  %s2723_s25 = sshll.u32 %s4150_s12, 6 }
  0x15   : > { %1910 = vmatprep.subr.bf16.mxu0 %v2797_v16  ;;  %2082 = vmatprep.subr.bf16.mxu1 %v2799_v17  ;;  %v2837_v42 = vld [vmem:[%s4143_s2 + $0x140] ss:$16 sps:$4 sm:$0xff]   ;;  %v2838_v43 = vld [vmem:[%s4143_s2 + $0x148] ss:$16 sps:$4 sm:$0xff]   ;;  %v2839_v44 = vld [vmem:[%s4143_s2 + $0x164] ss:$16 sps:$4 sm:$0xff]   ;;  %s3392_s17 = scalar_lea.vmem %s4141_s0, %s2720_s4  ;;  %s4116_s29 = scalar_lea.vmem %s4144_s3, %s2723_s25 }
  0x16   : > { %v2841_v45 = vld [vmem:[%s4143_s2 + $0x16c] ss:$16 sps:$4 sm:$0xff]   ;;  %v2843_v46 = vld [vmem:[%s4143_s2 + $0x160] ss:$16 sps:$4 sm:$0xff]   ;;  %v3401_v47 = vld [vmem:[%s3392_s17 + $0x4] ss:$16 sps:$4 sm:$0xff]  }
  0x17   : > { %v2844_v48 = vld [vmem:[%s4143_s2 + $0x168] ss:$16 sps:$4 sm:$0xff]   ;;  %v2845_v49 = vld [vmem:[%s4143_s2 + $0x184] ss:$16 sps:$4 sm:$0xff]   ;;  %v2847_v50 = vld [vmem:[%s4143_s2 + $0x18c] ss:$16 sps:$4 sm:$0xff]   ;;  %1934 = vmatprep.mubr.bf16.mxu0 %v3401_v47  ;;  %2106 = vmatprep.mubr.bf16.mxu1 %v3401_v47 }
  0x18   : > { %1911 = vmatpush1.bf16.msra.mxu0 %v2801_v18  ;;  %2083 = vmatpush1.bf16.msra.mxu1 %v2802_v19  ;;  %v2849_v51 = vld [vmem:[%s4143_s2 + $0x180] ss:$16 sps:$4 sm:$0xff]   ;;  %v2850_v52 = vld [vmem:[%s4143_s2 + $0x188] ss:$16 sps:$4 sm:$0xff]   ;;  %v2851_v53 = vld [vmem:[%s4143_s2 + $0x1a4] ss:$16 sps:$4 sm:$0xff]  }
  0x19   : > { %1912 = vmatprep.subr.bf16.mxu0 %v2803_v20  ;;  %2084 = vmatprep.subr.bf16.mxu1 %v2805_v21  ;;  %v2853_v54 = vld [vmem:[%s4143_s2 + $0x1ac] ss:$16 sps:$4 sm:$0xff]   ;;  %v2855_v55 = vld [vmem:[%s4143_s2 + $0x1a0] ss:$16 sps:$4 sm:$0xff]   ;;  %v2856_v56 = vld [vmem:[%s4143_s2 + $0x1a8] ss:$16 sps:$4 sm:$0xff]  }
  0x1a   : > { %v2857_v57 = vld [vmem:[%s4143_s2 + $0x1c4] ss:$16 sps:$4 sm:$0xff]   ;;  %v2859_v58 = vld [vmem:[%s4143_s2 + $0x1cc] ss:$16 sps:$4 sm:$0xff]   ;;  %v2861_v59 = vld [vmem:[%s4143_s2 + $0x1c0] ss:$16 sps:$4 sm:$0xff]  }
  0x1b   : > { %v2862_v60 = vld [vmem:[%s4143_s2 + $0x1c8] ss:$16 sps:$4 sm:$0xff]   ;;  %v2863_v61 = vld [vmem:[%s4143_s2 + $0x1e4] ss:$16 sps:$4 sm:$0xff]   ;;  %v2865_v62 = vld [vmem:[%s4143_s2 + $0x1ec] ss:$16 sps:$4 sm:$0xff]  }
  0x1c   : > { %1913 = vmatpush1.bf16.msra.mxu0 %v2807_v22  ;;  %2085 = vmatpush1.bf16.msra.mxu1 %v2808_v23  ;;  %v2867_v63 = vld [vmem:[%s4143_s2 + $0x1e0] ss:$16 sps:$4 sm:$0xff]   ;;  %v2868_v0 = vld [vmem:[%s4143_s2 + $0x1e8] ss:$16 sps:$4 sm:$0xff]   ;;  %v2873_v1 = vld [vmem:[%s4143_s2 + $0x204] ss:$16 sps:$4 sm:$0xff]  }
  0x1d   : > { %1914 = vmatprep.subr.bf16.mxu0 %v2809_v24  ;;  %2086 = vmatprep.subr.bf16.mxu1 %v2811_v25  ;;  %v2876_v2 = vld [vmem:[%s4143_s2 + $0x20c] ss:$16 sps:$4 sm:$0xff]   ;;  %v2871_v3 = vld [vmem:[%s4143_s2 + $0x200] ss:$16 sps:$4 sm:$0xff]   ;;  %v2874_v4 = vld [vmem:[%s4143_s2 + $0x208] ss:$16 sps:$4 sm:$0xff]  }
  0x1e   : > { %v3469_v5 = vld [vmem:[%s3392_s17] ss:$16 sps:$4 sm:$0xff]   ;;  %v2880_v6 = vld [vmem:[%s4143_s2 + $0x224] ss:$16 sps:$4 sm:$0xff]   ;;  %v2883_v7 = vld [vmem:[%s4143_s2 + $0x22c] ss:$16 sps:$4 sm:$0xff]  }
  0x1f   : > { %v2878_v8 = vld [vmem:[%s4143_s2 + $0x220] ss:$16 sps:$4 sm:$0xff]   ;;  %v2881_v9 = vld [vmem:[%s4143_s2 + $0x228] ss:$16 sps:$4 sm:$0xff]   ;;  %v2886_v10 = vld [vmem:[%s4143_s2 + $0x244] ss:$16 sps:$4 sm:$0xff]  }
  0x20   : > { %1915 = vmatpush1.bf16.msra.mxu0 %v2813_v26  ;;  %2087 = vmatpush1.bf16.msra.mxu1 %v2814_v27  ;;  %v2889_v11 = vld [vmem:[%s4143_s2 + $0x24c] ss:$16 sps:$4 sm:$0xff]   ;;  %v2884_v12 = vld [vmem:[%s4143_s2 + $0x240] ss:$16 sps:$4 sm:$0xff]   ;;  %v2887_v13 = vld [vmem:[%s4143_s2 + $0x248] ss:$16 sps:$4 sm:$0xff]  }
  0x21   : > { %1916 = vmatprep.subr.bf16.mxu0 %v2815_v28  ;;  %2088 = vmatprep.subr.bf16.mxu1 %v2817_v29  ;;  %v2892_v14 = vld [vmem:[%s4143_s2 + $0x264] ss:$16 sps:$4 sm:$0xff]   ;;  %v2895_v15 = vld [vmem:[%s4143_s2 + $0x26c] ss:$16 sps:$4 sm:$0xff]   ;;  %v2890_v16 = vld [vmem:[%s4143_s2 + $0x260] ss:$16 sps:$4 sm:$0xff]  }
  0x22   : > { %v2893_v17 = vld [vmem:[%s4143_s2 + $0x268] ss:$16 sps:$4 sm:$0xff]   ;;  %v2898_v18 = vld [vmem:[%s4143_s2 + $0x284] ss:$16 sps:$4 sm:$0xff]   ;;  %v2901_v19 = vld [vmem:[%s4143_s2 + $0x28c] ss:$16 sps:$4 sm:$0xff]  }
  0x23   : > { %v2896_v20 = vld [vmem:[%s4143_s2 + $0x280] ss:$16 sps:$4 sm:$0xff]   ;;  %v2899_v21 = vld [vmem:[%s4143_s2 + $0x288] ss:$16 sps:$4 sm:$0xff]   ;;  %v2904_v22 = vld [vmem:[%s4143_s2 + $0x2a4] ss:$16 sps:$4 sm:$0xff]  }
  0x24   : > { %1917 = vmatpush1.bf16.msra.mxu0 %v2819_v30  ;;  %2089 = vmatpush1.bf16.msra.mxu1 %v2820_v31  ;;  %v2907_v23 = vld [vmem:[%s4143_s2 + $0x2ac] ss:$16 sps:$4 sm:$0xff]   ;;  %v2902_v24 = vld [vmem:[%s4143_s2 + $0x2a0] ss:$16 sps:$4 sm:$0xff]   ;;  %v2905_v25 = vld [vmem:[%s4143_s2 + $0x2a8] ss:$16 sps:$4 sm:$0xff]  }
  0x25   : > { %1918 = vmatprep.subr.bf16.mxu0 %v2821_v32  ;;  %2090 = vmatprep.subr.bf16.mxu1 %v2823_v33  ;;  %v2910_v26 = vld [vmem:[%s4143_s2 + $0x2c4] ss:$16 sps:$4 sm:$0xff]   ;;  %v2913_v27 = vld [vmem:[%s4143_s2 + $0x2cc] ss:$16 sps:$4 sm:$0xff]   ;;  %v2908_v28 = vld [vmem:[%s4143_s2 + $0x2c0] ss:$16 sps:$4 sm:$0xff]  }
  0x26   : > { %v3543_v29 = vld [vmem:[%s3392_s17 + $0xc] ss:$16 sps:$4 sm:$0xff]   ;;  %v2911_v30 = vld [vmem:[%s4143_s2 + $0x2c8] ss:$16 sps:$4 sm:$0xff]   ;;  %v2916_v31 = vld [vmem:[%s4143_s2 + $0x2e4] ss:$16 sps:$4 sm:$0xff]  }
  0x27   : > { %v2919_v32 = vld [vmem:[%s4143_s2 + $0x2ec] ss:$16 sps:$4 sm:$0xff]   ;;  %v2914_v33 = vld [vmem:[%s4143_s2 + $0x2e0] ss:$16 sps:$4 sm:$0xff]   ;;  %s2722_s18 = sadd.s32 16, %s2720_s4 }
  0x28   : > { %1919 = vmatpush1.bf16.msra.mxu0 %v2825_v34  ;;  %2091 = vmatpush1.bf16.msra.mxu1 %v2826_v35  ;;  %v2917_v34 = vld [vmem:[%s4143_s2 + $0x2e8] ss:$16 sps:$4 sm:$0xff]   ;;  %v2922_v35 = vld [vmem:[%s4143_s2 + $0x304] ss:$16 sps:$4 sm:$0xff]   ;;  %s3680_s26 = scalar_lea.vmem %s4142_s1, %s2722_s18  ;;  %vm313_vm0 = vsmask.f32 7424 }
  0x29   : > { %1920 = vmatprep.subr.bf16.mxu0 %v2827_v36  ;;  %2092 = vmatprep.subr.bf16.mxu1 %v2829_v37  ;;  %v2925_v36 = vld [vmem:[%s4143_s2 + $0x30c] ss:$16 sps:$4 sm:$0xff]   ;;  %v2920_v37 = vld [vmem:[%s4143_s2 + $0x300] ss:$16 sps:$4 sm:$0xff]  }
  0x2c   : > { %1921 = vmatpush1.bf16.msra.mxu0 %v2831_v38  ;;  %2093 = vmatpush1.bf16.msra.mxu1 %v2832_v39  ;;  %v2923_v38 = vld [vmem:[%s4143_s2 + $0x308] ss:$16 sps:$4 sm:$0xff]   ;;  %v2928_v39 = vld [vmem:[%s4143_s2 + $0x324] ss:$16 sps:$4 sm:$0xff]  }
  0x2d   : > { %1922 = vmatprep.subr.bf16.mxu0 %v2833_v40  ;;  %2094 = vmatprep.subr.bf16.mxu1 %v2835_v41  ;;  %v2931_v40 = vld [vmem:[%s4143_s2 + $0x32c] ss:$16 sps:$4 sm:$0xff]   ;;  %v2926_v41 = vld [vmem:[%s4143_s2 + $0x320] ss:$16 sps:$4 sm:$0xff]  }
  0x30   : > { %1923 = vmatpush1.bf16.msra.mxu0 %v2837_v42  ;;  %2095 = vmatpush1.bf16.msra.mxu1 %v2838_v43  ;;  %v2929_v42 = vld [vmem:[%s4143_s2 + $0x328] ss:$16 sps:$4 sm:$0xff]   ;;  %v2934_v43 = vld [vmem:[%s4143_s2 + $0x344] ss:$16 sps:$4 sm:$0xff]  }
  0x31   : > { %1924 = vmatprep.subr.bf16.mxu0 %v2839_v44  ;;  %2096 = vmatprep.subr.bf16.mxu1 %v2841_v45  ;;  %v2937_v44 = vld [vmem:[%s4143_s2 + $0x34c] ss:$16 sps:$4 sm:$0xff]   ;;  %v2932_v45 = vld [vmem:[%s4143_s2 + $0x340] ss:$16 sps:$4 sm:$0xff]  }
  0x34   : > { %1925 = vmatpush1.bf16.msra.mxu0 %v2843_v46  ;;  %2097 = vmatpush1.bf16.msra.mxu1 %v2844_v48  ;;  %v2935_v46 = vld [vmem:[%s4143_s2 + $0x348] ss:$16 sps:$4 sm:$0xff]   ;;  %v2940_v48 = vld [vmem:[%s4143_s2 + $0x364] ss:$16 sps:$4 sm:$0xff]  }
  0x35   : > { %1926 = vmatprep.subr.bf16.mxu0 %v2845_v49  ;;  %2098 = vmatprep.subr.bf16.mxu1 %v2847_v50  ;;  %v2943_v49 = vld [vmem:[%s4143_s2 + $0x36c] ss:$16 sps:$4 sm:$0xff]   ;;  %v2938_v50 = vld [vmem:[%s4143_s2 + $0x360] ss:$16 sps:$4 sm:$0xff]  }
  0x38   : > { %1927 = vmatpush1.bf16.msra.mxu0 %v2849_v51  ;;  %2099 = vmatpush1.bf16.msra.mxu1 %v2850_v52  ;;  %v2941_v51 = vld [vmem:[%s4143_s2 + $0x368] ss:$16 sps:$4 sm:$0xff]   ;;  %v2946_v52 = vld [vmem:[%s4143_s2 + $0x384] ss:$16 sps:$4 sm:$0xff]  }
  0x39   : > { %1928 = vmatprep.subr.bf16.mxu0 %v2851_v53  ;;  %2100 = vmatprep.subr.bf16.mxu1 %v2853_v54  ;;  %v2949_v53 = vld [vmem:[%s4143_s2 + $0x38c] ss:$16 sps:$4 sm:$0xff]   ;;  %v2944_v54 = vld [vmem:[%s4143_s2 + $0x380] ss:$16 sps:$4 sm:$0xff]  }
  0x3c   : > { %1929 = vmatpush1.bf16.msra.mxu0 %v2855_v55  ;;  %2101 = vmatpush1.bf16.msra.mxu1 %v2856_v56  ;;  %v2947_v55 = vld [vmem:[%s4143_s2 + $0x388] ss:$16 sps:$4 sm:$0xff]   ;;  %v2952_v56 = vld [vmem:[%s4143_s2 + $0x3a4] ss:$16 sps:$4 sm:$0xff]  }
  0x3d   : > { %1930 = vmatprep.subr.bf16.mxu0 %v2857_v57  ;;  %2102 = vmatprep.subr.bf16.mxu1 %v2859_v58  ;;  %v2955_v57 = vld [vmem:[%s4143_s2 + $0x3ac] ss:$16 sps:$4 sm:$0xff]   ;;  %v2950_v58 = vld [vmem:[%s4143_s2 + $0x3a0] ss:$16 sps:$4 sm:$0xff]  }
  0x40   : > { %1931 = vmatpush1.bf16.msra.mxu0 %v2861_v59  ;;  %2103 = vmatpush1.bf16.msra.mxu1 %v2862_v60  ;;  %v2953_v59 = vld [vmem:[%s4143_s2 + $0x3a8] ss:$16 sps:$4 sm:$0xff]   ;;  %v2958_v60 = vld [vmem:[%s4143_s2 + $0x3c4] ss:$16 sps:$4 sm:$0xff]  }
  0x41   : > { %1932 = vmatprep.subr.bf16.mxu0 %v2863_v61  ;;  %2104 = vmatprep.subr.bf16.mxu1 %v2865_v62  ;;  %v2961_v61 = vld [vmem:[%s4143_s2 + $0x3cc] ss:$16 sps:$4 sm:$0xff]   ;;  %v2956_v62 = vld [vmem:[%s4143_s2 + $0x3c0] ss:$16 sps:$4 sm:$0xff]  }
  0x44   : > { %1933 = vmatpush1.bf16.msra.mxu0 %v2867_v63  ;;  %2105 = vmatpush1.bf16.msra.mxu1 %v2868_v0  ;;  %v2959_v63 = vld [vmem:[%s4143_s2 + $0x3c8] ss:$16 sps:$4 sm:$0xff]   ;;  %v2964_v0 = vld [vmem:[%s4143_s2 + $0x3e4] ss:$16 sps:$4 sm:$0xff]  }
  0x45   : > { %1945 = vmatprep.subr.bf16.mxu0 %v2873_v1  ;;  %2117 = vmatprep.subr.bf16.mxu1 %v2876_v2  ;;  %v2967_v1 = vld [vmem:[%s4143_s2 + $0x3ec] ss:$16 sps:$4 sm:$0xff]   ;;  %v2962_v2 = vld [vmem:[%s4143_s2 + $0x3e0] ss:$16 sps:$4 sm:$0xff]  }
  0x47   : > { %1935 = vmatmul.mubr.bf16.vlgmr.msra.gmra.mrb[0].mxu0 %v3469_v5  ;;  %2107 = vmatmul.mubr.bf16.vlgmr.msra.gmra.mrb[0].mxu1 %v3469_v5 }
  0x48   : > { %1946 = vmatpush1.bf16.msra.mxu0 %v2871_v3  ;;  %2118 = vmatpush1.bf16.msra.mxu1 %v2874_v4  ;;  %v2965_v3 = vld [vmem:[%s4143_s2 + $0x3e8] ss:$16 sps:$4 sm:$0xff]   ;;  %v2972_v4 = vld [vmem:[%s4143_s2 + $0x404] ss:$16 sps:$4 sm:$0xff]  }
  0x49   : > { %1947 = vmatprep.subr.bf16.mxu0 %v2880_v6  ;;  %2119 = vmatprep.subr.bf16.mxu1 %v2883_v7  ;;  %v329_v6 = vshll.u32 %v3401_v47, 16  ;;  %v2975_v7 = vld [vmem:[%s4143_s2 + $0x40c] ss:$16 sps:$4 sm:$0xff]  }
  0x4a   : > { %1977 = vmatprep.mubr.bf16.mxu0 %v3543_v29  ;;  %2149 = vmatprep.mubr.bf16.mxu1 %v3543_v29 }
  0x4c   : > { %1948 = vmatpush1.bf16.msra.mxu0 %v2878_v8  ;;  %2120 = vmatpush1.bf16.msra.mxu1 %v2881_v9  ;;  %v317_v8 = vshll.u32 %v3469_v5, 16  ;;  %v2970_v9 = vld [vmem:[%s4143_s2 + $0x400] ss:$16 sps:$4 sm:$0xff]  }
  0x4d   : > { %1949 = vmatprep.subr.bf16.mxu0 %v2886_v10  ;;  %2121 = vmatprep.subr.bf16.mxu1 %v2889_v11  ;;  %v2973_v10 = vld [vmem:[%s4143_s2 + $0x408] ss:$16 sps:$4 sm:$0xff]  }
  0x4e   : > { %v3675_v11 = vld [vmem:[%s3392_s17 + $0x8] ss:$16 sps:$4 sm:$0xff]  }
  0x50   : > { %1950 = vmatpush1.bf16.msra.mxu0 %v2884_v12  ;;  %2122 = vmatpush1.bf16.msra.mxu1 %v2887_v13  ;;  %v2979_v12 = vld [vmem:[%s4143_s2 + $0x424] ss:$16 sps:$4 sm:$0xff]   ;;  %v327_v13 = vshrl.u32 %v3401_v47, 16 }
  0x51   : > { %1951 = vmatprep.subr.bf16.mxu0 %v2892_v14  ;;  %2123 = vmatprep.subr.bf16.mxu1 %v2895_v15  ;;  %v331_v14 = vrot.slane %v329_v6, 1  ;;  %v2982_v15 = vld [vmem:[%s4143_s2 + $0x42c] ss:$16 sps:$4 sm:$0xff]   ;;  %v353_v6 = vshll.u32 %v3543_v29, 16 }
  0x54   : > { %1952 = vmatpush1.bf16.msra.mxu0 %v2890_v16  ;;  %2124 = vmatpush1.bf16.msra.mxu1 %v2893_v17  ;;  %v315_v16 = vshrl.u32 %v3469_v5, 16  ;;  %v319_v17 = vrot.slane %v317_v8, 1  ;;  %v2985_v5 = vld [vmem:[%s4143_s2 + $0x444] ss:$16 sps:$4 sm:$0xff]   ;;  %v3037_v8 = vld [vmem:[%s4143_s2 + $0x560] ss:$16 sps:$4 sm:$0xff]  }
  0x55   : > { %1953 = vmatprep.subr.bf16.mxu0 %v2898_v18  ;;  %2125 = vmatprep.subr.bf16.mxu1 %v2901_v19  ;;  %v281_v18 = vld [vmem:[%s3680_s26] sm:$0xff] }
  0x56   : > { %v2977_v19 = vld [vmem:[%s4143_s2 + $0x420] ss:$16 sps:$4 sm:$0xff]   ;;  %v2459_v47 = vcombine.high %v281_v18, %v281_v18 }
  0x58   : > { %1954 = vmatpush1.bf16.msra.mxu0 %v2896_v20  ;;  %2126 = vmatpush1.bf16.msra.mxu1 %v2899_v21  ;;  %v2458_v20 = vcombine.low %v281_v18, %v281_v18  ;;  %v2980_v21 = vld [vmem:[%s4143_s2 + $0x428] ss:$16 sps:$4 sm:$0xff]  }
  0x59   : > { %1955 = vmatprep.subr.bf16.mxu0 %v2904_v22  ;;  %2127 = vmatprep.subr.bf16.mxu1 %v2907_v23  ;;  %v2988_v22 = vld [vmem:[%s4143_s2 + $0x44c] ss:$16 sps:$4 sm:$0xff]   ;;  %v332_v23 = vor.u32 %v331_v14, %v327_v13  ;;  %v351_v13 = vshrl.u32 %v3543_v29, 16  ;;  %v355_v14 = vrot.slane %v353_v6, 1  ;;  %v3051_v29 = vld [vmem:[%s4143_s2 + $0x5a4] ss:$16 sps:$4 sm:$0xff]  }
  0x5a   : > { %v3116_v6 = vld [vmem:[%s4143_s2 + $0x6ec] ss:$16 sps:$4 sm:$0xff]  }
  0x5c   : > { %1956 = vmatpush1.bf16.msra.mxu0 %v2902_v24  ;;  %2128 = vmatpush1.bf16.msra.mxu1 %v2905_v25  ;;  %v334_v24 = vshll.u32 %v2459_v47, 16  ;;  %v320_v25 = vor.u32 %v319_v17, %v315_v16  ;;  %v282_v17 = vld [vmem:[%s3680_s26 + $0x8] sm:$0xff]  ;;  %v3043_v47 = vld [vmem:[%s4143_s2 + $0x580] ss:$16 sps:$4 sm:$0xff]  }
  0x5d   : > { %1957 = vmatprep.subr.bf16.mxu0 %v2910_v26  ;;  %2129 = vmatprep.subr.bf16.mxu1 %v2913_v27  ;;  %v322_v26 = vshll.u32 %v2458_v20, 16  ;;  %v2461_v18 = vcombine.high %v282_v17, %v282_v17  ;;  %v3046_v20 = vld [vmem:[%s4143_s2 + $0x588] ss:$16 sps:$4 sm:$0xff]  }
  0x5e   : > { %v336_v27 = vrot.slane %v334_v24, 1 }
  0x60   : > { %1958 = vmatpush1.bf16.msra.mxu0 %v2908_v28  ;;  %2130 = vmatpush1.bf16.msra.mxu1 %v2911_v30  ;;  %v324_v28 = vrot.slane %v322_v26, 1  ;;  %v2983_v30 = vld [vmem:[%s4143_s2 + $0x440] ss:$16 sps:$4 sm:$0xff]  }
  0x61   : > { %1959 = vmatprep.subr.bf16.mxu0 %v2916_v31  ;;  %2131 = vmatprep.subr.bf16.mxu1 %v2919_v32  ;;  %v2986_v31 = vld [vmem:[%s4143_s2 + $0x448] ss:$16 sps:$4 sm:$0xff]   ;;  %v2991_v32 = vld [vmem:[%s4143_s2 + $0x464] ss:$16 sps:$4 sm:$0xff]   ;;  %v3049_v26 = vld [vmem:[%s4143_s2 + $0x5a0] ss:$16 sps:$4 sm:$0xff]  }
  0x64   : > { %1960 = vmatpush1.bf16.msra.mxu0 %v2914_v33  ;;  %2132 = vmatpush1.bf16.msra.mxu1 %v2917_v34  ;;  %v2994_v33 = vld [vmem:[%s4143_s2 + $0x46c] ss:$16 sps:$4 sm:$0xff]   ;;  %v337_v34 = vsel %vm313_vm0, %v332_v23, %v336_v27  ;;  %v3052_v27 = vld [vmem:[%s4143_s2 + $0x5a8] ss:$16 sps:$4 sm:$0xff]  }
  0x65   : > { %1961 = vmatprep.subr.bf16.mxu0 %v2922_v35  ;;  %2133 = vmatprep.subr.bf16.mxu1 %v2925_v36  ;;  %v3719_v35 = vsel %vm313_vm0, %v320_v25, %v324_v28  ;;  %v2989_v36 = vld [vmem:[%s4143_s2 + $0x460] ss:$16 sps:$4 sm:$0xff]   ;;  %v3057_v28 = vld [vmem:[%s4143_s2 + $0x5c4] ss:$16 sps:$4 sm:$0xff]  }
  0x68   : > { %1962 = vmatpush1.bf16.msra.mxu0 %v2920_v37  ;;  %2134 = vmatpush1.bf16.msra.mxu1 %v2923_v38  ;;  %v2992_v37 = vld [vmem:[%s4143_s2 + $0x468] ss:$16 sps:$4 sm:$0xff]   ;;  %v2997_v38 = vld [vmem:[%s4143_s2 + $0x484] ss:$16 sps:$4 sm:$0xff]  }
  0x69   : > { %1963 = vmatprep.subr.bf16.mxu0 %v2928_v39  ;;  %2135 = vmatprep.subr.bf16.mxu1 %v2931_v40  ;;  %v3000_v39 = vld [vmem:[%s4143_s2 + $0x48c] ss:$16 sps:$4 sm:$0xff]   ;;  %v2995_v40 = vld [vmem:[%s4143_s2 + $0x480] ss:$16 sps:$4 sm:$0xff]  }
  0x6c   : > { %1964 = vmatpush1.bf16.msra.mxu0 %v2926_v41  ;;  %2136 = vmatpush1.bf16.msra.mxu1 %v2929_v42  ;;  %v2998_v41 = vld [vmem:[%s4143_s2 + $0x488] ss:$16 sps:$4 sm:$0xff]   ;;  %v3003_v42 = vld [vmem:[%s4143_s2 + $0x4a4] ss:$16 sps:$4 sm:$0xff]  }
  0x6d   : > { %1965 = vmatprep.subr.bf16.mxu0 %v2934_v43  ;;  %2137 = vmatprep.subr.bf16.mxu1 %v2937_v44  ;;  %v3006_v43 = vld [vmem:[%s4143_s2 + $0x4ac] ss:$16 sps:$4 sm:$0xff]   ;;  %v3001_v44 = vld [vmem:[%s4143_s2 + $0x4a0] ss:$16 sps:$4 sm:$0xff]  }
  0x70   : > { %1966 = vmatpush1.bf16.msra.mxu0 %v2932_v45  ;;  %2138 = vmatpush1.bf16.msra.mxu1 %v2935_v46  ;;  %v3004_v45 = vld [vmem:[%s4143_s2 + $0x4a8] ss:$16 sps:$4 sm:$0xff]   ;;  %v3009_v46 = vld [vmem:[%s4143_s2 + $0x4c4] ss:$16 sps:$4 sm:$0xff]  }
  0x71   : > { %1967 = vmatprep.subr.bf16.mxu0 %v2940_v48  ;;  %2139 = vmatprep.subr.bf16.mxu1 %v2943_v49  ;;  %v3012_v48 = vld [vmem:[%s4143_s2 + $0x4cc] ss:$16 sps:$4 sm:$0xff]   ;;  %v3007_v49 = vld [vmem:[%s4143_s2 + $0x4c0] ss:$16 sps:$4 sm:$0xff]  }
  0x74   : > { %1968 = vmatpush1.bf16.msra.mxu0 %v2938_v50  ;;  %2140 = vmatpush1.bf16.msra.mxu1 %v2941_v51  ;;  %v3010_v50 = vld [vmem:[%s4143_s2 + $0x4c8] ss:$16 sps:$4 sm:$0xff]   ;;  %v3015_v51 = vld [vmem:[%s4143_s2 + $0x4e4] ss:$16 sps:$4 sm:$0xff]  }
  0x75   : > { %1969 = vmatprep.subr.bf16.mxu0 %v2946_v52  ;;  %2141 = vmatprep.subr.bf16.mxu1 %v2949_v53  ;;  %v3018_v52 = vld [vmem:[%s4143_s2 + $0x4ec] ss:$16 sps:$4 sm:$0xff]   ;;  %v3013_v53 = vld [vmem:[%s4143_s2 + $0x4e0] ss:$16 sps:$4 sm:$0xff]  }
  0x78   : > { %1970 = vmatpush1.bf16.msra.mxu0 %v2944_v54  ;;  %2142 = vmatpush1.bf16.msra.mxu1 %v2947_v55  ;;  %v3016_v54 = vld [vmem:[%s4143_s2 + $0x4e8] ss:$16 sps:$4 sm:$0xff]   ;;  %v3021_v55 = vld [vmem:[%s4143_s2 + $0x504] ss:$16 sps:$4 sm:$0xff]  }
  0x79   : > { %1971 = vmatprep.subr.bf16.mxu0 %v2952_v56  ;;  %2143 = vmatprep.subr.bf16.mxu1 %v2955_v57  ;;  %v3024_v56 = vld [vmem:[%s4143_s2 + $0x50c] ss:$16 sps:$4 sm:$0xff]   ;;  %v3019_v57 = vld [vmem:[%s4143_s2 + $0x500] ss:$16 sps:$4 sm:$0xff]  }
  0x7c   : > { %1972 = vmatpush1.bf16.msra.mxu0 %v2950_v58  ;;  %2144 = vmatpush1.bf16.msra.mxu1 %v2953_v59  ;;  %v3022_v58 = vld [vmem:[%s4143_s2 + $0x508] ss:$16 sps:$4 sm:$0xff]   ;;  %v3027_v59 = vld [vmem:[%s4143_s2 + $0x524] ss:$16 sps:$4 sm:$0xff]  }
  0x7d   : > { %1973 = vmatprep.subr.bf16.mxu0 %v2958_v60  ;;  %2145 = vmatprep.subr.bf16.mxu1 %v2961_v61  ;;  %v3030_v60 = vld [vmem:[%s4143_s2 + $0x52c] ss:$16 sps:$4 sm:$0xff]   ;;  %v3025_v61 = vld [vmem:[%s4143_s2 + $0x520] ss:$16 sps:$4 sm:$0xff]  }
  0x80   : > { %1974 = vmatpush1.bf16.msra.mxu0 %v2956_v62  ;;  %2146 = vmatpush1.bf16.msra.mxu1 %v2959_v63  ;;  %v3028_v62 = vld [vmem:[%s4143_s2 + $0x528] ss:$16 sps:$4 sm:$0xff]   ;;  %v3033_v63 = vld [vmem:[%s4143_s2 + $0x544] ss:$16 sps:$4 sm:$0xff]  }
  0x81   : > { %1975 = vmatprep.subr.bf16.mxu0 %v2964_v0  ;;  %2147 = vmatprep.subr.bf16.mxu1 %v2967_v1  ;;  %v3036_v0 = vld [vmem:[%s4143_s2 + $0x54c] ss:$16 sps:$4 sm:$0xff]   ;;  %v3031_v1 = vld [vmem:[%s4143_s2 + $0x540] ss:$16 sps:$4 sm:$0xff]  }
  0x84   : > { %1976 = vmatpush1.bf16.msra.mxu0 %v2962_v2  ;;  %2148 = vmatpush1.bf16.msra.mxu1 %v2965_v3  ;;  %v3034_v2 = vld [vmem:[%s4143_s2 + $0x548] ss:$16 sps:$4 sm:$0xff]   ;;  %v3039_v3 = vld [vmem:[%s4143_s2 + $0x564] ss:$16 sps:$4 sm:$0xff]  }
  0x85   : > { %1988 = vmatprep.subr.bf16.mxu0 %v2972_v4  ;;  %2160 = vmatprep.subr.bf16.mxu1 %v2975_v7  ;;  %v3042_v4 = vld [vmem:[%s4143_s2 + $0x56c] ss:$16 sps:$4 sm:$0xff]   ;;  %v341_v7 = vshll.u32 %v3675_v11, 16 }
  0x87   : > { %1978 = vmatmul.mubr.bf16.vlgmr.msra.gmra.mrb[0].mxu0 %v3675_v11  ;;  %2150 = vmatmul.mubr.bf16.vlgmr.msra.gmra.mrb[0].mxu1 %v3675_v11  ;;  %v343_v16 = vrot.slane %v341_v7, 1  ;;  %v3111_v7 = vld [vmem:[%s4143_s2 + $0x6e0] ss:$16 sps:$4 sm:$0xff]  }
  0x88   : > { %1989 = vmatpush1.bf16.msra.mxu0 %v2970_v9  ;;  %2161 = vmatpush1.bf16.msra.mxu1 %v2973_v10  ;;  %v3040_v9 = vld [vmem:[%s4143_s2 + $0x568] ss:$16 sps:$4 sm:$0xff]   ;;  %v3045_v10 = vld [vmem:[%s4143_s2 + $0x584] ss:$16 sps:$4 sm:$0xff]  }
  0x89   : > { %1990 = vmatprep.subr.bf16.mxu0 %v2979_v12  ;;  %2162 = vmatprep.subr.bf16.mxu1 %v2982_v15  ;;  %v3048_v12 = vld [vmem:[%s4143_s2 + $0x58c] ss:$16 sps:$4 sm:$0xff]   ;;  %v339_v15 = vshrl.u32 %v3675_v11, 16 }
  0x8a   : > { %2020 = vmatprep.mubr.bf16.mxu0 %v337_v34  ;;  %2192 = vmatprep.mubr.bf16.mxu1 %v337_v34  ;;  %v3054_v11 = vld [vmem:[%s4143_s2 + $0x5ac] ss:$16 sps:$4 sm:$0xff]   ;;  %v3058_v34 = vld [vmem:[%s4143_s2 + $0x5c8] ss:$16 sps:$4 sm:$0xff]  }
  0x8c   : > { %1991 = vmatpush1.bf16.msra.mxu0 %v2977_v19  ;;  %2163 = vmatpush1.bf16.msra.mxu1 %v2980_v21  ;;  %v2460_v19 = vcombine.low %v282_v17, %v282_v17  ;;  %v356_v21 = vor.u32 %v355_v14, %v351_v13  ;;  %v3120_v13 = vld [vmem:[%s4143_s2 + $0x708] ss:$16 sps:$4 sm:$0xff]   ;;  %v3125_v14 = vld [vmem:[%s4143_s2 + $0x724] ss:$16 sps:$4 sm:$0xff]  }
  0x8d   : > { %1992 = vmatprep.subr.bf16.mxu0 %v2985_v5  ;;  %2164 = vmatprep.subr.bf16.mxu1 %v2988_v22  ;;  %v358_v5 = vshll.u32 %v2461_v18, 16  ;;  %v344_v22 = vor.u32 %v343_v16, %v339_v15  ;;  %v3128_v15 = vld [vmem:[%s4143_s2 + $0x72c] ss:$16 sps:$4 sm:$0xff]   ;;  %v3123_v16 = vld [vmem:[%s4143_s2 + $0x720] ss:$16 sps:$4 sm:$0xff]  }
  0x8e   : > { %v346_v23 = vshll.u32 %v2460_v19, 16  ;;  %v3126_v17 = vld [vmem:[%s4143_s2 + $0x728] ss:$16 sps:$4 sm:$0xff]   ;;  %v3131_v18 = vld [vmem:[%s4143_s2 + $0x744] ss:$16 sps:$4 sm:$0xff]  }
  0x8f   : > { %v360_v24 = vrot.slane %v358_v5, 1  ;;  %v3134_v19 = vld [vmem:[%s4143_s2 + $0x74c] ss:$16 sps:$4 sm:$0xff]   ;;  %v3138_v5 = vld [vmem:[%s4143_s2 + $0x768] ss:$16 sps:$4 sm:$0xff]  }
  0x90   : > { %1993 = vmatpush1.bf16.msra.mxu0 %v2983_v30  ;;  %2165 = vmatpush1.bf16.msra.mxu1 %v2986_v31  ;;  %v348_v25 = vrot.slane %v346_v23, 1  ;;  %v3060_v30 = vld [vmem:[%s4143_s2 + $0x5cc] ss:$16 sps:$4 sm:$0xff]  }
  0x91   : > { %1994 = vmatprep.subr.bf16.mxu0 %v2991_v32  ;;  %2166 = vmatprep.subr.bf16.mxu1 %v2994_v33  ;;  %v361_v31 = vsel %vm313_vm0, %v356_v21, %v360_v24  ;;  %v3055_v33 = vld [vmem:[%s4143_s2 + $0x5c0] ss:$16 sps:$4 sm:$0xff]   ;;  %v3146_v23 = vld [vmem:[%s4143_s2 + $0x78c] ss:$16 sps:$4 sm:$0xff]  }
  0x92   : > { %v3860_v32 = vsel %vm313_vm0, %v344_v22, %v348_v25  ;;  %v3135_v21 = vld [vmem:[%s4143_s2 + $0x760] ss:$16 sps:$4 sm:$0xff]   ;;  %v3143_v22 = vld [vmem:[%s4143_s2 + $0x784] ss:$16 sps:$4 sm:$0xff]   ;;  %v3144_v25 = vld [vmem:[%s4143_s2 + $0x788] ss:$16 sps:$4 sm:$0xff]  }
  0x93   : > { %v3141_v24 = vld [vmem:[%s4143_s2 + $0x780] ss:$16 sps:$4 sm:$0xff]  }
  0x94   : > { %1995 = vmatpush1.bf16.msra.mxu0 %v2989_v36  ;;  %2167 = vmatpush1.bf16.msra.mxu1 %v2992_v37  ;;  %v3063_v36 = vld [vmem:[%s4143_s2 + $0x5e4] ss:$16 sps:$4 sm:$0xff]   ;;  %v3066_v37 = vld [vmem:[%s4143_s2 + $0x5ec] ss:$16 sps:$4 sm:$0xff]  }
  0x95   : > { %1996 = vmatprep.subr.bf16.mxu0 %v2997_v38  ;;  %2168 = vmatprep.subr.bf16.mxu1 %v3000_v39  ;;  %v3061_v38 = vld [vmem:[%s4143_s2 + $0x5e0] ss:$16 sps:$4 sm:$0xff]   ;;  %v3064_v39 = vld [vmem:[%s4143_s2 + $0x5e8] ss:$16 sps:$4 sm:$0xff]  }
  0x98   : > { %1997 = vmatpush1.bf16.msra.mxu0 %v2995_v40  ;;  %2169 = vmatpush1.bf16.msra.mxu1 %v2998_v41  ;;  %v3070_v40 = vld [vmem:[%s4143_s2 + $0x604] ss:$16 sps:$4 sm:$0xff]   ;;  %v3073_v41 = vld [vmem:[%s4143_s2 + $0x60c] ss:$16 sps:$4 sm:$0xff]  }
  0x99   : > { %1998 = vmatprep.subr.bf16.mxu0 %v3003_v42  ;;  %2170 = vmatprep.subr.bf16.mxu1 %v3006_v43  ;;  %v3068_v42 = vld [vmem:[%s4143_s2 + $0x600] ss:$16 sps:$4 sm:$0xff]   ;;  %v3071_v43 = vld [vmem:[%s4143_s2 + $0x608] ss:$16 sps:$4 sm:$0xff]  }
  0x9c   : > { %1999 = vmatpush1.bf16.msra.mxu0 %v3001_v44  ;;  %2171 = vmatpush1.bf16.msra.mxu1 %v3004_v45  ;;  %v3077_v44 = vld [vmem:[%s4143_s2 + $0x624] ss:$16 sps:$4 sm:$0xff]   ;;  %v3080_v45 = vld [vmem:[%s4143_s2 + $0x62c] ss:$16 sps:$4 sm:$0xff]  }
  0x9d   : > { %2000 = vmatprep.subr.bf16.mxu0 %v3009_v46  ;;  %2172 = vmatprep.subr.bf16.mxu1 %v3012_v48  ;;  %v3075_v46 = vld [vmem:[%s4143_s2 + $0x620] ss:$16 sps:$4 sm:$0xff]   ;;  %v3078_v48 = vld [vmem:[%s4143_s2 + $0x628] ss:$16 sps:$4 sm:$0xff]  }
  0xa0   : > { %2001 = vmatpush1.bf16.msra.mxu0 %v3007_v49  ;;  %2173 = vmatpush1.bf16.msra.mxu1 %v3010_v50  ;;  %v3083_v49 = vld [vmem:[%s4143_s2 + $0x644] ss:$16 sps:$4 sm:$0xff]   ;;  %v3081_v50 = vld [vmem:[%s4143_s2 + $0x640] ss:$16 sps:$4 sm:$0xff]  }
  0xa1   : > { %2002 = vmatprep.subr.bf16.mxu0 %v3015_v51  ;;  %2174 = vmatprep.subr.bf16.mxu1 %v3018_v52  ;;  %v3084_v51 = vld [vmem:[%s4143_s2 + $0x648] ss:$16 sps:$4 sm:$0xff]   ;;  %v3089_v52 = vld [vmem:[%s4143_s2 + $0x664] ss:$16 sps:$4 sm:$0xff]  }
  0xa4   : > { %2003 = vmatpush1.bf16.msra.mxu0 %v3013_v53  ;;  %2175 = vmatpush1.bf16.msra.mxu1 %v3016_v54  ;;  %v3092_v53 = vld [vmem:[%s4143_s2 + $0x66c] ss:$16 sps:$4 sm:$0xff]   ;;  %v3087_v54 = vld [vmem:[%s4143_s2 + $0x660] ss:$16 sps:$4 sm:$0xff]  }
  0xa5   : > { %2004 = vmatprep.subr.bf16.mxu0 %v3021_v55  ;;  %2176 = vmatprep.subr.bf16.mxu1 %v3024_v56  ;;  %v3090_v55 = vld [vmem:[%s4143_s2 + $0x668] ss:$16 sps:$4 sm:$0xff]   ;;  %v3095_v56 = vld [vmem:[%s4143_s2 + $0x684] ss:$16 sps:$4 sm:$0xff]  }
  0xa8   : > { %2005 = vmatpush1.bf16.msra.mxu0 %v3019_v57  ;;  %2177 = vmatpush1.bf16.msra.mxu1 %v3022_v58  ;;  %v3098_v57 = vld [vmem:[%s4143_s2 + $0x68c] ss:$16 sps:$4 sm:$0xff]   ;;  %v3093_v58 = vld [vmem:[%s4143_s2 + $0x680] ss:$16 sps:$4 sm:$0xff]  }
  0xa9   : > { %2006 = vmatprep.subr.bf16.mxu0 %v3027_v59  ;;  %2178 = vmatprep.subr.bf16.mxu1 %v3030_v60  ;;  %v3096_v59 = vld [vmem:[%s4143_s2 + $0x688] ss:$16 sps:$4 sm:$0xff]   ;;  %v3101_v60 = vld [vmem:[%s4143_s2 + $0x6a4] ss:$16 sps:$4 sm:$0xff]  }
  0xac   : > { %2007 = vmatpush1.bf16.msra.mxu0 %v3025_v61  ;;  %2179 = vmatpush1.bf16.msra.mxu1 %v3028_v62  ;;  %v3104_v61 = vld [vmem:[%s4143_s2 + $0x6ac] ss:$16 sps:$4 sm:$0xff]   ;;  %v3099_v62 = vld [vmem:[%s4143_s2 + $0x6a0] ss:$16 sps:$4 sm:$0xff]  }
  0xad   : > { %2008 = vmatprep.subr.bf16.mxu0 %v3033_v63  ;;  %2180 = vmatprep.subr.bf16.mxu1 %v3036_v0  ;;  %v3102_v63 = vld [vmem:[%s4143_s2 + $0x6a8] ss:$16 sps:$4 sm:$0xff]   ;;  %v3107_v0 = vld [vmem:[%s4143_s2 + $0x6c4] ss:$16 sps:$4 sm:$0xff]  }
  0xb0   : > { %2009 = vmatpush1.bf16.msra.mxu0 %v3031_v1  ;;  %2181 = vmatpush1.bf16.msra.mxu1 %v3034_v2  ;;  %v3110_v1 = vld [vmem:[%s4143_s2 + $0x6cc] ss:$16 sps:$4 sm:$0xff]   ;;  %v3105_v2 = vld [vmem:[%s4143_s2 + $0x6c0] ss:$16 sps:$4 sm:$0xff]  }
  0xb1   : > { %2010 = vmatprep.subr.bf16.mxu0 %v3039_v3  ;;  %2182 = vmatprep.subr.bf16.mxu1 %v3042_v4  ;;  %v3108_v3 = vld [vmem:[%s4143_s2 + $0x6c8] ss:$16 sps:$4 sm:$0xff]   ;;  %v3113_v4 = vld [vmem:[%s4143_s2 + $0x6e4] ss:$16 sps:$4 sm:$0xff]  }
  0xb4   : > { %2011 = vmatpush1.bf16.msra.mxu0 %v3037_v8  ;;  %2183 = vmatpush1.bf16.msra.mxu1 %v3040_v9  ;;  %v3114_v8 = vld [vmem:[%s4143_s2 + $0x6e8] ss:$16 sps:$4 sm:$0xff]   ;;  %v3119_v9 = vld [vmem:[%s4143_s2 + $0x704] ss:$16 sps:$4 sm:$0xff]  }
  0xb5   : > { %2012 = vmatprep.subr.bf16.mxu0 %v3045_v10  ;;  %2184 = vmatprep.subr.bf16.mxu1 %v3048_v12  ;;  %v3122_v10 = vld [vmem:[%s4143_s2 + $0x70c] ss:$16 sps:$4 sm:$0xff]   ;;  %v3117_v12 = vld [vmem:[%s4143_s2 + $0x700] ss:$16 sps:$4 sm:$0xff]  }
  0xb8   : > { %2013 = vmatpush1.bf16.msra.mxu0 %v3043_v47  ;;  %2185 = vmatpush1.bf16.msra.mxu1 %v3046_v20  ;;  %v3129_v47 = vld [vmem:[%s4143_s2 + $0x740] ss:$16 sps:$4 sm:$0xff]   ;;  %v3132_v20 = vld [vmem:[%s4143_s2 + $0x748] ss:$16 sps:$4 sm:$0xff]  }
  0xb9   : > { %2014 = vmatprep.subr.bf16.mxu0 %v3051_v29  ;;  %2186 = vmatprep.subr.bf16.mxu1 %v3054_v11  ;;  %v3137_v29 = vld [vmem:[%s4143_s2 + $0x764] ss:$16 sps:$4 sm:$0xff]   ;;  %v3140_v11 = vld [vmem:[%s4143_s2 + $0x76c] ss:$16 sps:$4 sm:$0xff]  }
  0xbc   : > { %2015 = vmatpush1.bf16.msra.mxu0 %v3049_v26  ;;  %2187 = vmatpush1.bf16.msra.mxu1 %v3052_v27  ;;  %v3149_v26 = vld [vmem:[%s4143_s2 + $0x7a4] ss:$16 sps:$4 sm:$0xff]   ;;  %v3152_v27 = vld [vmem:[%s4143_s2 + $0x7ac] ss:$16 sps:$4 sm:$0xff]  }
  0xbd   : > { %2016 = vmatprep.subr.bf16.mxu0 %v3057_v28  ;;  %2188 = vmatprep.subr.bf16.mxu1 %v3060_v30  ;;  %v3147_v28 = vld [vmem:[%s4143_s2 + $0x7a0] ss:$16 sps:$4 sm:$0xff]   ;;  %v3150_v30 = vld [vmem:[%s4143_s2 + $0x7a8] ss:$16 sps:$4 sm:$0xff]  }
  0xc0   : > { %2017 = vmatpush1.bf16.msra.mxu0 %v3055_v33  ;;  %2189 = vmatpush1.bf16.msra.mxu1 %v3058_v34  ;;  %v3158_v33 = vld [vmem:[%s4143_s2 + $0x7cc] ss:$16 sps:$4 sm:$0xff]   ;;  %v3153_v34 = vld [vmem:[%s4143_s2 + $0x7c0] ss:$16 sps:$4 sm:$0xff]  }
  0xc1   : > { %2018 = vmatprep.subr.bf16.mxu0 %v3063_v36  ;;  %2190 = vmatprep.subr.bf16.mxu1 %v3066_v37  ;;  %v3156_v36 = vld [vmem:[%s4143_s2 + $0x7c8] ss:$16 sps:$4 sm:$0xff]   ;;  %v3161_v37 = vld [vmem:[%s4143_s2 + $0x7e4] ss:$16 sps:$4 sm:$0xff]  }
  0xc4   : > { %2019 = vmatpush1.bf16.msra.mxu0 %v3061_v38  ;;  %2191 = vmatpush1.bf16.msra.mxu1 %v3064_v39  ;;  %v3164_v38 = vld [vmem:[%s4143_s2 + $0x7ec] ss:$16 sps:$4 sm:$0xff]   ;;  %v3159_v39 = vld [vmem:[%s4143_s2 + $0x7e0] ss:$16 sps:$4 sm:$0xff]  }
  0xc5   : > { %2031 = vmatprep.subr.bf16.mxu0 %v3070_v40  ;;  %2203 = vmatprep.subr.bf16.mxu1 %v3073_v41  ;;  %v3162_v40 = vld [vmem:[%s4143_s2 + $0x7e8] ss:$16 sps:$4 sm:$0xff]  }
  0xc7   : > { %2021 = vmatmul.mubr.bf16.vlgmr.msra.gmra.mrb[0].mxu0 %v3719_v35  ;;  %2193 = vmatmul.mubr.bf16.vlgmr.msra.gmra.mrb[0].mxu1 %v3719_v35  ;;  %v3086_v35 = vld [vmem:[%s4143_s2 + $0x64c] ss:$16 sps:$4 sm:$0xff]  }
  0xc8   : > { %2032 = vmatpush1.bf16.msra.mxu0 %v3068_v42  ;;  %2204 = vmatpush1.bf16.msra.mxu1 %v3071_v43 }
  0xc9   : > { %2033 = vmatprep.subr.bf16.mxu0 %v3077_v44  ;;  %2205 = vmatprep.subr.bf16.mxu1 %v3080_v45 }
  0xca   : > { %2063 = vmatprep.mubr.bf16.mxu0 %v361_v31  ;;  %2235 = vmatprep.mubr.bf16.mxu1 %v361_v31  ;;  %v3155_v31 = vld [vmem:[%s4143_s2 + $0x7c4] ss:$16 sps:$4 sm:$0xff]  }
  0xcc   : > { %2034 = vmatpush1.bf16.msra.mxu0 %v3075_v46  ;;  %2206 = vmatpush1.bf16.msra.mxu1 %v3078_v48 }
  0xcd   : > { %2035 = vmatprep.subr.bf16.mxu0 %v3083_v49  ;;  %2207 = vmatprep.subr.bf16.mxu1 %v3086_v35 }
  0xd0   : > { %2036 = vmatpush1.bf16.msra.mxu0 %v3081_v50  ;;  %2208 = vmatpush1.bf16.msra.mxu1 %v3084_v51 }
  0xd1   : > { %2037 = vmatprep.subr.bf16.mxu0 %v3089_v52  ;;  %2209 = vmatprep.subr.bf16.mxu1 %v3092_v53 }
  0xd4   : > { %2038 = vmatpush1.bf16.msra.mxu0 %v3087_v54  ;;  %2210 = vmatpush1.bf16.msra.mxu1 %v3090_v55 }
  0xd5   : > { %2039 = vmatprep.subr.bf16.mxu0 %v3095_v56  ;;  %2211 = vmatprep.subr.bf16.mxu1 %v3098_v57 }
  0xd8   : > { %2040 = vmatpush1.bf16.msra.mxu0 %v3093_v58  ;;  %2212 = vmatpush1.bf16.msra.mxu1 %v3096_v59 }
  0xd9   : > { %2041 = vmatprep.subr.bf16.mxu0 %v3101_v60  ;;  %2213 = vmatprep.subr.bf16.mxu1 %v3104_v61 }
  0xdc   : > { %2042 = vmatpush1.bf16.msra.mxu0 %v3099_v62  ;;  %2214 = vmatpush1.bf16.msra.mxu1 %v3102_v63 }
  0xdd   : > { %2043 = vmatprep.subr.bf16.mxu0 %v3107_v0  ;;  %2215 = vmatprep.subr.bf16.mxu1 %v3110_v1 }
  0xe0   : > { %2044 = vmatpush1.bf16.msra.mxu0 %v3105_v2  ;;  %2216 = vmatpush1.bf16.msra.mxu1 %v3108_v3 }
  0xe1   : > { %2045 = vmatprep.subr.bf16.mxu0 %v3113_v4  ;;  %2217 = vmatprep.subr.bf16.mxu1 %v3116_v6 }
  0xe4   : > { %2046 = vmatpush1.bf16.msra.mxu0 %v3111_v7  ;;  %2218 = vmatpush1.bf16.msra.mxu1 %v3114_v8 }
  0xe5   : > { %2047 = vmatprep.subr.bf16.mxu0 %v3119_v9  ;;  %2219 = vmatprep.subr.bf16.mxu1 %v3122_v10 }
  0xe8   : > { %2048 = vmatpush1.bf16.msra.mxu0 %v3117_v12  ;;  %2220 = vmatpush1.bf16.msra.mxu1 %v3120_v13 }
  0xe9   : > { %2049 = vmatprep.subr.bf16.mxu0 %v3125_v14  ;;  %2221 = vmatprep.subr.bf16.mxu1 %v3128_v15 }
  0xec   : > { %2050 = vmatpush1.bf16.msra.mxu0 %v3123_v16  ;;  %2222 = vmatpush1.bf16.msra.mxu1 %v3126_v17 }
  0xed   : > { %2051 = vmatprep.subr.bf16.mxu0 %v3131_v18  ;;  %2223 = vmatprep.subr.bf16.mxu1 %v3134_v19 }
  0xf0   : > { %2052 = vmatpush1.bf16.msra.mxu0 %v3129_v47  ;;  %2224 = vmatpush1.bf16.msra.mxu1 %v3132_v20 }
  0xf1   : > { %2053 = vmatprep.subr.bf16.mxu0 %v3137_v29  ;;  %2225 = vmatprep.subr.bf16.mxu1 %v3140_v11 }
  0xf4   : > { %2054 = vmatpush1.bf16.msra.mxu0 %v3135_v21  ;;  %2226 = vmatpush1.bf16.msra.mxu1 %v3138_v5 }
  0xf5   : > { %2055 = vmatprep.subr.bf16.mxu0 %v3143_v22  ;;  %2227 = vmatprep.subr.bf16.mxu1 %v3146_v23 }
  0xf8   : > { %2056 = vmatpush1.bf16.msra.mxu0 %v3141_v24  ;;  %2228 = vmatpush1.bf16.msra.mxu1 %v3144_v25 }
  0xf9   : > { %2057 = vmatprep.subr.bf16.mxu0 %v3149_v26  ;;  %2229 = vmatprep.subr.bf16.mxu1 %v3152_v27 }
  0xfc   : > { %2058 = vmatpush1.bf16.msra.mxu0 %v3147_v28  ;;  %2230 = vmatpush1.bf16.msra.mxu1 %v3150_v30 }
  0xfd   : > { %2059 = vmatprep.subr.bf16.mxu0 %v3155_v31  ;;  %2231 = vmatprep.subr.bf16.mxu1 %v3158_v33 }
 0x100   : > { %2060 = vmatpush1.bf16.msra.mxu0 %v3153_v34  ;;  %2232 = vmatpush1.bf16.msra.mxu1 %v3156_v36 }
 0x101   : > { %2061 = vmatprep.subr.bf16.mxu0 %v3161_v37  ;;  %2233 = vmatprep.subr.bf16.mxu1 %v3164_v38 }
 0x104   : > { %2062 = vmatpush1.bf16.msra.mxu0 %v3159_v39  ;;  %2234 = vmatpush1.bf16.msra.mxu1 %v3162_v40 }
 0x107   : > { %2064 = vmatmul.mubr.bf16.vlgmr.msra.gmra.mrb[0].mxu0 %v3860_v32  ;;  %2236 = vmatmul.mubr.bf16.vlgmr.msra.gmra.mrb[0].mxu1 %v3860_v32 }
 0x1da   : > { %v2065_v41 = vpop.f32.mrb[0].mxu0  ;;  %v2237_v42 = vpop.f32.mrb[0].mxu1 }
 0x1db   : > { %v2254_v43 = vmul.f32 %v2065_v41, %v2065_v41  ;;  %v2256_v44 = vmul.f32 %v2237_v42, %v2237_v42  ;;  %v4076_v45 = vpop.f32.mrb[1].mxu0  ;;  %v4078_v46 = vpop.f32.mrb[1].mxu1  ;;  %v2246_v24 = vmul.f32 0.5, %v2065_v41  ;;  %v2248_v27 = vmul.f32 0.5, %v2237_v42 }
 0x1dc   : > { %v2255_v48 = vmul.f32 %v4076_v45, %v4076_v45  ;;  %v2257_v49 = vmul.f32 %v4078_v46, %v4078_v46  ;;  %v4084_v35 = vpop.f32.mrb[2].mxu0  ;;  %v4086_v50 = vpop.f32.mrb[2].mxu1  ;;  %v2247_v33 = vmul.f32 0.5, %v4076_v45  ;;  %v2249_v38 = vmul.f32 0.5, %v4078_v46 }
 0x1dd   : > { %v2262_v51 = vmul.f32 %v2254_v43, %v2065_v41  ;;  %v2264_v32 = vmul.f32 %v2256_v44, %v2237_v42  ;;  %v2258_v52 = vmul.f32 %v4084_v35, %v4084_v35  ;;  %v4090_v53 = vpop.f32.mrb[3].mxu0  ;;  %v4092_v54 = vpop.f32.mrb[3].mxu1  ;;  %v2260_v57 = vmul.f32 %v4086_v50, %v4086_v50 }
 0x1de   : > { %v2263_v55 = vmul.f32 %v2255_v48, %v4076_v45  ;;  %v2265_v56 = vmul.f32 %v2257_v49, %v4078_v46  ;;  %v2259_v0 = vmul.f32 %v4090_v53, %v4090_v53  ;;  %v2261_v13 = vmul.f32 %v4092_v54, %v4092_v54 }
 0x1df   : > { %v2270_v58 = vmul.f32 0.044715, %v2262_v51  ;;  %v2272_v59 = vmul.f32 0.044715, %v2264_v32  ;;  %v2266_v60 = vmul.f32 %v2258_v52, %v4084_v35  ;;  %v2268_v63 = vmul.f32 %v2260_v57, %v4086_v50 }
 0x1e0   : > { %v2271_v61 = vmul.f32 0.044715, %v2263_v55  ;;  %v2273_v62 = vmul.f32 0.044715, %v2265_v56  ;;  %v2267_v8 = vmul.f32 %v2259_v0, %v4090_v53  ;;  %v2269_v19 = vmul.f32 %v2261_v13, %v4092_v54 }
 0x1e1   : > { %v2278_v1 = vadd.f32 %v2270_v58, %v2065_v41  ;;  %v2280_v2 = vadd.f32 %v2272_v59, %v2237_v42  ;;  %v2274_v3 = vmul.f32 0.044715, %v2266_v60  ;;  %v2276_v7 = vmul.f32 0.044715, %v2268_v63 }
 0x1e2   : > { %v2279_v4 = vadd.f32 %v2271_v61, %v4076_v45  ;;  %v2281_v6 = vadd.f32 %v2273_v62, %v4078_v46  ;;  %v2275_v17 = vmul.f32 0.044715, %v2267_v8  ;;  %v2277_v29 = vmul.f32 0.044715, %v2269_v19 }
 0x1e3   : > { %v2286_v9 = vmul.f32 0.7978846, %v2278_v1  ;;  %v2288_v10 = vmul.f32 0.7978846, %v2280_v2  ;;  %v2282_v12 = vadd.f32 %v2274_v3, %v4084_v35  ;;  %v2284_v16 = vadd.f32 %v2276_v7, %v4086_v50 }
 0x1e4   : > { %v2287_v14 = vmul.f32 0.7978846, %v2279_v4  ;;  %v2289_v15 = vmul.f32 0.7978846, %v2281_v6  ;;  %v2283_v20 = vadd.f32 %v2275_v17, %v4090_v53  ;;  %v2285_v21 = vadd.f32 %v2277_v29, %v4092_v54 }
 0x1e5   : > { %3167 = vtanh.f32 %v2286_v9  ;;  %v2290_v18 = vmul.f32 0.7978846, %v2282_v12  ;;  %v2292_v47 = vmul.f32 0.7978846, %v2284_v16  ;;  %v2250_v42 = vmul.f32 0.5, %v4084_v35 }
 0x1e6   : > { %3169 = vtanh.f32 %v2288_v10  ;;  %v2291_v11 = vmul.f32 0.7978846, %v2283_v20  ;;  %v2293_v5 = vmul.f32 0.7978846, %v2285_v21  ;;  %v2252_v48 = vmul.f32 0.5, %v4086_v50 }
 0x1e7   : > { %3171 = vtanh.f32 %v2287_v14  ;;  %v2251_v51 = vmul.f32 0.5, %v4090_v53  ;;  %v2253_v56 = vmul.f32 0.5, %v4092_v54 }
 0x1e8   : > { %3173 = vtanh.f32 %v2289_v15 }
 0x1e9   : > { %3175 = vtanh.f32 %v2290_v18 }
 0x1ea   : > { %3177 = vtanh.f32 %v2292_v47 }
 0x1eb   : > { %3179 = vtanh.f32 %v2291_v11 }
 0x1ec   : > { %3181 = vtanh.f32 %v2293_v5 }
 0x1ef   : > { %v3168_v22 = vpop.eup %3167 }
 0x1f0   : > { %v3170_v23 = vpop.eup %3169  ;;  %v2302_v25 = vadd.f32 1.0, %v3168_v22 }
 0x1f1   : > { %v3172_v26 = vpop.eup %3171  ;;  %v2304_v28 = vadd.f32 1.0, %v3170_v23 }
 0x1f2   : > { %v3174_v30 = vpop.eup %3173  ;;  %v2310_v31 = vmul.f32 %v2302_v25, %v2246_v24  ;;  %v2303_v34 = vadd.f32 1.0, %v3172_v26 }
 0x1f3   : > { %v3176_v36 = vpop.eup %3175  ;;  %v2312_v37 = vmul.f32 %v2304_v28, %v2248_v27  ;;  %v2305_v39 = vadd.f32 1.0, %v3174_v30 }
 0x1f4   : > { %v3178_v40 = vpop.eup %3177  ;;  %2318 = vst [vmem:[%s4116_s29] sm:$0xff] %v2310_v31  ;;  %v2311_v41 = vmul.f32 %v2303_v34, %v2247_v33  ;;  %v2306_v43 = vadd.f32 1.0, %v3176_v36 }
 0x1f5   : > { %v3180_v44 = vpop.eup %3179  ;;  %2320 = vst [vmem:[%s4116_s29 + $0x10] sm:$0xff] %v2312_v37  ;;  %v2313_v45 = vmul.f32 %v2305_v39, %v2249_v38  ;;  %v2308_v49 = vadd.f32 1.0, %v3178_v40 }
 0x1f6   : > { %2319 = vst [vmem:[%s4116_s29 + $0x8] sm:$0xff] %v2311_v41  ;;  %v2314_v46 = vmul.f32 %v2306_v43, %v2250_v42  ;;  %v2307_v32 = vadd.f32 1.0, %v3180_v44  ;;  %v3182_v52 = vpop.eup %3181 }
 0x1f7   : > { %2321 = vst [vmem:[%s4116_s29 + $0x18] sm:$0xff] %v2313_v45  ;;  %v2316_v55 = vmul.f32 %v2308_v49, %v2252_v48  ;;  %v2309_v57 = vadd.f32 1.0, %v3182_v52 }
 0x1f8   : > { %2322 = vst [vmem:[%s4116_s29 + $0x20] sm:$0xff] %v2314_v46  ;;  %v2315_v35 = vmul.f32 %v2307_v32, %v2251_v51 }
 0x1f9   : > { %2324 = vst [vmem:[%s4116_s29 + $0x30] sm:$0xff] %v2316_v55  ;;  %v2317_v58 = vmul.f32 %v2309_v57, %v2253_v56 }
 0x1fa   : > { %2323 = vst [vmem:[%s4116_s29 + $0x28] sm:$0xff] %v2315_v35 }
 0x1fb   : > { %2325 = vst [vmem:[%s4116_s29 + $0x38] sm:$0xff] %v2317_v58 }
 0x1fc PF: > { %s13_s14 = sadd.s32 1, %s3205_s14   ;;  %s4145_s12 = smov %s3201_s13 }
 0x1fd   : > { %p10_p5 = scmp.ge.s32.totalorder %s13_s14, 4   ;;  %s4146_s13 = smov %s4148_s15 }
 0x1ff   :  { %12 = sbr.rel (!%p10_p5) target bundleno = 2 (0x2), region = 65 }

</bundles_post_ra>
